<compile_context>
chip_gen: v7x
topology: tpu7x:2x2x1
jax: 0.10.0
libtpu: 0.0.40
codegen_flags: <defaults>
</compile_context>

<pallas_src>
import functools
import numpy as np
import jax
import jax.numpy as jnp
from jax.experimental import pallas as pl
from jax.experimental.pallas import tpu as pltpu

NODE_TYPE = {'word': 0, 'sentence': 1, 'doc': 2, 'entity': 3, 'relation': 4,
             'type': 5, 'root': 6}

_LEAKY_SLOPE = 0.01          # torch F.leaky_relu default (module uses the default)
_NEG_INF = -1e30             # finite "-inf" so the online softmax never sees inf-inf
_LN_EPS = 1e-5               # torch LayerNorm default
_VMEM_LIMIT = 32 * 1024 * 1024


def _round_up(x, m):
    return (x + m - 1) // m * m


def _cparams(*sem):
    # Explicit scoped-VMEM limit sized well above the tiled working set (< a few MiB)
    # but within every generation's budget (v7x: 64 MiB physical per TensorCore).
    return pltpu.CompilerParams(dimension_semantics=sem,
                                vmem_limit_bytes=_VMEM_LIMIT)


def _block_layout(n_nodes):
    """Padding + tile sizes.  Tiles are the largest power-of-two blocks that keep the
    attention working set (adj tile x2 buffers + per-head (td,ts) logits + z tiles +
    accumulators) a small fraction of the 32 MiB scoped-VMEM request on all chips."""
    base = 512 if n_nodes > 256 else (256 if n_nodes > 128 else 128)
    n_pad = _round_up(n_nodes, base)
    ts = base                 # src columns per step (lane-dense, multiple of 128)
    td = min(base, 256)       # dst rows per step
    tn = min(base, 256)       # row tile for projection / FFN kernels
    return n_pad, tn, td, ts


# --------------------------------------------------------------------------- #
# Pallas kernels
# --------------------------------------------------------------------------- #
def gat_proj_kernel(h_ref, wcat_ref, astack_ref, z_ref, elr_ref):
    """Fused-head projection + stacked attention-term matmul for one row tile.
       z   = h @ W_cat                      (bf16 operands, f32 accumulate)
       elr = h @ [W_h a_src_h | W_h a_dst_h]  (exact fold: z_h.a == h.(W_h a))"""
    h = h_ref[...]                                               # (TN, nhid) f32
    z = jnp.dot(h.astype(jnp.bfloat16), wcat_ref[...],
                preferred_element_type=jnp.float32)              # (TN, nhid)
    z_ref[...] = z.astype(jnp.bfloat16)
    elr_ref[...] = jnp.dot(h, astack_ref[...],
                           preferred_element_type=jnp.float32)   # (TN, 2H)


def gat_attn_kernel(er_ref, elt_ref, z_ref, adj_ref, out_ref, m_sc, l_sc, acc_sc):
    """All heads fused; one (dst_tile, src_tile) block of the masked online softmax
    aggregation.  Shapes:
       er_ref : (TD, H)    dst attention term per head
       elt_ref: (H, TS)    src attention term per head (pre-transposed)
       z_ref  : (TS, nhid) bf16 src messages, head-major columns
       adj_ref: (TD, TS)   int8 edge mask (adj[d, s] != 0  iff  edge s -> d)
       out_ref: (TD, nhid) f32, written on the last src tile (lane-dense)."""
    j = pl.program_id(1)
    nj = pl.num_programs(1)
    td, n_head = er_ref.shape
    nhid = z_ref.shape[1]
    d_head = nhid // n_head

    @pl.when(j == 0)
    def _init():
        m_sc[...] = jnp.full_like(m_sc, _NEG_INF)
        l_sc[...] = jnp.zeros_like(l_sc)
        acc_sc[...] = jnp.zeros_like(acc_sc)

    er = er_ref[...]                                  # (TD, H) f32
    el = elt_ref[...]                                 # (H, TS) f32
    z = z_ref[...]                                    # (TS, nhid) bf16
    # int8 -> f32 convert then compare (cheap VPU work, robust lowering).
    has_edge = adj_ref[...].astype(jnp.float32) > 0.0  # (TD, TS) bool

    for h in range(n_head):                           # static unroll, static slices
        e = er[:, h:h + 1] + el[h:h + 1, :]                        # (TD, TS)
        e = jnp.where(e >= 0.0, e, _LEAKY_SLOPE * e)               # leaky_relu
        e = jnp.where(has_edge, e, _NEG_INF)                       # mask non-edges

        m_old = m_sc[:, h:h + 1]                                   # (TD, 1)
        m_new = jnp.maximum(m_old, jnp.max(e, axis=1, keepdims=True))
        scale = jnp.exp(m_old - m_new)                             # (TD, 1)
        p = jnp.exp(e - m_new)                                     # (TD, TS) f32
        p = jnp.where(has_edge, p, 0.0)

        m_sc[:, h:h + 1] = m_new
        l_sc[:, h:h + 1] = scale * l_sc[:, h:h + 1] + jnp.sum(p, axis=1, keepdims=True)
        cols = slice(h * d_head, (h + 1) * d_head)
        acc_sc[:, cols] = scale * acc_sc[:, cols] + jnp.dot(
            p.astype(jnp.bfloat16), z[:, cols],
            preferred_element_type=jnp.float32)

    @pl.when(j == nj - 1)
    def _finish():
        inv = [jnp.broadcast_to(
                   pl.reciprocal(jnp.maximum(l_sc[:, h:h + 1], 1e-30), approx=True),
                   (td, d_head))
               for h in range(n_head)]
        inv = jnp.concatenate(inv, axis=1)                         # (TD, nhid)
        # Rows with zero incoming edges end up 0 (DGL zero-fill for isolated nodes).
        out_ref[...] = (acc_sc[...] * inv).astype(out_ref.dtype)


def elu_res_ffn_kernel(g_ref, pre_ref, w1_ref, b1_ref, w2_ref, b2_ref,
                       gamma_ref, beta_ref, out_ref):
    """feats = elu(gat_out) + feats_pre ; feats = PositionwiseFeedForward(feats).
    Dropouts are identity (eval mode); Conv1d(kernel=1) == Linear."""
    g = g_ref[...]                                                 # (TN, nhid) f32
    # ELU(alpha=1); clamp the exp argument so large positives don't hit the EUP / inf.
    x = jnp.where(g > 0.0, g, jnp.exp(jnp.minimum(g, 0.0)) - 1.0) + pre_ref[...]
    residual = x

    h1 = jnp.dot(x.astype(jnp.bfloat16), w1_ref[...],
                 preferred_element_type=jnp.float32) + b1_ref[...]
    h1 = jnp.maximum(h1, 0.0)                                      # ReLU
    y = jnp.dot(h1.astype(jnp.bfloat16), w2_ref[...],
                preferred_element_type=jnp.float32) + b2_ref[...]
    y = y + residual

    mu = jnp.mean(y, axis=-1, keepdims=True)
    var = jnp.mean((y - mu) * (y - mu), axis=-1, keepdims=True)
    yhat = (y - mu) * jax.lax.rsqrt(var + _LN_EPS)
    out_ref[...] = yhat * gamma_ref[...] + beta_ref[...]


# --------------------------------------------------------------------------- #
# Wrappers
# --------------------------------------------------------------------------- #
def gat_stack_layer(feats, adj_i8, layer, *, tn, td, ts):
    """GATStackLayer_Hetersum forward (all heads fused, merge='cat', dropout=id)."""
    n_pad, nhid = feats.shape
    n_head = layer["A_stack"].shape[1] // 2

    z, elr = pl.pallas_call(
        gat_proj_kernel,
        out_shape=(jax.ShapeDtypeStruct((n_pad, nhid), jnp.bfloat16),
                   jax.ShapeDtypeStruct((n_pad, 2 * n_head), jnp.float32)),
        grid=(n_pad // tn,),
        in_specs=[
            pl.BlockSpec((tn, nhid), lambda i: (i, 0)),
            pl.BlockSpec((nhid, nhid), lambda i: (0, 0)),
            pl.BlockSpec((nhid, 2 * n_head), lambda i: (0, 0)),
        ],
        out_specs=(pl.BlockSpec((tn, nhid), lambda i: (i, 0)),
                   pl.BlockSpec((tn, 2 * n_head), lambda i: (i, 0))),
        compiler_params=_cparams("parallel"),
    )(feats, layer["W_cat"], layer["A_stack"])

    # Tiny (N, H) layout glue: el must enter the attention kernel as (H, N) so it can
    # broadcast along the src/lane axis without an in-kernel transpose.
    el_t = jnp.transpose(elr[:, :n_head])        # (H, N_pad)
    er = elr[:, n_head:]                         # (N_pad, H)

    return pl.pallas_call(
        gat_attn_kernel,
        out_shape=jax.ShapeDtypeStruct((n_pad, nhid), jnp.float32),
        grid=(n_pad // td, n_pad // ts),          # dst tiles (parallel), src tiles (reduction, last)
        in_specs=[
            pl.BlockSpec((td, n_head), lambda i, j: (i, 0)),
            pl.BlockSpec((n_head, ts), lambda i, j: (0, j)),
            pl.BlockSpec((ts, nhid), lambda i, j: (j, 0)),
            pl.BlockSpec((td, ts), lambda i, j: (i, j)),
        ],
        out_specs=pl.BlockSpec((td, nhid), lambda i, j: (i, 0)),
        scratch_shapes=[
            pltpu.VMEM((td, n_head), jnp.float32),   # running max  m
            pltpu.VMEM((td, n_head), jnp.float32),   # running sum  l
            pltpu.VMEM((td, nhid), jnp.float32),     # running numerator acc
        ],
        compiler_params=_cparams("parallel", "arbitrary"),
    )(er, el_t, z, adj_i8)


def elu_res_ffn(gat_out, feats_pre, ffn, *, tn):
    n_pad, nhid = gat_out.shape
    w1, b1, w2, b2, gamma, beta = ffn
    f_hid = w1.shape[1]
    row = lambda i: (i, 0)
    const = lambda i: (0, 0)
    return pl.pallas_call(
        elu_res_ffn_kernel,
        out_shape=jax.ShapeDtypeStruct((n_pad, nhid), jnp.float32),
        grid=(n_pad // tn,),
        in_specs=[
            pl.BlockSpec((tn, nhid), row),
            pl.BlockSpec((tn, nhid), row),
            pl.BlockSpec((nhid, f_hid), const),
            pl.BlockSpec((1, f_hid), const),
            pl.BlockSpec((f_hid, nhid), const),
            pl.BlockSpec((1, nhid), const),
            pl.BlockSpec((1, nhid), const),
            pl.BlockSpec((1, nhid), const),
        ],
        out_specs=pl.BlockSpec((tn, nhid), row),
        compiler_params=_cparams("parallel"),
    )(gat_out, feats_pre, w1, b1, w2, b2, gamma, beta)


def gat_hetersum_apply(feats_pad, adj_i8, params, *, tn, td, ts):
    """GAT_Hetersum propagation loop on the (padded) flattened node array.
    NOTE: the PyTorch module has a SINGLE shared self.ffn applied after every
    propagation step, so the FFN parameters are intentionally shared here too."""
    feats = feats_pad
    for layer in params["gat_layers"]:
        feats_pre = feats
        gat_out = gat_stack_layer(feats, adj_i8, layer, tn=tn, td=td, ts=ts)
        feats = elu_res_ffn(gat_out, feats_pre, params["ffn"], tn=tn)
    return feats


# --------------------------------------------------------------------------- #
# Deterministic parameter init (shapes follow the PyTorch module __init__)
# --------------------------------------------------------------------------- #
def init_params(key, nhid, n_head, prop, ffn_hidden):
    d_head = nhid // n_head
    gat_layers = []
    for _ in range(prop):
        key, k_w, k_a = jax.random.split(key, 3)
        # fc: Linear(nhid, D, bias=False) per head; attn_fc: Linear(2D, 1, bias=False).
        w = (1.0 / np.sqrt(nhid)) * jax.random.normal(
            k_w, (n_head, nhid, d_head), jnp.float32)
        a = (1.0 / np.sqrt(2 * d_head)) * jax.random.normal(
            k_a, (n_head, 2 * d_head), jnp.float32)
        a_src, a_dst = a[:, :d_head], a[:, d_head:]
        # Fused projection weight, column layout == torch.cat(head_outs, dim=1).
        w_cat = jnp.transpose(w, (1, 0, 2)).reshape(nhid, n_head * d_head)
        # Folded attention terms: z_h . a_{src,dst}_h == h . (W_h a_{src,dst}_h).
        u = jnp.einsum('hkd,hd->kh', w, a_src)       # (nhid, H)
        v = jnp.einsum('hkd,hd->kh', w, a_dst)       # (nhid, H)
        gat_layers.append({
            "W_cat": w_cat.astype(jnp.bfloat16),
            "A_stack": jnp.concatenate([u, v], axis=1),   # (nhid, 2H) f32
        })

    key, k1, k2, k3, k4 = jax.random.split(key, 5)
    w1 = (1.0 / np.sqrt(nhid)) * jax.random.normal(k1, (nhid, ffn_hidden), jnp.float32)
    b1 = 0.01 * jax.random.normal(k2, (1, ffn_hidden), jnp.float32)
    w2 = (1.0 / np.sqrt(ffn_hidden)) * jax.random.normal(k3, (ffn_hidden, nhid), jnp.float32)
    b2 = 0.01 * jax.random.normal(k4, (1, nhid), jnp.float32)
    gamma = jnp.ones((1, nhid), jnp.float32)    # LayerNorm weight
    beta = jnp.zeros((1, nhid), jnp.float32)    # LayerNorm bias
    return {"gat_layers": gat_layers,
            "ffn": (w1.astype(jnp.bfloat16), b1,
                    w2.astype(jnp.bfloat16), b2, gamma, beta)}


# --------------------------------------------------------------------------- #
# Main
# --------------------------------------------------------------------------- #
if __name__ == "__main__":
    # args
    nhid, n_head, prop = 32, 4, 2
    ffn_inner_hidden_size = 64
    B = 2
    Lw, Ls, Ld, Le, Lr, Lt = 6, 5, 2, 4, 3, 2     # padded lengths per node family

    key = jax.random.PRNGKey(0)
    ks = jax.random.split(key, 8)

    word_enc = jax.random.normal(ks[0], (B, Lw, nhid), jnp.float32)
    sent_enc = jax.random.normal(ks[1], (B, Ls, nhid), jnp.float32)
    doc_enc = jax.random.normal(ks[2], (B, Ld, nhid), jnp.float32)
    ent_enc = jax.random.normal(ks[3], (B, Le, nhid), jnp.float32)
    rel_emb = jax.random.normal(ks[4], (B, Lr, nhid), jnp.float32)
    type_emb = jax.random.normal(ks[5], (B, Lt, nhid), jnp.float32)

    # Masks: forward keeps rows where mask == 0 (deterministic keep-counts).
    def make_mask(L, n_keep):
        m = np.ones((B, L), dtype=np.int32)
        m[:, :n_keep] = 0
        return m

    word_mask = make_mask(Lw, 5)
    text_num_mask = make_mask(Ls, 4)
    doc_num_mask = make_mask(Ld, 1)
    ent_num_mask = make_mask(Le, 3)
    rel_mask = make_mask(Lr, 2)
    type_mask = make_mask(Lt, 1)

    # ------------------- glue: build init_h exactly like the torch loop -------
    init_h_parts, node_type_parts = [], []
    per_batch = [
        (word_enc, word_mask, NODE_TYPE['word']),
        (sent_enc, text_num_mask, NODE_TYPE['sentence']),
        (doc_enc, doc_num_mask, NODE_TYPE['doc']),
        (ent_enc, ent_num_mask, NODE_TYPE['entity']),
        (rel_emb, rel_mask, NODE_TYPE['relation']),
        (type_emb, type_mask, NODE_TYPE['type']),
    ]
    batch_sizes = []
    for i in range(B):
        n_nodes_i = 0
        for enc, mask, ntype in per_batch:
            keep = np.asarray(mask)[i] == 0
            rows = np.asarray(enc)[i][keep]
            init_h_parts.append(rows)
            node_type_parts.append(np.full((rows.shape[0],), ntype, np.int32))
            n_nodes_i += rows.shape[0]
        batch_sizes.append(n_nodes_i)

    init_h_np = np.concatenate(init_h_parts, axis=0)                 # (N, nhid)
    node_types = np.concatenate(node_type_parts, axis=0)             # (N,)
    N = init_h_np.shape[0]

    # Padding + tile selection (padded rows have no edges -> zero attention output,
    # never influence real rows, and are sliced off at the end).
    n_pad, tn, td, ts = _block_layout(N)
    feats0 = np.zeros((n_pad, nhid), np.float32)
    feats0[:N] = init_h_np

    # Synthetic batched graph: fully connected (incl. self loops) within each batch
    # element -> adj[dst, src] = 1 (int8 mask; quarter the bytes of f32 adjacency).
    # TODO(synk): DGL graph structure is synthesized here (no DGL on the TPU path).
    adj_np = np.zeros((n_pad, n_pad), np.int8)
    off = 0
    for n_i in batch_sizes:
        adj_np[off:off + n_i, off:off + n_i] = 1
        off += n_i

    feats0 = jnp.asarray(feats0)
    adj_i8 = jnp.asarray(adj_np)

    params = init_params(jax.random.PRNGKey(42), nhid, n_head, prop,
                         ffn_inner_hidden_size)

    apply_fn = jax.jit(functools.partial(gat_hetersum_apply, tn=tn, td=td, ts=ts))
    feats_pad = jax.block_until_ready(apply_fn(feats0, adj_i8, params))
    feats = feats_pad[:N]

    # graphs.filter_nodes(type == sentence) -> select sentence-node rows in order
    sent_idx = np.nonzero(node_types == NODE_TYPE['sentence'])[0]
    g_sent = jax.block_until_ready(jnp.take(feats, jnp.asarray(sent_idx), axis=0))

    assert g_sent.shape == (len(sent_idx), nhid)
    assert bool(jnp.all(jnp.isfinite(g_sent)))
    print("KERNEL_OK")
</pallas_src>

<mosaic_0001>
module attributes {stable_mosaic.version = 11 : i64} {
  func.func @gat_proj_kernel(%arg0: i32, %arg1: memref<128x32xf32, #tpu.memory_space<vmem>>, %arg2: memref<32x32xbf16, #tpu.memory_space<vmem>>, %arg3: memref<32x8xf32, #tpu.memory_space<vmem>>, %arg4: memref<128x32xbf16, #tpu.memory_space<vmem>>, %arg5: memref<128x8xf32, #tpu.memory_space<vmem>>) attributes {dimension_semantics = [#tpu.dimension_semantics<parallel>], iteration_bounds = array<i64: 1>, scalar_prefetch = 0 : i64, scratch_operands = 0 : i64, tpu.core_type = #tpu.core_type<tc>, window_params = [{transform_indices = @transform_0, window_bounds = array<i64: 128, 32>}, {pipeline_mode = #tpu.pipeline_mode<synchronous>, transform_indices = @transform_1, window_bounds = array<i64: 32, 32>}, {pipeline_mode = #tpu.pipeline_mode<synchronous>, transform_indices = @transform_2, window_bounds = array<i64: 32, 8>}, {transform_indices = @transform_3, window_bounds = array<i64: 128, 32>}, {transform_indices = @transform_4, window_bounds = array<i64: 128, 8>}]} {
    %c0 = arith.constant 0 : index
    %c0_0 = arith.constant 0 : index
    %0 = vector.load %arg1[%c0, %c0_0] : memref<128x32xf32, #tpu.memory_space<vmem>>, vector<128x32xf32>
    %1 = arith.truncf %0 : vector<128x32xf32> to vector<128x32xbf16>
    %c0_1 = arith.constant 0 : index
    %c0_2 = arith.constant 0 : index
    %2 = vector.load %arg2[%c0_1, %c0_2] : memref<32x32xbf16, #tpu.memory_space<vmem>>, vector<32x32xbf16>
    %cst = arith.constant dense<0.000000e+00> : vector<128x32xf32>
    %3 = tpu.matmul %1, %2, %cst {dimension_numbers = #tpu.dot_dimension_numbers<[1], [0], [0], [1], [0, 0, 1, 1], [], []>} : vector<128x32xbf16>, vector<32x32xbf16>, vector<128x32xf32> -> vector<128x32xf32>
    %4 = arith.truncf %3 : vector<128x32xf32> to vector<128x32xbf16>
    %c0_3 = arith.constant 0 : index
    %c0_4 = arith.constant 0 : index
    %5 = vector.load %arg4[%c0_3, %c0_4] : memref<128x32xbf16, #tpu.memory_space<vmem>>, vector<128x32xbf16>
    tpu.vector_store %arg4[%c0_3, %c0_4], %4 {strides = array<i32>} : memref<128x32xbf16, #tpu.memory_space<vmem>>, vector<128x32xbf16>,
    %c0_5 = arith.constant 0 : index
    %c0_6 = arith.constant 0 : index
    %6 = vector.load %arg3[%c0_5, %c0_6] : memref<32x8xf32, #tpu.memory_space<vmem>>, vector<32x8xf32>
    %cst_7 = arith.constant dense<0.000000e+00> : vector<128x8xf32>
    %7 = tpu.matmul %0, %6, %cst_7 {dimension_numbers = #tpu.dot_dimension_numbers<[1], [0], [0], [1], [0, 0, 1, 1], [], []>} : vector<128x32xf32>, vector<32x8xf32>, vector<128x8xf32> -> vector<128x8xf32>
    %c0_8 = arith.constant 0 : index
    %c0_9 = arith.constant 0 : index
    %8 = vector.load %arg5[%c0_8, %c0_9] : memref<128x8xf32, #tpu.memory_space<vmem>>, vector<128x8xf32>
    tpu.vector_store %arg5[%c0_8, %c0_9], %7 {strides = array<i32>} : memref<128x8xf32, #tpu.memory_space<vmem>>, vector<128x8xf32>,
    return
  }
  func.func @transform_0(%arg0: i32) -> (i32, i32) {
    %c0_i32 = arith.constant 0 : i32
    %c0_i32_0 = arith.constant 0 : i32
    return %arg0, %c0_i32 : i32, i32
  }
  func.func @transform_1(%arg0: i32) -> (i32, i32) {
    %c0_i32 = arith.constant 0 : i32
    %c0_i32_0 = arith.constant 0 : i32
    %c0_i32_1 = arith.constant 0 : i32
    return %c0_i32, %c0_i32_0 : i32, i32
  }
  func.func @transform_2(%arg0: i32) -> (i32, i32) {
    %c0_i32 = arith.constant 0 : i32
    %c0_i32_0 = arith.constant 0 : i32
    %c0_i32_1 = arith.constant 0 : i32
    return %c0_i32, %c0_i32_0 : i32, i32
  }
  func.func @transform_3(%arg0: i32) -> (i32, i32) {
    %c0_i32 = arith.constant 0 : i32
    %c0_i32_0 = arith.constant 0 : i32
    return %arg0, %c0_i32 : i32, i32
  }
  func.func @transform_4(%arg0: i32) -> (i32, i32) {
    %c0_i32 = arith.constant 0 : i32
    %c0_i32_0 = arith.constant 0 : i32
    return %arg0, %c0_i32 : i32, i32
  }
}

module attributes {stable_mosaic.version = 11 : i64} {
  func.func @gat_attn_kernel(%arg0: i32, %arg1: i32, %arg2: memref<128x4xf32, #tpu.memory_space<vmem>>, %arg3: memref<4x128xf32, #tpu.memory_space<vmem>>, %arg4: memref<128x32xbf16, #tpu.memory_space<vmem>>, %arg5: memref<128x128xi8, #tpu.memory_space<vmem>>, %arg6: memref<128x32xf32, #tpu.memory_space<vmem>>, %arg7: memref<128x4xf32, #tpu.memory_space<vmem>>, %arg8: memref<128x4xf32, #tpu.memory_space<vmem>>, %arg9: memref<128x32xf32, #tpu.memory_space<vmem>>) attributes {dimension_semantics = [#tpu.dimension_semantics<parallel>, #tpu.dimension_semantics<arbitrary>], iteration_bounds = array<i64: 1, 1>, scalar_prefetch = 0 : i64, scratch_operands = 3 : i64, tpu.core_type = #tpu.core_type<tc>, window_params = [{transform_indices = @transform_0, window_bounds = array<i64: 128, 4>}, {transform_indices = @transform_1, window_bounds = array<i64: 4, 128>}, {transform_indices = @transform_2, window_bounds = array<i64: 128, 32>}, {transform_indices = @transform_3, window_bounds = array<i64: 128, 128>}, {transform_indices = @transform_4, window_bounds = array<i64: 128, 32>}]} {
    %c0_i32 = arith.constant 0 : i32
    %0 = arith.cmpi eq, %arg1, %c0_i32 : i32
    %1 = arith.extui %0 : i1 to i32
    %c0_i32_0 = arith.constant 0 : i32
    %2 = arith.cmpi ne, %1, %c0_i32_0 : i32
    scf.if %2 {
      %cst_80 = arith.constant -1.000000e+30 : f32
      %165 = vector.broadcast %cst_80 : f32 to vector<128x4xf32>
      %c0_81 = arith.constant 0 : index
      %c0_82 = arith.constant 0 : index
      %166 = vector.load %arg7[%c0_81, %c0_82] : memref<128x4xf32, #tpu.memory_space<vmem>>, vector<128x4xf32>
      tpu.vector_store %arg7[%c0_81, %c0_82], %165 {strides = array<i32>} : memref<128x4xf32, #tpu.memory_space<vmem>>, vector<128x4xf32>,
      %cst_83 = arith.constant 0.000000e+00 : f32
      %167 = vector.broadcast %cst_83 : f32 to vector<128x4xf32>
      %c0_84 = arith.constant 0 : index
      %c0_85 = arith.constant 0 : index
      %168 = vector.load %arg8[%c0_84, %c0_85] : memref<128x4xf32, #tpu.memory_space<vmem>>, vector<128x4xf32>
      tpu.vector_store %arg8[%c0_84, %c0_85], %167 {strides = array<i32>} : memref<128x4xf32, #tpu.memory_space<vmem>>, vector<128x4xf32>,
      %cst_86 = arith.constant 0.000000e+00 : f32
      %169 = vector.broadcast %cst_86 : f32 to vector<128x32xf32>
      %c0_87 = arith.constant 0 : index
      %c0_88 = arith.constant 0 : index
      %170 = vector.load %arg9[%c0_87, %c0_88] : memref<128x32xf32, #tpu.memory_space<vmem>>, vector<128x32xf32>
      tpu.vector_store %arg9[%c0_87, %c0_88], %169 {strides = array<i32>} : memref<128x32xf32, #tpu.memory_space<vmem>>, vector<128x32xf32>,
    } else {
    }
    %c0 = arith.constant 0 : index
    %c0_1 = arith.constant 0 : index
    %3 = vector.load %arg2[%c0, %c0_1] : memref<128x4xf32, #tpu.memory_space<vmem>>, vector<128x4xf32>
    %c0_2 = arith.constant 0 : index
    %c0_3 = arith.constant 0 : index
    %4 = vector.load %arg3[%c0_2, %c0_3] : memref<4x128xf32, #tpu.memory_space<vmem>>, vector<4x128xf32>
    %c0_4 = arith.constant 0 : index
    %c0_5 = arith.constant 0 : index
    %5 = vector.load %arg4[%c0_4, %c0_5] : memref<128x32xbf16, #tpu.memory_space<vmem>>, vector<128x32xbf16>
    %c0_6 = arith.constant 0 : index
    %c0_7 = arith.constant 0 : index
    %6 = vector.load %arg5[%c0_6, %c0_7] : memref<128x128xi8, #tpu.memory_space<vmem>>, vector<128x128xi8>
    %7 = arith.sitofp %6 : vector<128x128xi8> to vector<128x128xf32>
    %cst = arith.constant 0.000000e+00 : f32
    %8 = vector.broadcast %cst : f32 to vector<128x128xf32>
    %9 = arith.cmpf ogt, %7, %8 : vector<128x128xf32>
    %10 = vector.extract_strided_slice %3 {offsets = [0, 0], sizes = [128, 1], strides = [1, 1]} : vector<128x4xf32> to vector<128x1xf32>
    %11 = vector.extract_strided_slice %4 {offsets = [0, 0], sizes = [1, 128], strides = [1, 1]} : vector<4x128xf32> to vector<1x128xf32>
    %12 = vector.broadcast %10 : vector<128x1xf32> to vector<128x128xf32>
    %13 = vector.broadcast %11 : vector<1x128xf32> to vector<128x128xf32>
    %14 = arith.addf %12, %13 : vector<128x128xf32>
    %cst_8 = arith.constant 0.000000e+00 : f32
    %15 = vector.broadcast %cst_8 : f32 to vector<128x128xf32>
    %16 = arith.cmpf oge, %14, %15 : vector<128x128xf32>
    %cst_9 = arith.constant 0.00999999977 : f32
    %17 = vector.broadcast %cst_9 : f32 to vector<128x128xf32>
    %18 = arith.mulf %17, %14 : vector<128x128xf32>
    %19 = arith.select %16, %14, %18 : vector<128x128xi1>, vector<128x128xf32>
    %cst_10 = arith.constant -1.000000e+30 : f32
    %20 = vector.broadcast %cst_10 : f32 to vector<128x128xf32>
    %21 = arith.select %9, %19, %20 : vector<128x128xi1>, vector<128x128xf32>
    %c0_11 = arith.constant 0 : index
    %c0_12 = arith.constant 0 : index
    %22 = vector.load %arg7[%c0_11, %c0_12] : memref<128x4xf32, #tpu.memory_space<vmem>>, vector<128x1xf32>
    %cst_13 = arith.constant dense<0xFF800000> : vector<128xf32>
    %23 = vector.multi_reduction <maximumf>, %21, %cst_13 [1] : vector<128x128xf32> to vector<128xf32>
    %24 = vector.shape_cast %23 : vector<128xf32> to vector<128x1xf32>
    %25 = arith.maximumf %22, %24 : vector<128x1xf32>
    %26 = arith.subf %22, %25 : vector<128x1xf32>
    %27 = math.exp %26 : vector<128x1xf32>
    %28 = vector.broadcast %25 : vector<128x1xf32> to vector<128x128xf32>
    %29 = arith.subf %21, %28 : vector<128x128xf32>
    %30 = math.exp %29 : vector<128x128xf32>
    %cst_14 = arith.constant 0.000000e+00 : f32
    %31 = vector.broadcast %cst_14 : f32 to vector<128x128xf32>
    %32 = arith.select %9, %30, %31 : vector<128x128xi1>, vector<128x128xf32>
    %c0_15 = arith.constant 0 : index
    %c0_16 = arith.constant 0 : index
    %33 = vector.load %arg7[%c0_15, %c0_16] : memref<128x4xf32, #tpu.memory_space<vmem>>, vector<128x1xf32>
    tpu.vector_store %arg7[%c0_15, %c0_16], %25 {strides = array<i32>} : memref<128x4xf32, #tpu.memory_space<vmem>>, vector<128x1xf32>,
    %c0_17 = arith.constant 0 : index
    %c0_18 = arith.constant 0 : index
    %34 = vector.load %arg8[%c0_17, %c0_18] : memref<128x4xf32, #tpu.memory_space<vmem>>, vector<128x1xf32>
    %35 = arith.mulf %27, %34 : vector<128x1xf32>
    %cst_19 = arith.constant dense<0.000000e+00> : vector<128xf32>
    %36 = vector.multi_reduction <add>, %32, %cst_19 [1] : vector<128x128xf32> to vector<128xf32>
    %37 = vector.shape_cast %36 : vector<128xf32> to vector<128x1xf32>
    %38 = arith.addf %35, %37 : vector<128x1xf32>
    %c0_20 = arith.constant 0 : index
    %c0_21 = arith.constant 0 : index
    %39 = vector.load %arg8[%c0_20, %c0_21] : memref<128x4xf32, #tpu.memory_space<vmem>>, vector<128x1xf32>
    tpu.vector_store %arg8[%c0_20, %c0_21], %38 {strides = array<i32>} : memref<128x4xf32, #tpu.memory_space<vmem>>, vector<128x1xf32>,
    %c0_22 = arith.constant 0 : index
    %c0_23 = arith.constant 0 : index
    %40 = vector.load %arg9[%c0_22, %c0_23] : memref<128x32xf32, #tpu.memory_space<vmem>>, vector<128x8xf32>
    %41 = vector.broadcast %27 : vector<128x1xf32> to vector<128x8xf32>
    %42 = arith.mulf %41, %40 : vector<128x8xf32>
    %43 = arith.truncf %32 : vector<128x128xf32> to vector<128x128xbf16>
    %44 = vector.extract_strided_slice %5 {offsets = [0, 0], sizes = [128, 8], strides = [1, 1]} : vector<128x32xbf16> to vector<128x8xbf16>
    %cst_24 = arith.constant dense<0.000000e+00> : vector<128x8xf32>
    %45 = tpu.matmul %43, %44, %cst_24 {dimension_numbers = #tpu.dot_dimension_numbers<[1], [0], [0], [1], [0, 0, 1, 1], [], []>} : vector<128x128xbf16>, vector<128x8xbf16>, vector<128x8xf32> -> vector<128x8xf32>
    %46 = arith.addf %42, %45 : vector<128x8xf32>
    %c0_25 = arith.constant 0 : index
    %c0_26 = arith.constant 0 : index
    %47 = vector.load %arg9[%c0_25, %c0_26] : memref<128x32xf32, #tpu.memory_space<vmem>>, vector<128x8xf32>
    tpu.vector_store %arg9[%c0_25, %c0_26], %46 {strides = array<i32>} : memref<128x32xf32, #tpu.memory_space<vmem>>, vector<128x8xf32>,
    %48 = vector.extract_strided_slice %3 {offsets = [0, 1], sizes = [128, 1], strides = [1, 1]} : vector<128x4xf32> to vector<128x1xf32>
    %49 = vector.extract_strided_slice %4 {offsets = [1, 0], sizes = [1, 128], strides = [1, 1]} : vector<4x128xf32> to vector<1x128xf32>
    %50 = vector.broadcast %48 : vector<128x1xf32> to vector<128x128xf32>
    %51 = vector.broadcast %49 : vector<1x128xf32> to vector<128x128xf32>
    %52 = arith.addf %50, %51 : vector<128x128xf32>
    %cst_27 = arith.constant 0.000000e+00 : f32
    %53 = vector.broadcast %cst_27 : f32 to vector<128x128xf32>
    %54 = arith.cmpf oge, %52, %53 : vector<128x128xf32>
    %cst_28 = arith.constant 0.00999999977 : f32
    %55 = vector.broadcast %cst_28 : f32 to vector<128x128xf32>
    %56 = arith.mulf %55, %52 : vector<128x128xf32>
    %57 = arith.select %54, %52, %56 : vector<128x128xi1>, vector<128x128xf32>
    %cst_29 = arith.constant -1.000000e+30 : f32
    %58 = vector.broadcast %cst_29 : f32 to vector<128x128xf32>
    %59 = arith.select %9, %57, %58 : vector<128x128xi1>, vector<128x128xf32>
    %c0_30 = arith.constant 0 : index
    %c1 = arith.constant 1 : index
    %60 = vector.load %arg7[%c0_30, %c1] : memref<128x4xf32, #tpu.memory_space<vmem>>, vector<128x1xf32>
    %cst_31 = arith.constant dense<0xFF800000> : vector<128xf32>
    %61 = vector.multi_reduction <maximumf>, %59, %cst_31 [1] : vector<128x128xf32> to vector<128xf32>
    %62 = vector.shape_cast %61 : vector<128xf32> to vector<128x1xf32>
    %63 = arith.maximumf %60, %62 : vector<128x1xf32>
    %64 = arith.subf %60, %63 : vector<128x1xf32>
    %65 = math.exp %64 : vector<128x1xf32>
    %66 = vector.broadcast %63 : vector<128x1xf32> to vector<128x128xf32>
    %67 = arith.subf %59, %66 : vector<128x128xf32>
    %68 = math.exp %67 : vector<128x128xf32>
    %cst_32 = arith.constant 0.000000e+00 : f32
    %69 = vector.broadcast %cst_32 : f32 to vector<128x128xf32>
    %70 = arith.select %9, %68, %69 : vector<128x128xi1>, vector<128x128xf32>
    %c0_33 = arith.constant 0 : index
    %c1_34 = arith.constant 1 : index
    %71 = vector.load %arg7[%c0_33, %c1_34] : memref<128x4xf32, #tpu.memory_space<vmem>>, vector<128x1xf32>
    tpu.vector_store %arg7[%c0_33, %c1_34], %63 {strides = array<i32>} : memref<128x4xf32, #tpu.memory_space<vmem>>, vector<128x1xf32>,
    %c0_35 = arith.constant 0 : index
    %c1_36 = arith.constant 1 : index
    %72 = vector.load %arg8[%c0_35, %c1_36] : memref<128x4xf32, #tpu.memory_space<vmem>>, vector<128x1xf32>
    %73 = arith.mulf %65, %72 : vector<128x1xf32>
    %cst_37 = arith.constant dense<0.000000e+00> : vector<128xf32>
    %74 = vector.multi_reduction <add>, %70, %cst_37 [1] : vector<128x128xf32> to vector<128xf32>
    %75 = vector.shape_cast %74 : vector<128xf32> to vector<128x1xf32>
    %76 = arith.addf %73, %75 : vector<128x1xf32>
    %c0_38 = arith.constant 0 : index
    %c1_39 = arith.constant 1 : index
    %77 = vector.load %arg8[%c0_38, %c1_39] : memref<128x4xf32, #tpu.memory_space<vmem>>, vector<128x1xf32>
    tpu.vector_store %arg8[%c0_38, %c1_39], %76 {strides = array<i32>} : memref<128x4xf32, #tpu.memory_space<vmem>>, vector<128x1xf32>,
    %c0_40 = arith.constant 0 : index
    %c8 = arith.constant 8 : index
    %78 = vector.load %arg9[%c0_40, %c8] : memref<128x32xf32, #tpu.memory_space<vmem>>, vector<128x8xf32>
    %79 = vector.broadcast %65 : vector<128x1xf32> to vector<128x8xf32>
    %80 = arith.mulf %79, %78 : vector<128x8xf32>
    %81 = arith.truncf %70 : vector<128x128xf32> to vector<128x128xbf16>
    %82 = vector.extract_strided_slice %5 {offsets = [0, 8], sizes = [128, 8], strides = [1, 1]} : vector<128x32xbf16> to vector<128x8xbf16>
    %cst_41 = arith.constant dense<0.000000e+00> : vector<128x8xf32>
    %83 = tpu.matmul %81, %82, %cst_41 {dimension_numbers = #tpu.dot_dimension_numbers<[1], [0], [0], [1], [0, 0, 1, 1], [], []>} : vector<128x128xbf16>, vector<128x8xbf16>, vector<128x8xf32> -> vector<128x8xf32>
    %84 = arith.addf %80, %83 : vector<128x8xf32>
    %c0_42 = arith.constant 0 : index
    %c8_43 = arith.constant 8 : index
    %85 = vector.load %arg9[%c0_42, %c8_43] : memref<128x32xf32, #tpu.memory_space<vmem>>, vector<128x8xf32>
    tpu.vector_store %arg9[%c0_42, %c8_43], %84 {strides = array<i32>} : memref<128x32xf32, #tpu.memory_space<vmem>>, vector<128x8xf32>,
    %86 = vector.extract_strided_slice %3 {offsets = [0, 2], sizes = [128, 1], strides = [1, 1]} : vector<128x4xf32> to vector<128x1xf32>
    %87 = vector.extract_strided_slice %4 {offsets = [2, 0], sizes = [1, 128], strides = [1, 1]} : vector<4x128xf32> to vector<1x128xf32>
    %88 = vector.broadcast %86 : vector<128x1xf32> to vector<128x128xf32>
    %89 = vector.broadcast %87 : vector<1x128xf32> to vector<128x128xf32>
    %90 = arith.addf %88, %89 : vector<128x128xf32>
    %cst_44 = arith.constant 0.000000e+00 : f32
    %91 = vector.broadcast %cst_44 : f32 to vector<128x128xf32>
    %92 = arith.cmpf oge, %90, %91 : vector<128x128xf32>
    %cst_45 = arith.constant 0.00999999977 : f32
    %93 = vector.broadcast %cst_45 : f32 to vector<128x128xf32>
    %94 = arith.mulf %93, %90 : vector<128x128xf32>
    %95 = arith.select %92, %90, %94 : vector<128x128xi1>, vector<128x128xf32>
    %cst_46 = arith.constant -1.000000e+30 : f32
    %96 = vector.broadcast %cst_46 : f32 to vector<128x128xf32>
    %97 = arith.select %9, %95, %96 : vector<128x128xi1>, vector<128x128xf32>
    %c0_47 = arith.constant 0 : index
    %c2 = arith.constant 2 : index
    %98 = vector.load %arg7[%c0_47, %c2] : memref<128x4xf32, #tpu.memory_space<vmem>>, vector<128x1xf32>
    %cst_48 = arith.constant dense<0xFF800000> : vector<128xf32>
    %99 = vector.multi_reduction <maximumf>, %97, %cst_48 [1] : vector<128x128xf32> to vector<128xf32>
    %100 = vector.shape_cast %99 : vector<128xf32> to vector<128x1xf32>
    %101 = arith.maximumf %98, %100 : vector<128x1xf32>
    %102 = arith.subf %98, %101 : vector<128x1xf32>
    %103 = math.exp %102 : vector<128x1xf32>
    %104 = vector.broadcast %101 : vector<128x1xf32> to vector<128x128xf32>
    %105 = arith.subf %97, %104 : vector<128x128xf32>
    %106 = math.exp %105 : vector<128x128xf32>
    %cst_49 = arith.constant 0.000000e+00 : f32
    %107 = vector.broadcast %cst_49 : f32 to vector<128x128xf32>
    %108 = arith.select %9, %106, %107 : vector<128x128xi1>, vector<128x128xf32>
    %c0_50 = arith.constant 0 : index
    %c2_51 = arith.constant 2 : index
    %109 = vector.load %arg7[%c0_50, %c2_51] : memref<128x4xf32, #tpu.memory_space<vmem>>, vector<128x1xf32>
    tpu.vector_store %arg7[%c0_50, %c2_51], %101 {strides = array<i32>} : memref<128x4xf32, #tpu.memory_space<vmem>>, vector<128x1xf32>,
    %c0_52 = arith.constant 0 : index
    %c2_53 = arith.constant 2 : index
    %110 = vector.load %arg8[%c0_52, %c2_53] : memref<128x4xf32, #tpu.memory_space<vmem>>, vector<128x1xf32>
    %111 = arith.mulf %103, %110 : vector<128x1xf32>
    %cst_54 = arith.constant dense<0.000000e+00> : vector<128xf32>
    %112 = vector.multi_reduction <add>, %108, %cst_54 [1] : vector<128x128xf32> to vector<128xf32>
    %113 = vector.shape_cast %112 : vector<128xf32> to vector<128x1xf32>
    %114 = arith.addf %111, %113 : vector<128x1xf32>
    %c0_55 = arith.constant 0 : index
    %c2_56 = arith.constant 2 : index
    %115 = vector.load %arg8[%c0_55, %c2_56] : memref<128x4xf32, #tpu.memory_space<vmem>>, vector<128x1xf32>
    tpu.vector_store %arg8[%c0_55, %c2_56], %114 {strides = array<i32>} : memref<128x4xf32, #tpu.memory_space<vmem>>, vector<128x1xf32>,
    %c0_57 = arith.constant 0 : index
    %c16 = arith.constant 16 : index
    %116 = vector.load %arg9[%c0_57, %c16] : memref<128x32xf32, #tpu.memory_space<vmem>>, vector<128x8xf32>
    %117 = vector.broadcast %103 : vector<128x1xf32> to vector<128x8xf32>
    %118 = arith.mulf %117, %116 : vector<128x8xf32>
    %119 = arith.truncf %108 : vector<128x128xf32> to vector<128x128xbf16>
    %120 = vector.extract_strided_slice %5 {offsets = [0, 16], sizes = [128, 8], strides = [1, 1]} : vector<128x32xbf16> to vector<128x8xbf16>
    %cst_58 = arith.constant dense<0.000000e+00> : vector<128x8xf32>
    %121 = tpu.matmul %119, %120, %cst_58 {dimension_numbers = #tpu.dot_dimension_numbers<[1], [0], [0], [1], [0, 0, 1, 1], [], []>} : vector<128x128xbf16>, vector<128x8xbf16>, vector<128x8xf32> -> vector<128x8xf32>
    %122 = arith.addf %118, %121 : vector<128x8xf32>
    %c0_59 = arith.constant 0 : index
    %c16_60 = arith.constant 16 : index
    %123 = vector.load %arg9[%c0_59, %c16_60] : memref<128x32xf32, #tpu.memory_space<vmem>>, vector<128x8xf32>
    tpu.vector_store %arg9[%c0_59, %c16_60], %122 {strides = array<i32>} : memref<128x32xf32, #tpu.memory_space<vmem>>, vector<128x8xf32>,
    %124 = vector.extract_strided_slice %3 {offsets = [0, 3], sizes = [128, 1], strides = [1, 1]} : vector<128x4xf32> to vector<128x1xf32>
    %125 = vector.extract_strided_slice %4 {offsets = [3, 0], sizes = [1, 128], strides = [1, 1]} : vector<4x128xf32> to vector<1x128xf32>
    %126 = vector.broadcast %124 : vector<128x1xf32> to vector<128x128xf32>
    %127 = vector.broadcast %125 : vector<1x128xf32> to vector<128x128xf32>
    %128 = arith.addf %126, %127 : vector<128x128xf32>
    %cst_61 = arith.constant 0.000000e+00 : f32
    %129 = vector.broadcast %cst_61 : f32 to vector<128x128xf32>
    %130 = arith.cmpf oge, %128, %129 : vector<128x128xf32>
    %cst_62 = arith.constant 0.00999999977 : f32
    %131 = vector.broadcast %cst_62 : f32 to vector<128x128xf32>
    %132 = arith.mulf %131, %128 : vector<128x128xf32>
    %133 = arith.select %130, %128, %132 : vector<128x128xi1>, vector<128x128xf32>
    %cst_63 = arith.constant -1.000000e+30 : f32
    %134 = vector.broadcast %cst_63 : f32 to vector<128x128xf32>
    %135 = arith.select %9, %133, %134 : vector<128x128xi1>, vector<128x128xf32>
    %c0_64 = arith.constant 0 : index
    %c3 = arith.constant 3 : index
    %136 = vector.load %arg7[%c0_64, %c3] : memref<128x4xf32, #tpu.memory_space<vmem>>, vector<128x1xf32>
    %cst_65 = arith.constant dense<0xFF800000> : vector<128xf32>
    %137 = vector.multi_reduction <maximumf>, %135, %cst_65 [1] : vector<128x128xf32> to vector<128xf32>
    %138 = vector.shape_cast %137 : vector<128xf32> to vector<128x1xf32>
    %139 = arith.maximumf %136, %138 : vector<128x1xf32>
    %140 = arith.subf %136, %139 : vector<128x1xf32>
    %141 = math.exp %140 : vector<128x1xf32>
    %142 = vector.broadcast %139 : vector<128x1xf32> to vector<128x128xf32>
    %143 = arith.subf %135, %142 : vector<128x128xf32>
    %144 = math.exp %143 : vector<128x128xf32>
    %cst_66 = arith.constant 0.000000e+00 : f32
    %145 = vector.broadcast %cst_66 : f32 to vector<128x128xf32>
    %146 = arith.select %9, %144, %145 : vector<128x128xi1>, vector<128x128xf32>
    %c0_67 = arith.constant 0 : index
    %c3_68 = arith.constant 3 : index
    %147 = vector.load %arg7[%c0_67, %c3_68] : memref<128x4xf32, #tpu.memory_space<vmem>>, vector<128x1xf32>
    tpu.vector_store %arg7[%c0_67, %c3_68], %139 {strides = array<i32>} : memref<128x4xf32, #tpu.memory_space<vmem>>, vector<128x1xf32>,
    %c0_69 = arith.constant 0 : index
    %c3_70 = arith.constant 3 : index
    %148 = vector.load %arg8[%c0_69, %c3_70] : memref<128x4xf32, #tpu.memory_space<vmem>>, vector<128x1xf32>
    %149 = arith.mulf %141, %148 : vector<128x1xf32>
    %cst_71 = arith.constant dense<0.000000e+00> : vector<128xf32>
    %150 = vector.multi_reduction <add>, %146, %cst_71 [1] : vector<128x128xf32> to vector<128xf32>
    %151 = vector.shape_cast %150 : vector<128xf32> to vector<128x1xf32>
    %152 = arith.addf %149, %151 : vector<128x1xf32>
    %c0_72 = arith.constant 0 : index
    %c3_73 = arith.constant 3 : index
    %153 = vector.load %arg8[%c0_72, %c3_73] : memref<128x4xf32, #tpu.memory_space<vmem>>, vector<128x1xf32>
    tpu.vector_store %arg8[%c0_72, %c3_73], %152 {strides = array<i32>} : memref<128x4xf32, #tpu.memory_space<vmem>>, vector<128x1xf32>,
    %c0_74 = arith.constant 0 : index
    %c24 = arith.constant 24 : index
    %154 = vector.load %arg9[%c0_74, %c24] : memref<128x32xf32, #tpu.memory_space<vmem>>, vector<128x8xf32>
    %155 = vector.broadcast %141 : vector<128x1xf32> to vector<128x8xf32>
    %156 = arith.mulf %155, %154 : vector<128x8xf32>
    %157 = arith.truncf %146 : vector<128x128xf32> to vector<128x128xbf16>
    %158 = vector.extract_strided_slice %5 {offsets = [0, 24], sizes = [128, 8], strides = [1, 1]} : vector<128x32xbf16> to vector<128x8xbf16>
    %cst_75 = arith.constant dense<0.000000e+00> : vector<128x8xf32>
    %159 = tpu.matmul %157, %158, %cst_75 {dimension_numbers = #tpu.dot_dimension_numbers<[1], [0], [0], [1], [0, 0, 1, 1], [], []>} : vector<128x128xbf16>, vector<128x8xbf16>, vector<128x8xf32> -> vector<128x8xf32>
    %160 = arith.addf %156, %159 : vector<128x8xf32>
    %c0_76 = arith.constant 0 : index
    %c24_77 = arith.constant 24 : index
    %161 = vector.load %arg9[%c0_76, %c24_77] : memref<128x32xf32, #tpu.memory_space<vmem>>, vector<128x8xf32>
    tpu.vector_store %arg9[%c0_76, %c24_77], %160 {strides = array<i32>} : memref<128x32xf32, #tpu.memory_space<vmem>>, vector<128x8xf32>,
    %c0_i32_78 = arith.constant 0 : i32
    %162 = arith.cmpi eq, %arg1, %c0_i32_78 : i32
    %163 = arith.extui %162 : i1 to i32
    %c0_i32_79 = arith.constant 0 : i32
    %164 = arith.cmpi ne, %163, %c0_i32_79 : i32
    scf.if %164 {
      %c0_80 = arith.constant 0 : index
      %c0_81 = arith.constant 0 : index
      %165 = vector.load %arg8[%c0_80, %c0_81] : memref<128x4xf32, #tpu.memory_space<vmem>>, vector<128x1xf32>
      %cst_82 = arith.constant 1.000000e-30 : f32
      %166 = vector.broadcast %cst_82 : f32 to vector<128x1xf32>
      %167 = arith.maximumf %165, %166 : vector<128x1xf32>
      %168 = tpu.reciprocal %167 {approx = true} : vector<128x1xf32> -> vector<128x1xf32>
      %169 = vector.shape_cast %168 : vector<128x1xf32> to vector<128x1xf32>
      %170 = vector.broadcast %169 : vector<128x1xf32> to vector<128x8xf32>
      %c0_83 = arith.constant 0 : index
      %c1_84 = arith.constant 1 : index
      %171 = vector.load %arg8[%c0_83, %c1_84] : memref<128x4xf32, #tpu.memory_space<vmem>>, vector<128x1xf32>
      %cst_85 = arith.constant 1.000000e-30 : f32
      %172 = vector.broadcast %cst_85 : f32 to vector<128x1xf32>
      %173 = arith.maximumf %171, %172 : vector<128x1xf32>
      %174 = tpu.reciprocal %173 {approx = true} : vector<128x1xf32> -> vector<128x1xf32>
      %175 = vector.shape_cast %174 : vector<128x1xf32> to vector<128x1xf32>
      %176 = vector.broadcast %175 : vector<128x1xf32> to vector<128x8xf32>
      %c0_86 = arith.constant 0 : index
      %c2_87 = arith.constant 2 : index
      %177 = vector.load %arg8[%c0_86, %c2_87] : memref<128x4xf32, #tpu.memory_space<vmem>>, vector<128x1xf32>
      %cst_88 = arith.constant 1.000000e-30 : f32
      %178 = vector.broadcast %cst_88 : f32 to vector<128x1xf32>
      %179 = arith.maximumf %177, %178 : vector<128x1xf32>
      %180 = tpu.reciprocal %179 {approx = true} : vector<128x1xf32> -> vector<128x1xf32>
      %181 = vector.shape_cast %180 : vector<128x1xf32> to vector<128x1xf32>
      %182 = vector.broadcast %181 : vector<128x1xf32> to vector<128x8xf32>
      %c0_89 = arith.constant 0 : index
      %c3_90 = arith.constant 3 : index
      %183 = vector.load %arg8[%c0_89, %c3_90] : memref<128x4xf32, #tpu.memory_space<vmem>>, vector<128x1xf32>
      %cst_91 = arith.constant 1.000000e-30 : f32
      %184 = vector.broadcast %cst_91 : f32 to vector<128x1xf32>
      %185 = arith.maximumf %183, %184 : vector<128x1xf32>
      %186 = tpu.reciprocal %185 {approx = true} : vector<128x1xf32> -> vector<128x1xf32>
      %187 = vector.shape_cast %186 : vector<128x1xf32> to vector<128x1xf32>
      %188 = vector.broadcast %187 : vector<128x1xf32> to vector<128x8xf32>
      %189 = tpu.concatenate %170, %176, %182, %188 in 1 : vector<128x8xf32>, vector<128x8xf32>, vector<128x8xf32>, vector<128x8xf32> -> vector<128x32xf32>
      %c0_92 = arith.constant 0 : index
      %c0_93 = arith.constant 0 : index
      %190 = vector.load %arg9[%c0_92, %c0_93] : memref<128x32xf32, #tpu.memory_space<vmem>>, vector<128x32xf32>
      %191 = arith.mulf %190, %189 : vector<128x32xf32>
      %c0_94 = arith.constant 0 : index
      %c0_95 = arith.constant 0 : index
      %192 = vector.load %arg6[%c0_94, %c0_95] : memref<128x32xf32, #tpu.memory_space<vmem>>, vector<128x32xf32>
      tpu.vector_store %arg6[%c0_94, %c0_95], %191 {strides = array<i32>} : memref<128x32xf32, #tpu.memory_space<vmem>>, vector<128x32xf32>,
    } else {
    }
    return
  }
  func.func @transform_0(%arg0: i32, %arg1: i32) -> (i32, i32) {
    %c0_i32 = arith.constant 0 : i32
    %c0_i32_0 = arith.constant 0 : i32
    return %arg0, %c0_i32 : i32, i32
  }
  func.func @transform_1(%arg0: i32, %arg1: i32) -> (i32, i32) {
    %c0_i32 = arith.constant 0 : i32
    %c0_i32_0 = arith.constant 0 : i32
    return %c0_i32, %arg1 : i32, i32
  }
  func.func @transform_2(%arg0: i32, %arg1: i32) -> (i32, i32) {
    %c0_i32 = arith.constant 0 : i32
    %c0_i32_0 = arith.constant 0 : i32
    return %arg1, %c0_i32 : i32, i32
  }
  func.func @transform_3(%arg0: i32, %arg1: i32) -> (i32, i32) {
    %c0_i32 = arith.constant 0 : i32
    return %arg0, %arg1 : i32, i32
  }
  func.func @transform_4(%arg0: i32, %arg1: i32) -> (i32, i32) {
    %c0_i32 = arith.constant 0 : i32
    %c0_i32_0 = arith.constant 0 : i32
    return %arg0, %c0_i32 : i32, i32
  }
}

module attributes {stable_mosaic.version = 11 : i64} {
  func.func @elu_res_ffn_kernel(%arg0: i32, %arg1: memref<128x32xf32, #tpu.memory_space<vmem>>, %arg2: memref<128x32xf32, #tpu.memory_space<vmem>>, %arg3: memref<32x64xbf16, #tpu.memory_space<vmem>>, %arg4: memref<1x64xf32, #tpu.memory_space<vmem>>, %arg5: memref<64x32xbf16, #tpu.memory_space<vmem>>, %arg6: memref<1x32xf32, #tpu.memory_space<vmem>>, %arg7: memref<1x32xf32, #tpu.memory_space<vmem>>, %arg8: memref<1x32xf32, #tpu.memory_space<vmem>>, %arg9: memref<128x32xf32, #tpu.memory_space<vmem>>) attributes {dimension_semantics = [#tpu.dimension_semantics<parallel>], iteration_bounds = array<i64: 1>, scalar_prefetch = 0 : i64, scratch_operands = 0 : i64, tpu.core_type = #tpu.core_type<tc>, window_params = [{transform_indices = @transform_0, window_bounds = array<i64: 128, 32>}, {transform_indices = @transform_1, window_bounds = array<i64: 128, 32>}, {pipeline_mode = #tpu.pipeline_mode<synchronous>, transform_indices = @transform_2, window_bounds = array<i64: 32, 64>}, {pipeline_mode = #tpu.pipeline_mode<synchronous>, transform_indices = @transform_3, window_bounds = array<i64: 1, 64>}, {pipeline_mode = #tpu.pipeline_mode<synchronous>, transform_indices = @transform_4, window_bounds = array<i64: 64, 32>}, {pipeline_mode = #tpu.pipeline_mode<synchronous>, transform_indices = @transform_5, window_bounds = array<i64: 1, 32>}, {pipeline_mode = #tpu.pipeline_mode<synchronous>, transform_indices = @transform_6, window_bounds = array<i64: 1, 32>}, {pipeline_mode = #tpu.pipeline_mode<synchronous>, transform_indices = @transform_7, window_bounds = array<i64: 1, 32>}, {transform_indices = @transform_8, window_bounds = array<i64: 128, 32>}]} {
    %c0 = arith.constant 0 : index
    %c0_0 = arith.constant 0 : index
    %0 = vector.load %arg1[%c0, %c0_0] : memref<128x32xf32, #tpu.memory_space<vmem>>, vector<128x32xf32>
    %cst = arith.constant 0.000000e+00 : f32
    %1 = vector.broadcast %cst : f32 to vector<128x32xf32>
    %2 = arith.cmpf ogt, %0, %1 : vector<128x32xf32>
    %cst_1 = arith.constant 0.000000e+00 : f32
    %3 = vector.broadcast %cst_1 : f32 to vector<128x32xf32>
    %4 = arith.minimumf %0, %3 : vector<128x32xf32>
    %5 = math.exp %4 : vector<128x32xf32>
    %cst_2 = arith.constant 1.000000e+00 : f32
    %6 = vector.broadcast %cst_2 : f32 to vector<128x32xf32>
    %7 = arith.subf %5, %6 : vector<128x32xf32>
    %8 = arith.select %2, %0, %7 : vector<128x32xi1>, vector<128x32xf32>
    %c0_3 = arith.constant 0 : index
    %c0_4 = arith.constant 0 : index
    %9 = vector.load %arg2[%c0_3, %c0_4] : memref<128x32xf32, #tpu.memory_space<vmem>>, vector<128x32xf32>
    %10 = arith.addf %8, %9 : vector<128x32xf32>
    %11 = arith.truncf %10 : vector<128x32xf32> to vector<128x32xbf16>
    %c0_5 = arith.constant 0 : index
    %c0_6 = arith.constant 0 : index
    %12 = vector.load %arg3[%c0_5, %c0_6] : memref<32x64xbf16, #tpu.memory_space<vmem>>, vector<32x64xbf16>
    %cst_7 = arith.constant dense<0.000000e+00> : vector<128x64xf32>
    %13 = tpu.matmul %11, %12, %cst_7 {dimension_numbers = #tpu.dot_dimension_numbers<[1], [0], [0], [1], [0, 0, 1, 1], [], []>} : vector<128x32xbf16>, vector<32x64xbf16>, vector<128x64xf32> -> vector<128x64xf32>
    %c0_8 = arith.constant 0 : index
    %c0_9 = arith.constant 0 : index
    %14 = vector.load %arg4[%c0_8, %c0_9] : memref<1x64xf32, #tpu.memory_space<vmem>>, vector<1x64xf32>
    %15 = vector.broadcast %14 : vector<1x64xf32> to vector<128x64xf32>
    %16 = arith.addf %13, %15 : vector<128x64xf32>
    %cst_10 = arith.constant 0.000000e+00 : f32
    %17 = vector.broadcast %cst_10 : f32 to vector<128x64xf32>
    %18 = arith.maximumf %16, %17 : vector<128x64xf32>
    %19 = arith.truncf %18 : vector<128x64xf32> to vector<128x64xbf16>
    %c0_11 = arith.constant 0 : index
    %c0_12 = arith.constant 0 : index
    %20 = vector.load %arg5[%c0_11, %c0_12] : memref<64x32xbf16, #tpu.memory_space<vmem>>, vector<64x32xbf16>
    %cst_13 = arith.constant dense<0.000000e+00> : vector<128x32xf32>
    %21 = tpu.matmul %19, %20, %cst_13 {dimension_numbers = #tpu.dot_dimension_numbers<[1], [0], [0], [1], [0, 0, 1, 1], [], []>} : vector<128x64xbf16>, vector<64x32xbf16>, vector<128x32xf32> -> vector<128x32xf32>
    %c0_14 = arith.constant 0 : index
    %c0_15 = arith.constant 0 : index
    %22 = vector.load %arg6[%c0_14, %c0_15] : memref<1x32xf32, #tpu.memory_space<vmem>>, vector<1x32xf32>
    %23 = vector.broadcast %22 : vector<1x32xf32> to vector<128x32xf32>
    %24 = arith.addf %21, %23 : vector<128x32xf32>
    %25 = arith.addf %24, %10 : vector<128x32xf32>
    %cst_16 = arith.constant dense<0.000000e+00> : vector<128xf32>
    %26 = vector.multi_reduction <add>, %25, %cst_16 [1] : vector<128x32xf32> to vector<128xf32>
    %27 = vector.shape_cast %26 : vector<128xf32> to vector<128x1xf32>
    %cst_17 = arith.constant 3.200000e+01 : f32
    %28 = vector.broadcast %cst_17 : f32 to vector<128x1xf32>
    %29 = arith.divf %27, %28 : vector<128x1xf32>
    %30 = vector.broadcast %29 : vector<128x1xf32> to vector<128x32xf32>
    %31 = arith.subf %25, %30 : vector<128x32xf32>
    %32 = vector.broadcast %29 : vector<128x1xf32> to vector<128x32xf32>
    %33 = arith.subf %25, %32 : vector<128x32xf32>
    %34 = arith.mulf %31, %33 : vector<128x32xf32>
    %cst_18 = arith.constant dense<0.000000e+00> : vector<128xf32>
    %35 = vector.multi_reduction <add>, %34, %cst_18 [1] : vector<128x32xf32> to vector<128xf32>
    %36 = vector.shape_cast %35 : vector<128xf32> to vector<128x1xf32>
    %cst_19 = arith.constant 3.200000e+01 : f32
    %37 = vector.broadcast %cst_19 : f32 to vector<128x1xf32>
    %38 = arith.divf %36, %37 : vector<128x1xf32>
    %39 = vector.broadcast %29 : vector<128x1xf32> to vector<128x32xf32>
    %40 = arith.subf %25, %39 : vector<128x32xf32>
    %cst_20 = arith.constant 9.99999974E-6 : f32
    %41 = vector.broadcast %cst_20 : f32 to vector<128x1xf32>
    %42 = arith.addf %38, %41 : vector<128x1xf32>
    %43 = math.rsqrt %42 : vector<128x1xf32>
    %44 = vector.broadcast %43 : vector<128x1xf32> to vector<128x32xf32>
    %45 = arith.mulf %40, %44 : vector<128x32xf32>
    %c0_21 = arith.constant 0 : index
    %c0_22 = arith.constant 0 : index
    %46 = vector.load %arg7[%c0_21, %c0_22] : memref<1x32xf32, #tpu.memory_space<vmem>>, vector<1x32xf32>
    %47 = vector.broadcast %46 : vector<1x32xf32> to vector<128x32xf32>
    %48 = arith.mulf %45, %47 : vector<128x32xf32>
    %c0_23 = arith.constant 0 : index
    %c0_24 = arith.constant 0 : index
    %49 = vector.load %arg8[%c0_23, %c0_24] : memref<1x32xf32, #tpu.memory_space<vmem>>, vector<1x32xf32>
    %50 = vector.broadcast %49 : vector<1x32xf32> to vector<128x32xf32>
    %51 = arith.addf %48, %50 : vector<128x32xf32>
    %c0_25 = arith.constant 0 : index
    %c0_26 = arith.constant 0 : index
    %52 = vector.load %arg9[%c0_25, %c0_26] : memref<128x32xf32, #tpu.memory_space<vmem>>, vector<128x32xf32>
    tpu.vector_store %arg9[%c0_25, %c0_26], %51 {strides = array<i32>} : memref<128x32xf32, #tpu.memory_space<vmem>>, vector<128x32xf32>,
    return
  }
  func.func @transform_0(%arg0: i32) -> (i32, i32) {
    %c0_i32 = arith.constant 0 : i32
    %c0_i32_0 = arith.constant 0 : i32
    return %arg0, %c0_i32 : i32, i32
  }
  func.func @transform_1(%arg0: i32) -> (i32, i32) {
    %c0_i32 = arith.constant 0 : i32
    %c0_i32_0 = arith.constant 0 : i32
    return %arg0, %c0_i32 : i32, i32
  }
  func.func @transform_2(%arg0: i32) -> (i32, i32) {
    %c0_i32 = arith.constant 0 : i32
    %c0_i32_0 = arith.constant 0 : i32
    %c0_i32_1 = arith.constant 0 : i32
    return %c0_i32, %c0_i32_0 : i32, i32
  }
  func.func @transform_3(%arg0: i32) -> (i32, i32) {
    %c0_i32 = arith.constant 0 : i32
    %c0_i32_0 = arith.constant 0 : i32
    %c0_i32_1 = arith.constant 0 : i32
    return %c0_i32, %c0_i32_0 : i32, i32
  }
  func.func @transform_4(%arg0: i32) -> (i32, i32) {
    %c0_i32 = arith.constant 0 : i32
    %c0_i32_0 = arith.constant 0 : i32
    %c0_i32_1 = arith.constant 0 : i32
    return %c0_i32, %c0_i32_0 : i32, i32
  }
  func.func @transform_5(%arg0: i32) -> (i32, i32) {
    %c0_i32 = arith.constant 0 : i32
    %c0_i32_0 = arith.constant 0 : i32
    %c0_i32_1 = arith.constant 0 : i32
    return %c0_i32, %c0_i32_0 : i32, i32
  }
  func.func @transform_6(%arg0: i32) -> (i32, i32) {
    %c0_i32 = arith.constant 0 : i32
    %c0_i32_0 = arith.constant 0 : i32
    %c0_i32_1 = arith.constant 0 : i32
    return %c0_i32, %c0_i32_0 : i32, i32
  }
  func.func @transform_7(%arg0: i32) -> (i32, i32) {
    %c0_i32 = arith.constant 0 : i32
    %c0_i32_0 = arith.constant 0 : i32
    %c0_i32_1 = arith.constant 0 : i32
    return %c0_i32, %c0_i32_0 : i32, i32
  }
  func.func @transform_8(%arg0: i32) -> (i32, i32) {
    %c0_i32 = arith.constant 0 : i32
    %c0_i32_0 = arith.constant 0 : i32
    return %arg0, %c0_i32 : i32, i32
  }
}

</mosaic_0001>

<bundles_post_ra>
// kernel: gat_hetersum_apply.6
= control target key start
LH: loop header
LB: loop body
LE: loop exit
PB: predicated region body
PF: predicated region fallthrough
CT: control target
= control target key end

     0   :  { %vm57_vm0 = vcmask 261120   ;;  %vm243_vm1 = vcmask 257024   ;;  %vm457_vm2 = vcmask 64512   ;;  %s875_s1 = inlined_call_operand.vmem [shape: bf16[32,32], index: 1, kind: input, shape index: {}]   ;;  %s876_s2 = inlined_call_operand.vmem [shape: f32[32,8], index: 2, kind: input, shape index: {}]   ;;  %s877_s0 = inlined_call_operand.vmem [shape: f32[128,32], index: 0, kind: input, shape index: {}]   ;;  %s878_s3 = inlined_call_operand.vmem [shape: bf16[128,32], index: 3, kind: output, shape index: {0}]   ;;  %s879_s4 = inlined_call_operand.vmem [shape: f32[128,8], index: 4, kind: output, shape index: {1}]  }
   0x1   :  { %v630_v0 = vld [vmem:[%s875_s1] sm:$0xff]   ;;  %v261_v2 = vld [vmem:[%s876_s2 + $0x8] sm:$0xff]  ;;  %v262_v5 = vld [vmem:[%s876_s2 + $0x10] sm:$0xff] }
   0x2   :  { %v260_v1 = vld [vmem:[%s876_s2] sm:$0xff]  ;;  %570 = vmatprep.subr.bf16.mxu0 %v630_v0  ;;  %v631_v4 = vld [vmem:[%s875_s1 + $0x8] sm:$0xff]   ;;  %v263_v6 = vld [vmem:[%s876_s2 + $0x18] sm:$0xff] }
   0x3   :  { %v622_v3 = vpack.c.bf16 %v261_v2, %v260_v1  ;;  %571 = vmatpush3.bf16.msra.mxu0 %v630_v0  ;;  %v17_v7 = vld [vmem:[%s877_s0] sm:$0xff]  ;;  %v18_v8 = vld [vmem:[%s877_s0 + $0x8] sm:$0xff]  ;;  %v626_v9 = vpack.c.bf16 %v263_v6, %v262_v5  ;;  %v19_v11 = vld [vmem:[%s877_s0 + $0x10] sm:$0xff] }
   0x4   :  { %572 = vmatprep.subr.bf16.mxu0 %v631_v4  ;;  %v33_v10 = vpack.c.bf16 %v18_v8, %v17_v7  ;;  %v20_v12 = vld [vmem:[%s877_s0 + $0x18] sm:$0xff]  ;;  %v21_v13 = vld [vmem:[%s877_s0 + $0x20] sm:$0xff]  ;;  %598 = vmatprep.mubr.msk.f32.mxu1 %vm57_vm0, %v17_v7  ;;  %v22_v14 = vld [vmem:[%s877_s0 + $0x28] sm:$0xff] }
   0x5   :  { %623 = vmatprep.subr.bf16.mxu1 %v622_v3  ;;  %v34_v15 = vpack.c.bf16 %v20_v12, %v19_v11  ;;  %v35_v16 = vpack.c.bf16 %v22_v14, %v21_v13  ;;  %v23_v17 = vld [vmem:[%s877_s0 + $0x30] sm:$0xff]  ;;  %v24_v18 = vld [vmem:[%s877_s0 + $0x38] sm:$0xff]  ;;  %v25_v19 = vld [vmem:[%s877_s0 + $0x40] sm:$0xff] }
   0x6   :  { %625 = vmatpush3.bf16.msra.mxu1 %v622_v3  ;;  %574 = vmatprep.mubr.msk.bf16.mxu0 %vm57_vm0, %v33_v10  ;;  %v26_v20 = vld [vmem:[%s877_s0 + $0x48] sm:$0xff]  ;;  %v36_v21 = vpack.c.bf16 %v24_v18, %v23_v17  ;;  %v27_v23 = vld [vmem:[%s877_s0 + $0x50] sm:$0xff]  ;;  %v28_v24 = vld [vmem:[%s877_s0 + $0x58] sm:$0xff] }
   0x7   :  { %627 = vmatprep.subr.bf16.mxu1 %v626_v9  ;;  %573 = vmatpush3.bf16.msra.mxu0 %v631_v4  ;;  %v37_v22 = vpack.c.bf16 %v26_v20, %v25_v19  ;;  %v29_v25 = vld [vmem:[%s877_s0 + $0x60] sm:$0xff]  ;;  %v30_v26 = vld [vmem:[%s877_s0 + $0x68] sm:$0xff]  ;;  %v38_v27 = vpack.c.bf16 %v28_v24, %v27_v23  ;;  %v31_v29 = vld [vmem:[%s877_s0 + $0x70] sm:$0xff] }
   0x8   :  { %v39_v28 = vpack.c.bf16 %v30_v26, %v29_v25  ;;  %v32_v30 = vld [vmem:[%s877_s0 + $0x78] sm:$0xff] }
   0x9   :  { %v40_v31 = vpack.c.bf16 %v32_v30, %v31_v29 }
   0xa   :  { %629 = vmatpush3.bf16.msra.mxu1 %v626_v9  ;;  %575 = vmatmul.mubr.msk.bf16.vlgmr.msra.gmra.mrb[0].mxu0 %vm57_vm0, %v34_v15 }
   0xb   :  { %578 = vmatprep.mubr.msk.bf16.mxu0 %vm57_vm0, %v35_v16 }
   0xd   :  { %599 = vmatmul.mubr.msk.f32.vlgmr.msra.gmra.mrb[0].mxu1 %vm57_vm0, %v18_v8 }
   0xe   :  { %601 = vmatprep.mubr.msk.f32.mxu1 %vm57_vm0, %v19_v11 }
  0x11   :  { %602 = vmatmul.mubr.msk.f32.gmra.mrb[2].mxu1 %vm57_vm0, %v20_v12 }
  0x12   :  { %604 = vmatprep.mubr.msk.f32.mxu1 %vm57_vm0, %v21_v13  ;;  %579 = vmatmul.mubr.msk.bf16.gmra.mrb[4].mxu0 %vm57_vm0, %v36_v21 }
  0x13   :  { %582 = vmatprep.mubr.msk.bf16.mxu0 %vm57_vm0, %v37_v22 }
  0x15   :  { %605 = vmatmul.mubr.msk.f32.gmra.mrb[4].mxu1 %vm57_vm0, %v22_v14 }
  0x16   :  { %607 = vmatprep.mubr.msk.f32.mxu1 %vm57_vm0, %v23_v17 }
  0x19   :  { %608 = vmatmul.mubr.msk.f32.gmra.mrb[6].mxu1 %vm57_vm0, %v24_v18 }
  0x1a   :  { %610 = vmatprep.mubr.msk.f32.mxu1 %vm57_vm0, %v25_v19  ;;  %583 = vmatmul.mubr.msk.bf16.gmra.mrb[8].mxu0 %vm57_vm0, %v38_v27 }
  0x1b   :  { %586 = vmatprep.mubr.msk.bf16.mxu0 %vm57_vm0, %v39_v28 }
  0x1d   :  { %611 = vmatmul.mubr.msk.f32.gmra.mrb[8].mxu1 %vm57_vm0, %v26_v20 }
  0x1e   :  { %613 = vmatprep.mubr.msk.f32.mxu1 %vm57_vm0, %v27_v23 }
  0x21   :  { %614 = vmatmul.mubr.msk.f32.gmra.mrb[10].mxu1 %vm57_vm0, %v28_v24 }
  0x22   :  { %616 = vmatprep.mubr.msk.f32.mxu1 %vm57_vm0, %v29_v25  ;;  %587 = vmatmul.mubr.msk.bf16.gmra.mrb[12].mxu0 %vm57_vm0, %v40_v31 }
  0x25   :  { %617 = vmatmul.mubr.msk.f32.gmra.mrb[12].mxu1 %vm57_vm0, %v30_v26 }
  0x26   :  { %619 = vmatprep.mubr.msk.f32.mxu1 %vm57_vm0, %v31_v29 }
  0x29   :  { %620 = vmatmul.mubr.msk.f32.gmra.mrb[14].mxu1 %vm57_vm0, %v32_v30 }
  0xdd   :  { %v576_v32 = vpop.f32.mrb[0].mxu0 }
  0xde   :  { %v526_v33 = vpack.c.bf16 %v576_v32, %v576_v32  ;;  %v116_v34 = vpop.f32.mrb[1].mxu0 }
  0xdf   :  { %v524_v36 = vpack.c.bf16 %v116_v34, %v116_v34  ;;  %v577_v37 = vpop.f32.mrb[2].mxu0 }
  0xe0   :  { %v600_v35 = vpop.f32.mrb[0].mxu1  ;;  %246 = vst.msk [vmem:[%s878_s3 + $0x8] sm:$0xf] %vm243_vm1, %v526_v33  ;;  %v527_v39 = vpack.c.bf16 %v577_v37, %v577_v37  ;;  %v119_v40 = vpop.f32.mrb[3].mxu0 }
  0xe1   :  { %459 = vst.msk [vmem:[%s879_s4 + $0x8] sm:$0xff] %vm457_vm2, %v600_v35  ;;  %v378_v38 = vpop.f32.mrb[1].mxu1  ;;  %v525_v41 = vpack.c.bf16 %v119_v40, %v119_v40 }
  0xe2   :  { %244 = vst.msk [vmem:[%s878_s3] sm:$0xf] %vm243_vm1, %v524_v36  ;;  %247 = vst.msk [vmem:[%s878_s3 + $0xc] sm:$0xf] %vm243_vm1, %v527_v39 }
  0xe3   :  { %458 = vst.msk [vmem:[%s879_s4] sm:$0xff] %vm457_vm2, %v378_v38 }
  0xe4   :  { %245 = vst.msk [vmem:[%s878_s3 + $0x4] sm:$0xf] %vm243_vm1, %v525_v41  ;;  %v603_v42 = vpop.f32.mrb[2].mxu1 }
  0xe5   :  { %461 = vst.msk [vmem:[%s879_s4 + $0x18] sm:$0xff] %vm457_vm2, %v603_v42  ;;  %v388_v43 = vpop.f32.mrb[3].mxu1  ;;  %v580_v44 = vpop.f32.mrb[4].mxu0 }
  0xe6   :  { %460 = vst.msk [vmem:[%s879_s4 + $0x10] sm:$0xff] %vm457_vm2, %v388_v43  ;;  %v530_v45 = vpack.c.bf16 %v580_v44, %v580_v44  ;;  %v132_v46 = vpop.f32.mrb[5].mxu0 }
  0xe7   :  { %v528_v48 = vpack.c.bf16 %v132_v46, %v132_v46  ;;  %v581_v49 = vpop.f32.mrb[6].mxu0 }
  0xe8   :  { %v606_v47 = vpop.f32.mrb[4].mxu1  ;;  %250 = vst.msk [vmem:[%s878_s3 + $0x18] sm:$0xf] %vm243_vm1, %v530_v45  ;;  %v531_v51 = vpack.c.bf16 %v581_v49, %v581_v49  ;;  %v135_v52 = vpop.f32.mrb[7].mxu0 }
  0xe9   :  { %463 = vst.msk [vmem:[%s879_s4 + $0x28] sm:$0xff] %vm457_vm2, %v606_v47  ;;  %v398_v50 = vpop.f32.mrb[5].mxu1  ;;  %v529_v53 = vpack.c.bf16 %v135_v52, %v135_v52 }
  0xea   :  { %248 = vst.msk [vmem:[%s878_s3 + $0x10] sm:$0xf] %vm243_vm1, %v528_v48  ;;  %251 = vst.msk [vmem:[%s878_s3 + $0x1c] sm:$0xf] %vm243_vm1, %v531_v51 }
  0xeb   :  { %462 = vst.msk [vmem:[%s879_s4 + $0x20] sm:$0xff] %vm457_vm2, %v398_v50 }
  0xec   :  { %249 = vst.msk [vmem:[%s878_s3 + $0x14] sm:$0xf] %vm243_vm1, %v529_v53  ;;  %v609_v54 = vpop.f32.mrb[6].mxu1 }
  0xed   :  { %465 = vst.msk [vmem:[%s879_s4 + $0x38] sm:$0xff] %vm457_vm2, %v609_v54  ;;  %v408_v55 = vpop.f32.mrb[7].mxu1  ;;  %v584_v56 = vpop.f32.mrb[8].mxu0 }
  0xee   :  { %464 = vst.msk [vmem:[%s879_s4 + $0x30] sm:$0xff] %vm457_vm2, %v408_v55  ;;  %v534_v57 = vpack.c.bf16 %v584_v56, %v584_v56  ;;  %v148_v58 = vpop.f32.mrb[9].mxu0 }
  0xef   :  { %v532_v60 = vpack.c.bf16 %v148_v58, %v148_v58  ;;  %v585_v61 = vpop.f32.mrb[10].mxu0 }
  0xf0   :  { %v612_v59 = vpop.f32.mrb[8].mxu1  ;;  %254 = vst.msk [vmem:[%s878_s3 + $0x28] sm:$0xf] %vm243_vm1, %v534_v57  ;;  %v535_v63 = vpack.c.bf16 %v585_v61, %v585_v61  ;;  %v151_v0 = vpop.f32.mrb[11].mxu0 }
  0xf1   :  { %467 = vst.msk [vmem:[%s879_s4 + $0x48] sm:$0xff] %vm457_vm2, %v612_v59  ;;  %v418_v62 = vpop.f32.mrb[9].mxu1  ;;  %v533_v1 = vpack.c.bf16 %v151_v0, %v151_v0 }
  0xf2   :  { %252 = vst.msk [vmem:[%s878_s3 + $0x20] sm:$0xf] %vm243_vm1, %v532_v60  ;;  %255 = vst.msk [vmem:[%s878_s3 + $0x2c] sm:$0xf] %vm243_vm1, %v535_v63 }
  0xf3   :  { %466 = vst.msk [vmem:[%s879_s4 + $0x40] sm:$0xff] %vm457_vm2, %v418_v62 }
  0xf4   :  { %253 = vst.msk [vmem:[%s878_s3 + $0x24] sm:$0xf] %vm243_vm1, %v533_v1  ;;  %v615_v2 = vpop.f32.mrb[10].mxu1 }
  0xf5   :  { %469 = vst.msk [vmem:[%s879_s4 + $0x58] sm:$0xff] %vm457_vm2, %v615_v2  ;;  %v428_v3 = vpop.f32.mrb[11].mxu1  ;;  %v588_v4 = vpop.f32.mrb[12].mxu0 }
  0xf6   :  { %468 = vst.msk [vmem:[%s879_s4 + $0x50] sm:$0xff] %vm457_vm2, %v428_v3  ;;  %v538_v5 = vpack.c.bf16 %v588_v4, %v588_v4  ;;  %v164_v6 = vpop.f32.mrb[13].mxu0 }
  0xf7   :  { %v536_v8 = vpack.c.bf16 %v164_v6, %v164_v6  ;;  %v589_v9 = vpop.f32.mrb[14].mxu0 }
  0xf8   :  { %v618_v7 = vpop.f32.mrb[12].mxu1  ;;  %258 = vst.msk [vmem:[%s878_s3 + $0x38] sm:$0xf] %vm243_vm1, %v538_v5  ;;  %v539_v11 = vpack.c.bf16 %v589_v9, %v589_v9  ;;  %v167_v12 = vpop.f32.mrb[15].mxu0 }
  0xf9   :  { %471 = vst.msk [vmem:[%s879_s4 + $0x68] sm:$0xff] %vm457_vm2, %v618_v7  ;;  %v438_v10 = vpop.f32.mrb[13].mxu1  ;;  %v537_v13 = vpack.c.bf16 %v167_v12, %v167_v12 }
  0xfa   :  { %256 = vst.msk [vmem:[%s878_s3 + $0x30] sm:$0xf] %vm243_vm1, %v536_v8  ;;  %259 = vst.msk [vmem:[%s878_s3 + $0x3c] sm:$0xf] %vm243_vm1, %v539_v11 }
  0xfb   :  { %470 = vst.msk [vmem:[%s879_s4 + $0x60] sm:$0xff] %vm457_vm2, %v438_v10 }
  0xfc   :  { %257 = vst.msk [vmem:[%s878_s3 + $0x34] sm:$0xf] %vm243_vm1, %v537_v13  ;;  %v621_v14 = vpop.f32.mrb[14].mxu1 }
  0xfd   :  { %473 = vst.msk [vmem:[%s879_s4 + $0x78] sm:$0xff] %vm457_vm2, %v621_v14  ;;  %v448_v15 = vpop.f32.mrb[15].mxu1 }
  0xfe   :  { %472 = vst.msk [vmem:[%s879_s4 + $0x70] sm:$0xff] %vm457_vm2, %v448_v15 }

// kernel: gat_hetersum_apply.8
= control target key start
LH: loop header
LB: loop body
LE: loop exit
PB: predicated region body
PF: predicated region fallthrough
CT: control target
= control target key end

     0   :  { %vm205_vm3 = vcmask 261120   ;;  %s1628_s2 = inlined_call_operand.vmem [shape: bf16[32,64], index: 2, kind: input, shape index: {}]   ;;  %s1629_s0 = inlined_call_operand.vmem [shape: f32[128,32], index: 0, kind: input, shape index: {}]   ;;  %s1630_s1 = inlined_call_operand.vmem [shape: f32[128,32], index: 1, kind: input, shape index: {}]   ;;  %s1631_s4 = inlined_call_operand.vmem [shape: bf16[64,32], index: 4, kind: input, shape index: {}]   ;;  %s1632_s3 = inlined_call_operand.vmem [shape: f32[1,64], index: 3, kind: input, shape index: {}]   ;;  %s1633_s5 = inlined_call_operand.vmem [shape: f32[1,32], index: 5, kind: input, shape index: {}]   ;;  %s1634_s6 = inlined_call_operand.vmem [shape: f32[1,32], index: 6, kind: input, shape index: {}]   ;;  %s1635_s7 = inlined_call_operand.vmem [shape: f32[1,32], index: 7, kind: input, shape index: {}]   ;;  %s1636_s8 = inlined_call_operand.vmem [shape: f32[128,32], index: 8, kind: output, shape index: {}]  }
   0x1   :  { %v911_v0 = vld [vmem:[%s1628_s2] sm:$0xff]   ;;  %v912_v1 = vld [vmem:[%s1628_s2 + $0x8] sm:$0xff]   ;;  %v1047_v6 = vld [vmem:[%s1629_s0 + $0x10] sm:$0xff] }
   0x2   :  { %867 = vmatprep.subr.bf16.mxu0 %v911_v0  ;;  %v1035_v2 = vld [vmem:[%s1629_s0] sm:$0xff]  ;;  %v1040_v3 = vld [vmem:[%s1629_s0 + $0x8] sm:$0xff]  ;;  %v1052_v7 = vld [vmem:[%s1629_s0 + $0x18] sm:$0xff]  ;;  %v64_v8 = vmin.f32 %v1047_v6, 0.0  ;;  %vm48_vm2 = vcmp.gt.f32.partialorder %v1047_v6, 0.0 }
   0x3   :  { %868 = vmatpush3.bf16.msra.mxu0 %v911_v0  ;;  %v62_v4 = vmin.f32 %v1035_v2, 0.0  ;;  %v63_v5 = vmin.f32 %v1040_v3, 0.0  ;;  %v65_v11 = vmin.f32 %v1052_v7, 0.0  ;;  %v1059_v13 = vld [vmem:[%s1629_s0 + $0x20] sm:$0xff]  ;;  %v1064_v14 = vld [vmem:[%s1629_s0 + $0x28] sm:$0xff]  ;;  %v1069_v16 = vld [vmem:[%s1629_s0 + $0x30] sm:$0xff] }
   0x4   :  { %869 = vmatprep.subr.bf16.mxu0 %v912_v1  ;;  %v82_v12 = vmul.f32 1.442695, %v64_v8  ;;  %v66_v17 = vmin.f32 %v1059_v13, 0.0  ;;  %v67_v18 = vmin.f32 %v1064_v14, 0.0  ;;  %v1076_v19 = vld [vmem:[%s1629_s0 + $0x38] sm:$0xff]  ;;  %v68_v20 = vmin.f32 %v1069_v16, 0.0 }
   0x5   :  { %v78_v9 = vmul.f32 1.442695, %v62_v4  ;;  %v80_v10 = vmul.f32 1.442695, %v63_v5  ;;  %v84_v15 = vmul.f32 1.442695, %v65_v11 }
   0x6   :  { %v69_v21 = vmin.f32 %v1076_v19, 0.0  ;;  %v1083_v22 = vld [vmem:[%s1629_s0 + $0x40] sm:$0xff]  ;;  %v1088_v23 = vld [vmem:[%s1629_s0 + $0x48] sm:$0xff]  ;;  %v86_v24 = vmul.f32 1.442695, %v66_v17  ;;  %vm46_vm0 = vcmp.gt.f32.partialorder %v1035_v2, 0.0 }
   0x7   :  { %870 = vmatpush3.bf16.msra.mxu0 %v912_v1  ;;  %917 = vpow2.f32 %v78_v9  ;;  %v88_v25 = vmul.f32 1.442695, %v67_v18  ;;  %v90_v26 = vmul.f32 1.442695, %v68_v20  ;;  %v70_v28 = vmin.f32 %v1083_v22, 0.0  ;;  %v1096_v30 = vld [vmem:[%s1629_s0 + $0x50] sm:$0xff] }
   0x8   :  { %919 = vpow2.f32 %v80_v10  ;;  %v92_v27 = vmul.f32 1.442695, %v69_v21  ;;  %v71_v29 = vmin.f32 %v1088_v23, 0.0  ;;  %v1101_v31 = vld [vmem:[%s1629_s0 + $0x58] sm:$0xff]  ;;  %vm47_vm1 = vcmp.gt.f32.partialorder %v1040_v3, 0.0  ;;  %v1108_v33 = vld [vmem:[%s1629_s0 + $0x60] sm:$0xff] }
   0x9   :  { %921 = vpow2.f32 %v82_v12  ;;  %v94_v32 = vmul.f32 1.442695, %v70_v28  ;;  %v72_v35 = vmin.f32 %v1096_v30, 0.0  ;;  %v73_v36 = vmin.f32 %v1101_v31, 0.0  ;;  %v1115_v37 = vld [vmem:[%s1629_s0 + $0x68] sm:$0xff]  ;;  %v1123_v39 = vld [vmem:[%s1629_s0 + $0x70] sm:$0xff] }
   0xa   :  { %923 = vpow2.f32 %v84_v15  ;;  %v96_v34 = vmul.f32 1.442695, %v71_v29  ;;  %vm49_vm4 = vcmp.gt.f32.partialorder %v1052_v7, 0.0  ;;  %vm50_vm5 = vcmp.gt.f32.partialorder %v1059_v13, 0.0  ;;  %v142_v40 = vld [vmem:[%s1630_s1] sm:$0xff]  ;;  %v1132_v44 = vld [vmem:[%s1629_s0 + $0x78] sm:$0xff] }
   0xb   :  { %925 = vpow2.f32 %v86_v24  ;;  %v74_v38 = vmin.f32 %v1108_v33, 0.0  ;;  %v98_v41 = vmul.f32 1.442695, %v72_v35  ;;  %v100_v42 = vmul.f32 1.442695, %v73_v36  ;;  %v143_v46 = vld [vmem:[%s1630_s1 + $0x8] sm:$0xff] }
   0xc   :  { %927 = vpow2.f32 %v88_v25  ;;  %v75_v43 = vmin.f32 %v1115_v37, 0.0  ;;  %vm51_vm6 = vcmp.gt.f32.partialorder %v1064_v14, 0.0  ;;  %vm52_vm7 = vcmp.gt.f32.partialorder %v1069_v16, 0.0  ;;  %v913_v48 = vld [vmem:[%s1631_s4] sm:$0xff]   ;;  %v144_v51 = vld [vmem:[%s1630_s1 + $0x10] sm:$0xff]  ;;  %v914_v61 = vld [vmem:[%s1631_s4 + $0x8] sm:$0xff]  }
   0xd   :  { %929 = vpow2.f32 %v90_v26  ;;  %v102_v47 = vmul.f32 1.442695, %v74_v38  ;;  %v76_v53 = vmin.f32 %v1123_v39, 0.0  ;;  %v77_v56 = vmin.f32 %v1132_v44, 0.0  ;;  %887 = vmatprep.subr.bf16.mxu1 %v913_v48  ;;  %v145_v1 = vld [vmem:[%s1630_s1 + $0x18] sm:$0xff]  ;;  %v146_v12 = vld [vmem:[%s1630_s1 + $0x20] sm:$0xff] }
   0xe   :  { %931 = vpow2.f32 %v92_v27  ;;  %v104_v52 = vmul.f32 1.442695, %v75_v43  ;;  %888 = vmatpush3.bf16.msra.mxu1 %v913_v48  ;;  %v147_v20 = vld [vmem:[%s1630_s1 + $0x28] sm:$0xff]  ;;  %vm53_vm8 = vcmp.gt.f32.partialorder %v1076_v19, 0.0  ;;  %v148_v25 = vld [vmem:[%s1630_s1 + $0x30] sm:$0xff]  ;;  %vm54_vm9 = vcmp.gt.f32.partialorder %v1083_v22, 0.0 }
   0xf   :  { %933 = vpow2.f32 %v94_v32  ;;  %v106_v60 = vmul.f32 1.442695, %v76_v53  ;;  %v108_v8 = vmul.f32 1.442695, %v77_v56  ;;  %889 = vmatprep.subr.bf16.mxu1 %v914_v61  ;;  %v149_v32 = vld [vmem:[%s1630_s1 + $0x38] sm:$0xff]  ;;  %vm55_vm10 = vcmp.gt.f32.partialorder %v1088_v23, 0.0 }
  0x10   :  { %935 = vpow2.f32 %v96_v34  ;;  %vm56_vm11 = vcmp.gt.f32.partialorder %v1096_v30, 0.0  ;;  %vm57_vm12 = vcmp.gt.f32.partialorder %v1101_v31, 0.0  ;;  %vm58_vm13 = vcmp.gt.f32.partialorder %v1108_v33, 0.0 }
  0x11   :  { %v918_v45 = vpop.eup %917  ;;  %937 = vpow2.f32 %v98_v41  ;;  %vm59_vm14 = vcmp.gt.f32.partialorder %v1115_v37, 0.0  ;;  %vm60_vm15 = vcmp.gt.f32.partialorder %v1123_v39, 0.0 }
  0x12   :  { %v920_v49 = vpop.eup %919  ;;  %v803_v50 = vadd.f32 -1.0, %v918_v45  ;;  %939 = vpow2.f32 %v100_v42  ;;  %890 = vmatpush3.bf16.msra.mxu1 %v914_v61  ;;  %v153_v61 = vld [vmem:[%s1630_s1 + $0x58] sm:$0xff] }
  0x13   :  { %v922_v54 = vpop.eup %921  ;;  %v804_v55 = vadd.f32 -1.0, %v920_v49  ;;  %941 = vpow2.f32 %v102_v47 }
  0x14   :  { %v924_v57 = vpop.eup %923  ;;  %v126_v58 = vsel %vm46_vm0, %v1035_v2, %v803_v50  ;;  %v805_v59 = vadd.f32 -1.0, %v922_v54  ;;  %943 = vpow2.f32 %v104_v52  ;;  %vm61_vm0 = vcmp.gt.f32.partialorder %v1132_v44, 0.0 }
  0x15   :  { %v127_v62 = vsel %vm47_vm1, %v1040_v3, %v804_v55  ;;  %v1156_v63 = vadd.f32 %v142_v40, %v126_v58  ;;  %v806_v0 = vadd.f32 -1.0, %v924_v57  ;;  %v926_v2 = vpop.eup %925  ;;  %945 = vpow2.f32 %v106_v60  ;;  %v152_v60 = vld [vmem:[%s1630_s1 + $0x50] sm:$0xff] }
  0x16   :  { %v1161_v4 = vadd.f32 %v143_v46, %v127_v62  ;;  %v128_v5 = vsel %vm48_vm2, %v1047_v6, %v805_v59  ;;  %v928_v9 = vpop.eup %927  ;;  %v807_v11 = vadd.f32 -1.0, %v926_v2  ;;  %947 = vpow2.f32 %v108_v8  ;;  %v154_v2 = vld [vmem:[%s1630_s1 + $0x60] sm:$0xff] }
  0x17   :  { %v129_v3 = vsel %vm49_vm4, %v1052_v7, %v806_v0  ;;  %v1169_v10 = vadd.f32 %v144_v51, %v128_v5  ;;  %v930_v15 = vpop.eup %929  ;;  %v808_v18 = vadd.f32 -1.0, %v928_v9  ;;  %vm390_vm1 = vcmask 523264  }
  0x18   :  { %v174_v17 = vpack.c.bf16 %v1161_v4, %v1156_v63  ;;  %v1176_v6 = vadd.f32 %v145_v1, %v129_v3  ;;  %v932_v7 = vpop.eup %931  ;;  %v130_v21 = vsel %vm50_vm5, %v1059_v13, %v807_v11  ;;  %v809_v24 = vadd.f32 -1.0, %v930_v15 }
  0x19   :  { %v934_v26 = vpop.eup %933  ;;  %v131_v28 = vsel %vm51_vm6, %v1064_v14, %v808_v18  ;;  %v1195_v13 = vadd.f32 %v146_v12, %v130_v21  ;;  %v810_v29 = vadd.f32 -1.0, %v932_v7  ;;  %v150_v14 = vld [vmem:[%s1630_s1 + $0x40] sm:$0xff]  ;;  %v157_v18 = vld [vmem:[%s1630_s1 + $0x78] sm:$0xff] }
  0x1a   :  { %871 = vmatprep.mubr.msk.bf16.mxu0 %vm205_vm3, %v174_v17  ;;  %v175_v27 = vpack.c.bf16 %v1176_v6, %v1169_v10  ;;  %v936_v34 = vpop.eup %935  ;;  %v1200_v35 = vadd.f32 %v147_v20, %v131_v28  ;;  %v132_v36 = vsel %vm52_vm7, %v1069_v16, %v809_v24  ;;  %v811_v38 = vadd.f32 -1.0, %v934_v26  ;;  %v151_v16 = vld [vmem:[%s1630_s1 + $0x48] sm:$0xff]  ;;  %v156_v17 = vld [vmem:[%s1630_s1 + $0x70] sm:$0xff]  ;;  %v916_v21 = vld [vmem:[%s1631_s4 + $0x18] sm:$0xff]  }
  0x1b   :  { %v938_v40 = vpop.eup %937  ;;  %v133_v41 = vsel %vm53_vm8, %v1076_v19, %v810_v29  ;;  %v1213_v42 = vadd.f32 %v148_v25, %v132_v36  ;;  %v812_v43 = vadd.f32 -1.0, %v936_v34  ;;  %v819_v24 = vld [vmem:[%s1632_s3] ss:$0 sm:$0xff] }
  0x1c   :  { %872 = vmatmul.mubr.msk.bf16.vlgmr.msra.gmra.mrb[0].mxu0 %vm205_vm3, %v175_v27  ;;  %v940_v45 = vpop.eup %939  ;;  %v176_v46 = vpack.c.bf16 %v1200_v35, %v1195_v13  ;;  %v1221_v47 = vadd.f32 %v149_v32, %v133_v41  ;;  %v134_v48 = vsel %vm54_vm9, %v1083_v22, %v811_v38  ;;  %v813_v19 = vadd.f32 -1.0, %v938_v40 }
  0x1d   :  { %v942_v49 = vpop.eup %941  ;;  %v135_v50 = vsel %vm55_vm10, %v1088_v23, %v812_v43  ;;  %v1229_v51 = vadd.f32 %v150_v14, %v134_v48  ;;  %v814_v52 = vadd.f32 -1.0, %v940_v45 }
  0x1e   :  { %v944_v53 = vpop.eup %943  ;;  %875 = vmatprep.mubr.msk.bf16.mxu0 %vm205_vm3, %v176_v46  ;;  %v1233_v54 = vadd.f32 %v151_v16, %v135_v50  ;;  %v815_v22 = vadd.f32 -1.0, %v942_v49  ;;  %v177_v55 = vpack.c.bf16 %v1221_v47, %v1213_v42  ;;  %v136_v58 = vsel %vm56_vm11, %v1096_v30, %v813_v19  ;;  %v155_v30 = vld [vmem:[%s1630_s1 + $0x68] sm:$0xff] }
  0x1f   :  { %v816_v56 = vadd.f32 -1.0, %v944_v53  ;;  %v946_v23 = vpop.eup %945  ;;  %v137_v59 = vsel %vm57_vm12, %v1101_v31, %v814_v52  ;;  %v1260_v31 = vadd.f32 %v152_v60, %v136_v58 }
  0x20   :  { %v178_v57 = vpack.c.bf16 %v1233_v54, %v1229_v51  ;;  %v948_v62 = vpop.eup %947  ;;  %v138_v0 = vsel %vm58_vm13, %v1108_v33, %v815_v22  ;;  %v1262_v5 = vadd.f32 %v153_v61, %v137_v59 }
  0x21   :  { %v139_v1 = vsel %vm59_vm14, %v1115_v37, %v816_v56  ;;  %v1265_v8 = vadd.f32 %v154_v2, %v138_v0  ;;  %v817_v37 = vadd.f32 -1.0, %v946_v23  ;;  %v818_v9 = vadd.f32 -1.0, %v948_v62 }
  0x22   :  { %v1267_v33 = vadd.f32 %v155_v30, %v139_v1  ;;  %v179_v3 = vpack.c.bf16 %v1262_v5, %v1260_v31 }
  0x23   :  { %v140_v12 = vsel %vm60_vm15, %v1123_v39, %v817_v37  ;;  %v141_v15 = vsel %vm61_vm0, %v1132_v44, %v818_v9  ;;  %v915_v44 = vld [vmem:[%s1631_s4 + $0x10] sm:$0xff]  }
  0x24   :  { %876 = vmatmul.mubr.msk.bf16.gmra.mrb[4].mxu0 %vm205_vm3, %v177_v55  ;;  %v180_v11 = vpack.c.bf16 %v1267_v33, %v1265_v8  ;;  %v1284_v20 = vadd.f32 %v156_v17, %v140_v12  ;;  %v1286_v7 = vadd.f32 %v157_v18, %v141_v15  ;;  %891 = vmatprep.subr.bf16.mxu1 %v915_v44 }
  0x25   :  { %879 = vmatprep.mubr.msk.bf16.mxu0 %vm205_vm3, %v178_v57  ;;  %892 = vmatpush3.bf16.msra.mxu1 %v915_v44 }
  0x26   :  { %v181_v39 = vpack.c.bf16 %v1286_v7, %v1284_v20  ;;  %893 = vmatprep.subr.bf16.mxu1 %v916_v21 }
  0x29   :  { %894 = vmatpush3.bf16.msra.mxu1 %v916_v21 }
  0x2c   :  { %880 = vmatmul.mubr.msk.bf16.gmra.mrb[8].mxu0 %vm205_vm3, %v179_v3 }
  0x2d   :  { %883 = vmatprep.mubr.msk.bf16.mxu0 %vm205_vm3, %v180_v11 }
  0x34   :  { %884 = vmatmul.mubr.msk.bf16.gmra.mrb[12].mxu0 %vm205_vm3, %v181_v39 }
  0xef   :  { %v873_v25 = vpop.f32.mrb[0].mxu0 }
  0xf0   :  { %v273_v26 = vadd.f32 %v873_v25, %v819_v24  ;;  %v264_v27 = vpop.f32.mrb[1].mxu0 }
  0xf1   :  { %v265_v28 = vadd.f32 %v819_v24, %v264_v27  ;;  %v874_v29 = vpop.f32.mrb[2].mxu0 }
  0xf2   :  { %v276_v32 = vadd.f32 %v874_v29, %v819_v24  ;;  %v267_v34 = vpop.f32.mrb[3].mxu0  ;;  %v329_v38 = vmax.f32 %v273_v26, 0.0 }
  0xf3   :  { %v268_v36 = vadd.f32 %v819_v24, %v267_v34  ;;  %v327_v40 = vmax.f32 %v265_v28, 0.0 }
  0xf4   :  { %v330_v14 = vmax.f32 %v276_v32, 0.0 }
  0xf5   :  { %v328_v41 = vmax.f32 %v268_v36, 0.0 }
  0xf6   :  { %v344_v43 = vpack.c.bf16 %v330_v14, %v329_v38  ;;  %v1312_v14 = vld [vmem:[%s1633_s5] ss:$0 sm:$0xff] }
  0xf7   :  { %v877_v16 = vpop.f32.mrb[4].mxu0  ;;  %v343_v45 = vpack.c.bf16 %v328_v41, %v327_v40 }
  0xf8   :  { %v289_v46 = vadd.f32 %v877_v16, %v819_v24  ;;  %v280_v48 = vpop.f32.mrb[5].mxu0 }
  0xf9   :  { %v281_v19 = vadd.f32 %v819_v24, %v280_v48  ;;  %v878_v49 = vpop.f32.mrb[6].mxu0  ;;  %895 = vmatprep.mubr.msk.bf16.mxu1 %vm390_vm1, %v343_v45 }
  0xfa   :  { %v333_v50 = vmax.f32 %v289_v46, 0.0  ;;  %v292_v52 = vadd.f32 %v878_v49, %v819_v24  ;;  %v283_v53 = vpop.f32.mrb[7].mxu0  ;;  %896 = vmatmul.mubr.msk.bf16.vlgmr.msra.gmra.mrb[0].mxu1 %vm390_vm1, %v344_v43 }
  0xfb   :  { %v284_v22 = vadd.f32 %v819_v24, %v283_v53  ;;  %v331_v56 = vmax.f32 %v281_v19, 0.0 }
  0xfc   :  { %v334_v55 = vmax.f32 %v292_v52, 0.0 }
  0xfd   :  { %v332_v23 = vmax.f32 %v284_v22, 0.0 }
  0xfe   :  { %v346_v57 = vpack.c.bf16 %v334_v55, %v333_v50 }
  0xff   :  { %v345_v58 = vpack.c.bf16 %v332_v23, %v331_v56  ;;  %v881_v59 = vpop.f32.mrb[8].mxu0 }
 0x100   :  { %v305_v60 = vadd.f32 %v881_v59, %v819_v24  ;;  %v296_v61 = vpop.f32.mrb[9].mxu0 }
 0x101   :  { %v297_v62 = vadd.f32 %v819_v24, %v296_v61  ;;  %v882_v0 = vpop.f32.mrb[10].mxu0  ;;  %899 = vmatprep.mubr.msk.bf16.mxu1 %vm390_vm1, %v345_v58 }
 0x102   :  { %v337_v1 = vmax.f32 %v305_v60, 0.0  ;;  %v308_v2 = vadd.f32 %v882_v0, %v819_v24  ;;  %v299_v30 = vpop.f32.mrb[11].mxu0  ;;  %900 = vmatmul.mubr.msk.bf16.gmra.mrb[4].mxu1 %vm390_vm1, %v346_v57 }
 0x103   :  { %v300_v37 = vadd.f32 %v819_v24, %v299_v30  ;;  %v335_v3 = vmax.f32 %v297_v62, 0.0 }
 0x104   :  { %v338_v9 = vmax.f32 %v308_v2, 0.0 }
 0x105   :  { %v336_v11 = vmax.f32 %v300_v37, 0.0 }
 0x106   :  { %v348_v12 = vpack.c.bf16 %v338_v9, %v337_v1 }
 0x107   :  { %v347_v15 = vpack.c.bf16 %v336_v11, %v335_v3  ;;  %v885_v17 = vpop.f32.mrb[12].mxu0 }
 0x108   :  { %v321_v18 = vadd.f32 %v885_v17, %v819_v24  ;;  %v312_v39 = vpop.f32.mrb[13].mxu0 }
 0x109   :  { %v313_v44 = vadd.f32 %v819_v24, %v312_v39  ;;  %v886_v21 = vpop.f32.mrb[14].mxu0  ;;  %903 = vmatprep.mubr.msk.bf16.mxu1 %vm390_vm1, %v347_v15 }
 0x10a   :  { %v341_v25 = vmax.f32 %v321_v18, 0.0  ;;  %v324_v26 = vadd.f32 %v886_v21, %v819_v24  ;;  %v315_v27 = vpop.f32.mrb[15].mxu0  ;;  %904 = vmatmul.mubr.msk.bf16.gmra.mrb[8].mxu1 %vm390_vm1, %v348_v12 }
 0x10b   :  { %v316_v28 = vadd.f32 %v819_v24, %v315_v27  ;;  %v339_v32 = vmax.f32 %v313_v44, 0.0 }
 0x10c   :  { %v342_v29 = vmax.f32 %v324_v26, 0.0 }
 0x10d   :  { %v340_v34 = vmax.f32 %v316_v28, 0.0 }
 0x10e   :  { %v350_v36 = vpack.c.bf16 %v342_v29, %v341_v25 }
 0x10f   :  { %v349_v38 = vpack.c.bf16 %v340_v34, %v339_v32 }
 0x111   :  { %907 = vmatprep.mubr.msk.bf16.mxu1 %vm390_vm1, %v349_v38 }
 0x112   :  { %908 = vmatmul.mubr.msk.bf16.gmra.mrb[12].mxu1 %vm390_vm1, %v350_v36 }
 0x1cd   :  { %v897_v40 = vpop.f32.mrb[0].mxu1 }
 0x1ce   :  { %v458_v41 = vadd.f32 %v897_v40, %v1312_v14  ;;  %v449_v43 = vpop.f32.mrb[1].mxu1 }
 0x1cf   :  { %v450_v24 = vadd.f32 %v1312_v14, %v449_v43  ;;  %v898_v16 = vpop.f32.mrb[2].mxu1 }
 0x1d0   :  { %v461_v45 = vadd.f32 %v898_v16, %v1312_v14  ;;  %v452_v46 = vpop.f32.mrb[3].mxu1  ;;  %v1318_v48 = vadd.f32 %v458_v41, %v1169_v10 }
 0x1d1   :  { %v453_v19 = vadd.f32 %v1312_v14, %v452_v46  ;;  %v1322_v49 = vadd.f32 %v450_v24, %v1156_v63 }
 0x1d2   :  { %v534_v50 = vsel %vm205_vm3, %v1318_v48, 0.0  ;;  %v1327_v52 = vadd.f32 %v461_v45, %v1176_v6 }
 0x1d3   :  { %535 = vadd.xlane.f32.xlu1 %v534_v50  ;;  %v528_v53 = vsel %vm205_vm3, %v1322_v49, 0.0  ;;  %v1332_v22 = vadd.f32 %v453_v19, %v1161_v4 }
 0x1d4   :  { %529 = vadd.xlane.f32.xlu0 %v528_v53  ;;  %v537_v63 = vsel %vm205_vm3, %v1327_v52, 0.0 }
 0x1d5   :  { %v901_v10 = vpop.f32.mrb[4].mxu1  ;;  %v531_v57 = vsel %vm205_vm3, %v1332_v22, 0.0 }
 0x1d6   :  { %v474_v55 = vadd.f32 %v901_v10, %v1312_v14  ;;  %v465_v56 = vpop.f32.mrb[5].mxu1 }
 0x1d7   :  { %v466_v23 = vadd.f32 %v1312_v14, %v465_v56  ;;  %538 = vadd.xlane.f32.xlu1 %v537_v63  ;;  %v902_v6 = vpop.f32.mrb[6].mxu1 }
 0x1d8   :  { %v477_v58 = vadd.f32 %v902_v6, %v1312_v14  ;;  %v468_v59 = vpop.f32.mrb[7].mxu1  ;;  %532 = vadd.xlane.f32.xlu0 %v531_v57  ;;  %v1342_v4 = vadd.f32 %v474_v55, %v1213_v42 }
 0x1d9   :  { %v469_v60 = vadd.f32 %v1312_v14, %v468_v59  ;;  %v1351_v0 = vadd.f32 %v466_v23, %v1195_v13 }
 0x1da   :  { %v546_v61 = vsel %vm205_vm3, %v1342_v4, 0.0  ;;  %v1348_v62 = vadd.f32 %v477_v58, %v1221_v47 }
 0x1db   :  { %v1356_v2 = vadd.f32 %v469_v60, %v1200_v35  ;;  %v540_v47 = vsel %vm205_vm3, %v1351_v0, 0.0 }
 0x1dc   :  { %547 = vadd.xlane.f32.xlu0 %v546_v61  ;;  %v549_v1 = vsel %vm205_vm3, %v1348_v62, 0.0 }
 0x1dd   :  { %550 = vadd.xlane.f32.xlu1 %v549_v1  ;;  %v905_v42 = vpop.f32.mrb[8].mxu1  ;;  %v543_v12 = vsel %vm205_vm3, %v1356_v2, 0.0 }
 0x1de   :  { %v490_v30 = vadd.f32 %v905_v42, %v1312_v14  ;;  %v481_v37 = vpop.f32.mrb[9].mxu1 }
 0x1df   :  { %v482_v9 = vadd.f32 %v1312_v14, %v481_v37  ;;  %v906_v3 = vpop.f32.mrb[10].mxu1 }
 0x1e0   :  { %v493_v13 = vadd.f32 %v906_v3, %v1312_v14  ;;  %v484_v11 = vpop.f32.mrb[11].mxu1  ;;  %541 = vadd.xlane.f32.xlu0 %v540_v47  ;;  %v1366_v35 = vadd.f32 %v490_v30, %v1260_v31 }
 0x1e1   :  { %v485_v15 = vadd.f32 %v1312_v14, %v484_v11  ;;  %544 = vadd.xlane.f32.xlu1 %v543_v12  ;;  %v1375_v39 = vadd.f32 %v482_v9, %v1229_v51 }
 0x1e2   :  { %v558_v17 = vsel %vm205_vm3, %v1366_v35, 0.0  ;;  %v1372_v18 = vadd.f32 %v493_v13, %v1262_v5 }
 0x1e3   :  { %v1380_v21 = vadd.f32 %v485_v15, %v1233_v54  ;;  %v552_v5 = vsel %vm205_vm3, %v1375_v39, 0.0 }
 0x1e4   :  { %559 = vadd.xlane.f32.xlu0 %v558_v17  ;;  %v561_v44 = vsel %vm205_vm3, %v1372_v18, 0.0 }
 0x1e5   :  { %v909_v31 = vpop.f32.mrb[12].mxu1  ;;  %562 = vadd.xlane.f32.xlu1 %v561_v44  ;;  %v555_v29 = vsel %vm205_vm3, %v1380_v21, 0.0 }
 0x1e6   :  { %v497_v25 = vpop.f32.mrb[13].mxu1  ;;  %v506_v26 = vadd.f32 %v909_v31, %v1312_v14 }
 0x1e7   :  { %v498_v27 = vadd.f32 %v1312_v14, %v497_v25  ;;  %v910_v28 = vpop.f32.mrb[14].mxu1 }
 0x1e8   :  { %v500_v51 = vpop.f32.mrb[15].mxu1  ;;  %553 = vadd.xlane.f32.xlu0 %v552_v5  ;;  %v509_v32 = vadd.f32 %v910_v28, %v1312_v14  ;;  %v1399_v40 = vadd.f32 %v506_v26, %v1284_v20 }
 0x1e9   :  { %v501_v54 = vadd.f32 %v1312_v14, %v500_v51  ;;  %556 = vadd.xlane.f32.xlu1 %v555_v29  ;;  %v1391_v34 = vadd.f32 %v498_v27, %v1265_v8 }
 0x1ea   :  { %v1404_v43 = vadd.f32 %v509_v32, %v1286_v7  ;;  %v570_v8 = vsel %vm205_vm3, %v1399_v40, 0.0 }
 0x1eb   :  { %v564_v36 = vsel %vm205_vm3, %v1391_v34, 0.0  ;;  %v1396_v38 = vadd.f32 %v501_v54, %v1267_v33 }
 0x1ec   :  { %565 = vadd.xlane.f32.xlu0 %v564_v36  ;;  %v573_v14 = vsel %vm205_vm3, %v1404_v43, 0.0 }
 0x1ed   :  { %v567_v41 = vsel %vm205_vm3, %v1396_v38, 0.0 }
 0x1ee   :  { %568 = vadd.xlane.f32.xlu1 %v567_v41 }
 0x1f0   :  { %571 = vadd.xlane.f32.xlu0 %v570_v8 }
 0x1f2   :  { %574 = vadd.xlane.f32.xlu1 %v573_v14 }
 0x260   :  { %v536_v33 = vpop.xlane.xlu1 %535 }
 0x261   :  { %v579_v24 = vmul.f32 0.03125, %v536_v33  ;;  %v530_v20 = vpop.xlane.xlu0 %529 }
 0x262   :  { %v577_v16 = vmul.f32 0.03125, %v530_v20 }
 0x263   :  { %v1411_v45 = vsub.f32 %v1318_v48, %v579_v24 }
 0x264   :  { %v1414_v46 = vsub.f32 %v1322_v49, %v577_v16  ;;  %v539_v7 = vpop.xlane.xlu1 %538 }
 0x265   :  { %v580_v19 = vmul.f32 0.03125, %v539_v7  ;;  %v533_v50 = vpop.xlane.xlu0 %532  ;;  %v611_v53 = vmul.f32 %v1411_v45, %v1411_v45 }
 0x266   :  { %v578_v10 = vmul.f32 0.03125, %v533_v50  ;;  %v609_v63 = vmul.f32 %v1414_v46, %v1414_v46 }
 0x267   :  { %v1419_v55 = vsub.f32 %v1327_v52, %v580_v19  ;;  %v631_v56 = vsel %vm205_vm3, %v611_v53, 0.0 }
 0x268   :  { %v1425_v48 = vsub.f32 %v1332_v22, %v578_v10  ;;  %632 = vadd.xlane.f32.xlu0 %v631_v56  ;;  %v625_v52 = vsel %vm205_vm3, %v609_v63, 0.0 }
 0x269   :  { %v548_v49 = vpop.xlane.xlu0 %547  ;;  %v612_v23 = vmul.f32 %v1419_v55, %v1419_v55 }
 0x26a   :  { %v583_v6 = vmul.f32 0.03125, %v548_v49  ;;  %v551_v57 = vpop.xlane.xlu1 %550  ;;  %v610_v60 = vmul.f32 %v1425_v48, %v1425_v48 }
 0x26b   :  { %v584_v58 = vmul.f32 0.03125, %v551_v57  ;;  %v634_v59 = vsel %vm205_vm3, %v612_v23, 0.0 }
 0x26c   :  { %v1434_v61 = vsub.f32 %v1342_v4, %v583_v6  ;;  %635 = vadd.xlane.f32.xlu1 %v634_v59  ;;  %626 = vadd.xlane.f32.xlu0 %v625_v52  ;;  %v628_v3 = vsel %vm205_vm3, %v610_v60, 0.0 }
 0x26d   :  { %v1437_v22 = vsub.f32 %v1348_v62, %v584_v58  ;;  %v542_v1 = vpop.xlane.xlu0 %541 }
 0x26e   :  { %v581_v42 = vmul.f32 0.03125, %v542_v1  ;;  %v545_v30 = vpop.xlane.xlu1 %544  ;;  %v615_v37 = vmul.f32 %v1434_v61, %v1434_v61 }
 0x26f   :  { %v582_v9 = vmul.f32 0.03125, %v545_v30  ;;  %v616_v47 = vmul.f32 %v1437_v22, %v1437_v22 }
 0x270   :  { %v1445_v4 = vsub.f32 %v1351_v0, %v581_v42  ;;  %629 = vadd.xlane.f32.xlu1 %v628_v3  ;;  %v643_v13 = vsel %vm205_vm3, %v615_v37, 0.0 }
 0x271   :  { %v1449_v62 = vsub.f32 %v1356_v2, %v582_v9  ;;  %644 = vadd.xlane.f32.xlu0 %v643_v13  ;;  %v560_v11 = vpop.xlane.xlu0 %559  ;;  %v646_v31 = vsel %vm205_vm3, %v616_v47, 0.0 }
 0x272   :  { %v587_v12 = vmul.f32 0.03125, %v560_v11  ;;  %v563_v15 = vpop.xlane.xlu1 %562  ;;  %v613_v17 = vmul.f32 %v1445_v4, %v1445_v4 }
 0x273   :  { %v588_v44 = vmul.f32 0.03125, %v563_v15  ;;  %v614_v0 = vmul.f32 %v1449_v62, %v1449_v62 }
 0x274   :  { %v1457_v25 = vsub.f32 %v1366_v35, %v587_v12  ;;  %647 = vadd.xlane.f32.xlu1 %v646_v31  ;;  %v637_v2 = vsel %vm205_vm3, %v613_v17, 0.0 }
 0x275   :  { %v1461_v26 = vsub.f32 %v1372_v18, %v588_v44  ;;  %638 = vadd.xlane.f32.xlu0 %v637_v2  ;;  %v554_v27 = vpop.xlane.xlu0 %553  ;;  %v640_v32 = vsel %vm205_vm3, %v614_v0, 0.0 }
 0x276   :  { %v585_v28 = vmul.f32 0.03125, %v554_v27  ;;  %v557_v5 = vpop.xlane.xlu1 %556  ;;  %v619_v51 = vmul.f32 %v1457_v25, %v1457_v25 }
 0x277   :  { %v586_v29 = vmul.f32 0.03125, %v557_v5  ;;  %v620_v35 = vmul.f32 %v1461_v26, %v1461_v26 }
 0x278   :  { %v1469_v54 = vsub.f32 %v1375_v39, %v585_v28  ;;  %641 = vadd.xlane.f32.xlu1 %v640_v32  ;;  %v655_v18 = vsel %vm205_vm3, %v619_v51, 0.0  ;;  %v1509_v28 = vld [vmem:[%s1634_s6] ss:$0 sm:$0xff] }
 0x279   :  { %v1473_v36 = vsub.f32 %v1380_v21, %v586_v29  ;;  %656 = vadd.xlane.f32.xlu0 %v655_v18  ;;  %v566_v41 = vpop.xlane.xlu0 %565  ;;  %v658_v24 = vsel %vm205_vm3, %v620_v35, 0.0  ;;  %v1515_v35 = vld [vmem:[%s1635_s7] ss:$0 sm:$0xff] }
 0x27a   :  { %v589_v8 = vmul.f32 0.03125, %v566_v41  ;;  %v617_v14 = vmul.f32 %v1469_v54, %v1469_v54 }
 0x27b   :  { %v569_v33 = vpop.xlane.xlu1 %568  ;;  %v618_v20 = vmul.f32 %v1473_v36, %v1473_v36 }
 0x27c   :  { %v1481_v39 = vsub.f32 %v1391_v34, %v589_v8  ;;  %v590_v16 = vmul.f32 0.03125, %v569_v33  ;;  %659 = vadd.xlane.f32.xlu1 %v658_v24  ;;  %v649_v21 = vsel %vm205_vm3, %v617_v14, 0.0 }
 0x27d   :  { %650 = vadd.xlane.f32.xlu0 %v649_v21  ;;  %v572_v7 = vpop.xlane.xlu0 %571  ;;  %v652_v56 = vsel %vm205_vm3, %v618_v20, 0.0 }
 0x27e   :  { %v1485_v19 = vsub.f32 %v1396_v38, %v590_v16  ;;  %v591_v50 = vmul.f32 0.03125, %v572_v7  ;;  %v621_v53 = vmul.f32 %v1481_v39, %v1481_v39 }
 0x27f   :  { %v575_v10 = vpop.xlane.xlu1 %574 }
 0x280   :  { %v1491_v63 = vsub.f32 %v1399_v40, %v591_v50  ;;  %v592_v34 = vmul.f32 0.03125, %v575_v10  ;;  %653 = vadd.xlane.f32.xlu1 %v652_v56  ;;  %v661_v49 = vsel %vm205_vm3, %v621_v53, 0.0  ;;  %v622_v23 = vmul.f32 %v1485_v19, %v1485_v19 }
 0x281   :  { %662 = vadd.xlane.f32.xlu0 %v661_v49 }
 0x282   :  { %v1497_v38 = vsub.f32 %v1404_v43, %v592_v34  ;;  %v664_v6 = vsel %vm205_vm3, %v622_v23, 0.0  ;;  %v623_v57 = vmul.f32 %v1491_v63, %v1491_v63 }
 0x284   :  { %665 = vadd.xlane.f32.xlu1 %v664_v6  ;;  %v667_v40 = vsel %vm205_vm3, %v623_v57, 0.0  ;;  %v624_v58 = vmul.f32 %v1497_v38, %v1497_v38 }
 0x285   :  { %668 = vadd.xlane.f32.xlu0 %v667_v40 }
 0x286   :  { %v670_v59 = vsel %vm205_vm3, %v624_v58, 0.0 }
 0x288   :  { %671 = vadd.xlane.f32.xlu1 %v670_v59 }
 0x2f5   :  { %v633_v52 = vpop.xlane.xlu0 %632 }
 0x2f6   :  { %v675_v60 = vmul.f32 0.03125, %v633_v52 }
 0x2f8   :  { %v691_v1 = vadd.f32 1e-05, %v675_v60 }
 0x2f9   :  { %v636_v43 = vpop.xlane.xlu1 %635  ;;  %v627_v42 = vpop.xlane.xlu0 %626 }
 0x2fa   :  { %949 = vrsqrt.f32 %v691_v1  ;;  %v676_v30 = vmul.f32 0.03125, %v636_v43  ;;  %v673_v37 = vmul.f32 0.03125, %v627_v42 }
 0x2fc   :  { %v692_v9 = vadd.f32 1e-05, %v676_v30  ;;  %v689_v3 = vadd.f32 1e-05, %v673_v37 }
 0x2fd   :  { %v630_v47 = vpop.xlane.xlu1 %629 }
 0x2fe   :  { %951 = vrsqrt.f32 %v692_v9  ;;  %v674_v13 = vmul.f32 0.03125, %v630_v47  ;;  %v645_v11 = vpop.xlane.xlu0 %644 }
 0x2ff   :  { %953 = vrsqrt.f32 %v689_v3  ;;  %v679_v12 = vmul.f32 0.03125, %v645_v11 }
 0x300   :  { %v690_v15 = vadd.f32 1e-05, %v674_v13 }
 0x301   :  { %v695_v17 = vadd.f32 1e-05, %v679_v12  ;;  %v648_v44 = vpop.xlane.xlu1 %647 }
 0x302   :  { %955 = vrsqrt.f32 %v690_v15  ;;  %v680_v31 = vmul.f32 0.03125, %v648_v44  ;;  %v639_v0 = vpop.xlane.xlu0 %638 }
 0x303   :  { %957 = vrsqrt.f32 %v695_v17  ;;  %v677_v2 = vmul.f32 0.03125, %v639_v0 }
 0x304   :  { %v950_v27 = vpop.eup %949  ;;  %v696_v5 = vadd.f32 1e-05, %v680_v31 }
 0x305   :  { %v723_v51 = vmul.f32 %v950_v27, %v1411_v45  ;;  %v693_v29 = vadd.f32 1e-05, %v677_v2  ;;  %v642_v32 = vpop.xlane.xlu1 %641 }
 0x306   :  { %959 = vrsqrt.f32 %v696_v5  ;;  %v678_v18 = vmul.f32 0.03125, %v642_v32  ;;  %v657_v41 = vpop.xlane.xlu0 %656 }
 0x307   :  { %v746_v8 = vmul.f32 %v1509_v28, %v723_v51  ;;  %961 = vrsqrt.f32 %v693_v29  ;;  %v683_v14 = vmul.f32 0.03125, %v657_v41 }
 0x308   :  { %v952_v33 = vpop.eup %951  ;;  %v694_v24 = vadd.f32 1e-05, %v678_v18 }
 0x309   :  { %v954_v20 = vpop.eup %953  ;;  %v769_v16 = vadd.f32 %v1515_v35, %v746_v8  ;;  %v724_v45 = vmul.f32 %v952_v33, %v1419_v55  ;;  %v699_v21 = vadd.f32 1e-05, %v683_v14  ;;  %v660_v7 = vpop.xlane.xlu1 %659 }
 0x30a   :  { %v721_v50 = vmul.f32 %v954_v20, %v1414_v46  ;;  %963 = vrsqrt.f32 %v694_v24  ;;  %v684_v53 = vmul.f32 0.03125, %v660_v7  ;;  %v651_v10 = vpop.xlane.xlu0 %650 }
 0x30b   :  { %785 = vst.msk [vmem:[%s1636_s8 + $0x10] sm:$0xff] %vm205_vm3, %v769_v16  ;;  %v747_v56 = vmul.f32 %v1509_v28, %v724_v45  ;;  %965 = vrsqrt.f32 %v699_v21  ;;  %v681_v34 = vmul.f32 0.03125, %v651_v10 }
 0x30c   :  { %v956_v49 = vpop.eup %955  ;;  %v744_v23 = vmul.f32 %v1509_v28, %v721_v50  ;;  %v700_v55 = vadd.f32 1e-05, %v684_v53 }
 0x30d   :  { %v958_v6 = vpop.eup %957  ;;  %v770_v57 = vadd.f32 %v1515_v35, %v747_v56  ;;  %v722_v46 = vmul.f32 %v956_v49, %v1425_v48  ;;  %v697_v40 = vadd.f32 1e-05, %v681_v34  ;;  %v654_v58 = vpop.xlane.xlu1 %653 }
 0x30e   :  { %v767_v59 = vadd.f32 %v1515_v35, %v744_v23  ;;  %v727_v52 = vmul.f32 %v958_v6, %v1434_v61  ;;  %967 = vrsqrt.f32 %v700_v55  ;;  %v682_v60 = vmul.f32 0.03125, %v654_v58  ;;  %v663_v1 = vpop.xlane.xlu0 %662 }
 0x30f   :  { %786 = vst.msk [vmem:[%s1636_s8 + $0x18] sm:$0xff] %vm205_vm3, %v770_v57  ;;  %v745_v43 = vmul.f32 %v1509_v28, %v722_v46  ;;  %969 = vrsqrt.f32 %v697_v40  ;;  %v685_v42 = vmul.f32 0.03125, %v663_v1 }
 0x310   :  { %v960_v30 = vpop.eup %959  ;;  %783 = vst.msk [vmem:[%s1636_s8] sm:$0xff] %vm205_vm3, %v767_v59  ;;  %v750_v48 = vmul.f32 %v1509_v28, %v727_v52  ;;  %v698_v61 = vadd.f32 1e-05, %v682_v60 }
 0x311   :  { %v962_v37 = vpop.eup %961  ;;  %v768_v9 = vadd.f32 %v1515_v35, %v745_v43  ;;  %v728_v3 = vmul.f32 %v960_v30, %v1437_v22  ;;  %v701_v47 = vadd.f32 1e-05, %v685_v42  ;;  %v666_v13 = vpop.xlane.xlu1 %665 }
 0x312   :  { %v773_v11 = vadd.f32 %v1515_v35, %v750_v48  ;;  %v725_v12 = vmul.f32 %v962_v37, %v1445_v4  ;;  %971 = vrsqrt.f32 %v698_v61  ;;  %v686_v15 = vmul.f32 0.03125, %v666_v13  ;;  %v669_v17 = vpop.xlane.xlu0 %668 }
 0x313   :  { %784 = vst.msk [vmem:[%s1636_s8 + $0x8] sm:$0xff] %vm205_vm3, %v768_v9  ;;  %v751_v44 = vmul.f32 %v1509_v28, %v728_v3  ;;  %973 = vrsqrt.f32 %v701_v47  ;;  %v687_v31 = vmul.f32 0.03125, %v669_v17 }
 0x314   :  { %v964_v0 = vpop.eup %963  ;;  %789 = vst.msk [vmem:[%s1636_s8 + $0x30] sm:$0xff] %vm205_vm3, %v773_v11  ;;  %v748_v22 = vmul.f32 %v1509_v28, %v725_v12  ;;  %v702_v4 = vadd.f32 1e-05, %v686_v15 }
 0x315   :  { %v966_v2 = vpop.eup %965  ;;  %v774_v27 = vadd.f32 %v1515_v35, %v751_v44  ;;  %v726_v5 = vmul.f32 %v964_v0, %v1449_v62  ;;  %v703_v51 = vadd.f32 1e-05, %v687_v31  ;;  %v672_v29 = vpop.xlane.xlu1 %671 }
 0x316   :  { %v771_v32 = vadd.f32 %v1515_v35, %v748_v22  ;;  %v731_v18 = vmul.f32 %v966_v2, %v1457_v25  ;;  %975 = vrsqrt.f32 %v702_v4  ;;  %v688_v41 = vmul.f32 0.03125, %v672_v29 }
 0x317   :  { %790 = vst.msk [vmem:[%s1636_s8 + $0x38] sm:$0xff] %vm205_vm3, %v774_v27  ;;  %v749_v8 = vmul.f32 %v1509_v28, %v726_v5  ;;  %977 = vrsqrt.f32 %v703_v51 }
 0x318   :  { %v968_v14 = vpop.eup %967  ;;  %787 = vst.msk [vmem:[%s1636_s8 + $0x20] sm:$0xff] %vm205_vm3, %v771_v32  ;;  %v754_v62 = vmul.f32 %v1509_v28, %v731_v18  ;;  %v704_v33 = vadd.f32 1e-05, %v688_v41 }
 0x319   :  { %v970_v25 = vpop.eup %969  ;;  %v772_v24 = vadd.f32 %v1515_v35, %v749_v8  ;;  %v732_v20 = vmul.f32 %v968_v14, %v1461_v26 }
 0x31a   :  { %v777_v16 = vadd.f32 %v1515_v35, %v754_v62  ;;  %v729_v45 = vmul.f32 %v970_v25, %v1469_v54  ;;  %979 = vrsqrt.f32 %v704_v33 }
 0x31b   :  { %788 = vst.msk [vmem:[%s1636_s8 + $0x28] sm:$0xff] %vm205_vm3, %v772_v24  ;;  %v755_v21 = vmul.f32 %v1509_v28, %v732_v20 }
 0x31c   :  { %v972_v7 = vpop.eup %971  ;;  %793 = vst.msk [vmem:[%s1636_s8 + $0x50] sm:$0xff] %vm205_vm3, %v777_v16  ;;  %v752_v26 = vmul.f32 %v1509_v28, %v729_v45 }
 0x31d   :  { %v974_v50 = vpop.eup %973  ;;  %v778_v53 = vadd.f32 %v1515_v35, %v755_v21  ;;  %v730_v54 = vmul.f32 %v972_v7, %v1473_v36 }
 0x31e   :  { %v775_v10 = vadd.f32 %v1515_v35, %v752_v26  ;;  %v733_v56 = vmul.f32 %v974_v50, %v1481_v39 }
 0x31f   :  { %794 = vst.msk [vmem:[%s1636_s8 + $0x58] sm:$0xff] %vm205_vm3, %v778_v53  ;;  %v753_v34 = vmul.f32 %v1509_v28, %v730_v54 }
 0x320   :  { %v976_v49 = vpop.eup %975  ;;  %791 = vst.msk [vmem:[%s1636_s8 + $0x40] sm:$0xff] %vm205_vm3, %v775_v10  ;;  %v756_v23 = vmul.f32 %v1509_v28, %v733_v56 }
 0x321   :  { %v978_v36 = vpop.eup %977  ;;  %v776_v55 = vadd.f32 %v1515_v35, %v753_v34  ;;  %v734_v39 = vmul.f32 %v976_v49, %v1485_v19 }
 0x322   :  { %v779_v6 = vadd.f32 %v1515_v35, %v756_v23  ;;  %v735_v57 = vmul.f32 %v978_v36, %v1491_v63 }
 0x323   :  { %792 = vst.msk [vmem:[%s1636_s8 + $0x48] sm:$0xff] %vm205_vm3, %v776_v55  ;;  %v757_v46 = vmul.f32 %v1509_v28, %v734_v39 }
 0x324   :  { %v980_v40 = vpop.eup %979  ;;  %795 = vst.msk [vmem:[%s1636_s8 + $0x60] sm:$0xff] %vm205_vm3, %v779_v6  ;;  %v758_v58 = vmul.f32 %v1509_v28, %v735_v57 }
 0x325   :  { %v780_v19 = vadd.f32 %v1515_v35, %v757_v46  ;;  %v736_v59 = vmul.f32 %v980_v40, %v1497_v38 }
 0x326   :  { %v781_v63 = vadd.f32 %v1515_v35, %v758_v58 }
 0x327   :  { %796 = vst.msk [vmem:[%s1636_s8 + $0x68] sm:$0xff] %vm205_vm3, %v780_v19  ;;  %v759_v52 = vmul.f32 %v1509_v28, %v736_v59 }
 0x328   :  { %797 = vst.msk [vmem:[%s1636_s8 + $0x70] sm:$0xff] %vm205_vm3, %v781_v63 }
 0x329   :  { %v782_v60 = vadd.f32 %v1515_v35, %v759_v52 }
 0x32b   :  { %798 = vst.msk [vmem:[%s1636_s8 + $0x78] sm:$0xff] %vm205_vm3, %v782_v60 }

// kernel: gat_hetersum_apply.7
= control target key start
LH: loop header
LB: loop body
LE: loop exit
PB: predicated region body
PF: predicated region fallthrough
CT: control target
= control target key end

     0   :  { %v7845_v0 = vmov 1   ;;  %v7843_v2 = vmov 0   ;;  %vm22_vm0 = vcmask 31744   ;;  %v4652_v18 = vmov -1e+30   ;;  %s4655_s22 = smov 120   ;;  %s7832_s0 = inlined_call_operand.vmem [shape: f32[128,4], index: 0, kind: input, shape index: {}]   ;;  %s7833_s3 = inlined_call_operand.vmem [shape: s8[128,128], index: 3, kind: input, shape index: {}]   ;;  %s7834_s1 = inlined_call_operand.vmem [shape: f32[4,128], index: 1, kind: input, shape index: {}]   ;;  %s7835_s2 = inlined_call_operand.vmem [shape: bf16[128,32], index: 2, kind: input, shape index: {}]   ;;  %s7836_s4 = inlined_call_operand.vmem [shape: f32[128,32], index: 4, kind: output, shape index: {}]  }
   0x1   :  { %4288 = vset.pattern.permute.xlu0 %v7845_v0  ;;  %v72_v1 = vld [vmem:[%s7832_s0] sm:$0xff]  ;;  %4287 = vset.pattern.permute.xlu1 %v7843_v2  ;;  %v74_v3 = vld [vmem:[%s7832_s0 + $0x10] sm:$0xff]  ;;  %v75_v4 = vld [vmem:[%s7832_s0 + $0x18] sm:$0xff]  ;;  %23 = vst.msk [vmem:[#allocation2] sm:$0xff] %vm22_vm0, %v4652_v18  ;;  %v237_v28 = vlaneseq  ;;  %s4656_s13 = smov 8   ;;  %s4657_s16 = smov 112  }
   0x2   :  { %989 = vperm.xlu0 %4288, %v72_v1   ;;  %169 = vperm.xlu1 %4287, %v74_v3   ;;  %v77_v5 = vld [vmem:[%s7832_s0 + $0x28] sm:$0xff]  ;;  %v79_v6 = vld [vmem:[%s7832_s0 + $0x38] sm:$0xff]  ;;  %v76_v12 = vld [vmem:[%s7832_s0 + $0x20] sm:$0xff]  ;;  %24 = vst.msk [vmem:[#allocation2 + $0x8] sm:$0xff] %vm22_vm0, %v4652_v18  ;;  %s4661_s9 = smov 24  }
   0x3   :  { %v81_v7 = vld [vmem:[%s7832_s0 + $0x48] sm:$0xff]  ;;  %v83_v8 = vld [vmem:[%s7832_s0 + $0x58] sm:$0xff]  ;;  %v78_v13 = vld [vmem:[%s7832_s0 + $0x30] sm:$0xff]  ;;  %25 = vst.msk [vmem:[#allocation2 + $0x10] sm:$0xff] %vm22_vm0, %v4652_v18  ;;  %v4770_v30 = vshrl.u32 %v237_v28, 7 }
   0x4   :  { %v85_v9 = vld [vmem:[%s7832_s0 + $0x68] sm:$0xff]  ;;  %v87_v10 = vld [vmem:[%s7832_s0 + $0x78] sm:$0xff]  ;;  %v80_v14 = vld [vmem:[%s7832_s0 + $0x40] sm:$0xff]  ;;  %26 = vst.msk [vmem:[#allocation2 + $0x18] sm:$0xff] %vm22_vm0, %v4652_v18 }
   0x5   :  { %v73_v11 = vld [vmem:[%s7832_s0 + $0x8] sm:$0xff]  ;;  %v82_v15 = vld [vmem:[%s7832_s0 + $0x50] sm:$0xff]  ;;  %v84_v16 = vld [vmem:[%s7832_s0 + $0x60] sm:$0xff]  ;;  %27 = vst.msk [vmem:[#allocation2 + $0x20] sm:$0xff] %vm22_vm0, %v4652_v18  ;;  %v239_v33 = vsub.s32 0, %v4770_v30  ;;  %v1054_v53 = vsub.s32 1, %v4770_v30 }
   0x6   :  { %1001 = vperm.xlu0 %4288, %v75_v4   ;;  %174 = vperm.xlu1 %4287, %v75_v4   ;;  %v86_v17 = vld [vmem:[%s7832_s0 + $0x70] sm:$0xff]  ;;  %28 = vst.msk [vmem:[#allocation2 + $0x28] sm:$0xff] %vm22_vm0, %v4652_v18  ;;  %29 = vst.msk [vmem:[#allocation2 + $0x30] sm:$0xff] %vm22_vm0, %v4652_v18  ;;  %v105_v34 = vld [vmem:[%s7833_s3] sm:$0xff] }
   0x7   :  { %30 = vst.msk [vmem:[#allocation2 + $0x38] sm:$0xff] %vm22_vm0, %v4652_v18  ;;  %31 = vst.msk [vmem:[#allocation2 + $0x40] sm:$0xff] %vm22_vm0, %v4652_v18  ;;  %v88_v35 = vld [vmem:[%s7834_s1] sm:$0xf]  ;;  %v109_v39 = vunpack.c.0.s8 %v105_v34  ;;  %v111_v40 = vunpack.c.2.s8 %v105_v34  ;;  %v110_v41 = vunpack.c.1.s8 %v105_v34  ;;  %v4797_v46 = vld [vmem:[%s7833_s3 + $0x8] sm:$0xff]  ;;  %v112_v56 = vunpack.c.3.s8 %v105_v34 }
   0x8   :  { %32 = vst.msk [vmem:[#allocation2 + $0x48] sm:$0xff] %vm22_vm0, %v4652_v18  ;;  %33 = vst.msk [vmem:[#allocation2 + $0x50] sm:$0xff] %vm22_vm0, %v4652_v18  ;;  %v4785_v37 = vrot.slane %v88_v35, %v239_v33  ;;  %v113_v49 = vunpack.c.0.s8 %v4797_v46  ;;  %v114_v57 = vunpack.c.1.s8 %v4797_v46  ;;  %v116_v28 = vunpack.c.3.s8 %v4797_v46 }
   0x9   :  { %34 = vst.msk [vmem:[#allocation2 + $0x58] sm:$0xff] %vm22_vm0, %v4652_v18  ;;  %35 = vst.msk [vmem:[#allocation2 + $0x60] sm:$0xff] %vm22_vm0, %v4652_v18  ;;  %v4790_v44 = vcvt.s32.f32 %v109_v39  ;;  %v4792_v45 = vcvt.s32.f32 %v111_v40  ;;  %v4800_v48 = vcvt.s32.f32 %v110_v41 }
   0xa   :  { %1009 = vperm.xlu0 %4288, %v77_v5   ;;  %184 = vperm.xlu1 %4287, %v77_v5   ;;  %36 = vst.msk [vmem:[#allocation2 + $0x68] sm:$0xff] %vm22_vm0, %v4652_v18  ;;  %37 = vst.msk [vmem:[#allocation2 + $0x70] sm:$0xff] %vm22_vm0, %v4652_v18  ;;  %v4812_v60 = vcvt.s32.f32 %v113_v49  ;;  %v4821_v5 = vrot.slane %v88_v35, %v1054_v53  ;;  %v4881_v53 = vld [vmem:[%s7833_s3 + $0x18] sm:$0xff] }
   0xb   :  { %38 = vst.msk [vmem:[#allocation2 + $0x78] sm:$0xff] %vm22_vm0, %v4652_v18  ;;  %8008 = vst [vmem:[#allocation5_spill] sm:$0xff] %v4770_v30  ;;  %vm7950_vm3 = vcmp.gt.f32.partialorder %v4790_v44, 0.0  ;;  %vm7911_vm4 = vcmp.gt.f32.partialorder %v4792_v45, 0.0  ;;  %vm7912_vm5 = vcmp.gt.f32.partialorder %v4800_v48, 0.0 }
   0xc   :  { %vm7910_vm8 = vcmp.gt.f32.partialorder %v4812_v60, 0.0 }
   0xe   :  { %1017 = vperm.xlu0 %4288, %v79_v6   ;;  %194 = vperm.xlu1 %4287, %v79_v6  }
  0x12   :  { %1025 = vperm.xlu0 %4288, %v81_v7   ;;  %204 = vperm.xlu1 %4287, %v81_v7  }
  0x16   :  { %1033 = vperm.xlu0 %4288, %v83_v8   ;;  %214 = vperm.xlu1 %4287, %v83_v8   ;;  %v4825_v8 = vcvt.s32.f32 %v112_v56  ;;  %v121_v56 = vunpack.c.0.s8 %v4881_v53 }
  0x18   :  { %vm7913_vm10 = vcmp.gt.f32.partialorder %v4825_v8, 0.0 }
  0x1a   :  { %1041 = vperm.xlu0 %4288, %v85_v9   ;;  %224 = vperm.xlu1 %4287, %v85_v9   ;;  %v4827_v9 = vcvt.s32.f32 %v114_v57 }
  0x1c   :  { %vm7842_vm12 = vcmp.gt.f32.partialorder %v4827_v9, 0.0 }
  0x1e   :  { %1049 = vperm.xlu0 %4288, %v87_v10   ;;  %234 = vperm.xlu1 %4287, %v87_v10   ;;  %v4832_v10 = vld [vmem:[%s7833_s3 + $0x10] sm:$0xff] }
  0x1f   :  { %v119_v33 = vunpack.c.2.s8 %v4832_v10 }
  0x22   :  { %4290 = vset.pattern.permute.xlu0 %v7843_v2  ;;  %4289 = vset.pattern.permute.xlu1 %v7845_v0  ;;  %v5167_v0 = vld [vmem:[#allocation2 + $0x30] sm:$0xff] }
  0x23   :  { %159 = vperm.xlu0 %4290, %v72_v1   ;;  %993 = vperm.xlu1 %4289, %v73_v11   ;;  %v115_v1 = vunpack.c.2.s8 %v4797_v46  ;;  %8029 = vst [vmem:[#allocation22_spill] sm:$0xff] %v5167_v0 }
  0x27   :  { %164 = vperm.xlu0 %4290, %v73_v11   ;;  %997 = vperm.xlu1 %4289, %v74_v3  }
  0x2b   :  { %179 = vperm.xlu0 %4290, %v76_v12   ;;  %1005 = vperm.xlu1 %4289, %v76_v12  }
  0x2f   :  { %189 = vperm.xlu0 %4290, %v78_v13   ;;  %1013 = vperm.xlu1 %4289, %v78_v13   ;;  %v117_v13 = vunpack.c.0.s8 %v4832_v10 }
  0x31   :  { %v4858_v39 = vcvt.s32.f32 %v117_v13  ;;  %v4906_v13 = vcvt.s32.f32 %v121_v56 }
  0x33   :  { %199 = vperm.xlu0 %4290, %v80_v14   ;;  %1021 = vperm.xlu1 %4289, %v80_v14   ;;  %8010 = vst [vmem:[#allocation7_spill] sm:$0xff] %v4906_v13 }
  0x37   :  { %209 = vperm.xlu0 %4290, %v82_v15   ;;  %1029 = vperm.xlu1 %4289, %v82_v15  }
  0x3b   :  { %219 = vperm.xlu0 %4290, %v84_v16   ;;  %1037 = vperm.xlu1 %4289, %v84_v16  }
  0x3f   :  { %229 = vperm.xlu0 %4290, %v86_v17   ;;  %1045 = vperm.xlu1 %4289, %v86_v17   ;;  %v4845_v17 = vcvt.s32.f32 %v115_v1 }
  0x41   :  { %vm7840_vm13 = vcmp.gt.f32.partialorder %v4845_v17, 0.0 }
  0x43   :  { %4291 = vset.pattern.permute.xlu1 %v7843_v2 }
  0x81   :  { %v4756_v19 = vpop.permute.xlu0 %989  ;;  %v170_v20 = vpop.permute.xlu1 %169 }
  0x82   :  { %v243_v42 = vadd.f32 %v4785_v37, %v170_v20 }
  0x84   :  { %v275_v52 = vmul.f32 0.01, %v243_v42  ;;  %vm259_vm2 = vcmp.ge.f32.partialorder %v243_v42, 0.0 }
  0x85   :  { %v4758_v21 = vpop.permute.xlu0 %1001  ;;  %v175_v22 = vpop.permute.xlu1 %174 }
  0x86   :  { %v244_v50 = vadd.f32 %v4785_v37, %v175_v22  ;;  %v291_v62 = vsel %vm259_vm2, %v243_v42, %v275_v52  ;;  %v4876_v52 = vcvt.s32.f32 %v119_v33 }
  0x87   :  { %v4839_v14 = vsel %vm7911_vm4, %v291_v62, -1e+30 }
  0x88   :  { %v276_v63 = vmul.f32 0.01, %v244_v50  ;;  %vm260_vm7 = vcmp.ge.f32.partialorder %v244_v50, 0.0 }
  0x89   :  { %v4760_v23 = vpop.permute.xlu0 %1009  ;;  %v185_v24 = vpop.permute.xlu1 %184 }
  0x8a   :  { %v246_v3 = vadd.f32 %v4785_v37, %v185_v24  ;;  %v292_v16 = vsel %vm260_vm7, %v244_v50, %v276_v63  ;;  %v118_v50 = vunpack.c.1.s8 %v4832_v10 }
  0x8b   :  { %v4864_v41 = vsel %vm7913_vm10, %v292_v16, -1e+30  ;;  %v123_v16 = vunpack.c.2.s8 %v4881_v53 }
  0x8c   :  { %v278_v22 = vmul.f32 0.01, %v246_v3  ;;  %vm262_vm11 = vcmp.ge.f32.partialorder %v246_v3, 0.0 }
  0x8d   :  { %v4762_v25 = vpop.permute.xlu0 %1017  ;;  %v4766_v27 = vpop.permute.xlu1 %194 }
  0x8e   :  { %v248_v18 = vadd.f32 %v4785_v37, %v4766_v27 }
  0x90   :  { %vm264_vm15 = vcmp.ge.f32.partialorder %v248_v18, 0.0 }
  0x91   :  { %v4764_v26 = vpop.permute.xlu0 %1025  ;;  %v4772_v31 = vpop.permute.xlu1 %204 }
  0x92   :  { %v250_v40 = vadd.f32 %v4785_v37, %v4772_v31  ;;  %v4873_v31 = vcvt.s32.f32 %v116_v28 }
  0x94   :  { %8009 = vst [vmem:[#allocation6_spill] sm:$0xff] %v4873_v31  ;;  %v282_v62 = vmul.f32 0.01, %v250_v40  ;;  %vm7841_vm7 = vcmp.gt.f32.partialorder %v4873_v31, 0.0 }
  0x95   :  { %v4768_v29 = vpop.permute.xlu0 %1033  ;;  %v4787_v38 = vpop.permute.xlu1 %214 }
  0x96   :  { %v252_v57 = vadd.f32 %v4785_v37, %v4787_v38 }
  0x99   :  { %v4774_v32 = vpop.permute.xlu0 %1041  ;;  %v4804_v51 = vpop.permute.xlu1 %224 }
  0x9d   :  { %v4783_v36 = vpop.permute.xlu0 %1049  ;;  %v4823_v6 = vpop.permute.xlu1 %234 }
  0xa2   :  { %v160_v43 = vpop.permute.xlu0 %159  ;;  %v4854_v34 = vpop.permute.xlu1 %993 }
  0xa3   :  { %v241_v47 = vadd.f32 %v4785_v37, %v160_v43  ;;  %v294_v43 = vsel %vm262_vm11, %v246_v3, %v278_v22 }
  0xa5   :  { %vm257_vm1 = vcmp.ge.f32.partialorder %v241_v47, 0.0  ;;  %v273_v54 = vmul.f32 0.01, %v241_v47 }
  0xa6   :  { %v165_v55 = vpop.permute.xlu0 %164  ;;  %v4896_v63 = vpop.permute.xlu1 %997 }
  0xa7   :  { %v242_v58 = vadd.f32 %v4785_v37, %v165_v55  ;;  %v289_v59 = vsel %vm257_vm1, %v241_v47, %v273_v54  ;;  %v280_v47 = vmul.f32 0.01, %v248_v18  ;;  %vm7837_vm1 = vcmp.gt.f32.partialorder %v4858_v39, 0.0 }
  0xa8   :  { %v4816_v61 = vsel %vm7950_vm3, %v289_v59, -1e+30 }
  0xa9   :  { %337 = vmax.xlane.f32.xlu0 %v4816_v61  ;;  %vm258_vm6 = vcmp.ge.f32.partialorder %v242_v58, 0.0  ;;  %v274_v4 = vmul.f32 0.01, %v242_v58  ;;  %v296_v1 = vsel %vm264_vm15, %v248_v18, %v280_v47  ;;  %v1056_v47 = vadd.f32 %v4821_v5, %v4756_v19 }
  0xaa   :  { %v180_v7 = vpop.permute.xlu0 %179  ;;  %v4911_v18 = vsel %vm7841_vm7, %v296_v1, -1e+30 }
  0xab   :  { %v245_v11 = vadd.f32 %v4785_v37, %v180_v7  ;;  %v290_v12 = vsel %vm258_vm6, %v242_v58, %v274_v4  ;;  %v4890_v58 = vsel %vm7842_vm12, %v294_v43, -1e+30  ;;  %vm266_vm6 = vcmp.ge.f32.partialorder %v250_v40, 0.0  ;;  %v4925_v43 = vpop.permute.xlu1 %1005 }
  0xac   :  { %v4843_v15 = vsel %vm7912_vm5, %v290_v12, -1e+30  ;;  %v4901_v4 = vcvt.s32.f32 %v118_v50  ;;  %v120_v7 = vunpack.c.3.s8 %v4832_v10  ;;  %v298_v22 = vsel %vm266_vm6, %v250_v40, %v282_v62 }
  0xad   :  { %341 = vmax.xlane.f32.xlu0 %v4839_v14  ;;  %339 = vmax.xlane.f32.xlu1 %v4843_v15  ;;  %vm261_vm9 = vcmp.ge.f32.partialorder %v245_v11, 0.0  ;;  %v277_v20 = vmul.f32 0.01, %v245_v11  ;;  %v254_v10 = vadd.f32 %v4785_v37, %v4804_v51  ;;  %v4929_v51 = vcvt.s32.f32 %v123_v16 }
  0xae   :  { %v190_v24 = vpop.permute.xlu0 %189  ;;  %vm7839_vm15 = vcmp.gt.f32.partialorder %v4901_v4, 0.0 }
  0xaf   :  { %v247_v35 = vadd.f32 %v4785_v37, %v190_v24  ;;  %v293_v27 = vsel %vm261_vm9, %v245_v11, %v277_v20  ;;  %vm7838_vm9 = vcmp.gt.f32.partialorder %v4876_v52, 0.0  ;;  %v284_v24 = vmul.f32 0.01, %v252_v57  ;;  %8011 = vst [vmem:[#allocation8_spill] sm:$0xff] %v4929_v51  ;;  %v1014_v16 = vpop.permute.xlu1 %1013 }
  0xb0   :  { %v4868_v42 = vsel %vm7910_vm8, %v293_v27, -1e+30  ;;  %v122_v27 = vunpack.c.1.s8 %v4881_v53  ;;  %v286_v62 = vmul.f32 0.01, %v254_v10 }
  0xb1   :  { %343 = vmax.xlane.f32.xlu0 %v4864_v41  ;;  %345 = vmax.xlane.f32.xlu1 %v4868_v42  ;;  %vm263_vm14 = vcmp.ge.f32.partialorder %v247_v35, 0.0  ;;  %v279_v46 = vmul.f32 0.01, %v247_v35 }
  0xb2   :  { %v200_v49 = vpop.permute.xlu0 %199  ;;  %v4946_v1 = vcvt.s32.f32 %v122_v27  ;;  %v7847_v27 = vmov 0.0  }
  0xb3   :  { %v249_v54 = vadd.f32 %v4785_v37, %v200_v49  ;;  %v295_v55 = vsel %vm263_vm14, %v247_v35, %v279_v46  ;;  %vm268_vm14 = vcmp.ge.f32.partialorder %v252_v57, 0.0  ;;  %v4922_v35 = vcvt.s32.f32 %v120_v7  ;;  %39 = vst.msk [vmem:[#allocation3] sm:$0xff] %vm22_vm0, %v7847_v27  ;;  %40 = vst.msk [vmem:[#allocation3 + $0x8] sm:$0xff] %vm22_vm0, %v7847_v27 }
  0xb4   :  { %v4894_v59 = vsel %vm7840_vm13, %v295_v55, -1e+30  ;;  %v4935_v49 = vsel %vm7839_vm15, %v298_v22, -1e+30  ;;  %v256_v55 = vadd.f32 %v4785_v37, %v4823_v6  ;;  %8012 = vst [vmem:[#allocation9_spill] sm:$0xff] %v4946_v1  ;;  %v1057_v6 = vadd.f32 %v4821_v5, %v4854_v34  ;;  %41 = vst.msk [vmem:[#allocation3 + $0x10] sm:$0xff] %vm22_vm0, %v7847_v27 }
  0xb5   :  { %347 = vmax.xlane.f32.xlu0 %v4890_v58  ;;  %349 = vmax.xlane.f32.xlu1 %v4894_v59  ;;  %vm265_vm2 = vcmp.ge.f32.partialorder %v249_v54, 0.0  ;;  %v281_v3 = vmul.f32 0.01, %v249_v54  ;;  %v1059_v7 = vadd.f32 %v4821_v5, %v4758_v21  ;;  %vm1072_vm13 = vcmp.ge.f32.partialorder %v1056_v47, 0.0  ;;  %42 = vst.msk [vmem:[#allocation3 + $0x18] sm:$0xff] %vm22_vm0, %v7847_v27  ;;  %43 = vst.msk [vmem:[#allocation3 + $0x20] sm:$0xff] %vm22_vm0, %v7847_v27 }
  0xb6   :  { %v210_v38 = vpop.permute.xlu0 %209  ;;  %v288_v22 = vmul.f32 0.01, %v256_v55  ;;  %vm272_vm15 = vcmp.ge.f32.partialorder %v256_v55, 0.0  ;;  %44 = vst.msk [vmem:[#allocation3 + $0x28] sm:$0xff] %vm22_vm0, %v7847_v27  ;;  %45 = vst.msk [vmem:[#allocation3 + $0x30] sm:$0xff] %vm22_vm0, %v7847_v27 }
  0xb7   :  { %v251_v11 = vadd.f32 %v4785_v37, %v210_v38  ;;  %v297_v12 = vsel %vm265_vm2, %v249_v54, %v281_v3  ;;  %vm7952_vm2 = vcmp.gt.f32.partialorder %v4906_v13, 0.0  ;;  %v300_v54 = vsel %vm268_vm14, %v252_v57, %v284_v24  ;;  %46 = vst.msk [vmem:[#allocation3 + $0x38] sm:$0xff] %vm22_vm0, %v7847_v27  ;;  %47 = vst.msk [vmem:[#allocation3 + $0x40] sm:$0xff] %vm22_vm0, %v7847_v27 }
  0xb8   :  { %v4915_v20 = vsel %vm7837_vm1, %v297_v12, -1e+30  ;;  %vm270_vm1 = vcmp.ge.f32.partialorder %v254_v10, 0.0  ;;  %v124_v3 = vunpack.c.3.s8 %v4881_v53  ;;  %vm7951_vm14 = vcmp.gt.f32.partialorder %v4929_v51, 0.0  ;;  %48 = vst.msk [vmem:[#allocation3 + $0x48] sm:$0xff] %vm22_vm0, %v7847_v27  ;;  %49 = vst.msk [vmem:[#allocation3 + $0x50] sm:$0xff] %vm22_vm0, %v7847_v27 }
  0xb9   :  { %351 = vmax.xlane.f32.xlu0 %v4911_v18  ;;  %353 = vmax.xlane.f32.xlu1 %v4915_v20  ;;  %vm267_vm11 = vcmp.ge.f32.partialorder %v251_v11, 0.0  ;;  %v283_v28 = vmul.f32 0.01, %v251_v11  ;;  %v1088_v53 = vmul.f32 0.01, %v1056_v47  ;;  %50 = vst.msk [vmem:[#allocation3 + $0x58] sm:$0xff] %vm22_vm0, %v7847_v27 }
  0xba   :  { %v220_v33 = vpop.permute.xlu0 %219  ;;  %v4966_v24 = vcvt.s32.f32 %v124_v3  ;;  %51 = vst.msk [vmem:[#allocation3 + $0x60] sm:$0xff] %vm22_vm0, %v7847_v27  ;;  %52 = vst.msk [vmem:[#allocation3 + $0x68] sm:$0xff] %vm22_vm0, %v7847_v27  ;;  %v1060_v3 = vadd.f32 %v4821_v5, %v4925_v43  ;;  %v595_v51 = vld [vmem:[#allocation3 + $0x8] sm:$0xff] }
  0xbb   :  { %v253_v40 = vadd.f32 %v4785_v37, %v220_v33  ;;  %v299_v46 = vsel %vm267_vm11, %v251_v11, %v283_v28  ;;  %vm152_vm11 = vcmp.gt.f32.partialorder %v4922_v35, 0.0  ;;  %v1058_v28 = vadd.f32 %v4821_v5, %v4896_v63  ;;  %53 = vst.msk [vmem:[#allocation3 + $0x70] sm:$0xff] %vm22_vm0, %v7847_v27  ;;  %54 = vst.msk [vmem:[#allocation3 + $0x78] sm:$0xff] %vm22_vm0, %v7847_v27  ;;  %v5169_v27 = vld [vmem:[#allocation2 + $0x28] sm:$0xff] }
  0xbc   :  { %v4939_v50 = vsel %vm7838_vm9, %v299_v46, -1e+30  ;;  %v4957_v11 = vsel %vm152_vm11, %v300_v54, -1e+30  ;;  %vm154_vm9 = vcmp.gt.f32.partialorder %v4946_v1, 0.0  ;;  %8013 = vst [vmem:[#allocation10_spill] sm:$0xff] %v4966_v24  ;;  %v304_v46 = vsel %vm272_vm15, %v256_v55, %v288_v22 }
  0xbd   :  { %355 = vmax.xlane.f32.xlu0 %v4935_v49  ;;  %357 = vmax.xlane.f32.xlu1 %v4939_v50  ;;  %vm269_vm6 = vcmp.ge.f32.partialorder %v253_v40, 0.0  ;;  %v285_v56 = vmul.f32 0.01, %v253_v40  ;;  %v1089_v33 = vmul.f32 0.01, %v1057_v6  ;;  %v1104_v54 = vsel %vm1072_vm13, %v1056_v47, %v1088_v53 }
  0xbe   :  { %v230_v19 = vpop.permute.xlu0 %229  ;;  %vm1075_vm0 = vcmp.ge.f32.partialorder %v1059_v7, 0.0  ;;  %vm1074_vm15 = vcmp.ge.f32.partialorder %v1058_v28, 0.0  ;;  %v1063_v47 = vadd.f32 %v4821_v5, %v4762_v25 }
  0xbf   :  { %v255_v57 = vadd.f32 %v4785_v37, %v230_v19  ;;  %v301_v38 = vsel %vm269_vm6, %v253_v40, %v285_v56  ;;  %v302_v37 = vsel %vm270_vm1, %v254_v10, %v286_v62  ;;  %vm1073_vm1 = vcmp.ge.f32.partialorder %v1057_v6, 0.0  ;;  %v1022_v62 = vpop.permute.xlu1 %1021 }
  0xc0   :  { %v4961_v12 = vsel %vm7952_vm2, %v301_v38, -1e+30  ;;  %v5004_v63 = vsel %vm154_vm9, %v302_v37, -1e+30  ;;  %v1061_v40 = vadd.f32 %v4821_v5, %v4760_v23  ;;  %v1091_v56 = vmul.f32 0.01, %v1059_v7 }
  0xc1   :  { %359 = vmax.xlane.f32.xlu0 %v4957_v11  ;;  %361 = vmax.xlane.f32.xlu1 %v4961_v12  ;;  %vm271_vm6 = vcmp.ge.f32.partialorder %v255_v57, 0.0  ;;  %v287_v34 = vmul.f32 0.01, %v255_v57  ;;  %v1105_v19 = vsel %vm1073_vm1, %v1057_v6, %v1089_v33  ;;  %v5025_v38 = vsel %vm7950_vm3, %v1104_v54, -1e+30 }
  0xc2   :  { %v1107_v55 = vsel %vm1075_vm0, %v1059_v7, %v1091_v56  ;;  %v1093_v6 = vmul.f32 0.01, %v1061_v40  ;;  %v5033_v43 = vsel %vm7912_vm5, %v1105_v19, -1e+30  ;;  %vm1077_vm13 = vcmp.ge.f32.partialorder %v1061_v40, 0.0 }
  0xc3   :  { %v303_v21 = vsel %vm271_vm6, %v255_v57, %v287_v34  ;;  %vm7941_vm6 = vcmp.gt.f32.partialorder %v4966_v24, 0.0  ;;  %v1090_v57 = vmul.f32 0.01, %v1058_v28  ;;  %v1062_v37 = vadd.f32 %v4821_v5, %v1014_v16  ;;  %v1030_v25 = vpop.permute.xlu1 %1029 }
  0xc4   :  { %v5008_v10 = vsel %vm7951_vm14, %v303_v21, -1e+30  ;;  %v5021_v23 = vsel %vm7941_vm6, %v304_v46, -1e+30  ;;  %v1092_v34 = vmul.f32 0.01, %v1060_v3  ;;  %v1065_v21 = vadd.f32 %v4821_v5, %v4764_v26 }
  0xc5   :  { %363 = vmax.xlane.f32.xlu0 %v5004_v63  ;;  %365 = vmax.xlane.f32.xlu1 %v5008_v10  ;;  %v1106_v53 = vsel %vm1074_vm15, %v1058_v28, %v1090_v57  ;;  %v5038_v22 = vsel %vm7913_vm10, %v1107_v55, -1e+30  ;;  %vm1076_vm1 = vcmp.ge.f32.partialorder %v1060_v3, 0.0  ;;  %v1109_v7 = vsel %vm1077_vm13, %v1061_v40, %v1093_v6 }
  0xc6   :  { %v1095_v33 = vmul.f32 0.01, %v1063_v47  ;;  %v5046_v28 = vsel %vm7911_vm4, %v1106_v53, -1e+30  ;;  %vm1079_vm0 = vcmp.ge.f32.partialorder %v1063_v47, 0.0  ;;  %v1108_v16 = vsel %vm1076_vm1, %v1060_v3, %v1092_v34 }
  0xc7   :  { %8014 = vst [vmem:[#allocation11_spill] sm:$0xff] %v5046_v28  ;;  %v1064_v46 = vadd.f32 %v4821_v5, %v1022_v62  ;;  %v1094_v54 = vmul.f32 0.01, %v1062_v37  ;;  %v5051_v56 = vsel %vm7842_vm12, %v1109_v7, -1e+30  ;;  %vm1078_vm15 = vcmp.ge.f32.partialorder %v1062_v37, 0.0  ;;  %v1038_v62 = vpop.permute.xlu1 %1037 }
  0xc8   :  { %v1067_v26 = vadd.f32 %v4821_v5, %v4768_v29  ;;  %v1111_v40 = vsel %vm1079_vm0, %v1063_v47, %v1095_v33  ;;  %v1097_v19 = vmul.f32 0.01, %v1065_v21  ;;  %v5059_v3 = vsel %vm7910_vm8, %v1108_v16, -1e+30 }
  0xc9   :  { %367 = vmax.xlane.f32.xlu0 %v5021_v23  ;;  %1152 = vmax.xlane.f32.xlu1 %v5025_v38  ;;  %8015 = vst [vmem:[#allocation12_spill] sm:$0xff] %v5059_v3  ;;  %vm1081_vm13 = vcmp.ge.f32.partialorder %v1065_v21, 0.0  ;;  %v1110_v57 = vsel %vm1078_vm15, %v1062_v37, %v1094_v54  ;;  %v1066_v55 = vadd.f32 %v4821_v5, %v1030_v25  ;;  %v1096_v6 = vmul.f32 0.01, %v1064_v46 }
  0xca   :  { %v5064_v53 = vsel %vm7841_vm7, %v1111_v40, -1e+30  ;;  %vm1080_vm1 = vcmp.ge.f32.partialorder %v1064_v46, 0.0  ;;  %v1069_v29 = vadd.f32 %v4821_v5, %v4774_v32  ;;  %v1113_v47 = vsel %vm1081_vm13, %v1065_v21, %v1097_v19 }
  0xcb   :  { %v1099_v34 = vmul.f32 0.01, %v1067_v26  ;;  %vm8016_vm0 = vcmp.gt.f32.partialorder %v4845_v17, 0.0  ;;  %vm1083_vm15 = vcmp.ge.f32.partialorder %v1067_v26, 0.0  ;;  %v1112_v25 = vsel %vm1080_vm1, %v1064_v46, %v1096_v6  ;;  %v1046_v32 = vpop.permute.xlu1 %1045 }
  0xcc   :  { %v5072_v37 = vsel %vm8016_vm0, %v1110_v57, -1e+30  ;;  %v1068_v7 = vadd.f32 %v4821_v5, %v1038_v62  ;;  %v1098_v33 = vmul.f32 0.01, %v1066_v55  ;;  %vm8018_vm7 = vcmp.gt.f32.partialorder %v4901_v4, 0.0 }
  0xcd   :  { %1154 = vmax.xlane.f32.xlu0 %v5033_v43  ;;  %1158 = vmax.xlane.f32.xlu1 %v5038_v22  ;;  %8017 = vst [vmem:[#allocation13_spill] sm:$0xff] %v5072_v37  ;;  %v5077_v16 = vsel %vm8018_vm7, %v1113_v47, -1e+30  ;;  %vm1082_vm12 = vcmp.ge.f32.partialorder %v1066_v55, 0.0  ;;  %v1071_v54 = vadd.f32 %v4821_v5, %v4783_v36  ;;  %v1115_v21 = vsel %vm1083_vm15, %v1067_v26, %v1099_v34 }
  0xce   :  { %v1101_v40 = vmul.f32 0.01, %v1069_v29  ;;  %vm8019_vm13 = vcmp.gt.f32.partialorder %v4858_v39, 0.0  ;;  %vm1085_vm1 = vcmp.ge.f32.partialorder %v1069_v29, 0.0  ;;  %v1114_v19 = vsel %vm1082_vm12, %v1066_v55, %v1098_v33 }
  0xcf   :  { %v5085_v46 = vsel %vm8019_vm13, %v1112_v25, -1e+30  ;;  %v1070_v62 = vadd.f32 %v4821_v5, %v1046_v32  ;;  %v1100_v57 = vmul.f32 0.01, %v1068_v7  ;;  %v5090_v6 = vsel %vm152_vm11, %v1115_v21, -1e+30 }
  0xd0   :  { %8020 = vst [vmem:[#allocation14_spill] sm:$0xff] %v5085_v46  ;;  %vm1084_vm7 = vcmp.ge.f32.partialorder %v1068_v7, 0.0  ;;  %v1117_v36 = vsel %vm1085_vm1, %v1069_v29, %v1101_v40  ;;  %v1103_v26 = vmul.f32 0.01, %v1071_v54  ;;  %vm8021_vm0 = vcmp.gt.f32.partialorder %v4876_v52, 0.0  ;;  %v4307_v21 = vld [vmem:[%s7835_s2 + $0x8] sm:$0xff]  }
  0xd1   :  { %1156 = vmax.xlane.f32.xlu0 %v5046_v28  ;;  %1162 = vmax.xlane.f32.xlu1 %v5051_v56  ;;  %v5096_v47 = vsel %vm8021_vm0, %v1114_v19, -1e+30  ;;  %vm1087_vm15 = vcmp.ge.f32.partialorder %v1071_v54, 0.0  ;;  %v1116_v55 = vsel %vm1084_vm7, %v1068_v7, %v1100_v57  ;;  %v1102_v34 = vmul.f32 0.01, %v1070_v62  ;;  %v5125_v40 = vld [vmem:[#allocation2] sm:$0xff]  ;;  %vm5554_vm0 = vmpackc.low %vm7912_vm5, %vm7950_vm3 }
  0xd2   :  { %8022 = vst [vmem:[#allocation15_spill] sm:$0xff] %v5096_v47  ;;  %v5100_v5 = vsel %vm154_vm9, %v1117_v36, -1e+30  ;;  %vm1086_vm12 = vcmp.ge.f32.partialorder %v1070_v62, 0.0  ;;  %v1119_v25 = vsel %vm1087_vm15, %v1071_v54, %v1103_v26  ;;  %v5106_v29 = vsel %vm7952_vm2, %v1116_v55, -1e+30  ;;  %vm5562_vm15 = vmpackc.low %vm7913_vm10, %vm7911_vm4 }
  0xd3   :  { %8023 = vst [vmem:[#allocation16_spill] sm:$0xff] %v5106_v29  ;;  %v1118_v33 = vsel %vm1086_vm12, %v1070_v62, %v1102_v34  ;;  %v5110_v32 = vsel %vm7941_vm6, %v1119_v25, -1e+30  ;;  %v4306_v54 = vld [vmem:[%s7835_s2] sm:$0xff]   ;;  %vm7909_vm13 = vcmask 7168   ;;  %v5130_v57 = vld [vmem:[#allocation2 + $0x8] sm:$0xff] }
  0xd4   :  { %v5116_v7 = vsel %vm7951_vm14, %v1118_v33, -1e+30  ;;  %4147 = vmatprep.subr.bf16.mxu0 %v4306_v54  ;;  %8025 = vst [vmem:[#allocation18_spill] sm:$0xff] %v5130_v57  ;;  %v5132_v36 = vld [vmem:[#allocation2 + $0x10] sm:$0xff]  ;;  %vm7908_vm1 = vcmask 15368   ;;  %vm7907_vm7 = vcmask 261120  }
  0xd5   :  { %1160 = vmax.xlane.f32.xlu0 %v5059_v3  ;;  %1166 = vmax.xlane.f32.xlu1 %v5064_v53  ;;  %8024 = vst [vmem:[#allocation17_spill] sm:$0xff] %v5116_v7  ;;  %v4308_v26 = vld [vmem:[%s7835_s2 + $0x10] sm:$0xff]   ;;  %v5264_v3 = vld [vmem:[#allocation2 + $0x68] sm:$0xff]  ;;  %vm8081_vm12 = vcmp.gt.f32.partialorder %v4827_v9, 0.0 }
  0xd6   :  { %4148 = vmatpush3.bf16.msra.mxu0 %v4306_v54  ;;  %v5146_v54 = vld [vmem:[#allocation2 + $0x20] sm:$0xff] }
  0xd7   :  { %4149 = vmatprep.subr.bf16.mxu0 %v4307_v21  ;;  %8027 = vst [vmem:[#allocation20_spill] sm:$0xff] %v5146_v54 }
  0xd9   :  { %1164 = vmax.xlane.f32.xlu0 %v5072_v37  ;;  %1170 = vmax.xlane.f32.xlu1 %v5077_v16 }
  0xda   :  { %4150 = vmatpush3.bf16.msra.mxu0 %v4307_v21  ;;  %v5148_v21 = vld [vmem:[#allocation2 + $0x18] sm:$0xff] }
  0xdb   :  { %4151 = vmatprep.subr.bf16.mxu0 %v4308_v26 }
  0xdd   :  { %1168 = vmax.xlane.f32.xlu0 %v5085_v46  ;;  %1174 = vmax.xlane.f32.xlu1 %v5090_v6  ;;  %v5237_v46 = vld [vmem:[#allocation2 + $0x58] sm:$0xff] }
  0xde   :  { %4152 = vmatpush3.bf16.msra.mxu0 %v4308_v26 }
  0xe1   :  { %1172 = vmax.xlane.f32.xlu0 %v5096_v47  ;;  %1178 = vmax.xlane.f32.xlu1 %v5100_v5 }
  0xe5   :  { %1176 = vmax.xlane.f32.xlu0 %v5106_v29  ;;  %1182 = vmax.xlane.f32.xlu1 %v5110_v32  ;;  %v5211_v29 = vld [vmem:[#allocation2 + $0x48] sm:$0xff] }
  0xe9   :  { %1180 = vmax.xlane.f32.xlu0 %v5116_v7 }
 0x136   :  { %v338_v19 = vpop.xlane.xlu0 %337 }
 0x137   :  { %v5128_v62 = vmax.f32 %v5125_v40, %v338_v19 }
 0x139   :  { %578 = vst.msk [vmem:[#allocation2] sm:$0xff] %vm7909_vm13, %v5128_v62  ;;  %435 = vperm.xlu1 %4291, %v5128_v62  }
 0x13a   :  { %v340_v55 = vpop.xlane.xlu1 %339  ;;  %v342_v34 = vpop.xlane.xlu0 %341 }
 0x13b   :  { %v5141_v25 = vmax.f32 %v5130_v57, %v340_v55  ;;  %v5144_v33 = vmax.f32 %v5132_v36, %v342_v34  ;;  %v4309_v55 = vld [vmem:[%s7835_s2 + $0x18] sm:$0xff]  }
 0x13c   :  { %4153 = vmatprep.subr.bf16.mxu0 %v4309_v55  ;;  %v5190_v57 = vld [vmem:[#allocation2 + $0x38] sm:$0xff] }
 0x13d   :  { %8026 = vst [vmem:[#allocation19_spill] sm:$0xff] %v5141_v25  ;;  %579 = vst.msk [vmem:[#allocation2 + $0x8] sm:$0xff] %vm7909_vm13, %v5141_v25  ;;  %440 = vperm.xlu0 %4290, %v5141_v25   ;;  %445 = vperm.xlu1 %4291, %v5144_v33  }
 0x13e   :  { %580 = vst.msk [vmem:[#allocation2 + $0x10] sm:$0xff] %vm7909_vm13, %v5144_v33  ;;  %v346_v34 = vpop.xlane.xlu1 %345  ;;  %v344_v2 = vpop.xlane.xlu0 %343  ;;  %4154 = vmatpush3.bf16.msra.mxu0 %v4309_v55 }
 0x13f   :  { %v5162_v26 = vmax.f32 %v5146_v54, %v346_v34  ;;  %v5165_v19 = vmax.f32 %v5148_v21, %v344_v2  ;;  %v4310_v2 = vld [vmem:[%s7835_s2 + $0x20] sm:$0xff]  }
 0x140   :  { %4155 = vmatprep.subr.bf16.mxu0 %v4310_v2  ;;  %v5188_v54 = vld [vmem:[#allocation2 + $0x40] sm:$0xff] }
 0x141   :  { %8028 = vst [vmem:[#allocation21_spill] sm:$0xff] %v5162_v26  ;;  %582 = vst.msk [vmem:[#allocation2 + $0x20] sm:$0xff] %vm7909_vm13, %v5162_v26  ;;  %455 = vperm.xlu0 %4290, %v5162_v26   ;;  %450 = vperm.xlu1 %4291, %v5165_v19  }
 0x142   :  { %581 = vst.msk [vmem:[#allocation2 + $0x18] sm:$0xff] %vm7909_vm13, %v5165_v19  ;;  %v350_v34 = vpop.xlane.xlu1 %349  ;;  %v348_v25 = vpop.xlane.xlu0 %347  ;;  %8031 = vst [vmem:[#allocation24_spill] sm:$0xff] %v5188_v54  ;;  %4156 = vmatpush3.bf16.msra.mxu0 %v4310_v2 }
 0x143   :  { %v5183_v55 = vmax.f32 %v5167_v0, %v350_v34  ;;  %v5186_v30 = vmax.f32 %v5169_v27, %v348_v25  ;;  %v4311_v25 = vld [vmem:[%s7835_s2 + $0x28] sm:$0xff]   ;;  %v5209_v0 = vld [vmem:[#allocation2 + $0x50] sm:$0xff] }
 0x144   :  { %4157 = vmatprep.subr.bf16.mxu0 %v4311_v25  ;;  %8033 = vst [vmem:[#allocation26_spill] sm:$0xff] %v5209_v0 }
 0x145   :  { %8030 = vst [vmem:[#allocation23_spill] sm:$0xff] %v5183_v55  ;;  %584 = vst.msk [vmem:[#allocation2 + $0x30] sm:$0xff] %vm7909_vm13, %v5183_v55  ;;  %465 = vperm.xlu0 %4290, %v5183_v55   ;;  %460 = vperm.xlu1 %4291, %v5186_v30  }
 0x146   :  { %583 = vst.msk [vmem:[#allocation2 + $0x28] sm:$0xff] %vm7909_vm13, %v5186_v30  ;;  %v354_v34 = vpop.xlane.xlu1 %353  ;;  %v352_v7 = vpop.xlane.xlu0 %351  ;;  %4158 = vmatpush3.bf16.msra.mxu0 %v4311_v25  ;;  %v385_v25 = vsub.f32 %v5125_v40, %v5128_v62  ;;  %v5251_v40 = vld [vmem:[%s7835_s2 + $0x38] sm:$0xff]  }
 0x147   :  { %v5204_v2 = vmax.f32 %v5188_v54, %v354_v34  ;;  %v5207_v26 = vmax.f32 %v5190_v57, %v352_v7  ;;  %v5224_v7 = vld [vmem:[%s7835_s2 + $0x30] sm:$0xff]   ;;  %8037 = vst [vmem:[#allocation30_spill] sm:$0xff] %v5251_v40 }
 0x148   :  { %8034 = vst [vmem:[#allocation27_spill] sm:$0xff] %v5224_v7  ;;  %4159 = vmatprep.subr.bf16.mxu0 %v5224_v7  ;;  %v401_v62 = vmul.f32 1.442695, %v385_v25 }
 0x149   :  { %8032 = vst [vmem:[#allocation25_spill] sm:$0xff] %v5204_v2  ;;  %586 = vst.msk [vmem:[#allocation2 + $0x40] sm:$0xff] %vm7909_vm13, %v5204_v2  ;;  %475 = vperm.xlu0 %4290, %v5204_v2   ;;  %470 = vperm.xlu1 %4291, %v5207_v26   ;;  %v5235_v2 = vld [vmem:[#allocation2 + $0x60] sm:$0xff] }
 0x14a   :  { %585 = vst.msk [vmem:[#allocation2 + $0x38] sm:$0xff] %vm7909_vm13, %v5207_v26  ;;  %v358_v34 = vpop.xlane.xlu1 %357  ;;  %v356_v55 = vpop.xlane.xlu0 %355  ;;  %8036 = vst [vmem:[#allocation29_spill] sm:$0xff] %v5235_v2  ;;  %4160 = vmatpush3.bf16.msra.mxu0 %v5224_v7  ;;  %4314 = vpow2.f32 %v401_v62 }
 0x14b   :  { %v5229_v54 = vmax.f32 %v5209_v0, %v358_v34  ;;  %v5232_v47 = vmax.f32 %v5211_v29, %v356_v55  ;;  %v387_v55 = vsub.f32 %v5132_v36, %v5144_v33  ;;  %4161 = vmatprep.subr.bf16.mxu0 %v5251_v40  ;;  %v388_v36 = vsub.f32 %v5148_v21, %v5165_v19 }
 0x14c   :  { %v390_v19 = vsub.f32 %v5169_v27, %v5186_v30  ;;  %v8044_v27 = vmov 1  }
 0x14d   :  { %8035 = vst [vmem:[#allocation28_spill] sm:$0xff] %v5229_v54  ;;  %588 = vst.msk [vmem:[#allocation2 + $0x50] sm:$0xff] %vm7909_vm13, %v5229_v54  ;;  %485 = vperm.xlu0 %4290, %v5229_v54   ;;  %480 = vperm.xlu1 %4291, %v5232_v47   ;;  %v5262_v54 = vld [vmem:[#allocation2 + $0x70] sm:$0xff]  ;;  %v407_v21 = vmul.f32 1.442695, %v388_v36  ;;  %v392_v36 = vsub.f32 %v5190_v57, %v5207_v26 }
 0x14e   :  { %587 = vst.msk [vmem:[#allocation2 + $0x48] sm:$0xff] %vm7909_vm13, %v5232_v47  ;;  %v362_v34 = vpop.xlane.xlu1 %361  ;;  %v360_v37 = vpop.xlane.xlu0 %359  ;;  %8039 = vst [vmem:[#allocation32_spill] sm:$0xff] %v5262_v54  ;;  %4162 = vmatpush3.bf16.msra.mxu0 %v5251_v40 }
 0x14f   :  { %v5256_v0 = vmax.f32 %v5235_v2, %v362_v34  ;;  %v5259_v7 = vmax.f32 %v5237_v46, %v360_v37  ;;  %v405_v37 = vmul.f32 1.442695, %v387_v55  ;;  %v5283_v2 = vld [vmem:[#allocation2 + $0x78] sm:$0xff]  ;;  %v5295_v55 = vld [vmem:[#allocation2] sm:$0xff]  ;;  %v415_v26 = vmul.f32 1.442695, %v392_v36 }
 0x150   :  { %8041 = vst [vmem:[#allocation34_spill] sm:$0xff] %v5295_v55 }
 0x151   :  { %8038 = vst [vmem:[#allocation31_spill] sm:$0xff] %v5256_v0  ;;  %590 = vst.msk [vmem:[#allocation2 + $0x60] sm:$0xff] %vm7909_vm13, %v5256_v0  ;;  %495 = vperm.xlu0 %4290, %v5256_v0   ;;  %490 = vperm.xlu1 %4291, %v5259_v7   ;;  %4316 = vpow2.f32 %v405_v37  ;;  %v411_v37 = vmul.f32 1.442695, %v390_v19  ;;  %v394_v19 = vsub.f32 %v5211_v29, %v5232_v47 }
 0x152   :  { %589 = vst.msk [vmem:[#allocation2 + $0x58] sm:$0xff] %vm7909_vm13, %v5259_v7  ;;  %v366_v33 = vpop.xlane.xlu1 %365  ;;  %v364_v34 = vpop.xlane.xlu0 %363  ;;  %4318 = vpow2.f32 %v407_v21  ;;  %v5372_v21 = vld [vmem:[#allocation2 + $0x10] sm:$0xff]  ;;  %v396_v36 = vsub.f32 %v5237_v46, %v5259_v7 }
 0x153   :  { %v5278_v40 = vmax.f32 %v5262_v54, %v366_v33  ;;  %v5281_v25 = vmax.f32 %v5264_v3, %v364_v34  ;;  %4320 = vpow2.f32 %v411_v37  ;;  %v419_v29 = vmul.f32 1.442695, %v394_v19  ;;  %v5396_v37 = vld [vmem:[#allocation2 + $0x20] sm:$0xff] }
 0x154   :  { %v5356_v28 = vpop.eup %4314  ;;  %4322 = vpow2.f32 %v415_v26  ;;  %v423_v7 = vmul.f32 1.442695, %v396_v36  ;;  %v5420_v26 = vld [vmem:[#allocation2 + $0x30] sm:$0xff] }
 0x155   :  { %8040 = vst [vmem:[#allocation33_spill] sm:$0xff] %v5278_v40  ;;  %592 = vst.msk [vmem:[#allocation2 + $0x70] sm:$0xff] %vm7909_vm13, %v5278_v40  ;;  %505 = vperm.xlu0 %4290, %v5278_v40   ;;  %500 = vperm.xlu1 %4291, %v5281_v25   ;;  %v8043_v40 = vmov 0.0   ;;  %4324 = vpow2.f32 %v419_v29  ;;  %v398_v19 = vsub.f32 %v5264_v3, %v5281_v25  ;;  %v5444_v29 = vld [vmem:[#allocation2 + $0x40] sm:$0xff] }
 0x156   :  { %591 = vst.msk [vmem:[#allocation2 + $0x68] sm:$0xff] %vm7909_vm13, %v5281_v25  ;;  %v1153_v62 = vpop.xlane.xlu1 %1152  ;;  %v368_v33 = vpop.xlane.xlu0 %367  ;;  %8047 = vst [vmem:[#allocation38_spill] sm:$0xff] %v5356_v28  ;;  %4326 = vpow2.f32 %v423_v7 }
 0x157   :  { %v5298_v34 = vmax.f32 %v5295_v55, %v1153_v62  ;;  %v5301_v0 = vmax.f32 %v5283_v2, %v368_v33  ;;  %56 = vst.msk [vmem:[#allocation4] sm:$0xff] %vm7907_vm7, %v8043_v40  ;;  %57 = vst.msk [vmem:[#allocation4 + $0x8] sm:$0xff] %vm7907_vm7, %v8043_v40  ;;  %v5348_v33 = vld [vmem:[#allocation2 + $0x8] sm:$0xff]  ;;  %v427_v25 = vmul.f32 1.442695, %v398_v19 }
 0x158   :  { %58 = vst.msk [vmem:[#allocation4 + $0x10] sm:$0xff] %vm7907_vm7, %v8043_v40  ;;  %59 = vst.msk [vmem:[#allocation4 + $0x18] sm:$0xff] %vm7907_vm7, %v8043_v40 }
 0x159   :  { %8042 = vst [vmem:[#allocation35_spill] sm:$0xff] %v5298_v34  ;;  %60 = vst.msk [vmem:[#allocation4 + $0x20] sm:$0xff] %vm7907_vm7, %v8043_v40  ;;  %4292 = vset.pattern.permute.xlu0 %v8044_v27  ;;  %510 = vperm.xlu1 %4291, %v5301_v0   ;;  %v400_v36 = vsub.f32 %v5283_v2, %v5301_v0  ;;  %4328 = vpow2.f32 %v427_v25 }
 0x15a   :  { %61 = vst.msk [vmem:[#allocation4 + $0x28] sm:$0xff] %vm7907_vm7, %v8043_v40  ;;  %62 = vst.msk [vmem:[#allocation4 + $0x30] sm:$0xff] %vm7907_vm7, %v8043_v40  ;;  %v1159_v62 = vpop.xlane.xlu1 %1158  ;;  %1250 = vperm.xlu0 %4292, %v5298_v34   ;;  %v1155_v30 = vpop.xlane.xlu0 %1154 }
 0x15b   :  { %63 = vst.msk [vmem:[#allocation4 + $0x38] sm:$0xff] %vm7907_vm7, %v8043_v40  ;;  %64 = vst.msk [vmem:[#allocation4 + $0x40] sm:$0xff] %vm7907_vm7, %v8043_v40  ;;  %v5354_v54 = vmax.f32 %v5348_v33, %v1155_v30  ;;  %v431_v2 = vmul.f32 1.442695, %v400_v36 }
 0x15c   :  { %65 = vst.msk [vmem:[#allocation4 + $0x48] sm:$0xff] %vm7907_vm7, %v8043_v40  ;;  %66 = vst.msk [vmem:[#allocation4 + $0x50] sm:$0xff] %vm7907_vm7, %v8043_v40 }
 0x15d   :  { %67 = vst.msk [vmem:[#allocation4 + $0x58] sm:$0xff] %vm7907_vm7, %v8043_v40  ;;  %68 = vst.msk [vmem:[#allocation4 + $0x60] sm:$0xff] %vm7907_vm7, %v8043_v40  ;;  %708 = vperm.xlu1 %4291, %v5356_v28   ;;  %v5380_v28 = vpop.eup %4316  ;;  %4330 = vpow2.f32 %v431_v2 }
 0x15e   :  { %69 = vst.msk [vmem:[#allocation4 + $0x68] sm:$0xff] %vm7907_vm7, %v8043_v40  ;;  %70 = vst.msk [vmem:[#allocation4 + $0x70] sm:$0xff] %vm7907_vm7, %v8043_v40  ;;  %v1163_v30 = vpop.xlane.xlu1 %1162 }
 0x15f   :  { %71 = vst.msk [vmem:[#allocation4 + $0x78] sm:$0xff] %vm7907_vm7, %v8043_v40  ;;  %v5345_v40 = vld [vmem:[#allocation2 + $0x18] sm:$0xff]  ;;  %8050 = vst [vmem:[#allocation41_spill] sm:$0xff] %v5380_v28 }
 0x160   :  { %1393 = vst.msk [vmem:[#allocation2] sm:$0xff] %vm7908_vm1, %v5298_v34  ;;  %8045 = vst [vmem:[#allocation36_spill] sm:$0xff] %v5345_v40  ;;  %v5351_v55 = vmax.f32 %v5345_v40, %v1159_v62  ;;  %v5369_v62 = vld [vmem:[#allocation2 + $0x28] sm:$0xff]  ;;  %v1157_v40 = vpop.xlane.xlu0 %1156 }
 0x161   :  { %593 = vst.msk [vmem:[#allocation2 + $0x78] sm:$0xff] %vm7909_vm13, %v5301_v0  ;;  %8048 = vst [vmem:[#allocation39_spill] sm:$0xff] %v5369_v62  ;;  %v5375_v57 = vmax.f32 %v5369_v62, %v1163_v30  ;;  %v5378_v34 = vmax.f32 %v5372_v21, %v1157_v40  ;;  %718 = vperm.xlu1 %4291, %v5380_v28   ;;  %v5393_v30 = vld [vmem:[#allocation2 + $0x38] sm:$0xff]  ;;  %v5404_v28 = vpop.eup %4318  ;;  %vm8086_vm13 = vcmp.gt.f32.partialorder %v4845_v17, 0.0 }
 0x162   :  { %8046 = vst [vmem:[#allocation37_spill] sm:$0xff] %v5351_v55  ;;  %1396 = vst.msk [vmem:[#allocation2 + $0x18] sm:$0xff] %vm7908_vm1, %v5351_v55  ;;  %1265 = vperm.xlu0 %4292, %v5351_v55   ;;  %v1167_v40 = vpop.xlane.xlu1 %1166 }
 0x163   :  { %1394 = vst.msk [vmem:[#allocation2 + $0x8] sm:$0xff] %vm7908_vm1, %v5354_v54  ;;  %8049 = vst [vmem:[#allocation40_spill] sm:$0xff] %v5375_v57  ;;  %v5399_v47 = vmax.f32 %v5393_v30, %v1167_v40  ;;  %v5417_v40 = vld [vmem:[#allocation2 + $0x48] sm:$0xff] }
 0x164   :  { %1398 = vst.msk [vmem:[#allocation2 + $0x28] sm:$0xff] %vm7908_vm1, %v5375_v57  ;;  %1395 = vst.msk [vmem:[#allocation2 + $0x10] sm:$0xff] %vm7908_vm1, %v5378_v34  ;;  %v1161_v62 = vpop.xlane.xlu0 %1160 }
 0x165   :  { %8051 = vst [vmem:[#allocation42_spill] sm:$0xff] %v5393_v30  ;;  %8052 = vst [vmem:[#allocation43_spill] sm:$0xff] %v5399_v47  ;;  %v5402_v55 = vmax.f32 %v5396_v37, %v1161_v62  ;;  %723 = vperm.xlu1 %4291, %v5404_v28  }
 0x166   :  { %1275 = vperm.xlu0 %4292, %v5375_v57   ;;  %8053 = vst [vmem:[#allocation44_spill] sm:$0xff] %v5404_v28  ;;  %1400 = vst.msk [vmem:[#allocation2 + $0x38] sm:$0xff] %vm7908_vm1, %v5399_v47  ;;  %v1171_v62 = vpop.xlane.xlu1 %1170  ;;  %v5428_v28 = vpop.eup %4320 }
 0x167   :  { %1397 = vst.msk [vmem:[#allocation2 + $0x20] sm:$0xff] %vm7908_vm1, %v5402_v55  ;;  %8054 = vst [vmem:[#allocation45_spill] sm:$0xff] %v5417_v40  ;;  %v5423_v46 = vmax.f32 %v5417_v40, %v1171_v62  ;;  %v5441_v62 = vld [vmem:[#allocation2 + $0x58] sm:$0xff] }
 0x168   :  { %v1165_v30 = vpop.xlane.xlu0 %1164  ;;  %8056 = vst [vmem:[#allocation47_spill] sm:$0xff] %v5428_v28  ;;  %8057 = vst [vmem:[#allocation48_spill] sm:$0xff] %v5441_v62 }
 0x169   :  { %8055 = vst [vmem:[#allocation46_spill] sm:$0xff] %v5423_v46  ;;  %v5426_v57 = vmax.f32 %v5420_v26, %v1165_v30  ;;  %1402 = vst.msk [vmem:[#allocation2 + $0x48] sm:$0xff] %vm7908_vm1, %v5423_v46  ;;  %733 = vperm.xlu1 %4291, %v5428_v28   ;;  %v5452_v28 = vpop.eup %4322 }
 0x16a   :  { %1285 = vperm.xlu0 %4292, %v5399_v47   ;;  %v1175_v30 = vpop.xlane.xlu1 %1174  ;;  %8060 = vst [vmem:[#allocation51_spill] sm:$0xff] %v5452_v28  ;;  %vm5580_vm7 = vmpackc.low %vm8081_vm12, %vm7910_vm8 }
 0x16b   :  { %1399 = vst.msk [vmem:[#allocation2 + $0x30] sm:$0xff] %vm7908_vm1, %v5426_v57  ;;  %v5447_v3 = vmax.f32 %v5441_v62, %v1175_v30  ;;  %v5466_v30 = vld [vmem:[#allocation2 + $0x50] sm:$0xff] }
 0x16c   :  { %v1169_v40 = vpop.xlane.xlu0 %1168  ;;  %8062 = vst [vmem:[#allocation53_spill] sm:$0xff] %v5466_v30 }
 0x16d   :  { %8058 = vst [vmem:[#allocation49_spill] sm:$0xff] %v5447_v3  ;;  %v5450_v47 = vmax.f32 %v5444_v29, %v1169_v40  ;;  %1404 = vst.msk [vmem:[#allocation2 + $0x58] sm:$0xff] %vm7908_vm1, %v5447_v3  ;;  %743 = vperm.xlu1 %4291, %v5452_v28   ;;  %v5463_v40 = vld [vmem:[#allocation2 + $0x68] sm:$0xff] }
 0x16e   :  { %1295 = vperm.xlu0 %4292, %v5423_v46   ;;  %v1179_v19 = vpop.xlane.xlu1 %1178  ;;  %8061 = vst [vmem:[#allocation52_spill] sm:$0xff] %v5463_v40  ;;  %v5474_v46 = vpop.eup %4324 }
 0x16f   :  { %8059 = vst [vmem:[#allocation50_spill] sm:$0xff] %v5450_v47  ;;  %1401 = vst.msk [vmem:[#allocation2 + $0x40] sm:$0xff] %vm7908_vm1, %v5450_v47  ;;  %v5469_v62 = vmax.f32 %v5463_v40, %v1179_v19  ;;  %v5496_v36 = vpop.eup %4326 }
 0x170   :  { %v1173_v7 = vpop.xlane.xlu0 %1172  ;;  %8065 = vst [vmem:[#allocation56_spill] sm:$0xff] %v5474_v46  ;;  %8070 = vst [vmem:[#allocation61_spill] sm:$0xff] %v5496_v36 }
 0x171   :  { %8063 = vst [vmem:[#allocation54_spill] sm:$0xff] %v5469_v62  ;;  %v5472_v0 = vmax.f32 %v5466_v30, %v1173_v7  ;;  %1406 = vst.msk [vmem:[#allocation2 + $0x68] sm:$0xff] %vm7908_vm1, %v5469_v62  ;;  %753 = vperm.xlu1 %4291, %v5474_v46   ;;  %v5485_v7 = vld [vmem:[#allocation2 + $0x78] sm:$0xff]  ;;  %v5513_v46 = vpop.eup %4328 }
 0x172   :  { %1305 = vperm.xlu0 %4292, %v5447_v3   ;;  %v1183_v19 = vpop.xlane.xlu1 %1182  ;;  %8066 = vst [vmem:[#allocation57_spill] sm:$0xff] %v5485_v7  ;;  %v5488_v3 = vld [vmem:[#allocation2 + $0x60] sm:$0xff]  ;;  %8073 = vst [vmem:[#allocation64_spill] sm:$0xff] %v5513_v46  ;;  %v5520_v2 = vpop.eup %4330 }
 0x173   :  { %8064 = vst [vmem:[#allocation55_spill] sm:$0xff] %v5472_v0  ;;  %1403 = vst.msk [vmem:[#allocation2 + $0x50] sm:$0xff] %vm7908_vm1, %v5472_v0  ;;  %v5491_v40 = vmax.f32 %v5485_v7, %v1183_v19 }
 0x174   :  { %8067 = vst [vmem:[#allocation58_spill] sm:$0xff] %v5488_v3  ;;  %v1177_v25 = vpop.xlane.xlu0 %1176  ;;  %8074 = vst [vmem:[#allocation65_spill] sm:$0xff] %v5520_v2 }
 0x175   :  { %8068 = vst [vmem:[#allocation59_spill] sm:$0xff] %v5491_v40  ;;  %v5494_v28 = vmax.f32 %v5488_v3, %v1177_v25  ;;  %1408 = vst.msk [vmem:[#allocation2 + $0x78] sm:$0xff] %vm7908_vm1, %v5491_v40  ;;  %763 = vperm.xlu1 %4291, %v5496_v36   ;;  %v5508_v25 = vld [vmem:[#allocation2 + $0x70] sm:$0xff] }
 0x176   :  { %1315 = vperm.xlu0 %4292, %v5469_v62   ;;  %8071 = vst [vmem:[#allocation62_spill] sm:$0xff] %v5508_v25 }
 0x177   :  { %8069 = vst [vmem:[#allocation60_spill] sm:$0xff] %v5494_v28  ;;  %1405 = vst.msk [vmem:[#allocation2 + $0x60] sm:$0xff] %vm7908_vm1, %v5494_v28 }
 0x178   :  { %v1181_v19 = vpop.xlane.xlu0 %1180 }
 0x179   :  { %v5511_v62 = vmax.f32 %v5508_v25, %v1181_v19  ;;  %773 = vperm.xlu1 %4291, %v5513_v46  }
 0x17a   :  { %1325 = vperm.xlu0 %4292, %v5491_v40  }
 0x17b   :  { %8072 = vst [vmem:[#allocation63_spill] sm:$0xff] %v5511_v62  ;;  %1407 = vst.msk [vmem:[#allocation2 + $0x70] sm:$0xff] %vm7908_vm1, %v5511_v62 }
 0x17c   :  { %vm8085_vm1 = vmmov %vm8081_vm12  ;;  %vm8088_vm12 = vcmp.gt.f32.partialorder %v4873_v31, 0.0 }
 0x17d   :  { %783 = vperm.xlu1 %4291, %v5520_v2  }
 0x181   :  { %4293 = vset.pattern.permute.xlu1 %v8044_v27 }
 0x182   :  { %1255 = vperm.xlu1 %4293, %v5354_v54  }
 0x186   :  { %1260 = vperm.xlu1 %4293, %v5378_v34  }
 0x18a   :  { %1270 = vperm.xlu1 %4293, %v5402_v55  }
 0x18e   :  { %1280 = vperm.xlu1 %4293, %v5426_v57  }
 0x192   :  { %1290 = vperm.xlu1 %4293, %v5450_v47  }
 0x196   :  { %1300 = vperm.xlu1 %4293, %v5472_v0  }
 0x19a   :  { %1310 = vperm.xlu1 %4293, %v5494_v28  }
 0x19e   :  { %1320 = vperm.xlu1 %4293, %v5511_v62  }
 0x1b8   :  { %v436_v19 = vpop.permute.xlu1 %435 }
 0x1b9   :  { %v513_v7 = vsub.f32 %v4816_v61, %v436_v19 }
 0x1bb   :  { %v529_v27 = vmul.f32 1.442695, %v513_v7 }
 0x1bc   :  { %v446_v40 = vpop.permute.xlu1 %445  ;;  %v441_v2 = vpop.permute.xlu0 %440 }
 0x1bd   :  { %4332 = vpow2.f32 %v529_v27  ;;  %v515_v46 = vsub.f32 %v4839_v14, %v446_v40  ;;  %v514_v36 = vsub.f32 %v4843_v15, %v441_v2  ;;  %v7914_v15 = vmov 2  }
 0x1be   :  { %4295 = vset.pattern.permute.xlu0 %v7914_v15 }
 0x1bf   :  { %v533_v25 = vmul.f32 1.442695, %v515_v46  ;;  %v531_v3 = vmul.f32 1.442695, %v514_v36 }
 0x1c0   :  { %v451_v30 = vpop.permute.xlu1 %450  ;;  %v456_v47 = vpop.permute.xlu0 %455 }
 0x1c1   :  { %4334 = vpow2.f32 %v533_v25  ;;  %v516_v28 = vsub.f32 %v4864_v41, %v451_v30  ;;  %v517_v62 = vsub.f32 %v4868_v42, %v456_v47 }
 0x1c2   :  { %4336 = vpow2.f32 %v531_v3 }
 0x1c3   :  { %v535_v0 = vmul.f32 1.442695, %v516_v28  ;;  %v537_v61 = vmul.f32 1.442695, %v517_v62 }
 0x1c4   :  { %v461_v7 = vpop.permute.xlu1 %460  ;;  %v466_v19 = vpop.permute.xlu0 %465 }
 0x1c5   :  { %4338 = vpow2.f32 %v535_v0  ;;  %v518_v27 = vsub.f32 %v4890_v58, %v461_v7  ;;  %v519_v14 = vsub.f32 %v4894_v59, %v466_v19 }
 0x1c6   :  { %4340 = vpow2.f32 %v537_v61 }
 0x1c7   :  { %v4333_v46 = vpop.eup %4332  ;;  %v539_v40 = vmul.f32 1.442695, %v518_v27  ;;  %v541_v36 = vmul.f32 1.442695, %v519_v14 }
 0x1c8   :  { %v471_v41 = vpop.permute.xlu1 %470  ;;  %v476_v30 = vpop.permute.xlu0 %475  ;;  %v561_v42 = vsel %vm7950_vm3, %v4333_v46, 0.0 }
 0x1c9   :  { %4342 = vpow2.f32 %v539_v40  ;;  %v520_v28 = vsub.f32 %v4911_v18, %v471_v41  ;;  %v521_v47 = vsub.f32 %v4915_v20, %v476_v30  ;;  %626 = vadd.xlane.f32.xlu0 %v561_v42  ;;  %v8075_v20 = vmov 0 }
 0x1ca   :  { %4344 = vpow2.f32 %v541_v36  ;;  %v8076_v20 = vsel %vm5554_vm0, 4294967295, %v8075_v20 }
 0x1cb   :  { %v4335_v58 = vpop.eup %4334  ;;  %v543_v59 = vmul.f32 1.442695, %v520_v28  ;;  %v545_v3 = vmul.f32 1.442695, %v521_v47  ;;  %8077 = vst [vmem:[#allocation66_spill] sm:$0xff] %v8076_v20 }
 0x1cc   :  { %v4337_v62 = vpop.eup %4336  ;;  %v481_v0 = vpop.permute.xlu1 %480  ;;  %v563_v25 = vsel %vm7911_vm4, %v4335_v58, 0.0  ;;  %vm8093_vm4 = vcmp.gt.f32.partialorder %v4858_v39, 0.0 }
 0x1cd   :  { %v486_v2 = vpop.permute.xlu0 %485  ;;  %4346 = vpow2.f32 %v543_v59  ;;  %v522_v61 = vsub.f32 %v4935_v49, %v481_v0  ;;  %630 = vadd.xlane.f32.xlu0 %v563_v25  ;;  %v562_v18 = vsel %vm7912_vm5, %v4337_v62, 0.0  ;;  %v3988_v19 = vpack.c.bf16 %v4337_v62, %v4333_v46 }
 0x1ce   :  { %v523_v7 = vsub.f32 %v4939_v50, %v486_v2  ;;  %4348 = vpow2.f32 %v545_v3  ;;  %628 = vadd.xlane.f32.xlu1 %v562_v18  ;;  %v8078_v50 = vmov 0  ;;  %vm8100_vm5 = vcmp.gt.f32.partialorder %v4876_v52, 0.0 }
 0x1cf   :  { %v4339_v27 = vpop.eup %4338  ;;  %v547_v14 = vmul.f32 1.442695, %v522_v61  ;;  %v8079_v50 = vsel %vm5562_vm15, 4294967295, %v8078_v50  ;;  %4163 = vmatprep.mubr.msk.bf16.mxu0 %vm5554_vm0, %v3988_v19 }
 0x1d0   :  { %v549_v49 = vmul.f32 1.442695, %v523_v7  ;;  %8080 = vst [vmem:[#allocation67_spill] sm:$0xff] %v8079_v50  ;;  %v4341_v40 = vpop.eup %4340  ;;  %v491_v36 = vpop.permute.xlu1 %490  ;;  %v564_v46 = vsel %vm7913_vm10, %v4339_v27, 0.0  ;;  %v3991_v30 = vpack.c.bf16 %v4339_v27, %v4335_v58 }
 0x1d1   :  { %v496_v41 = vpop.permute.xlu0 %495  ;;  %4350 = vpow2.f32 %v547_v14  ;;  %v524_v42 = vsub.f32 %v4957_v11, %v491_v36  ;;  %632 = vadd.xlane.f32.xlu0 %v564_v46  ;;  %v565_v47 = vsel %vm7910_vm8, %v4341_v40, 0.0  ;;  %v8082_v11 = vmov 0 }
 0x1d2   :  { %v525_v28 = vsub.f32 %v4961_v12, %v496_v41  ;;  %4352 = vpow2.f32 %v549_v49  ;;  %634 = vadd.xlane.f32.xlu1 %v565_v47  ;;  %4164 = vmatmul.mubr.msk.bf16.vlgmr.msra.gmra.mrb[0].mxu0 %vm5562_vm15, %v3991_v30  ;;  %v8083_v11 = vsel %vm5580_vm7, 4294967295, %v8082_v11 }
 0x1d3   :  { %v4343_v59 = vpop.eup %4342  ;;  %v551_v3 = vmul.f32 1.442695, %v524_v42  ;;  %8084 = vst [vmem:[#allocation68_spill] sm:$0xff] %v8083_v11 }
 0x1d4   :  { %v553_v62 = vmul.f32 1.442695, %v525_v28  ;;  %v4345_v12 = vpop.eup %4344  ;;  %v501_v58 = vpop.permute.xlu1 %500  ;;  %v566_v2 = vsel %vm8085_vm1, %v4343_v59, 0.0  ;;  %v3994_v25 = vpack.c.bf16 %v4343_v59, %v4341_v40  ;;  %vm8087_vm1 = vmmov %vm8086_vm13 }
 0x1d5   :  { %v506_v0 = vpop.permute.xlu0 %505  ;;  %4354 = vpow2.f32 %v551_v3  ;;  %v526_v61 = vsub.f32 %v5004_v63, %v501_v58  ;;  %636 = vadd.xlane.f32.xlu0 %v566_v2  ;;  %v567_v18 = vsel %vm8086_vm13, %v4345_v12, 0.0  ;;  %vm5596_vm8 = vmpackc.low %vm8088_vm12, %vm8087_vm1  ;;  %v8089_v63 = vmov 0 }
 0x1d6   :  { %v527_v7 = vsub.f32 %v5008_v10, %v506_v0  ;;  %4356 = vpow2.f32 %v553_v62  ;;  %638 = vadd.xlane.f32.xlu1 %v567_v18  ;;  %4167 = vmatprep.mubr.msk.bf16.mxu0 %vm5580_vm7, %v3994_v25  ;;  %v8090_v63 = vsel %vm5596_vm8, 4294967295, %v8089_v63  ;;  %vm8092_vm13 = vmmov %vm8088_vm12  ;;  %vm8095_vm12 = vcmp.gt.f32.partialorder %v4901_v4, 0.0 }
 0x1d7   :  { %v4347_v19 = vpop.eup %4346  ;;  %v555_v27 = vmul.f32 1.442695, %v526_v61  ;;  %8091 = vst [vmem:[#allocation69_spill] sm:$0xff] %v8090_v63  ;;  %vm8094_vm1 = vmmov %vm8093_vm4  ;;  %v8102_v61 = vmov 0 }
 0x1d8   :  { %v557_v14 = vmul.f32 1.442695, %v527_v7  ;;  %v4349_v10 = vpop.eup %4348  ;;  %v511_v49 = vpop.permute.xlu1 %510  ;;  %v568_v40 = vsel %vm8092_vm13, %v4347_v19, 0.0  ;;  %v3997_v36 = vpack.c.bf16 %v4347_v19, %v4345_v12  ;;  %vm5612_vm13 = vmpackc.low %vm8095_vm12, %vm8094_vm1 }
 0x1d9   :  { %4358 = vpow2.f32 %v555_v27  ;;  %v528_v41 = vsub.f32 %v5021_v23, %v511_v49  ;;  %640 = vadd.xlane.f32.xlu0 %v568_v40  ;;  %v569_v46 = vsel %vm8093_vm4, %v4349_v10, 0.0  ;;  %v1251_v30 = vpop.permute.xlu0 %1250  ;;  %v8096_v23 = vmov 0  ;;  %vm8099_vm4 = vmmov %vm8095_vm12 }
 0x1da   :  { %4360 = vpow2.f32 %v557_v14  ;;  %642 = vadd.xlane.f32.xlu1 %v569_v46  ;;  %v1328_v42 = vsub.f32 %v5025_v38, %v1251_v30  ;;  %4168 = vmatmul.mubr.msk.bf16.gmra.mrb[4].mxu0 %vm5596_vm8, %v3997_v36  ;;  %v8097_v23 = vsel %vm5612_vm13, 4294967295, %v8096_v23  ;;  %vm8101_vm1 = vmmov %vm8100_vm5  ;;  %v8105_v36 = vmov 0 }
 0x1db   :  { %v4351_v28 = vpop.eup %4350  ;;  %v559_v47 = vmul.f32 1.442695, %v528_v41  ;;  %8098 = vst [vmem:[#allocation70_spill] sm:$0xff] %v8097_v23  ;;  %vm5629_vm12 = vmpackc.low %vm152_vm11, %vm8101_vm1  ;;  %vm8111_vm1 = vcmp.gt.f32.partialorder %v4827_v9, 0.0 }
 0x1dc   :  { %v4353_v59 = vpop.eup %4352  ;;  %v1344_v3 = vmul.f32 1.442695, %v1328_v42  ;;  %v5616_v62 = vpop.permute.xlu1 %708  ;;  %v570_v38 = vsel %vm8099_vm4, %v4351_v28, 0.0  ;;  %v4000_v12 = vpack.c.bf16 %v4351_v28, %v4349_v10  ;;  %v8103_v61 = vsel %vm5629_vm12, 4294967295, %v8102_v61  ;;  %vm5663_vm4 = vmpackc.low %vm7941_vm6, %vm7951_vm14 }
 0x1dd   :  { %4362 = vpow2.f32 %v559_v47  ;;  %644 = vadd.xlane.f32.xlu0 %v570_v38  ;;  %v571_v58 = vsel %vm8100_vm5, %v4353_v59, 0.0  ;;  %8104 = vst [vmem:[#allocation71_spill] sm:$0xff] %v8103_v61  ;;  %vm5646_vm5 = vmpackc.low %vm154_vm9, %vm7952_vm2  ;;  %v8108_v38 = vmov 0 }
 0x1de   :  { %4364 = vpow2.f32 %v1344_v3  ;;  %646 = vadd.xlane.f32.xlu1 %v571_v58  ;;  %4171 = vmatprep.mubr.msk.bf16.mxu0 %vm5612_vm13, %v4000_v12  ;;  %v8106_v36 = vsel %vm5646_vm5, 4294967295, %v8105_v36  ;;  %v8109_v38 = vsel %vm5663_vm4, 4294967295, %v8108_v38 }
 0x1df   :  { %v4355_v25 = vpop.eup %4354  ;;  %8107 = vst [vmem:[#allocation72_spill] sm:$0xff] %v8106_v36  ;;  %8110 = vst [vmem:[#allocation73_spill] sm:$0xff] %v8109_v38  ;;  %v597_v36 = vld [vmem:[#allocation3 + $0x18] sm:$0xff] }
 0x1e0   :  { %v4357_v7 = vpop.eup %4356  ;;  %v5633_v19 = vpop.permute.xlu1 %718  ;;  %v572_v27 = vsel %vm152_vm11, %v4355_v25, 0.0 }
 0x1e1   :  { %v1266_v0 = vpop.permute.xlu0 %1265  ;;  %648 = vadd.xlane.f32.xlu0 %v572_v27  ;;  %v573_v14 = vsel %vm7952_vm2, %v4357_v7, 0.0 }
 0x1e2   :  { %v1331_v2 = vsub.f32 %v5038_v22, %v1266_v0  ;;  %v4003_v22 = vpack.c.bf16 %v4355_v25, %v4353_v59  ;;  %650 = vadd.xlane.f32.xlu1 %v573_v14 }
 0x1e3   :  { %v4359_v40 = vpop.eup %4358 }
 0x1e4   :  { %v1350_v18 = vmul.f32 1.442695, %v1331_v2  ;;  %4172 = vmatmul.mubr.msk.bf16.gmra.mrb[8].mxu0 %vm5629_vm12, %v4003_v22  ;;  %v4361_v41 = vpop.eup %4360  ;;  %v5650_v30 = vpop.permute.xlu1 %723  ;;  %v574_v42 = vsel %vm154_vm9, %v4359_v40, 0.0 }
 0x1e5   :  { %v1276_v10 = vpop.permute.xlu0 %1275  ;;  %652 = vadd.xlane.f32.xlu0 %v574_v42  ;;  %v575_v28 = vsel %vm7951_vm14, %v4361_v41, 0.0 }
 0x1e6   :  { %4366 = vpow2.f32 %v1350_v18  ;;  %v1333_v49 = vsub.f32 %v5051_v56, %v1276_v10  ;;  %v4006_v56 = vpack.c.bf16 %v4359_v40, %v4357_v7  ;;  %654 = vadd.xlane.f32.xlu1 %v575_v28 }
 0x1e7   :  { %v4363_v3 = vpop.eup %4362 }
 0x1e8   :  { %v1354_v46 = vmul.f32 1.442695, %v1333_v49  ;;  %4175 = vmatprep.mubr.msk.bf16.mxu0 %vm5646_vm5, %v4006_v56  ;;  %v5667_v12 = vpop.eup %4364  ;;  %v5669_v0 = vpop.permute.xlu1 %733  ;;  %v4009_v2 = vpack.c.bf16 %v4363_v3, %v4361_v41 }
 0x1e9   :  { %v1286_v47 = vpop.permute.xlu0 %1285  ;;  %v1376_v7 = vsel %vm7950_vm3, %v5667_v12, 0.0 }
 0x1ea   :  { %4368 = vpow2.f32 %v1354_v46  ;;  %v1335_v59 = vsub.f32 %v5064_v53, %v1286_v47  ;;  %v576_v53 = vsel %vm7941_vm6, %v4363_v3, 0.0  ;;  %1441 = vadd.xlane.f32.xlu1 %v1376_v7 }
 0x1eb   :  { %656 = vadd.xlane.f32.xlu0 %v576_v53 }
 0x1ec   :  { %v1358_v58 = vmul.f32 1.442695, %v1335_v59  ;;  %4176 = vmatmul.mubr.msk.bf16.gmra.mrb[12].mxu0 %vm5663_vm4, %v4009_v2  ;;  %v5681_v14 = vpop.permute.xlu1 %743 }
 0x1ed   :  { %v1296_v25 = vpop.permute.xlu0 %1295 }
 0x1ee   :  { %4370 = vpow2.f32 %v1358_v58  ;;  %v1337_v18 = vsub.f32 %v5077_v16, %v1296_v25 }
 0x1f0   :  { %v5679_v27 = vpop.eup %4366  ;;  %v1362_v22 = vmul.f32 1.442695, %v1337_v18  ;;  %v5689_v46 = vpop.permute.xlu1 %753 }
 0x1f1   :  { %v1306_v10 = vpop.permute.xlu0 %1305  ;;  %v1379_v49 = vsel %vm7913_vm10, %v5679_v27, 0.0  ;;  %vm8112_vm10 = vcmp.gt.f32.partialorder %v4873_v31, 0.0 }
 0x1f2   :  { %4372 = vpow2.f32 %v1362_v22  ;;  %v1339_v40 = vsub.f32 %v5090_v6, %v1306_v10  ;;  %1447 = vadd.xlane.f32.xlu1 %v1379_v49 }
 0x1f4   :  { %v5687_v41 = vpop.eup %4368  ;;  %v1366_v16 = vmul.f32 1.442695, %v1339_v40  ;;  %v5697_v3 = vpop.permute.xlu1 %763 }
 0x1f5   :  { %v1316_v42 = vpop.permute.xlu0 %1315  ;;  %v1381_v56 = vsel %vm8111_vm1, %v5687_v41, 0.0  ;;  %vm8113_vm1 = vcmp.gt.f32.partialorder %v4901_v4, 0.0 }
 0x1f6   :  { %4374 = vpow2.f32 %v1366_v16  ;;  %v1341_v28 = vsub.f32 %v5100_v5, %v1316_v42  ;;  %1451 = vadd.xlane.f32.xlu1 %v1381_v56 }
 0x1f8   :  { %v5695_v47 = vpop.eup %4370  ;;  %v1370_v59 = vmul.f32 1.442695, %v1341_v28  ;;  %v5705_v7 = vpop.permute.xlu1 %773 }
 0x1f9   :  { %v1326_v6 = vpop.permute.xlu0 %1325  ;;  %v1383_v58 = vsel %vm8112_vm10, %v5695_v47, 0.0  ;;  %vm8122_vm10 = vcmp.gt.f32.partialorder %v4800_v48, 0.0 }
 0x1fa   :  { %4376 = vpow2.f32 %v1370_v59  ;;  %v1343_v53 = vsub.f32 %v5110_v32, %v1326_v6  ;;  %1455 = vadd.xlane.f32.xlu1 %v1383_v58  ;;  %v8116_v6 = vld [vmem:[#allocation11_spill] sm:$0xff] }
 0x1fc   :  { %v5703_v2 = vpop.eup %4372  ;;  %v1374_v25 = vmul.f32 1.442695, %v1343_v53  ;;  %v5712_v22 = vpop.permute.xlu1 %783  ;;  %v8117_v53 = vsub.f32 %v5348_v33, %v5354_v54  ;;  %v8121_v54 = vsub.f32 %v5396_v37, %v5402_v55  ;;  %v8124_v55 = vsub.f32 %v5420_v26, %v5426_v57  ;;  %v8127_v57 = vld [vmem:[#allocation50_spill] sm:$0xff] }
 0x1fd   :  { %v1385_v5 = vsel %vm8113_vm1, %v5703_v2, 0.0  ;;  %vm8125_vm1 = vcmp.gt.f32.partialorder %v4792_v45, 0.0  ;;  %v8128_v26 = vsub.f32 %v5444_v29, %v8127_v57  ;;  %v8131_v29 = vld [vmem:[#allocation53_spill] sm:$0xff] }
 0x1fe   :  { %4378 = vpow2.f32 %v1374_v25  ;;  %1459 = vadd.xlane.f32.xlu1 %v1385_v5  ;;  %v1218_v25 = vmul.f32 1.442695, %v8117_v53  ;;  %v1224_v33 = vmul.f32 1.442695, %v8121_v54  ;;  %v1228_v37 = vmul.f32 1.442695, %v8124_v55 }
 0x200   :  { %v5710_v18 = vpop.eup %4374 }
 0x201   :  { %v1387_v32 = vsel %vm152_vm11, %v5710_v18, 0.0  ;;  %v1256_v49 = vpop.permute.xlu1 %1255 }
 0x202   :  { %1463 = vadd.xlane.f32.xlu1 %v1387_v32  ;;  %v1329_v16 = vsub.f32 %v5033_v43, %v1256_v49  ;;  %v8118_v43 = vld [vmem:[#allocation12_spill] sm:$0xff] }
 0x204   :  { %v5717_v10 = vpop.eup %4376  ;;  %v1346_v56 = vmul.f32 1.442695, %v1329_v16 }
 0x205   :  { %8114 = vst [vmem:[#allocation74_spill] sm:$0xff] %v5717_v10  ;;  %v1389_v40 = vsel %vm154_vm9, %v5717_v10, 0.0  ;;  %v1261_v28 = vpop.permute.xlu1 %1260 }
 0x206   :  { %1467 = vadd.xlane.f32.xlu1 %v1389_v40  ;;  %4380 = vpow2.f32 %v1346_v56  ;;  %v1330_v58 = vsub.f32 %v8116_v6, %v1261_v28  ;;  %v8119_v40 = vsub.f32 %v5372_v21, %v5378_v34  ;;  %v8120_v56 = vld [vmem:[#allocation13_spill] sm:$0xff]  ;;  %v8123_v34 = vld [vmem:[#allocation14_spill] sm:$0xff] }
 0x208   :  { %v5723_v42 = vpop.eup %4378  ;;  %v1348_v5 = vmul.f32 1.442695, %v1330_v58  ;;  %v1220_v16 = vmul.f32 1.442695, %v8119_v40 }
 0x209   :  { %8115 = vst [vmem:[#allocation75_spill] sm:$0xff] %v5723_v42  ;;  %v1391_v59 = vsel %vm7941_vm6, %v5723_v42, 0.0  ;;  %v1271_v32 = vpop.permute.xlu1 %1270 }
 0x20a   :  { %1471 = vadd.xlane.f32.xlu1 %v1391_v59  ;;  %4382 = vpow2.f32 %v1348_v5  ;;  %v1332_v49 = vsub.f32 %v8118_v43, %v1271_v32  ;;  %v8153_v32 = vld [vmem:[#allocation21_spill] sm:$0xff] }
 0x20b   :  { %4384 = vpow2.f32 %v1218_v25 }
 0x20c   :  { %v1352_v15 = vmul.f32 1.442695, %v1332_v49  ;;  %v8126_v49 = vld [vmem:[#allocation15_spill] sm:$0xff] }
 0x20d   :  { %v1281_v24 = vpop.permute.xlu1 %1280 }
 0x20e   :  { %4386 = vpow2.f32 %v1352_v15  ;;  %v1334_v28 = vsub.f32 %v8120_v56, %v1281_v24  ;;  %v1232_v56 = vmul.f32 1.442695, %v8128_v26 }
 0x20f   :  { %4388 = vpow2.f32 %v1220_v16 }
 0x210   :  { %v4381_v59 = vpop.eup %4380  ;;  %v1356_v6 = vmul.f32 1.442695, %v1334_v28 }
 0x211   :  { %v1291_v58 = vpop.permute.xlu1 %1290  ;;  %v1377_v53 = vsel %vm8122_vm10, %v4381_v59, 0.0  ;;  %v4012_v25 = vpack.c.bf16 %v4381_v59, %v5667_v12  ;;  %vm8129_vm10 = vcmp.gt.f32.partialorder %v4812_v60, 0.0 }
 0x212   :  { %4390 = vpow2.f32 %v1356_v6  ;;  %v1336_v21 = vsub.f32 %v8123_v34, %v1291_v58  ;;  %1443 = vadd.xlane.f32.xlu0 %v1377_v53  ;;  %v8130_v58 = vld [vmem:[#allocation16_spill] sm:$0xff]  ;;  %v8132_v34 = vld [vmem:[#allocation55_spill] sm:$0xff] }
 0x213   :  { %4195 = vmatprep.mubr.msk.bf16.mxu1 %vm5554_vm0, %v4012_v25  ;;  %4392 = vpow2.f32 %v1224_v33 }
 0x214   :  { %v5746_v24 = vpop.eup %4382  ;;  %v1360_v15 = vmul.f32 1.442695, %v1336_v21  ;;  %v8133_v21 = vsub.f32 %v8131_v29, %v8132_v34  ;;  %v8149_v29 = vld [vmem:[#allocation18_spill] sm:$0xff] }
 0x215   :  { %v1301_v5 = vpop.permute.xlu1 %1300  ;;  %v1378_v12 = vsel %vm8125_vm1, %v5746_v24, 0.0  ;;  %v5756_v43 = vpop.eup %4384  ;;  %vm8134_vm1 = vcmp.gt.f32.partialorder %v4845_v17, 0.0 }
 0x216   :  { %4394 = vpow2.f32 %v1360_v15  ;;  %v1338_v40 = vsub.f32 %v8126_v49, %v1301_v5  ;;  %1445 = vadd.xlane.f32.xlu0 %v1378_v12  ;;  %v1236_v55 = vmul.f32 1.442695, %v8133_v21  ;;  %v8150_v12 = vld [vmem:[#allocation19_spill] sm:$0xff] }
 0x217   :  { %4396 = vpow2.f32 %v1228_v37 }
 0x218   :  { %v5760_v16 = vpop.eup %4386  ;;  %v1364_v28 = vmul.f32 1.442695, %v1338_v40  ;;  %v8135_v40 = vld [vmem:[#allocation17_spill] sm:$0xff] }
 0x219   :  { %v1311_v59 = vpop.permute.xlu1 %1310  ;;  %v1380_v54 = vsel %vm8129_vm10, %v5760_v16, 0.0  ;;  %v5770_v6 = vpop.eup %4388  ;;  %vm8139_vm10 = vcmp.gt.f32.partialorder %v4858_v39, 0.0 }
 0x21a   :  { %4398 = vpow2.f32 %v1364_v28  ;;  %v1340_v53 = vsub.f32 %v8130_v58, %v1311_v59  ;;  %1449 = vadd.xlane.f32.xlu0 %v1380_v54  ;;  %v8137_v28 = vld [vmem:[#allocation60_spill] sm:$0xff] }
 0x21b   :  { %1528 = vperm.xlu1 %4293, %v5756_v43   ;;  %4400 = vpow2.f32 %v1232_v56  ;;  %v8136_v56 = vld [vmem:[#allocation58_spill] sm:$0xff] }
 0x21c   :  { %v5774_v25 = vpop.eup %4390  ;;  %v1368_v37 = vmul.f32 1.442695, %v1340_v53  ;;  %v8138_v59 = vsub.f32 %v8136_v56, %v8137_v28 }
 0x21d   :  { %v1321_v15 = vpop.permute.xlu1 %1320  ;;  %v1382_v5 = vsel %vm8134_vm1, %v5774_v25, 0.0  ;;  %v5784_v49 = vpop.eup %4392  ;;  %vm8144_vm1 = vcmp.gt.f32.partialorder %v4876_v52, 0.0 }
 0x21e   :  { %4402 = vpow2.f32 %v1368_v37  ;;  %v1342_v57 = vsub.f32 %v8135_v40, %v1321_v15  ;;  %1453 = vadd.xlane.f32.xlu0 %v1382_v5  ;;  %v1240_v54 = vmul.f32 1.442695, %v8138_v59  ;;  %v8142_v37 = vld [vmem:[#allocation63_spill] sm:$0xff] }
 0x21f   :  { %1533 = vperm.xlu1 %4293, %v5770_v6   ;;  %4404 = vpow2.f32 %v1236_v55  ;;  %v8141_v55 = vld [vmem:[#allocation62_spill] sm:$0xff] }
 0x220   :  { %v5788_v26 = vpop.eup %4394  ;;  %v1372_v58 = vmul.f32 1.442695, %v1342_v57  ;;  %v8143_v15 = vsub.f32 %v8141_v55, %v8142_v37  ;;  %v4603_v37 = vld [vmem:[%s7835_s2 + $0x10] sm:$0xff]   ;;  %v4605_v57 = vld [vmem:[%s7835_s2 + $0x8] sm:$0xff]  }
 0x221   :  { %v1384_v53 = vsel %vm8139_vm10, %v5788_v26, 0.0  ;;  %v5798_v34 = vpop.eup %4396  ;;  %vm8167_vm10 = vcmask 7168  }
 0x222   :  { %4406 = vpow2.f32 %v1372_v58  ;;  %1457 = vadd.xlane.f32.xlu0 %v1384_v53  ;;  %v1244_v5 = vmul.f32 1.442695, %v8143_v15 }
 0x223   :  { %1543 = vperm.xlu1 %4293, %v5784_v49   ;;  %4408 = vpow2.f32 %v1240_v54  ;;  %v8148_v54 = vld [vmem:[#allocation27_spill] sm:$0xff] }
 0x224   :  { %v5801_v21 = vpop.eup %4398  ;;  %4410 = vpow2.f32 %v1244_v5 }
 0x225   :  { %8140 = vst [vmem:[#allocation11_spill] sm:$0xff] %v5801_v21  ;;  %v1386_v40 = vsel %vm8144_vm1, %v5801_v21, 0.0  ;;  %v5811_v56 = vpop.eup %4400  ;;  %vm8173_vm1 = vmmov %vm8167_vm10 }
 0x226   :  { %1461 = vadd.xlane.f32.xlu0 %v1386_v40  ;;  %v4602_v40 = vld [vmem:[%s7835_s2] sm:$0xff]   ;;  %vm8213_vm6 = vmmov %vm8173_vm1 }
 0x227   :  { %1553 = vperm.xlu1 %4293, %v5798_v34  }
 0x228   :  { %v5814_v28 = vpop.eup %4402 }
 0x229   :  { %8145 = vst [vmem:[#allocation12_spill] sm:$0xff] %v5814_v28  ;;  %v1388_v59 = vsel %vm7952_vm2, %v5814_v28, 0.0  ;;  %v5821_v58 = vpop.eup %4404 }
 0x22a   :  { %1465 = vadd.xlane.f32.xlu0 %v1388_v59  ;;  %v8147_v59 = vmov 2  }
 0x22b   :  { %1563 = vperm.xlu1 %4293, %v5811_v56  }
 0x22c   :  { %v5824_v53 = vpop.eup %4406 }
 0x22d   :  { %8146 = vst [vmem:[#allocation13_spill] sm:$0xff] %v5824_v53  ;;  %v1390_v55 = vsel %vm7951_vm14, %v5824_v53, 0.0  ;;  %v5831_v15 = vpop.eup %4408  ;;  %v594_v53 = vld [vmem:[#allocation3] sm:$0xff] }
 0x22e   :  { %1469 = vadd.xlane.f32.xlu0 %v1390_v55  ;;  %v5834_v5 = vpop.eup %4410  ;;  %v4604_v55 = vld [vmem:[%s7835_s2 + $0x20] sm:$0xff]  }
 0x22f   :  { %1573 = vperm.xlu1 %4293, %v5821_v58  }
 0x233   :  { %1583 = vperm.xlu1 %4293, %v5831_v15  }
 0x237   :  { %1593 = vperm.xlu1 %4293, %v5834_v5  }
 0x23b   :  { %1625 = vrot.lane.b32.xlu1 %v4602_v40, %s4655_s22  ;;  %v4606_v40 = vld [vmem:[%s7832_s0] sm:$0xff] }
 0x23c   :  { %4294 = vset.pattern.permute.xlu1 %v8147_v59 }
 0x23f   :  { %1629 = vrot.lane.b32.xlu1 %v4603_v37, %s4655_s22  ;;  %v4607_v37 = vld [vmem:[%s7835_s2 + $0x18] sm:$0xff]  }
 0x243   :  { %1633 = vrot.lane.b32.xlu1 %v4604_v55, %s4655_s22  ;;  %v8151_v55 = vsub.f32 %v8149_v29, %v8150_v12  ;;  %v4610_v12 = vld [vmem:[%s7832_s0 + $0x18] sm:$0xff]  ;;  %v8155_v29 = vld [vmem:[#allocation30_spill] sm:$0xff] }
 0x244   :  { %1627 = vrot.lane.b32.xlu0 %v4605_v57, %s4655_s22  ;;  %v4609_v57 = vld [vmem:[%s7835_s2 + $0x28] sm:$0xff]  }
 0x245   :  { %v403_v33 = vmul.f32 1.442695, %v8151_v55  ;;  %v8157_v55 = vld [vmem:[#allocation23_spill] sm:$0xff] }
 0x247   :  { %1637 = vrot.lane.b32.xlu1 %v8148_v54, %s4655_s22  ;;  %v4608_v54 = vld [vmem:[%s7832_s0 + $0x10] sm:$0xff]  ;;  %4412 = vpow2.f32 %v403_v33  ;;  %v4611_v33 = vld [vmem:[%s7832_s0 + $0x28] sm:$0xff] }
 0x248   :  { %1631 = vrot.lane.b32.xlu0 %v4607_v37, %s4655_s22  ;;  %v8156_v37 = vld [vmem:[#allocation22_spill] sm:$0xff] }
 0x24b   :  { %1844 = vperm.xlu1 %4294, %v4606_v40   ;;  %v8152_v40 = vld [vmem:[#allocation20_spill] sm:$0xff] }
 0x24c   :  { %1635 = vrot.lane.b32.xlu0 %v4609_v57, %s4655_s22  ;;  %v8154_v59 = vsub.f32 %v8152_v40, %v8153_v32  ;;  %v4612_v32 = vld [vmem:[%s7832_s0 + $0x8] sm:$0xff]  ;;  %v8160_v57 = vld [vmem:[#allocation25_spill] sm:$0xff] }
 0x24e   :  { %v409_v20 = vmul.f32 1.442695, %v8154_v59  ;;  %v8159_v59 = vld [vmem:[#allocation24_spill] sm:$0xff] }
 0x24f   :  { %1852 = vperm.xlu1 %4294, %v4608_v54   ;;  %v8158_v54 = vsub.f32 %v8156_v37, %v8157_v55  ;;  %v8161_v40 = vsub.f32 %v8159_v59, %v8160_v57  ;;  %v596_v55 = vld [vmem:[#allocation3 + $0x10] sm:$0xff]  ;;  %v8165_v59 = vld [vmem:[#allocation28_spill] sm:$0xff] }
 0x250   :  { %1639 = vrot.lane.b32.xlu0 %v8155_v29, %s4655_s22  ;;  %4414 = vpow2.f32 %v409_v20 }
 0x251   :  { %v413_v38 = vmul.f32 1.442695, %v8158_v54  ;;  %v417_v20 = vmul.f32 1.442695, %v8161_v40  ;;  %v5886_v54 = vpop.eup %4412  ;;  %v8168_v40 = vld [vmem:[#allocation41_spill] sm:$0xff] }
 0x252   :  { %8163 = vst [vmem:[#allocation14_spill] sm:$0xff] %v5886_v54 }
 0x253   :  { %1856 = vperm.xlu1 %4294, %v4610_v12   ;;  %4416 = vpow2.f32 %v413_v38  ;;  %v8162_v12 = vld [vmem:[#allocation38_spill] sm:$0xff]  ;;  %v4614_v38 = vld [vmem:[%s7832_s0 + $0x20] sm:$0xff] }
 0x254   :  { %1848 = vperm.xlu0 %4295, %v4612_v32   ;;  %v610_v29 = vmul.f32 %v8162_v12, %v594_v53  ;;  %4418 = vpow2.f32 %v417_v20  ;;  %v8164_v32 = vld [vmem:[#allocation26_spill] sm:$0xff]  ;;  %v612_v12 = vmul.f32 %v8168_v40, %v596_v55  ;;  %v8171_v55 = vld [vmem:[#allocation31_spill] sm:$0xff]  ;;  %v8174_v40 = vld [vmem:[#allocation44_spill] sm:$0xff] }
 0x255   :  { %v8166_v53 = vsub.f32 %v8164_v32, %v8165_v59  ;;  %v4615_v20 = vld [vmem:[%s7832_s0 + $0x48] sm:$0xff] }
 0x256   :  { %v627_v37 = vpop.xlane.xlu0 %626 }
 0x257   :  { %1864 = vperm.xlu1 %4294, %v4611_v33   ;;  %v658_v42 = vadd.f32 %v627_v37, %v610_v29  ;;  %v4613_v33 = vld [vmem:[%s7832_s0 + $0x38] sm:$0xff]  ;;  %v421_v57 = vmul.f32 1.442695, %v8166_v53  ;;  %v611_v29 = vmul.f32 %v5886_v54, %v595_v51  ;;  %v8170_v51 = vld [vmem:[#allocation29_spill] sm:$0xff] }
 0x258   :  { %1860 = vperm.xlu0 %4295, %v4614_v38   ;;  %v598_v38 = vld [vmem:[#allocation3 + $0x20] sm:$0xff]  ;;  %v8172_v59 = vsub.f32 %v8170_v51, %v8171_v55 }
 0x259   :  { %674 = vst.msk [vmem:[#allocation3] sm:$0xff] %vm8167_vm10, %v658_v42  ;;  %v4616_v42 = vld [vmem:[%s7832_s0 + $0x30] sm:$0xff]  ;;  %4420 = vpow2.f32 %v421_v57  ;;  %vm8175_vm10 = vmmov %vm8173_vm1  ;;  %v4617_v57 = vld [vmem:[%s7832_s0 + $0x58] sm:$0xff] }
 0x25a   :  { %v631_v37 = vpop.xlane.xlu0 %630  ;;  %v425_v53 = vmul.f32 1.442695, %v8172_v59  ;;  %v8180_v59 = vld [vmem:[#allocation47_spill] sm:$0xff] }
 0x25b   :  { %1872 = vperm.xlu1 %4294, %v4613_v33   ;;  %v5900_v33 = vpop.eup %4414  ;;  %v629_v28 = vpop.xlane.xlu1 %628  ;;  %v660_v10 = vadd.f32 %v631_v37, %v612_v12  ;;  %v613_v12 = vmul.f32 %v8174_v40, %v597_v36  ;;  %v4618_v36 = vld [vmem:[%s7832_s0 + $0x40] sm:$0xff] }
 0x25c   :  { %8169 = vst [vmem:[#allocation15_spill] sm:$0xff] %v5900_v33  ;;  %v659_v32 = vadd.f32 %v629_v28, %v611_v29  ;;  %1868 = vperm.xlu0 %4295, %v4616_v42   ;;  %v614_v37 = vmul.f32 %v5900_v33, %v598_v38  ;;  %v599_v28 = vld [vmem:[#allocation3 + $0x28] sm:$0xff]  ;;  %v600_v42 = vld [vmem:[#allocation3 + $0x30] sm:$0xff]  ;;  %4422 = vpow2.f32 %v425_v53  ;;  %v8178_v38 = vld [vmem:[#allocation33_spill] sm:$0xff] }
 0x25d   :  { %676 = vst.msk [vmem:[#allocation3 + $0x10] sm:$0xff] %vm8173_vm1, %v660_v10  ;;  %v5915_v29 = vpop.eup %4416  ;;  %v8177_v10 = vld [vmem:[#allocation32_spill] sm:$0xff]  ;;  %v615_v40 = vmul.f32 %v8180_v59, %v599_v28  ;;  %v4619_v53 = vld [vmem:[%s7832_s0 + $0x68] sm:$0xff]  ;;  %v8183_v28 = vld [vmem:[#allocation51_spill] sm:$0xff] }
 0x25e   :  { %675 = vst.msk [vmem:[#allocation3 + $0x8] sm:$0xff] %vm8175_vm10, %v659_v32  ;;  %8176 = vst [vmem:[#allocation50_spill] sm:$0xff] %v5915_v29  ;;  %v8179_v32 = vsub.f32 %v8177_v10, %v8178_v38 }
 0x25f   :  { %1880 = vperm.xlu1 %4294, %v4615_v20   ;;  %v633_v20 = vpop.xlane.xlu0 %632  ;;  %v635_v54 = vpop.xlane.xlu1 %634  ;;  %vm8181_vm10 = vmmov %vm8173_vm1 }
 0x260   :  { %v661_v13 = vadd.f32 %v633_v20, %v613_v12  ;;  %v662_v51 = vadd.f32 %v635_v54, %v614_v37  ;;  %1876 = vperm.xlu0 %4295, %v4618_v36   ;;  %v429_v55 = vmul.f32 1.442695, %v8179_v32  ;;  %v616_v12 = vmul.f32 %v5915_v29, %v600_v42  ;;  %v601_v54 = vld [vmem:[#allocation3 + $0x38] sm:$0xff]  ;;  %v5930_v37 = vpop.eup %4418  ;;  %v602_v36 = vld [vmem:[#allocation3 + $0x40] sm:$0xff]  ;;  %v603_v32 = vld [vmem:[#allocation3 + $0x48] sm:$0xff] }
 0x261   :  { %8182 = vst [vmem:[#allocation16_spill] sm:$0xff] %v5930_v37  ;;  %v617_v42 = vmul.f32 %v8183_v28, %v601_v54  ;;  %v8189_v54 = vld [vmem:[#allocation56_spill] sm:$0xff] }
 0x262   :  { %677 = vst.msk [vmem:[#allocation3 + $0x18] sm:$0xff] %vm8173_vm1, %v661_v13  ;;  %v4620_v13 = vld [vmem:[%s7832_s0 + $0x50] sm:$0xff]  ;;  %4424 = vpow2.f32 %v429_v55 }
 0x263   :  { %1888 = vperm.xlu1 %4294, %v4617_v57   ;;  %678 = vst.msk [vmem:[#allocation3 + $0x20] sm:$0xff] %vm8181_vm10, %v662_v51  ;;  %v637_v20 = vpop.xlane.xlu0 %636  ;;  %v639_v57 = vpop.xlane.xlu1 %638  ;;  %vm8184_vm10 = vmmov %vm8173_vm1  ;;  %v618_v51 = vmul.f32 %v5930_v37, %v602_v36  ;;  %v619_v36 = vmul.f32 %v8189_v54, %v603_v32  ;;  %v8195_v32 = vld [vmem:[#allocation61_spill] sm:$0xff]  ;;  %v607_v54 = vld [vmem:[#allocation3 + $0x68] sm:$0xff] }
 0x264   :  { %v663_v33 = vadd.f32 %v637_v20, %v615_v40  ;;  %v664_v10 = vadd.f32 %v639_v57, %v616_v12  ;;  %1884 = vperm.xlu0 %4295, %v4620_v13   ;;  %v5942_v59 = vpop.eup %4420  ;;  %v8186_v40 = vld [vmem:[#allocation34_spill] sm:$0xff]  ;;  %v8187_v12 = vld [vmem:[#allocation35_spill] sm:$0xff] }
 0x265   :  { %8185 = vst [vmem:[#allocation53_spill] sm:$0xff] %v5942_v59  ;;  %v8188_v20 = vsub.f32 %v8186_v40, %v8187_v12  ;;  %v604_v13 = vld [vmem:[#allocation3 + $0x50] sm:$0xff]  ;;  %v605_v40 = vld [vmem:[#allocation3 + $0x58] sm:$0xff] }
 0x266   :  { %679 = vst.msk [vmem:[#allocation3 + $0x28] sm:$0xff] %vm8173_vm1, %v663_v33  ;;  %v4621_v33 = vld [vmem:[%s7832_s0 + $0x60] sm:$0xff]  ;;  %v5954_v12 = vpop.eup %4422 }
 0x267   :  { %1896 = vperm.xlu1 %4294, %v4619_v53   ;;  %680 = vst.msk [vmem:[#allocation3 + $0x30] sm:$0xff] %vm8184_vm10, %v664_v10  ;;  %v641_v38 = vpop.xlane.xlu0 %640  ;;  %v1216_v57 = vmul.f32 1.442695, %v8188_v20  ;;  %v643_v53 = vpop.xlane.xlu1 %642  ;;  %vm8190_vm10 = vmmov %vm8173_vm1  ;;  %v620_v10 = vmul.f32 %v5942_v59, %v604_v13  ;;  %v621_v13 = vmul.f32 %v8195_v32, %v605_v40  ;;  %v609_v32 = vld [vmem:[#allocation3 + $0x78] sm:$0xff] }
 0x268   :  { %v665_v29 = vadd.f32 %v641_v38, %v617_v42  ;;  %v666_v55 = vadd.f32 %v643_v53, %v618_v51  ;;  %1892 = vperm.xlu0 %4295, %v4621_v33   ;;  %8191 = vst [vmem:[#allocation55_spill] sm:$0xff] %v5954_v12  ;;  %v8192_v42 = vld [vmem:[#allocation36_spill] sm:$0xff]  ;;  %v8193_v51 = vld [vmem:[#allocation37_spill] sm:$0xff] }
 0x269   :  { %4426 = vpow2.f32 %v1216_v57  ;;  %v8194_v38 = vsub.f32 %v8192_v42, %v8193_v51  ;;  %v606_v33 = vld [vmem:[#allocation3 + $0x60] sm:$0xff] }
 0x26a   :  { %681 = vst.msk [vmem:[#allocation3 + $0x38] sm:$0xff] %vm8173_vm1, %v665_v29  ;;  %v4622_v29 = vld [vmem:[%s7832_s0 + $0x70] sm:$0xff]  ;;  %v622_v57 = vmul.f32 %v5954_v12, %v606_v33 }
 0x26b   :  { %682 = vst.msk [vmem:[#allocation3 + $0x40] sm:$0xff] %vm8190_vm10, %v666_v55  ;;  %v645_v28 = vpop.xlane.xlu0 %644  ;;  %v1222_v20 = vmul.f32 1.442695, %v8194_v38  ;;  %v647_v53 = vpop.xlane.xlu1 %646  ;;  %vm8196_vm10 = vmmov %vm8173_vm1  ;;  %v8204_v12 = vld [vmem:[#allocation43_spill] sm:$0xff] }
 0x26c   :  { %v667_v37 = vadd.f32 %v645_v28, %v619_v36  ;;  %v668_v61 = vadd.f32 %v647_v53, %v620_v10  ;;  %1900 = vperm.xlu0 %4295, %v4622_v29   ;;  %v5966_v42 = vpop.eup %4424  ;;  %v8198_v36 = vld [vmem:[#allocation39_spill] sm:$0xff]  ;;  %v8199_v10 = vld [vmem:[#allocation40_spill] sm:$0xff] }
 0x26d   :  { %8197 = vst [vmem:[#allocation17_spill] sm:$0xff] %v5966_v42  ;;  %4428 = vpow2.f32 %v1222_v20  ;;  %v8200_v28 = vsub.f32 %v8198_v36, %v8199_v10  ;;  %v608_v29 = vld [vmem:[#allocation3 + $0x70] sm:$0xff]  ;;  %v8203_v20 = vld [vmem:[#allocation42_spill] sm:$0xff] }
 0x26e   :  { %683 = vst.msk [vmem:[#allocation3 + $0x48] sm:$0xff] %vm8173_vm1, %v667_v37  ;;  %v8201_v37 = vld [vmem:[#allocation64_spill] sm:$0xff]  ;;  %v8205_v21 = vsub.f32 %v8203_v20, %v8204_v12 }
 0x26f   :  { %684 = vst.msk [vmem:[#allocation3 + $0x50] sm:$0xff] %vm8196_vm10, %v668_v61  ;;  %v649_v55 = vpop.xlane.xlu0 %648  ;;  %v1226_v51 = vmul.f32 1.442695, %v8200_v28  ;;  %v651_v38 = vpop.xlane.xlu1 %650  ;;  %v623_v40 = vmul.f32 %v8201_v37, %v607_v54  ;;  %vm8202_vm10 = vmmov %vm8173_vm1  ;;  %v624_v61 = vmul.f32 %v5966_v42, %v608_v29  ;;  %v8207_v54 = vld [vmem:[#allocation65_spill] sm:$0xff]  ;;  %v8210_v29 = vld [vmem:[#allocation46_spill] sm:$0xff] }
 0x270   :  { %v669_v53 = vadd.f32 %v649_v55, %v621_v13  ;;  %v670_v59 = vadd.f32 %v651_v38, %v622_v57  ;;  %v1230_v36 = vmul.f32 1.442695, %v8205_v21  ;;  %v1409_v13 = vld [vmem:[#allocation3] sm:$0xff]  ;;  %v625_v38 = vmul.f32 %v8207_v54, %v609_v32  ;;  %v1414_v54 = vld [vmem:[#allocation3 + $0x28] sm:$0xff] }
 0x271   :  { %4430 = vpow2.f32 %v1226_v51  ;;  %v8209_v51 = vld [vmem:[#allocation45_spill] sm:$0xff] }
 0x272   :  { %685 = vst.msk [vmem:[#allocation3 + $0x58] sm:$0xff] %vm8173_vm1, %v669_v53  ;;  %4432 = vpow2.f32 %v1230_v36  ;;  %v8211_v12 = vsub.f32 %v8209_v51, %v8210_v29  ;;  %v8221_v29 = vld [vmem:[#allocation54_spill] sm:$0xff]  ;;  %v6310_v42 = vld [vmem:[#allocation2 + $0x40] sm:$0xff] }
 0x273   :  { %686 = vst.msk [vmem:[#allocation3 + $0x60] sm:$0xff] %vm8202_vm10, %v670_v59  ;;  %v653_v33 = vpop.xlane.xlu0 %652  ;;  %v655_v10 = vpop.xlane.xlu1 %654  ;;  %vm8208_vm10 = vmmov %vm8173_vm1 }
 0x274   :  { %v671_v28 = vadd.f32 %v653_v33, %v623_v40  ;;  %v672_v55 = vadd.f32 %v655_v10, %v624_v61  ;;  %v5978_v57 = vpop.eup %4426  ;;  %v1234_v21 = vmul.f32 1.442695, %v8211_v12  ;;  %v1412_v33 = vld [vmem:[#allocation3 + $0x18] sm:$0xff]  ;;  %8287 = vst [vmem:[#allocation34_spill] sm:$0xff] %v6310_v42 }
 0x275   :  { %8206 = vst [vmem:[#allocation58_spill] sm:$0xff] %v5978_v57  ;;  %v1425_v53 = vmul.f32 %v5978_v57, %v1409_v13  ;;  %v8215_v10 = vld [vmem:[#allocation48_spill] sm:$0xff] }
 0x276   :  { %687 = vst.msk [vmem:[#allocation3 + $0x68] sm:$0xff] %vm8173_vm1, %v671_v28  ;;  %vm8214_vm1 = vcmask 15368   ;;  %4434 = vpow2.f32 %v1234_v21  ;;  %v8216_v28 = vld [vmem:[#allocation49_spill] sm:$0xff]  ;;  %v1416_v21 = vld [vmem:[#allocation3 + $0x38] sm:$0xff] }
 0x277   :  { %688 = vst.msk [vmem:[#allocation3 + $0x70] sm:$0xff] %vm8208_vm10, %v672_v55  ;;  %v1442_v40 = vpop.xlane.xlu1 %1441  ;;  %v5987_v20 = vpop.eup %4428  ;;  %v8217_v36 = vsub.f32 %v8215_v10, %v8216_v28  ;;  %vm8219_vm10 = vmmov %vm8214_vm1  ;;  %v8225_v10 = vld [vmem:[#allocation57_spill] sm:$0xff]  ;;  %v8226_v28 = vld [vmem:[#allocation59_spill] sm:$0xff] }
 0x278   :  { %v657_v59 = vpop.xlane.xlu0 %656  ;;  %v1473_v61 = vadd.f32 %v1442_v40, %v1425_v53  ;;  %8212 = vst [vmem:[#allocation60_spill] sm:$0xff] %v5987_v20  ;;  %v1428_v32 = vmul.f32 %v5987_v20, %v1412_v33  ;;  %v8220_v53 = vld [vmem:[#allocation52_spill] sm:$0xff] }
 0x279   :  { %v673_v37 = vadd.f32 %v657_v59, %v625_v38  ;;  %v1238_v13 = vmul.f32 1.442695, %v8217_v36  ;;  %v8222_v12 = vsub.f32 %v8220_v53, %v8221_v29  ;;  %v8227_v36 = vsub.f32 %v8225_v10, %v8226_v28  ;;  %v1420_v29 = vld [vmem:[#allocation3 + $0x58] sm:$0xff] }
 0x27a   :  { %1489 = vst.msk [vmem:[#allocation3] sm:$0xff] %vm8214_vm1, %v1473_v61 }
 0x27b   :  { %689 = vst.msk [vmem:[#allocation3 + $0x78] sm:$0xff] %vm8213_vm6, %v673_v37  ;;  %v5995_v38 = vpop.eup %4430  ;;  %4436 = vpow2.f32 %v1238_v13  ;;  %v1242_v37 = vmul.f32 1.442695, %v8222_v12  ;;  %vm8224_vm6 = vmmov %vm8214_vm1  ;;  %v1418_v13 = vld [vmem:[#allocation3 + $0x48] sm:$0xff] }
 0x27c   :  { %8218 = vst [vmem:[#allocation62_spill] sm:$0xff] %v5995_v38  ;;  %v1430_v59 = vmul.f32 %v5995_v38, %v1414_v54  ;;  %v6002_v61 = vpop.eup %4432 }
 0x27d   :  { %8223 = vst [vmem:[#allocation63_spill] sm:$0xff] %v6002_v61  ;;  %4438 = vpow2.f32 %v1242_v37 }
 0x27f   :  { %v1448_v55 = vpop.xlane.xlu1 %1447 }
 0x280   :  { %v1476_v51 = vadd.f32 %v1448_v55, %v1428_v32  ;;  %v1432_v32 = vmul.f32 %v6002_v61, %v1416_v21  ;;  %v1246_v55 = vmul.f32 1.442695, %v8227_v36  ;;  %v6009_v38 = vpop.eup %4434 }
 0x281   :  { %8228 = vst [vmem:[#allocation27_spill] sm:$0xff] %v6009_v38 }
 0x282   :  { %1492 = vst.msk [vmem:[#allocation3 + $0x18] sm:$0xff] %vm8219_vm10, %v1476_v51  ;;  %4440 = vpow2.f32 %v1246_v55  ;;  %vm8230_vm10 = vmmov %vm8214_vm1  ;;  %v1424_v55 = vld [vmem:[#allocation3 + $0x78] sm:$0xff] }
 0x283   :  { %v1452_v40 = vpop.xlane.xlu1 %1451 }
 0x284   :  { %v1478_v33 = vadd.f32 %v1452_v40, %v1430_v59  ;;  %v1434_v59 = vmul.f32 %v6009_v38, %v1418_v13  ;;  %v1413_v38 = vld [vmem:[#allocation3 + $0x20] sm:$0xff] }
 0x285   :  { %v6013_v40 = vpop.eup %4436  ;;  %v1429_v20 = vmul.f32 %v5784_v49, %v1413_v38  ;;  %v695_v49 = vld [vmem:[#allocation4 + $0x28] sm:$0xff] }
 0x286   :  { %1494 = vst.msk [vmem:[#allocation3 + $0x28] sm:$0xff] %vm8224_vm6, %v1478_v33  ;;  %8229 = vst [vmem:[#allocation18_spill] sm:$0xff] %v6013_v40  ;;  %v1436_v37 = vmul.f32 %v6013_v40, %v1420_v29  ;;  %v1422_v33 = vld [vmem:[#allocation3 + $0x68] sm:$0xff] }
 0x287   :  { %v1456_v54 = vpop.xlane.xlu1 %1455  ;;  %vm8232_vm6 = vmmov %vm8214_vm1 }
 0x288   :  { %v1480_v51 = vadd.f32 %v1456_v54, %v1432_v32  ;;  %v6017_v32 = vpop.eup %4438 }
 0x289   :  { %8231 = vst [vmem:[#allocation19_spill] sm:$0xff] %v6017_v32  ;;  %v1438_v28 = vmul.f32 %v6017_v32, %v1422_v33  ;;  %v692_v32 = vld [vmem:[#allocation4 + $0x10] sm:$0xff] }
 0x28a   :  { %1496 = vst.msk [vmem:[#allocation3 + $0x38] sm:$0xff] %vm8214_vm1, %v1480_v51 }
 0x28b   :  { %v1460_v53 = vpop.xlane.xlu1 %1459 }
 0x28c   :  { %v1482_v12 = vadd.f32 %v1460_v53, %v1434_v59  ;;  %v6021_v13 = vpop.eup %4440 }
 0x28d   :  { %8233 = vst [vmem:[#allocation20_spill] sm:$0xff] %v6021_v13  ;;  %v1440_v51 = vmul.f32 %v6021_v13, %v1424_v55  ;;  %v788_v13 = vmul.f32 %v5633_v19, %v692_v32 }
 0x28e   :  { %1498 = vst.msk [vmem:[#allocation3 + $0x48] sm:$0xff] %vm8230_vm10, %v1482_v12  ;;  %vm8234_vm10 = vmmov %vm8214_vm1 }
 0x28f   :  { %v1464_v21 = vpop.xlane.xlu1 %1463 }
 0x290   :  { %v1484_v10 = vadd.f32 %v1464_v21, %v1436_v37  ;;  %v1410_v37 = vld [vmem:[#allocation3 + $0x8] sm:$0xff] }
 0x291   :  { %v1426_v21 = vmul.f32 %v5756_v43, %v1410_v37 }
 0x292   :  { %1500 = vst.msk [vmem:[#allocation3 + $0x58] sm:$0xff] %vm8232_vm6, %v1484_v10  ;;  %vm8237_vm6 = vmmov %vm8214_vm1 }
 0x293   :  { %v1468_v36 = vpop.xlane.xlu1 %1467 }
 0x294   :  { %v1486_v54 = vadd.f32 %v1468_v36, %v1438_v28  ;;  %v1411_v28 = vld [vmem:[#allocation3 + $0x10] sm:$0xff] }
 0x295   :  { %v1427_v55 = vmul.f32 %v5770_v6, %v1411_v28 }
 0x296   :  { %1502 = vst.msk [vmem:[#allocation3 + $0x68] sm:$0xff] %vm8214_vm1, %v1486_v54  ;;  %v690_v54 = vld [vmem:[#allocation4] sm:$0xff]  ;;  %vm7949_vm1 = vcmask 64512  }
 0x297   :  { %v1472_v59 = vpop.xlane.xlu1 %1471  ;;  %v786_v43 = vmul.f32 %v5616_v62, %v690_v54  ;;  %v1415_v62 = vld [vmem:[#allocation3 + $0x30] sm:$0xff] }
 0x298   :  { %v1488_v53 = vadd.f32 %v1472_v59, %v1440_v51  ;;  %v693_v51 = vld [vmem:[#allocation4 + $0x18] sm:$0xff]  ;;  %v1431_v54 = vmul.f32 %v5798_v34, %v1415_v62 }
 0x29a   :  { %1504 = vst.msk [vmem:[#allocation3 + $0x78] sm:$0xff] %vm8234_vm10, %v1488_v53  ;;  %vm8239_vm10 = vmmov %vm8237_vm6 }
 0x29b   :  { %v6026_v29 = vpop.permute.xlu1 %1528 }
 0x29c   :  { %8235 = vst [vmem:[#allocation21_spill] sm:$0xff] %v6026_v29  ;;  %v6294_v29 = vld [vmem:[#allocation2 + $0x30] sm:$0xff] }
 0x29d   :  { %8285 = vst [vmem:[#allocation47_spill] sm:$0xff] %v6294_v29 }
 0x29f   :  { %v6028_v12 = vpop.permute.xlu1 %1533  ;;  %v1444_v10 = vpop.xlane.xlu0 %1443 }
 0x2a0   :  { %v1474_v36 = vadd.f32 %v1444_v10, %v1426_v21  ;;  %v789_v21 = vmul.f32 %v5650_v30, %v693_v51  ;;  %v1417_v51 = vld [vmem:[#allocation3 + $0x40] sm:$0xff] }
 0x2a2   :  { %1490 = vst.msk [vmem:[#allocation3 + $0x8] sm:$0xff] %vm8237_vm6, %v1474_v36 }
 0x2a3   :  { %v6031_v33 = vpop.permute.xlu1 %1543  ;;  %v1446_v53 = vpop.xlane.xlu0 %1445 }
 0x2a4   :  { %8236 = vst [vmem:[#allocation30_spill] sm:$0xff] %v6031_v33  ;;  %v1475_v40 = vadd.f32 %v1446_v53, %v1427_v55 }
 0x2a5   :  { %v4165_v37 = vpop.f32.mrb[0].mxu0 }
 0x2a6   :  { %1491 = vst.msk [vmem:[#allocation3 + $0x10] sm:$0xff] %vm8239_vm10, %v1475_v40  ;;  %v957_v10 = vadd.f32 %v4165_v37, %v788_v13  ;;  %v892_v36 = vpop.f32.mrb[1].mxu0  ;;  %v697_v40 = vld [vmem:[#allocation4 + $0x38] sm:$0xff]  ;;  %vm8245_vm10 = vmmov %vm8237_vm6 }
 0x2a7   :  { %v6035_v59 = vpop.permute.xlu1 %1553  ;;  %v955_v61 = vadd.f32 %v892_v36, %v786_v43  ;;  %v4166_v6 = vpop.f32.mrb[2].mxu0  ;;  %v793_v37 = vmul.f32 %v5681_v14, %v697_v40  ;;  %v1433_v36 = vmul.f32 %v5811_v56, %v1417_v51  ;;  %v701_v14 = vld [vmem:[#allocation4 + $0x58] sm:$0xff]  ;;  %v1421_v56 = vld [vmem:[#allocation3 + $0x60] sm:$0xff] }
 0x2a8   :  { %8238 = vst [vmem:[#allocation22_spill] sm:$0xff] %v6035_v59  ;;  %974 = vst.msk [vmem:[#allocation4 + $0x10] sm:$0xff] %vm7949_vm1, %v957_v10  ;;  %v958_v19 = vadd.f32 %v4166_v6, %v789_v21  ;;  %v1450_v32 = vpop.xlane.xlu0 %1449  ;;  %v6045_v55 = vpop.f32.mrb[3].mxu0  ;;  %v6275_v59 = vld [vmem:[#allocation2 + $0x20] sm:$0xff] }
 0x2a9   :  { %8241 = vst [vmem:[#allocation24_spill] sm:$0xff] %v6045_v55  ;;  %972 = vst.msk [vmem:[#allocation4] sm:$0xff] %vm7949_vm1, %v955_v61  ;;  %v1477_v30 = vadd.f32 %v1450_v32, %v1429_v20  ;;  %v791_v20 = vmul.f32 %v5669_v0, %v695_v49  ;;  %v1419_v32 = vld [vmem:[#allocation3 + $0x50] sm:$0xff] }
 0x2aa   :  { %975 = vst.msk [vmem:[#allocation4 + $0x18] sm:$0xff] %vm7949_vm1, %v958_v19  ;;  %v1435_v40 = vmul.f32 %v5821_v58, %v1419_v32  ;;  %v1423_v32 = vld [vmem:[#allocation3 + $0x70] sm:$0xff]  ;;  %8284 = vst [vmem:[#allocation33_spill] sm:$0xff] %v6275_v59 }
 0x2ab   :  { %v6041_v28 = vpop.permute.xlu1 %1563  ;;  %1493 = vst.msk [vmem:[#allocation3 + $0x20] sm:$0xff] %vm8237_vm6, %v1477_v30 }
 0x2ac   :  { %8240 = vst [vmem:[#allocation23_spill] sm:$0xff] %v6041_v28  ;;  %v1454_v38 = vpop.xlane.xlu0 %1453  ;;  %v6338_v28 = vld [vmem:[#allocation2 + $0x60] sm:$0xff] }
 0x2ad   :  { %v1479_v53 = vadd.f32 %v1454_v38, %v1431_v54  ;;  %v6053_v43 = vpop.f32.mrb[4].mxu0  ;;  %v699_v54 = vld [vmem:[#allocation4 + $0x48] sm:$0xff]  ;;  %8291 = vst [vmem:[#allocation37_spill] sm:$0xff] %v6338_v28 }
 0x2ae   :  { %8243 = vst [vmem:[#allocation38_spill] sm:$0xff] %v6053_v43  ;;  %v6056_v21 = vpop.f32.mrb[5].mxu0 }
 0x2af   :  { %v6050_v13 = vpop.permute.xlu1 %1573  ;;  %8244 = vst [vmem:[#allocation26_spill] sm:$0xff] %v6056_v21  ;;  %1495 = vst.msk [vmem:[#allocation3 + $0x30] sm:$0xff] %vm8245_vm10, %v1479_v53  ;;  %v4170_v61 = vpop.f32.mrb[6].mxu0  ;;  %v797_v53 = vmul.f32 %v5697_v3, %v701_v14  ;;  %v705_v3 = vld [vmem:[#allocation4 + $0x78] sm:$0xff]  ;;  %v1439_v14 = vmul.f32 %v5834_v5, %v1423_v32 }
 0x2b0   :  { %8242 = vst [vmem:[#allocation25_spill] sm:$0xff] %v6050_v13  ;;  %v962_v34 = vadd.f32 %v4170_v61, %v793_v37  ;;  %v1458_v6 = vpop.xlane.xlu0 %1457  ;;  %v911_v19 = vpop.f32.mrb[7].mxu0  ;;  %vm8250_vm10 = vmmov %vm8237_vm6  ;;  %v6308_v21 = vld [vmem:[#allocation2 + $0x58] sm:$0xff] }
 0x2b1   :  { %v1481_v62 = vadd.f32 %v1458_v6, %v1433_v36  ;;  %v960_v30 = vadd.f32 %v911_v19, %v791_v20  ;;  %v795_v20 = vmul.f32 %v5689_v46, %v699_v54 }
 0x2b2   :  { %979 = vst.msk [vmem:[#allocation4 + $0x38] sm:$0xff] %vm7949_vm1, %v962_v34  ;;  %v1437_v34 = vmul.f32 %v5831_v15, %v1421_v56  ;;  %v801_v56 = vmul.f32 %v5712_v22, %v705_v3 }
 0x2b3   :  { %v6060_v10 = vpop.permute.xlu1 %1583  ;;  %1497 = vst.msk [vmem:[#allocation3 + $0x40] sm:$0xff] %vm8237_vm6, %v1481_v62 }
 0x2b4   :  { %8246 = vst [vmem:[#allocation28_spill] sm:$0xff] %v6060_v10  ;;  %977 = vst.msk [vmem:[#allocation4 + $0x28] sm:$0xff] %vm7949_vm1, %v960_v30  ;;  %v1462_v49 = vpop.xlane.xlu0 %1461  ;;  %v6256_v10 = vld [vmem:[#allocation2 + $0x8] sm:$0xff] }
 0x2b5   :  { %v1483_v38 = vadd.f32 %v1462_v49, %v1435_v40  ;;  %v703_v40 = vld [vmem:[#allocation4 + $0x68] sm:$0xff] }
 0x2b7   :  { %v6066_v0 = vpop.permute.xlu1 %1593  ;;  %v6069_v51 = vpop.f32.mrb[8].mxu0  ;;  %1499 = vst.msk [vmem:[#allocation3 + $0x50] sm:$0xff] %vm8250_vm10, %v1483_v38  ;;  %vm8253_vm10 = vmmov %vm8237_vm6 }
 0x2b8   :  { %8247 = vst [vmem:[#allocation41_spill] sm:$0xff] %v6066_v0  ;;  %8248 = vst [vmem:[#allocation29_spill] sm:$0xff] %v6069_v51  ;;  %v6072_v37 = vpop.f32.mrb[9].mxu0  ;;  %v1466_v58 = vpop.xlane.xlu0 %1465 }
 0x2b9   :  { %8249 = vst [vmem:[#allocation31_spill] sm:$0xff] %v6072_v37  ;;  %v4174_v61 = vpop.f32.mrb[10].mxu0  ;;  %v1485_v62 = vadd.f32 %v1466_v58, %v1437_v34  ;;  %v8254_v58 = vld [vmem:[#allocation5_spill] sm:$0xff]  ;;  %v6292_v37 = vld [vmem:[#allocation2 + $0x48] sm:$0xff] }
 0x2ba   :  { %v966_v6 = vadd.f32 %v4174_v61, %v797_v53  ;;  %v927_v19 = vpop.f32.mrb[11].mxu0  ;;  %v799_v53 = vmul.f32 %v5705_v7, %v703_v40  ;;  %v1909_v5 = vsub.s32 2, %v8254_v58  ;;  %v4623_v7 = vld [vmem:[%s7834_s1] sm:$0xf] }
 0x2bb   :  { %v1626_v36 = vpop.permute.xlu1 %1625  ;;  %v964_v30 = vadd.f32 %v927_v19, %v795_v20  ;;  %1501 = vst.msk [vmem:[#allocation3 + $0x60] sm:$0xff] %vm8237_vm6, %v1485_v62 }
 0x2bc   :  { %4179 = vmatprep.subr.bf16.mxu1 %v1626_v36  ;;  %983 = vst.msk [vmem:[#allocation4 + $0x58] sm:$0xff] %vm7949_vm1, %v966_v6  ;;  %v1470_v15 = vpop.xlane.xlu0 %1469  ;;  %v6094_v62 = vrot.slane %v4623_v7, %v1909_v5 }
 0x2bd   :  { %4180 = vmatpush3.bf16.msra.mxu1 %v1626_v36  ;;  %981 = vst.msk [vmem:[#allocation4 + $0x48] sm:$0xff] %vm7949_vm1, %v964_v30  ;;  %v1487_v54 = vadd.f32 %v1470_v15, %v1439_v14 }
 0x2bf   :  { %v1630_v46 = vpop.permute.xlu1 %1629  ;;  %v6081_v49 = vpop.f32.mrb[12].mxu0  ;;  %1503 = vst.msk [vmem:[#allocation3 + $0x70] sm:$0xff] %vm8253_vm10, %v1487_v54 }
 0x2c0   :  { %8251 = vst [vmem:[#allocation44_spill] sm:$0xff] %v6081_v49  ;;  %v6084_v38 = vpop.f32.mrb[13].mxu0  ;;  %v1628_v34 = vpop.permute.xlu0 %1627 }
 0x2c1   :  { %8252 = vst [vmem:[#allocation32_spill] sm:$0xff] %v6084_v38  ;;  %v4178_v20 = vpop.f32.mrb[14].mxu0  ;;  %4181 = vmatprep.subr.bf16.mxu1 %v1628_v34  ;;  %v6273_v38 = vld [vmem:[#allocation2 + $0x38] sm:$0xff] }
 0x2c2   :  { %v970_v36 = vadd.f32 %v4178_v20, %v801_v56  ;;  %v943_v6 = vpop.f32.mrb[15].mxu0  ;;  %4182 = vmatpush3.bf16.msra.mxu1 %v1628_v34 }
 0x2c3   :  { %v1634_v61 = vpop.permute.xlu1 %1633  ;;  %v968_v19 = vadd.f32 %v943_v6, %v799_v53  ;;  %4183 = vmatprep.subr.bf16.mxu1 %v1630_v46 }
 0x2c4   :  { %987 = vst.msk [vmem:[#allocation4 + $0x78] sm:$0xff] %vm7949_vm1, %v970_v36  ;;  %v1632_v32 = vpop.permute.xlu0 %1631 }
 0x2c5   :  { %985 = vst.msk [vmem:[#allocation4 + $0x68] sm:$0xff] %vm7949_vm1, %v968_v19  ;;  %vm8255_vm1 = vcmp.gt.f32.partialorder %v4792_v45, 0.0 }
 0x2c6   :  { %4184 = vmatpush3.bf16.msra.mxu1 %v1630_v46 }
 0x2c7   :  { %v1638_v22 = vpop.permute.xlu1 %1637  ;;  %4185 = vmatprep.subr.bf16.mxu1 %v1632_v32 }
 0x2c8   :  { %v1636_v14 = vpop.permute.xlu0 %1635 }
 0x2ca   :  { %4186 = vmatpush3.bf16.msra.mxu1 %v1632_v32 }
 0x2cb   :  { %v1845_v30 = vpop.permute.xlu1 %1844  ;;  %4187 = vmatprep.subr.bf16.mxu1 %v1634_v61 }
 0x2cc   :  { %v1911_v3 = vadd.f32 %v6094_v62, %v1845_v30  ;;  %v1640_v46 = vpop.permute.xlu0 %1639 }
 0x2ce   :  { %v1943_v40 = vmul.f32 0.01, %v1911_v3  ;;  %vm1927_vm6 = vcmp.ge.f32.partialorder %v1911_v3, 0.0  ;;  %4188 = vmatpush3.bf16.msra.mxu1 %v1634_v61 }
 0x2cf   :  { %v1853_v15 = vpop.permute.xlu1 %1852  ;;  %4189 = vmatprep.subr.bf16.mxu1 %v1636_v14 }
 0x2d0   :  { %v1913_v54 = vadd.f32 %v6094_v62, %v1853_v15  ;;  %v1959_v56 = vsel %vm1927_vm6, %v1911_v3, %v1943_v40 }
 0x2d1   :  { %v6100_v53 = vsel %vm7950_vm3, %v1959_v56, -1e+30  ;;  %vm8256_vm3 = vcmp.gt.f32.partialorder %v4825_v8, 0.0 }
 0x2d2   :  { %v1945_v20 = vmul.f32 0.01, %v1913_v54  ;;  %2007 = vmax.xlane.f32.xlu0 %v6100_v53  ;;  %vm1929_vm10 = vcmp.ge.f32.partialorder %v1913_v54, 0.0  ;;  %4190 = vmatpush3.bf16.msra.mxu1 %v1636_v14 }
 0x2d3   :  { %v1857_v36 = vpop.permute.xlu1 %1856  ;;  %v1849_v61 = vpop.permute.xlu0 %1848  ;;  %4191 = vmatprep.subr.bf16.mxu1 %v1638_v22 }
 0x2d4   :  { %v1914_v34 = vadd.f32 %v6094_v62, %v1857_v36  ;;  %v1961_v6 = vsel %vm1929_vm10, %v1913_v54, %v1945_v20  ;;  %v1912_v30 = vadd.f32 %v6094_v62, %v1849_v61 }
 0x2d5   :  { %v6106_v5 = vsel %vm8255_vm1, %v1961_v6, -1e+30 }
 0x2d6   :  { %v1946_v19 = vmul.f32 0.01, %v1914_v34  ;;  %2011 = vmax.xlane.f32.xlu0 %v6106_v5  ;;  %vm1930_vm6 = vcmp.ge.f32.partialorder %v1914_v34, 0.0  ;;  %v1944_v54 = vmul.f32 0.01, %v1912_v30  ;;  %4192 = vmatpush3.bf16.msra.mxu1 %v1638_v22  ;;  %vm1928_vm10 = vcmp.ge.f32.partialorder %v1912_v30, 0.0 }
 0x2d7   :  { %v1865_v32 = vpop.permute.xlu1 %1864  ;;  %4193 = vmatprep.subr.bf16.mxu1 %v1640_v46  ;;  %v1861_v56 = vpop.permute.xlu0 %1860 }
 0x2d8   :  { %v1916_v7 = vadd.f32 %v6094_v62, %v1865_v32  ;;  %v1962_v3 = vsel %vm1930_vm6, %v1914_v34, %v1946_v19  ;;  %v1915_v36 = vadd.f32 %v6094_v62, %v1861_v56  ;;  %v1960_v34 = vsel %vm1928_vm10, %v1912_v30, %v1944_v54 }
 0x2d9   :  { %v6113_v40 = vsel %vm8256_vm3, %v1962_v3, -1e+30  ;;  %vm8257_vm6 = vcmp.gt.f32.partialorder %v4827_v9, 0.0  ;;  %vm8258_vm3 = vcmp.gt.f32.partialorder %v4800_v48, 0.0  ;;  %v8259_v56 = vpack.c.bf16 %v5679_v27, %v5746_v24 }
 0x2da   :  { %v1948_v15 = vmul.f32 0.01, %v1916_v7  ;;  %2013 = vmax.xlane.f32.xlu0 %v6113_v40  ;;  %vm1932_vm1 = vcmp.ge.f32.partialorder %v1916_v7, 0.0  ;;  %v6124_v22 = vsel %vm8258_vm3, %v1960_v34, -1e+30  ;;  %4194 = vmatpush3.bf16.msra.mxu1 %v1640_v46  ;;  %vm1931_vm2 = vcmp.ge.f32.partialorder %v1915_v36, 0.0 }
 0x2db   :  { %v1873_v14 = vpop.permute.xlu1 %1872  ;;  %v1947_v61 = vmul.f32 0.01, %v1915_v36  ;;  %2009 = vmax.xlane.f32.xlu1 %v6124_v22  ;;  %vm8261_vm10 = vcmp.gt.f32.partialorder %v4812_v60, 0.0  ;;  %vm8264_vm3 = vcmp.gt.f32.partialorder %v4845_v17, 0.0 }
 0x2dc   :  { %v1918_v20 = vadd.f32 %v6094_v62, %v1873_v14  ;;  %v1964_v6 = vsel %vm1932_vm1, %v1916_v7, %v1948_v15  ;;  %v1869_v7 = vpop.permute.xlu0 %1868  ;;  %vm8260_vm1 = vcmp.gt.f32.partialorder %v4873_v31, 0.0 }
 0x2dd   :  { %v6120_v19 = vsel %vm8257_vm6, %v1964_v6, -1e+30  ;;  %v1917_v15 = vadd.f32 %v6094_v62, %v1869_v7  ;;  %v1963_v14 = vsel %vm1931_vm2, %v1915_v36, %v1947_v61  ;;  %4196 = vmatmul.mubr.msk.bf16.vlgmr.msra.gmra.mrb[0].mxu1 %vm5562_vm15, %v8259_v56  ;;  %vm8263_vm6 = vcmp.gt.f32.partialorder %v4901_v4, 0.0 }
 0x2de   :  { %v1950_v32 = vmul.f32 0.01, %v1918_v20  ;;  %2017 = vmax.xlane.f32.xlu0 %v6120_v19  ;;  %vm1934_vm14 = vcmp.ge.f32.partialorder %v1918_v20, 0.0  ;;  %v6141_v6 = vsel %vm8261_vm10, %v1963_v14, -1e+30 }
 0x2df   :  { %v1881_v3 = vpop.permute.xlu1 %1880  ;;  %2015 = vmax.xlane.f32.xlu1 %v6141_v6 }
 0x2e0   :  { %v1920_v30 = vadd.f32 %v6094_v62, %v1881_v3  ;;  %v1966_v54 = vsel %vm1934_vm14, %v1918_v20, %v1950_v32  ;;  %v1949_v3 = vmul.f32 0.01, %v1917_v15  ;;  %v8262_v20 = vpack.c.bf16 %v5687_v41, %v5760_v16  ;;  %v1877_v24 = vpop.permute.xlu0 %1876 }
 0x2e1   :  { %v6137_v46 = vsel %vm8260_vm1, %v1966_v54, -1e+30  ;;  %vm1933_vm14 = vcmp.ge.f32.partialorder %v1917_v15, 0.0  ;;  %v1919_v32 = vadd.f32 %v6094_v62, %v1877_v24 }
 0x2e2   :  { %v1952_v34 = vmul.f32 0.01, %v1920_v30  ;;  %4199 = vmatprep.mubr.msk.bf16.mxu1 %vm5580_vm7, %v8262_v20  ;;  %2021 = vmax.xlane.f32.xlu0 %v6137_v46  ;;  %vm1936_vm2 = vcmp.ge.f32.partialorder %v1920_v30, 0.0  ;;  %v1965_v7 = vsel %vm1933_vm14, %v1917_v15, %v1949_v3 }
 0x2e3   :  { %v1889_v27 = vpop.permute.xlu1 %1888  ;;  %v6158_v16 = vsel %vm8264_vm3, %v1965_v7, -1e+30  ;;  %v1951_v14 = vmul.f32 0.01, %v1919_v32  ;;  %vm1935_vm10 = vcmp.ge.f32.partialorder %v1919_v32, 0.0  ;;  %vm8268_vm3 = vcmp.gt.f32.partialorder %v4876_v52, 0.0 }
 0x2e4   :  { %v1922_v36 = vadd.f32 %v6094_v62, %v1889_v27  ;;  %v1968_v61 = vsel %vm1936_vm2, %v1920_v30, %v1952_v34  ;;  %2019 = vmax.xlane.f32.xlu1 %v6158_v16  ;;  %v1885_v20 = vpop.permute.xlu0 %1884  ;;  %v8265_v27 = vpack.c.bf16 %v5695_v47, %v5774_v25  ;;  %vm8266_vm2 = vcmp.gt.f32.partialorder %v4858_v39, 0.0 }
 0x2e5   :  { %v6154_v41 = vsel %vm8263_vm6, %v1968_v61, -1e+30  ;;  %v1921_v15 = vadd.f32 %v6094_v62, %v1885_v20  ;;  %v1967_v3 = vsel %vm1935_vm10, %v1919_v32, %v1951_v14 }
 0x2e6   :  { %v1954_v54 = vmul.f32 0.01, %v1922_v36  ;;  %2025 = vmax.xlane.f32.xlu0 %v6154_v41  ;;  %vm1938_vm1 = vcmp.ge.f32.partialorder %v1922_v36, 0.0  ;;  %4200 = vmatmul.mubr.msk.bf16.gmra.mrb[4].mxu1 %vm5596_vm8, %v8265_v27  ;;  %v6175_v61 = vsel %vm8266_vm2, %v1967_v3, -1e+30  ;;  %v6326_v27 = vld [vmem:[#allocation2 + $0x50] sm:$0xff] }
 0x2e7   :  { %v1897_v56 = vpop.permute.xlu1 %1896  ;;  %vm1937_vm6 = vcmp.ge.f32.partialorder %v1921_v15, 0.0  ;;  %8289 = vst [vmem:[#allocation56_spill] sm:$0xff] %v6326_v27 }
 0x2e8   :  { %v1924_v30 = vadd.f32 %v6094_v62, %v1897_v56  ;;  %v1970_v34 = vsel %vm1938_vm1, %v1922_v36, %v1954_v54  ;;  %v1953_v56 = vmul.f32 0.01, %v1921_v15  ;;  %v8267_v36 = vpack.c.bf16 %v5703_v2, %v5788_v26  ;;  %2023 = vmax.xlane.f32.xlu1 %v6175_v61  ;;  %v1893_v47 = vpop.permute.xlu0 %1892 }
 0x2e9   :  { %v6171_v24 = vsel %vm152_vm11, %v1970_v34, -1e+30  ;;  %v1923_v25 = vadd.f32 %v6094_v62, %v1893_v47  ;;  %v8274_v47 = vld [vmem:[#allocation74_spill] sm:$0xff] }
 0x2ea   :  { %v1956_v7 = vmul.f32 0.01, %v1924_v30  ;;  %4203 = vmatprep.mubr.msk.bf16.mxu1 %vm5612_vm13, %v8267_v36  ;;  %2029 = vmax.xlane.f32.xlu0 %v6171_v24  ;;  %vm1940_vm14 = vcmp.ge.f32.partialorder %v1924_v30, 0.0  ;;  %v1969_v54 = vsel %vm1937_vm6, %v1921_v15, %v1953_v56  ;;  %vm2247_vm6 = vcmask 23568  }
 0x2eb   :  { %v6191_v2 = vsel %vm8268_vm3, %v1969_v54, -1e+30  ;;  %v1955_v26 = vmul.f32 0.01, %v1923_v25  ;;  %vm1939_vm1 = vcmp.ge.f32.partialorder %v1923_v25, 0.0 }
 0x2ec   :  { %v1972_v32 = vsel %vm1940_vm14, %v1924_v30, %v1956_v7  ;;  %2027 = vmax.xlane.f32.xlu1 %v6191_v2  ;;  %v1901_v20 = vpop.permute.xlu0 %1900  ;;  %v8269_v30 = vld [vmem:[#allocation11_spill] sm:$0xff] }
 0x2ed   :  { %v6187_v14 = vsel %vm154_vm9, %v1972_v32, -1e+30  ;;  %v1925_v34 = vadd.f32 %v6094_v62, %v1901_v20  ;;  %v1971_v3 = vsel %vm1939_vm1, %v1923_v25, %v1955_v26  ;;  %v8270_v15 = vpack.c.bf16 %v5710_v18, %v8269_v30  ;;  %v8272_v7 = vld [vmem:[#allocation7_spill] sm:$0xff]  ;;  %v8275_v32 = vld [vmem:[#allocation12_spill] sm:$0xff] }
 0x2ee   :  { %2033 = vmax.xlane.f32.xlu0 %v6187_v14  ;;  %vm8273_vm10 = vcmp.gt.f32.partialorder %v8272_v7, 0.0  ;;  %v8276_v54 = vpack.c.bf16 %v8274_v47, %v8275_v32  ;;  %v8278_v26 = vld [vmem:[#allocation8_spill] sm:$0xff]  ;;  %v8280_v20 = vld [vmem:[#allocation75_spill] sm:$0xff]  ;;  %v6224_v32 = vld [vmem:[#allocation2] sm:$0xff] }
 0x2ef   :  { %4204 = vmatmul.mubr.msk.bf16.gmra.mrb[8].mxu1 %vm5629_vm12, %v8270_v15  ;;  %v6203_v56 = vsel %vm8273_vm10, %v1971_v3, -1e+30  ;;  %v1957_v36 = vmul.f32 0.01, %v1925_v34  ;;  %vm1941_vm2 = vcmp.ge.f32.partialorder %v1925_v34, 0.0  ;;  %vm8279_vm14 = vcmp.gt.f32.partialorder %v8278_v26, 0.0 }
 0x2f0   :  { %4207 = vmatprep.mubr.msk.bf16.mxu1 %vm5646_vm5, %v8276_v54  ;;  %2031 = vmax.xlane.f32.xlu1 %v6203_v56  ;;  %v8281_v3 = vld [vmem:[#allocation13_spill] sm:$0xff]  ;;  %v4624_v47 = vld [vmem:[%s7832_s0 + $0x78] sm:$0xff]  ;;  %v6324_v15 = vld [vmem:[#allocation2 + $0x68] sm:$0xff]  ;;  %vm8300_vm10 = vcmp.gt.f32.partialorder %v4790_v44, 0.0 }
 0x2f1   :  { %v1973_v25 = vsel %vm1941_vm2, %v1925_v34, %v1957_v36  ;;  %v8282_v30 = vpack.c.bf16 %v8280_v20, %v8281_v3  ;;  %vm8301_vm2 = vcmp.gt.f32.partialorder %v4792_v45, 0.0 }
 0x2f2   :  { %v6213_v18 = vsel %vm8279_vm14, %v1973_v25, -1e+30  ;;  %v6234_v25 = vld [vmem:[#allocation2 + $0x10] sm:$0xff]  ;;  %vm8302_vm14 = vcmp.gt.f32.partialorder %v4825_v8, 0.0 }
 0x2f4   :  { %2035 = vmax.xlane.f32.xlu1 %v6213_v18 }
 0x2f7   :  { %4208 = vmatmul.mubr.msk.bf16.gmra.mrb[12].mxu1 %vm5663_vm4, %v8282_v30 }
 0x305   :  { %1904 = vperm.xlu1 %4294, %v4624_v47   ;;  %v6244_v47 = vld [vmem:[#allocation2 + $0x18] sm:$0xff] }
 0x35f   :  { %v2008_v34 = vpop.xlane.xlu0 %2007 }
 0x360   :  { %v6227_v36 = vmax.f32 %v6224_v32, %v2008_v34 }
 0x362   :  { %2248 = vst.msk [vmem:[#allocation2] sm:$0xff] %vm2247_vm6, %v6227_v36  ;;  %2105 = vperm.xlu1 %4294, %v6227_v36  }
 0x363   :  { %v2012_v20 = vpop.xlane.xlu0 %2011 }
 0x364   :  { %v6237_v3 = vmax.f32 %v6234_v25, %v2012_v20  ;;  %v6254_v20 = vld [vmem:[#allocation2 + $0x28] sm:$0xff] }
 0x366   :  { %2250 = vst.msk [vmem:[#allocation2 + $0x10] sm:$0xff] %vm2247_vm6, %v6237_v3  ;;  %2115 = vperm.xlu1 %4294, %v6237_v3  }
 0x367   :  { %v2014_v34 = vpop.xlane.xlu0 %2013 }
 0x368   :  { %v6247_v54 = vmax.f32 %v6244_v47, %v2014_v34  ;;  %v2010_v13 = vpop.xlane.xlu1 %2009 }
 0x369   :  { %v6262_v34 = vmax.f32 %v6256_v10, %v2010_v13 }
 0x36a   :  { %2251 = vst.msk [vmem:[#allocation2 + $0x18] sm:$0xff] %vm2247_vm6, %v6247_v54  ;;  %2120 = vperm.xlu1 %4294, %v6247_v54  }
 0x36b   :  { %v2018_v30 = vpop.xlane.xlu0 %2017  ;;  %2249 = vst.msk [vmem:[#allocation2 + $0x8] sm:$0xff] %vm2247_vm6, %v6262_v34 }
 0x36c   :  { %v6259_v49 = vmax.f32 %v6254_v20, %v2018_v30  ;;  %v2016_v13 = vpop.xlane.xlu1 %2015 }
 0x36d   :  { %v6281_v0 = vmax.f32 %v6275_v59, %v2016_v13 }
 0x36e   :  { %2253 = vst.msk [vmem:[#allocation2 + $0x28] sm:$0xff] %vm2247_vm6, %v6259_v49  ;;  %2130 = vperm.xlu1 %4294, %v6259_v49  }
 0x36f   :  { %v2022_v30 = vpop.xlane.xlu0 %2021  ;;  %2252 = vst.msk [vmem:[#allocation2 + $0x20] sm:$0xff] %vm2247_vm6, %v6281_v0 }
 0x370   :  { %v6278_v51 = vmax.f32 %v6273_v38, %v2022_v30 }
 0x371   :  { %v2020_v13 = vpop.xlane.xlu1 %2019 }
 0x372   :  { %2255 = vst.msk [vmem:[#allocation2 + $0x38] sm:$0xff] %vm2247_vm6, %v6278_v51  ;;  %2140 = vperm.xlu1 %4294, %v6278_v51   ;;  %v6300_v33 = vmax.f32 %v6294_v29, %v2020_v13 }
 0x373   :  { %v2026_v30 = vpop.xlane.xlu0 %2025 }
 0x374   :  { %v6297_v43 = vmax.f32 %v6292_v37, %v2026_v30  ;;  %8286 = vst [vmem:[#allocation51_spill] sm:$0xff] %v6300_v33  ;;  %2254 = vst.msk [vmem:[#allocation2 + $0x30] sm:$0xff] %vm2247_vm6, %v6300_v33 }
 0x375   :  { %v2024_v58 = vpop.xlane.xlu1 %2023 }
 0x376   :  { %2257 = vst.msk [vmem:[#allocation2 + $0x48] sm:$0xff] %vm2247_vm6, %v6297_v43  ;;  %v6316_v13 = vmax.f32 %v6310_v42, %v2024_v58 }
 0x377   :  { %v2030_v55 = vpop.xlane.xlu0 %2029 }
 0x378   :  { %v6313_v30 = vmax.f32 %v6308_v21, %v2030_v55  ;;  %8288 = vst [vmem:[#allocation35_spill] sm:$0xff] %v6316_v13  ;;  %2256 = vst.msk [vmem:[#allocation2 + $0x40] sm:$0xff] %vm2247_vm6, %v6316_v13 }
 0x379   :  { %v2028_v23 = vpop.xlane.xlu1 %2027 }
 0x37a   :  { %2259 = vst.msk [vmem:[#allocation2 + $0x58] sm:$0xff] %vm2247_vm6, %v6313_v30  ;;  %v6332_v58 = vmax.f32 %v6326_v27, %v2028_v23 }
 0x37b   :  { %v2034_v57 = vpop.xlane.xlu0 %2033 }
 0x37c   :  { %v6329_v55 = vmax.f32 %v6324_v15, %v2034_v57  ;;  %8290 = vst [vmem:[#allocation36_spill] sm:$0xff] %v6332_v58  ;;  %2258 = vst.msk [vmem:[#allocation2 + $0x50] sm:$0xff] %vm2247_vm6, %v6332_v58  ;;  %v6345_v57 = vld [vmem:[#allocation2 + $0x70] sm:$0xff] }
 0x37d   :  { %v2032_v63 = vpop.xlane.xlu1 %2031  ;;  %8293 = vst [vmem:[#allocation39_spill] sm:$0xff] %v6345_v57 }
 0x37e   :  { %2261 = vst.msk [vmem:[#allocation2 + $0x68] sm:$0xff] %vm2247_vm6, %v6329_v55  ;;  %v6341_v11 = vmax.f32 %v6338_v28, %v2032_v63  ;;  %v8295_v63 = vld [vmem:[#allocation10_spill] sm:$0xff] }
 0x37f   :  { %vm8296_vm1 = vcmp.gt.f32.partialorder %v8295_v63, 0.0 }
 0x380   :  { %8292 = vst [vmem:[#allocation61_spill] sm:$0xff] %v6341_v11  ;;  %2260 = vst.msk [vmem:[#allocation2 + $0x60] sm:$0xff] %vm2247_vm6, %v6341_v11 }
 0x381   :  { %v2036_v50 = vpop.xlane.xlu1 %2035 }
 0x382   :  { %v6348_v23 = vmax.f32 %v6345_v57, %v2036_v50 }
 0x384   :  { %8294 = vst [vmem:[#allocation40_spill] sm:$0xff] %v6348_v23  ;;  %2262 = vst.msk [vmem:[#allocation2 + $0x70] sm:$0xff] %vm2247_vm6, %v6348_v23 }
 0x385   :  { %v1905_v27 = vpop.permute.xlu1 %1904 }
 0x386   :  { %v1926_v42 = vadd.f32 %v6094_v62, %v1905_v27 }
 0x388   :  { %v1958_v29 = vmul.f32 0.01, %v1926_v42  ;;  %vm1942_vm3 = vcmp.ge.f32.partialorder %v1926_v42, 0.0 }
 0x38a   :  { %v1974_v59 = vsel %vm1942_vm3, %v1926_v42, %v1958_v29  ;;  %vm8303_vm3 = vcmp.gt.f32.partialorder %v4827_v9, 0.0 }
 0x38b   :  { %v6355_v28 = vsel %vm8296_vm1, %v1974_v59, -1e+30  ;;  %vm8304_vm1 = vcmp.gt.f32.partialorder %v4873_v31, 0.0 }
 0x38c   :  { %8297 = vst [vmem:[#allocation64_spill] sm:$0xff] %v6355_v28  ;;  %2037 = vmax.xlane.f32.xlu0 %v6355_v28 }
 0x3a2   :  { %2110 = vperm.xlu0 %4295, %v6262_v34  }
 0x3a6   :  { %2125 = vperm.xlu0 %4295, %v6281_v0  }
 0x3aa   :  { %2135 = vperm.xlu0 %4295, %v6300_v33  }
 0x3ae   :  { %2145 = vperm.xlu0 %4295, %v6316_v13  }
 0x3b0   :  { %v4197_v50 = vpop.f32.mrb[0].mxu1 }
 0x3b1   :  { %v1683_v57 = vpop.f32.mrb[1].mxu1  ;;  %1766 = vrot.lane.b32.xlu1 %v4197_v50, %s4656_s13 }
 0x3b2   :  { %v4198_v42 = vpop.f32.mrb[2].mxu1 }
 0x3b3   :  { %v1686_v29 = vpop.f32.mrb[3].mxu1  ;;  %1768 = vrot.lane.b32.xlu0 %v4198_v42, %s4656_s13 }
 0x3b5   :  { %1762 = vrot.lane.b32.xlu1 %v1683_v57, %s4656_s13 }
 0x3b7   :  { %1764 = vrot.lane.b32.xlu0 %v1686_v29, %s4656_s13 }
 0x3b9   :  { %v4201_v59 = vpop.f32.mrb[4].mxu1 }
 0x3ba   :  { %v1699_v62 = vpop.f32.mrb[5].mxu1  ;;  %1774 = vrot.lane.b32.xlu1 %v4201_v59, %s4656_s13 }
 0x3bb   :  { %v4202_v27 = vpop.f32.mrb[6].mxu1 }
 0x3bc   :  { %v1702_v63 = vpop.f32.mrb[7].mxu1  ;;  %1776 = vrot.lane.b32.xlu0 %v4202_v27, %s4656_s13 }
 0x3be   :  { %1770 = vrot.lane.b32.xlu1 %v1699_v62, %s4656_s13 }
 0x3c0   :  { %1772 = vrot.lane.b32.xlu0 %v1702_v63, %s4656_s13 }
 0x3c2   :  { %v4205_v50 = vpop.f32.mrb[8].mxu1 }
 0x3c3   :  { %v1715_v28 = vpop.f32.mrb[9].mxu1  ;;  %1782 = vrot.lane.b32.xlu1 %v4205_v50, %s4656_s13 }
 0x3c4   :  { %v4206_v42 = vpop.f32.mrb[10].mxu1 }
 0x3c5   :  { %v1718_v57 = vpop.f32.mrb[11].mxu1  ;;  %1784 = vrot.lane.b32.xlu0 %v4206_v42, %s4656_s13 }
 0x3c7   :  { %1778 = vrot.lane.b32.xlu1 %v1715_v28, %s4656_s13 }
 0x3c9   :  { %1780 = vrot.lane.b32.xlu0 %v1718_v57, %s4656_s13 }
 0x3ca   :  { %v4209_v29 = vpop.f32.mrb[12].mxu1 }
 0x3cb   :  { %v1731_v59 = vpop.f32.mrb[13].mxu1  ;;  %1790 = vrot.lane.b32.xlu1 %v4209_v29, %s4656_s13 }
 0x3cc   :  { %v6375_v27 = vpop.f32.mrb[14].mxu1 }
 0x3cd   :  { %8298 = vst [vmem:[#allocation42_spill] sm:$0xff] %v6375_v27  ;;  %v6377_v62 = vpop.f32.mrb[15].mxu1  ;;  %2155 = vperm.xlu0 %4295, %v6332_v58  }
 0x3ce   :  { %8299 = vst [vmem:[#allocation43_spill] sm:$0xff] %v6377_v62 }
 0x3cf   :  { %1786 = vrot.lane.b32.xlu1 %v1731_v59, %s4656_s13 }
 0x3d1   :  { %2165 = vperm.xlu0 %4295, %v6341_v11  }
 0x3d3   :  { %2150 = vperm.xlu1 %4294, %v6297_v43  }
 0x3d5   :  { %2175 = vperm.xlu0 %4295, %v6348_v23  }
 0x3d7   :  { %2160 = vperm.xlu1 %4294, %v6313_v30  }
 0x3db   :  { %2170 = vperm.xlu1 %4294, %v6329_v55  }
 0x3e1   :  { %v2106_v28 = vpop.permute.xlu1 %2105 }
 0x3e2   :  { %v2183_v63 = vsub.f32 %v6100_v53, %v2106_v28 }
 0x3e4   :  { %v2199_v50 = vmul.f32 1.442695, %v2183_v63 }
 0x3e5   :  { %v2116_v42 = vpop.permute.xlu1 %2115 }
 0x3e6   :  { %v2185_v57 = vsub.f32 %v6106_v5, %v2116_v42  ;;  %4442 = vpow2.f32 %v2199_v50 }
 0x3e8   :  { %v2203_v29 = vmul.f32 1.442695, %v2185_v57  ;;  %v1507_v57 = vld [vmem:[#allocation4 + $0x10] sm:$0xff] }
 0x3e9   :  { %v2121_v59 = vpop.permute.xlu1 %2120 }
 0x3ea   :  { %v2186_v62 = vsub.f32 %v6113_v40, %v2121_v59  ;;  %4444 = vpow2.f32 %v2203_v29 }
 0x3ec   :  { %v2205_v27 = vmul.f32 1.442695, %v2186_v62  ;;  %v6415_v62 = vld [vmem:[#allocation2 + $0x78] sm:$0xff] }
 0x3ed   :  { %v2131_v11 = vpop.permute.xlu1 %2130 }
 0x3ee   :  { %4446 = vpow2.f32 %v2205_v27  ;;  %v2188_v23 = vsub.f32 %v6120_v19, %v2131_v11 }
 0x3f0   :  { %v2209_v58 = vmul.f32 1.442695, %v2188_v23  ;;  %v4443_v33 = vpop.eup %4442 }
 0x3f1   :  { %v2141_v13 = vpop.permute.xlu1 %2140  ;;  %v2231_v5 = vsel %vm8300_vm10, %v4443_v33, 0.0  ;;  %vm1826_vm10 = vcmask 130112  }
 0x3f2   :  { %v2190_v53 = vsub.f32 %v6137_v46, %v2141_v13  ;;  %4448 = vpow2.f32 %v2209_v58 }
 0x3f4   :  { %v2213_v28 = vmul.f32 1.442695, %v2190_v53  ;;  %v6393_v63 = vpop.eup %4444  ;;  %2296 = vadd.xlane.f32.xlu0 %v2231_v5  ;;  %v1603_v53 = vmul.f32 %v6028_v12, %v1507_v57 }
 0x3f5   :  { %v2233_v11 = vsel %vm8301_vm2, %v6393_v63, 0.0  ;;  %vm8308_vm2 = vcmp.gt.f32.partialorder %v4800_v48, 0.0 }
 0x3f6   :  { %4450 = vpow2.f32 %v2213_v28 }
 0x3f8   :  { %v6395_v40 = vpop.eup %4446  ;;  %2300 = vadd.xlane.f32.xlu0 %v2233_v11 }
 0x3f9   :  { %v2234_v19 = vsel %vm8302_vm14, %v6395_v40, 0.0  ;;  %vm8312_vm14 = vcmp.gt.f32.partialorder %v4812_v60, 0.0 }
 0x3fc   :  { %v6405_v46 = vpop.eup %4448  ;;  %2302 = vadd.xlane.f32.xlu0 %v2234_v19 }
 0x3fd   :  { %v2236_v13 = vsel %vm8303_vm3, %v6405_v46, 0.0  ;;  %vm8314_vm3 = vcmp.gt.f32.partialorder %v4845_v17, 0.0 }
 0x400   :  { %v6410_v58 = vpop.eup %4450  ;;  %2306 = vadd.xlane.f32.xlu0 %v2236_v13 }
 0x401   :  { %v2238_v23 = vsel %vm8304_vm1, %v6410_v58, 0.0  ;;  %vm8317_vm1 = vcmp.gt.f32.partialorder %v4858_v39, 0.0 }
 0x404   :  { %2310 = vadd.xlane.f32.xlu0 %v2238_v23 }
 0x419   :  { %v2038_v50 = vpop.xlane.xlu0 %2037 }
 0x41a   :  { %v6418_v42 = vmax.f32 %v6415_v62, %v2038_v50 }
 0x41c   :  { %2263 = vst.msk [vmem:[#allocation2 + $0x78] sm:$0xff] %vm2247_vm6, %v6418_v42 }
 0x421   :  { %v2111_v29 = vpop.permute.xlu0 %2110 }
 0x422   :  { %v2184_v59 = vsub.f32 %v6124_v22, %v2111_v29 }
 0x423   :  { %v1767_v5 = vpop.permute.xlu1 %1766 }
 0x424   :  { %v2201_v28 = vmul.f32 1.442695, %v2184_v59  ;;  %v1812_v11 = vadd.f32 %v1767_v5, %v1603_v53 }
 0x425   :  { %v2126_v19 = vpop.permute.xlu0 %2125 }
 0x426   :  { %4452 = vpow2.f32 %v2201_v28  ;;  %v2187_v13 = vsub.f32 %v6141_v6, %v2126_v19  ;;  %1829 = vst.msk [vmem:[#allocation4 + $0x10] sm:$0xff] %vm1826_vm10, %v1812_v11 }
 0x427   :  { %v6426_v50 = vpop.permute.xlu1 %1762 }
 0x428   :  { %v2207_v23 = vmul.f32 1.442695, %v2187_v13  ;;  %8305 = vst [vmem:[#allocation65_spill] sm:$0xff] %v6426_v50 }
 0x429   :  { %v2136_v27 = vpop.permute.xlu0 %2135 }
 0x42a   :  { %4454 = vpow2.f32 %v2207_v23  ;;  %v2189_v31 = vsub.f32 %v6158_v16, %v2136_v27 }
 0x42c   :  { %v2211_v22 = vmul.f32 1.442695, %v2189_v31  ;;  %v6430_v57 = vpop.permute.xlu1 %1774 }
 0x42d   :  { %v2146_v29 = vpop.permute.xlu0 %2145  ;;  %8306 = vst [vmem:[#allocation45_spill] sm:$0xff] %v6430_v57 }
 0x42e   :  { %4456 = vpow2.f32 %v2211_v22  ;;  %v2191_v12 = vsub.f32 %v6175_v61, %v2146_v29 }
 0x430   :  { %v4453_v59 = vpop.eup %4452  ;;  %v2215_v53 = vmul.f32 1.442695, %v2191_v12  ;;  %v6440_v16 = vpop.permute.xlu1 %1770 }
 0x431   :  { %v6432_v28 = vpop.permute.xlu0 %1768  ;;  %v2232_v6 = vsel %vm8308_vm2, %v4453_v59, 0.0  ;;  %v4036_v5 = vpack.c.bf16 %v4453_v59, %v4443_v33  ;;  %8310 = vst [vmem:[#allocation48_spill] sm:$0xff] %v6440_v16  ;;  %vm8323_vm2 = vcmp.gt.f32.partialorder %v4876_v52, 0.0 }
 0x432   :  { %8307 = vst [vmem:[#allocation46_spill] sm:$0xff] %v6432_v28  ;;  %4458 = vpow2.f32 %v2215_v53  ;;  %2298 = vadd.xlane.f32.xlu1 %v2232_v6 }
 0x433   :  { %4227 = vmatprep.mubr.msk.bf16.mxu0 %vm5554_vm0, %v4036_v5 }
 0x434   :  { %v6438_v31 = vpop.eup %4454 }
 0x435   :  { %v6442_v61 = vpop.permute.xlu0 %1764  ;;  %v2235_v27 = vsel %vm8312_vm14, %v6438_v31, 0.0  ;;  %v6458_v29 = vpop.permute.xlu1 %1782  ;;  %vm8324_vm14 = vcmp.gt.f32.partialorder %v8272_v7, 0.0 }
 0x436   :  { %8311 = vst [vmem:[#allocation49_spill] sm:$0xff] %v6442_v61  ;;  %2304 = vadd.xlane.f32.xlu1 %v2235_v27  ;;  %8315 = vst [vmem:[#allocation54_spill] sm:$0xff] %v6458_v29 }
 0x438   :  { %v6449_v33 = vpop.eup %4456 }
 0x439   :  { %v6451_v13 = vpop.permute.xlu0 %1776  ;;  %v2237_v23 = vsel %vm8314_vm3, %v6449_v33, 0.0  ;;  %v6467_v6 = vpop.permute.xlu1 %1778  ;;  %vm8325_vm3 = vcmp.gt.f32.partialorder %v4901_v4, 0.0 }
 0x43a   :  { %8313 = vst [vmem:[#allocation52_spill] sm:$0xff] %v6451_v13  ;;  %2308 = vadd.xlane.f32.xlu1 %v2237_v23  ;;  %8318 = vst [vmem:[#allocation59_spill] sm:$0xff] %v6467_v6 }
 0x43c   :  { %v6460_v12 = vpop.eup %4458 }
 0x43d   :  { %v6462_v59 = vpop.permute.xlu0 %1772  ;;  %v2239_v53 = vsel %vm8317_vm1, %v6460_v12, 0.0  ;;  %v6471_v27 = vpop.permute.xlu1 %1790  ;;  %vm8326_vm1 = vcmp.gt.f32.partialorder %v8278_v26, 0.0 }
 0x43e   :  { %8316 = vst [vmem:[#allocation57_spill] sm:$0xff] %v6462_v59  ;;  %2312 = vadd.xlane.f32.xlu1 %v2239_v53  ;;  %8320 = vst [vmem:[#allocation74_spill] sm:$0xff] %v6471_v27 }
 0x441   :  { %v6469_v5 = vpop.permute.xlu0 %1784  ;;  %v6476_v13 = vpop.permute.xlu1 %1786 }
 0x442   :  { %8319 = vst [vmem:[#allocation11_spill] sm:$0xff] %v6469_v5  ;;  %8322 = vst [vmem:[#allocation75_spill] sm:$0xff] %v6476_v13 }
 0x445   :  { %v6473_v19 = vpop.permute.xlu0 %1780 }
 0x446   :  { %8321 = vst [vmem:[#allocation12_spill] sm:$0xff] %v6473_v19 }
 0x44c   :  { %v2156_v23 = vpop.permute.xlu0 %2155 }
 0x44d   :  { %v2193_v22 = vsub.f32 %v6191_v2, %v2156_v23 }
 0x44f   :  { %v2219_v28 = vmul.f32 1.442695, %v2193_v22 }
 0x450   :  { %v2166_v59 = vpop.permute.xlu0 %2165 }
 0x451   :  { %4460 = vpow2.f32 %v2219_v28  ;;  %v2195_v50 = vsub.f32 %v6203_v56, %v2166_v59 }
 0x452   :  { %v2151_v29 = vpop.permute.xlu1 %2150 }
 0x453   :  { %v2223_v53 = vmul.f32 1.442695, %v2195_v50  ;;  %v2192_v6 = vsub.f32 %v6154_v41, %v2151_v29 }
 0x454   :  { %v2176_v57 = vpop.permute.xlu0 %2175 }
 0x455   :  { %4462 = vpow2.f32 %v2223_v53  ;;  %v2217_v5 = vmul.f32 1.442695, %v2192_v6  ;;  %v2197_v27 = vsub.f32 %v6213_v18, %v2176_v57 }
 0x456   :  { %v2161_v19 = vpop.permute.xlu1 %2160 }
 0x457   :  { %4464 = vpow2.f32 %v2217_v5  ;;  %v2227_v16 = vmul.f32 1.442695, %v2197_v27  ;;  %v2194_v2 = vsub.f32 %v6171_v24, %v2161_v19 }
 0x459   :  { %4466 = vpow2.f32 %v2227_v16  ;;  %v2221_v22 = vmul.f32 1.442695, %v2194_v2 }
 0x45a   :  { %v2171_v23 = vpop.permute.xlu1 %2170 }
 0x45b   :  { %v6482_v28 = vpop.eup %4460  ;;  %4468 = vpow2.f32 %v2221_v22  ;;  %v2196_v56 = vsub.f32 %v6187_v14, %v2171_v23  ;;  %v8327_v22 = vsub.f32 %v6224_v32, %v6227_v36  ;;  %v8331_v36 = vsub.f32 %v6273_v38, %v6278_v51  ;;  %v2266_v38 = vld [vmem:[#allocation3 + $0x10] sm:$0xff] }
 0x45c   :  { %v2241_v41 = vsel %vm8323_vm2, %v6482_v28, 0.0  ;;  %v2068_v51 = vsub.f32 %v6324_v15, %v6329_v55 }
 0x45d   :  { %v2225_v50 = vmul.f32 1.442695, %v2196_v56  ;;  %2316 = vadd.xlane.f32.xlu1 %v2241_v41  ;;  %v2071_v23 = vmul.f32 1.442695, %v8327_v22  ;;  %v8328_v56 = vsub.f32 %v6234_v25, %v6237_v3  ;;  %v2085_v25 = vmul.f32 1.442695, %v8331_v36 }
 0x45e   :  { %v2064_v3 = vsub.f32 %v6292_v37, %v6297_v43  ;;  %v2269_v36 = vld [vmem:[#allocation3 + $0x28] sm:$0xff] }
 0x45f   :  { %v6488_v18 = vpop.eup %4462  ;;  %4470 = vpow2.f32 %v2225_v50  ;;  %v2075_v41 = vmul.f32 1.442695, %v8328_v56  ;;  %v8329_v50 = vsub.f32 %v6244_v47, %v6247_v54  ;;  %v2066_v47 = vsub.f32 %v6308_v21, %v6313_v30 }
 0x460   :  { %v2243_v24 = vsel %vm8324_vm14, %v6488_v18, 0.0  ;;  %4472 = vpow2.f32 %v2071_v23  ;;  %v2089_v54 = vmul.f32 1.442695, %v2064_v3  ;;  %v2097_v21 = vmul.f32 1.442695, %v2068_v51  ;;  %v6577_v51 = vld [vmem:[%s7835_s2 + $0x28] sm:$0xff]  }
 0x461   :  { %v6493_v57 = vpop.eup %4464  ;;  %2320 = vadd.xlane.f32.xlu1 %v2243_v24  ;;  %4474 = vpow2.f32 %v2075_v41  ;;  %v2077_v24 = vmul.f32 1.442695, %v8329_v50  ;;  %v2093_v56 = vmul.f32 1.442695, %v2066_v47  ;;  %v2070_v30 = vsub.f32 %v6415_v62, %v6418_v42  ;;  %v2271_v62 = vld [vmem:[#allocation3 + $0x38] sm:$0xff] }
 0x462   :  { %v2240_v14 = vsel %vm8325_vm3, %v6493_v57, 0.0 }
 0x463   :  { %v6500_v19 = vpop.eup %4466  ;;  %2314 = vadd.xlane.f32.xlu0 %v2240_v14  ;;  %4476 = vpow2.f32 %v2077_v24  ;;  %v8330_v14 = vsub.f32 %v6254_v20, %v6259_v49  ;;  %v2267_v24 = vld [vmem:[#allocation3 + $0x18] sm:$0xff]  ;;  %v2101_v55 = vmul.f32 1.442695, %v2070_v30  ;;  %v8335_v30 = vld [vmem:[#allocation47_spill] sm:$0xff] }
 0x464   :  { %v2245_v29 = vsel %vm8326_vm1, %v6500_v19, 0.0  ;;  %vm8398_vm1 = vcmp.gt.f32.partialorder %v4790_v44, 0.0 }
 0x465   :  { %v6505_v59 = vpop.eup %4468  ;;  %2324 = vadd.xlane.f32.xlu1 %v2245_v29  ;;  %v2081_v29 = vmul.f32 1.442695, %v8330_v14 }
 0x466   :  { %v2242_v6 = vsel %vm152_vm11, %v6505_v59, 0.0 }
 0x467   :  { %2318 = vadd.xlane.f32.xlu0 %v2242_v6  ;;  %4478 = vpow2.f32 %v2081_v29 }
 0x468   :  { %4480 = vpow2.f32 %v2085_v25 }
 0x469   :  { %v6512_v27 = vpop.eup %4470  ;;  %4482 = vpow2.f32 %v2089_v54 }
 0x46a   :  { %v2244_v53 = vsel %vm154_vm9, %v6512_v27, 0.0  ;;  %v4473_v32 = vpop.eup %4472  ;;  %4484 = vpow2.f32 %v2093_v56  ;;  %v6570_v56 = vld [vmem:[%s7835_s2 + $0x18] sm:$0xff]  }
 0x46b   :  { %2322 = vadd.xlane.f32.xlu0 %v2244_v53  ;;  %v4475_v6 = vpop.eup %4474  ;;  %v2264_v53 = vld [vmem:[#allocation3] sm:$0xff]  ;;  %4486 = vpow2.f32 %v2097_v21 }
 0x46c   :  { %v2280_v49 = vmul.f32 %v4473_v32, %v2264_v53  ;;  %v2282_v43 = vmul.f32 %v4475_v6, %v2266_v38  ;;  %4488 = vpow2.f32 %v2101_v55  ;;  %v6584_v38 = vld [vmem:[%s7835_s2 + $0x38] sm:$0xff]  }
 0x46d   :  { %v4477_v20 = vpop.eup %4476 }
 0x46e   :  { %v2283_v14 = vmul.f32 %v4477_v20, %v2267_v24  ;;  %v8336_v24 = vld [vmem:[#allocation51_spill] sm:$0xff] }
 0x471   :  { %v4479_v37 = vpop.eup %4478 }
 0x472   :  { %v4481_v29 = vpop.eup %4480  ;;  %v2285_v25 = vmul.f32 %v4479_v37, %v2269_v36 }
 0x473   :  { %v6546_v3 = vpop.eup %4482 }
 0x474   :  { %v6550_v47 = vpop.eup %4484 }
 0x476   :  { %2180 = vperm.xlu1 %4294, %v6418_v42   ;;  %v2287_v42 = vmul.f32 %v4481_v29, %v2271_v62  ;;  %v2268_v62 = vld [vmem:[#allocation3 + $0x20] sm:$0xff] }
 0x47a   :  { %2378 = vperm.xlu1 %4294, %v4473_v32  }
 0x47e   :  { %2388 = vperm.xlu1 %4294, %v4475_v6  }
 0x481   :  { %v2297_v22 = vpop.xlane.xlu0 %2296 }
 0x482   :  { %v2328_v23 = vadd.f32 %v2297_v22, %v2280_v49  ;;  %2393 = vperm.xlu1 %4294, %v4477_v20   ;;  %v6554_v20 = vpop.eup %4486 }
 0x483   :  { %v6557_v22 = vpop.eup %4488 }
 0x484   :  { %2344 = vst.msk [vmem:[#allocation3] sm:$0xff] %vm2247_vm6, %v2328_v23  ;;  %v6563_v23 = vld [vmem:[%s7835_s2 + $0x8] sm:$0xff]  }
 0x485   :  { %v2301_v41 = vpop.xlane.xlu0 %2300 }
 0x486   :  { %v2330_v50 = vadd.f32 %v2301_v41, %v2282_v43  ;;  %2403 = vperm.xlu1 %4294, %v4479_v37   ;;  %v8332_v43 = vsub.f32 %v6256_v10, %v6262_v34  ;;  %v8333_v41 = vld [vmem:[#allocation33_spill] sm:$0xff]  ;;  %v2265_v10 = vld [vmem:[#allocation3 + $0x8] sm:$0xff] }
 0x488   :  { %2346 = vst.msk [vmem:[#allocation3 + $0x10] sm:$0xff] %vm2247_vm6, %v2330_v50  ;;  %v2073_v37 = vmul.f32 1.442695, %v8332_v43  ;;  %v8334_v50 = vsub.f32 %v8333_v41, %v6281_v0 }
 0x489   :  { %v2303_v32 = vpop.xlane.xlu0 %2302 }
 0x48a   :  { %v2331_v15 = vadd.f32 %v2303_v32, %v2283_v14  ;;  %2413 = vperm.xlu1 %4294, %v4481_v29   ;;  %4490 = vpow2.f32 %v2073_v37  ;;  %v2079_v21 = vmul.f32 1.442695, %v8334_v50  ;;  %v8337_v14 = vsub.f32 %v8335_v30, %v8336_v24  ;;  %v8338_v32 = vld [vmem:[#allocation34_spill] sm:$0xff]  ;;  %v2270_v37 = vld [vmem:[#allocation3 + $0x30] sm:$0xff]  ;;  %v2272_v24 = vld [vmem:[#allocation3 + $0x40] sm:$0xff] }
 0x48c   :  { %2347 = vst.msk [vmem:[#allocation3 + $0x18] sm:$0xff] %vm2247_vm6, %v2331_v15  ;;  %4492 = vpow2.f32 %v2079_v21  ;;  %v2083_v29 = vmul.f32 1.442695, %v8337_v14  ;;  %v8339_v15 = vld [vmem:[#allocation35_spill] sm:$0xff] }
 0x48d   :  { %v2307_v6 = vpop.xlane.xlu0 %2306  ;;  %v8340_v55 = vsub.f32 %v8338_v32, %v8339_v15  ;;  %v8345_v15 = vld [vmem:[#allocation36_spill] sm:$0xff] }
 0x48e   :  { %v2333_v54 = vadd.f32 %v2307_v6, %v2285_v25  ;;  %2423 = vperm.xlu1 %4294, %v6546_v3   ;;  %4494 = vpow2.f32 %v2083_v29 }
 0x48f   :  { %v2087_v36 = vmul.f32 1.442695, %v8340_v55  ;;  %v8346_v55 = vld [vmem:[#allocation56_spill] sm:$0xff] }
 0x490   :  { %2349 = vst.msk [vmem:[#allocation3 + $0x28] sm:$0xff] %vm2247_vm6, %v2333_v54 }
 0x491   :  { %v2311_v53 = vpop.xlane.xlu0 %2310  ;;  %4496 = vpow2.f32 %v2087_v36  ;;  %v2065_v36 = vsub.f32 %v8346_v55, %v8345_v15 }
 0x492   :  { %v2335_v49 = vadd.f32 %v2311_v53, %v2287_v42  ;;  %2433 = vperm.xlu1 %4294, %v6550_v47  }
 0x494   :  { %2351 = vst.msk [vmem:[#allocation3 + $0x38] sm:$0xff] %vm2247_vm6, %v2335_v49  ;;  %v6600_v25 = vpop.eup %4490 }
 0x495   :  { %8341 = vst [vmem:[#allocation13_spill] sm:$0xff] %v6600_v25  ;;  %v2281_v34 = vmul.f32 %v6600_v25, %v2265_v10  ;;  %v2091_v10 = vmul.f32 1.442695, %v2065_v36 }
 0x496   :  { %2443 = vperm.xlu1 %4294, %v6554_v20   ;;  %v6603_v6 = vpop.eup %4492 }
 0x497   :  { %8342 = vst [vmem:[#allocation66_spill] sm:$0xff] %v6603_v6  ;;  %v2284_v42 = vmul.f32 %v6603_v6, %v2268_v62  ;;  %4498 = vpow2.f32 %v2091_v10  ;;  %v2273_v10 = vld [vmem:[#allocation3 + $0x48] sm:$0xff] }
 0x498   :  { %v6607_v53 = vpop.eup %4494 }
 0x499   :  { %8343 = vst [vmem:[#allocation33_spill] sm:$0xff] %v6607_v53  ;;  %v2286_v41 = vmul.f32 %v6607_v53, %v2270_v37 }
 0x49a   :  { %2453 = vperm.xlu1 %4294, %v6557_v22  }
 0x49b   :  { %v6611_v50 = vpop.eup %4496 }
 0x49c   :  { %8344 = vst [vmem:[#allocation47_spill] sm:$0xff] %v6611_v50  ;;  %v2288_v14 = vmul.f32 %v6611_v50, %v2272_v24 }
 0x49e   :  { %2482 = vrot.lane.b32.xlu1 %v6563_v23, %s4657_s16 }
 0x4a2   :  { %2486 = vrot.lane.b32.xlu1 %v6570_v56, %s4657_s16 }
 0x4a6   :  { %2490 = vrot.lane.b32.xlu1 %v6577_v51, %s4657_s16 }
 0x4aa   :  { %2494 = vrot.lane.b32.xlu1 %v6584_v38, %s4657_s16 }
 0x4bf   :  { %v2299_v0 = vpop.xlane.xlu1 %2298 }
 0x4c0   :  { %v2329_v54 = vadd.f32 %v2299_v0, %v2281_v34  ;;  %v8347_v34 = vld [vmem:[#allocation61_spill] sm:$0xff] }
 0x4c1   :  { %v8348_v0 = vld [vmem:[#allocation37_spill] sm:$0xff] }
 0x4c2   :  { %2345 = vst.msk [vmem:[#allocation3 + $0x8] sm:$0xff] %vm2247_vm6, %v2329_v54  ;;  %v2067_v54 = vsub.f32 %v8348_v0, %v8347_v34  ;;  %v2289_v0 = vmul.f32 %v6546_v3, %v2273_v10  ;;  %v2277_v3 = vld [vmem:[#allocation3 + $0x68] sm:$0xff] }
 0x4c3   :  { %v2305_v49 = vpop.xlane.xlu1 %2304  ;;  %v2293_v10 = vmul.f32 %v6554_v20, %v2277_v3  ;;  %v6653_v20 = vld [vmem:[%s7835_s2 + $0x10] sm:$0xff]  }
 0x4c4   :  { %v2332_v43 = vadd.f32 %v2305_v49, %v2284_v42  ;;  %v2095_v62 = vmul.f32 1.442695, %v2067_v54  ;;  %v8349_v42 = vld [vmem:[#allocation40_spill] sm:$0xff]  ;;  %v8350_v49 = vld [vmem:[#allocation39_spill] sm:$0xff] }
 0x4c6   :  { %2348 = vst.msk [vmem:[#allocation3 + $0x20] sm:$0xff] %vm2247_vm6, %v2332_v43  ;;  %v2069_v43 = vsub.f32 %v8350_v49, %v8349_v42  ;;  %4500 = vpow2.f32 %v2095_v62  ;;  %v2278_v62 = vld [vmem:[#allocation3 + $0x70] sm:$0xff] }
 0x4c7   :  { %v2309_v21 = vpop.xlane.xlu1 %2308 }
 0x4c8   :  { %v2334_v30 = vadd.f32 %v2309_v21, %v2286_v41  ;;  %v2099_v37 = vmul.f32 1.442695, %v2069_v43  ;;  %v6622_v41 = vpop.eup %4498  ;;  %v2274_v21 = vld [vmem:[#allocation3 + $0x50] sm:$0xff] }
 0x4c9   :  { %8351 = vst [vmem:[#allocation51_spill] sm:$0xff] %v6622_v41 }
 0x4ca   :  { %2350 = vst.msk [vmem:[#allocation3 + $0x30] sm:$0xff] %vm2247_vm6, %v2334_v30  ;;  %4502 = vpow2.f32 %v2099_v37  ;;  %v2290_v30 = vmul.f32 %v6622_v41, %v2274_v21  ;;  %v2275_v37 = vld [vmem:[#allocation3 + $0x58] sm:$0xff] }
 0x4cb   :  { %v2313_v29 = vpop.xlane.xlu1 %2312 }
 0x4cc   :  { %v2336_v32 = vadd.f32 %v2313_v29, %v2288_v14 }
 0x4ce   :  { %2352 = vst.msk [vmem:[#allocation3 + $0x40] sm:$0xff] %vm2247_vm6, %v2336_v32  ;;  %v2276_v32 = vld [vmem:[#allocation3 + $0x60] sm:$0xff] }
 0x4d0   :  { %v6625_v24 = vpop.eup %4500 }
 0x4d1   :  { %8352 = vst [vmem:[#allocation34_spill] sm:$0xff] %v6625_v24  ;;  %v2292_v15 = vmul.f32 %v6625_v24, %v2276_v32 }
 0x4d4   :  { %v6629_v55 = vpop.eup %4502 }
 0x4d5   :  { %8353 = vst [vmem:[#allocation35_spill] sm:$0xff] %v6629_v55  ;;  %v2294_v49 = vmul.f32 %v6629_v55, %v2278_v62 }
 0x4ea   :  { %v2317_v14 = vpop.xlane.xlu1 %2316 }
 0x4eb   :  { %v2338_v29 = vadd.f32 %v2317_v14, %v2290_v30  ;;  %v2291_v30 = vmul.f32 %v6550_v47, %v2275_v37  ;;  %v8355_v47 = vld [vmem:[#allocation10_spill] sm:$0xff]  ;;  %v6667_v37 = vld [vmem:[%s7835_s2 + $0x30] sm:$0xff]  }
 0x4ec   :  { %vm8356_vm2 = vcmp.gt.f32.partialorder %v8355_v47, 0.0 }
 0x4ed   :  { %2354 = vst.msk [vmem:[#allocation3 + $0x50] sm:$0xff] %vm2247_vm6, %v2338_v29 }
 0x4ee   :  { %v2321_v36 = vpop.xlane.xlu1 %2320 }
 0x4ef   :  { %v2340_v34 = vadd.f32 %v2321_v36, %v2292_v15  ;;  %v8354_v15 = vld [vmem:[#allocation64_spill] sm:$0xff] }
 0x4f0   :  { %v2315_v54 = vpop.xlane.xlu0 %2314 }
 0x4f1   :  { %2356 = vst.msk [vmem:[#allocation3 + $0x60] sm:$0xff] %vm2247_vm6, %v2340_v34  ;;  %v2337_v42 = vadd.f32 %v2315_v54, %v2289_v0 }
 0x4f2   :  { %v2325_v43 = vpop.xlane.xlu1 %2324 }
 0x4f3   :  { %2353 = vst.msk [vmem:[#allocation3 + $0x48] sm:$0xff] %vm2247_vm6, %v2337_v42  ;;  %v2342_v21 = vadd.f32 %v2325_v43, %v2294_v49  ;;  %v6646_v49 = vld [vmem:[%s7835_s2] sm:$0xff]  }
 0x4f4   :  { %v2319_v14 = vpop.xlane.xlu0 %2318  ;;  %v6660_v43 = vld [vmem:[%s7835_s2 + $0x20] sm:$0xff]   ;;  %s4659_s2 = smov 16  }
 0x4f5   :  { %2358 = vst.msk [vmem:[#allocation3 + $0x70] sm:$0xff] %vm2247_vm6, %v2342_v21  ;;  %v2339_v29 = vadd.f32 %v2319_v14, %v2291_v30  ;;  %v8357_v21 = vld [vmem:[#allocation42_spill] sm:$0xff]  ;;  %v8358_v30 = vld [vmem:[#allocation43_spill] sm:$0xff] }
 0x4f6   :  { %v2181_v32 = vpop.permute.xlu1 %2180 }
 0x4f7   :  { %2355 = vst.msk [vmem:[#allocation3 + $0x58] sm:$0xff] %vm2247_vm6, %v2339_v29  ;;  %v2198_v36 = vsub.f32 %v8354_v15, %v2181_v32 }
 0x4f8   :  { %v2323_v34 = vpop.xlane.xlu0 %2322 }
 0x4f9   :  { %v2229_v0 = vmul.f32 1.442695, %v2198_v36  ;;  %v2341_v54 = vadd.f32 %v2323_v34, %v2293_v10 }
 0x4fa   :  { %v6675_v14 = vpop.permute.xlu1 %2378 }
 0x4fb   :  { %4504 = vpow2.f32 %v2229_v0  ;;  %2357 = vst.msk [vmem:[#allocation3 + $0x68] sm:$0xff] %vm2247_vm6, %v2341_v54  ;;  %8359 = vst [vmem:[#allocation36_spill] sm:$0xff] %v6675_v14  ;;  %v2279_v0 = vld [vmem:[#allocation3 + $0x78] sm:$0xff] }
 0x4fc   :  { %v2295_v54 = vmul.f32 %v6557_v22, %v2279_v0 }
 0x4fe   :  { %v6677_v29 = vpop.permute.xlu1 %2388 }
 0x502   :  { %v6679_v32 = vpop.permute.xlu1 %2393 }
 0x503   :  { %8360 = vst [vmem:[#allocation56_spill] sm:$0xff] %v6679_v32 }
 0x505   :  { %v4505_v62 = vpop.eup %4504 }
 0x506   :  { %v2246_v42 = vsel %vm8356_vm2, %v4505_v62, 0.0  ;;  %v6681_v3 = vpop.permute.xlu1 %2403 }
 0x507   :  { %2326 = vadd.xlane.f32.xlu0 %v2246_v42  ;;  %8361 = vst [vmem:[#allocation61_spill] sm:$0xff] %v6681_v3  ;;  %v8404_v3 = vld [vmem:[#allocation6_spill] sm:$0xff] }
 0x50a   :  { %v6683_v15 = vpop.permute.xlu1 %2413 }
 0x50b   :  { %8362 = vst [vmem:[#allocation37_spill] sm:$0xff] %v6683_v15 }
 0x50e   :  { %v6685_v36 = vpop.permute.xlu1 %2423 }
 0x50f   :  { %8363 = vst [vmem:[#allocation40_spill] sm:$0xff] %v6685_v36 }
 0x512   :  { %v6687_v10 = vpop.permute.xlu1 %2433 }
 0x513   :  { %8364 = vst [vmem:[#allocation39_spill] sm:$0xff] %v6687_v10 }
 0x516   :  { %v6689_v34 = vpop.permute.xlu1 %2443 }
 0x517   :  { %8365 = vst [vmem:[#allocation64_spill] sm:$0xff] %v6689_v34 }
 0x51a   :  { %v6692_v42 = vpop.permute.xlu1 %2453 }
 0x51b   :  { %8366 = vst [vmem:[#allocation42_spill] sm:$0xff] %v6692_v42 }
 0x51d   :  { %2480 = vrot.lane.b32.xlu0 %v6646_v49, %s4657_s16 }
 0x51e   :  { %v2483_v5 = vpop.permute.xlu1 %2482 }
 0x521   :  { %2484 = vrot.lane.b32.xlu0 %v6653_v20, %s4657_s16 }
 0x522   :  { %v2487_v10 = vpop.permute.xlu1 %2486 }
 0x525   :  { %2488 = vrot.lane.b32.xlu0 %v6660_v43, %s4657_s16 }
 0x526   :  { %v2491_v22 = vpop.permute.xlu1 %2490 }
 0x529   :  { %2492 = vrot.lane.b32.xlu0 %v6667_v37, %s4657_s16 }
 0x52d   :  { %1792 = vrot.lane.b32.xlu0 %v8357_v21, %s4656_s13 }
 0x531   :  { %1788 = vrot.lane.b32.xlu0 %v8358_v30, %s4656_s13 }
 0x594   :  { %v2327_v21 = vpop.xlane.xlu0 %2326 }
 0x595   :  { %v2343_v30 = vadd.f32 %v2327_v21, %v2295_v54  ;;  %v2495_v54 = vpop.permute.xlu1 %2494 }
 0x597   :  { %2359 = vst.msk [vmem:[#allocation3 + $0x78] sm:$0xff] %vm2247_vm6, %v2343_v30  ;;  %v8373_v30 = vpack.c.bf16 %v6493_v57, %v6460_v12  ;;  %v7977_v12 = vmov 3   ;;  %vm7979_vm6 = vcmask 195712  }
 0x598   :  { %v2481_v2 = vpop.permute.xlu0 %2480  ;;  %4296 = vset.pattern.permute.xlu0 %v7977_v12  ;;  %4297 = vset.pattern.permute.xlu1 %v7977_v12 }
 0x599   :  { %4211 = vmatprep.subr.bf16.mxu0 %v2481_v2 }
 0x59a   :  { %4212 = vmatpush3.bf16.msra.mxu0 %v2481_v2 }
 0x59b   :  { %4213 = vmatprep.subr.bf16.mxu0 %v2483_v5 }
 0x59c   :  { %v2485_v16 = vpop.permute.xlu0 %2484 }
 0x59e   :  { %4214 = vmatpush3.bf16.msra.mxu0 %v2483_v5  ;;  %v8367_v5 = vpack.c.bf16 %v6395_v40, %v6393_v63  ;;  %v8375_v63 = vpack.c.bf16 %v6505_v59, %v6482_v28 }
 0x59f   :  { %4215 = vmatprep.subr.bf16.mxu0 %v2485_v16 }
 0x5a0   :  { %v2489_v34 = vpop.permute.xlu0 %2488 }
 0x5a2   :  { %4216 = vmatpush3.bf16.msra.mxu0 %v2485_v16  ;;  %v8369_v16 = vpack.c.bf16 %v6405_v46, %v6438_v31  ;;  %v8377_v46 = vpack.c.bf16 %v6512_v27, %v6488_v18 }
 0x5a3   :  { %4217 = vmatprep.subr.bf16.mxu0 %v2487_v10 }
 0x5a4   :  { %v2493_v0 = vpop.permute.xlu0 %2492 }
 0x5a6   :  { %4218 = vmatpush3.bf16.msra.mxu0 %v2487_v10 }
 0x5a7   :  { %4219 = vmatprep.subr.bf16.mxu0 %v2489_v34 }
 0x5aa   :  { %4220 = vmatpush3.bf16.msra.mxu0 %v2489_v34  ;;  %v8371_v34 = vpack.c.bf16 %v6410_v58, %v6449_v33  ;;  %v4057_v58 = vpack.c.bf16 %v4505_v62, %v6500_v19 }
 0x5ab   :  { %4221 = vmatprep.subr.bf16.mxu0 %v2491_v22 }
 0x5ae   :  { %4222 = vmatpush3.bf16.msra.mxu0 %v2491_v22 }
 0x5af   :  { %4223 = vmatprep.subr.bf16.mxu0 %v2493_v0 }
 0x5b2   :  { %4224 = vmatpush3.bf16.msra.mxu0 %v2493_v0 }
 0x5b3   :  { %4225 = vmatprep.subr.bf16.mxu0 %v2495_v54 }
 0x5b6   :  { %4226 = vmatpush3.bf16.msra.mxu0 %v2495_v54 }
 0x5b9   :  { %4228 = vmatmul.mubr.msk.bf16.vlgmr.msra.gmra.mrb[16].mxu0 %vm5562_vm15, %v8367_v5 }
 0x5ba   :  { %4231 = vmatprep.mubr.msk.bf16.mxu0 %vm5580_vm7, %v8369_v16 }
 0x5c1   :  { %4232 = vmatmul.mubr.msk.bf16.gmra.mrb[20].mxu0 %vm5596_vm8, %v8371_v34 }
 0x5c2   :  { %4235 = vmatprep.mubr.msk.bf16.mxu0 %vm5612_vm13, %v8373_v30 }
 0x5c9   :  { %4236 = vmatmul.mubr.msk.bf16.gmra.mrb[24].mxu0 %vm5629_vm12, %v8375_v63 }
 0x5ca   :  { %4239 = vmatprep.mubr.msk.bf16.mxu0 %vm5646_vm5, %v8377_v46 }
 0x5d1   :  { %4240 = vmatmul.mubr.msk.bf16.gmra.mrb[28].mxu0 %vm5663_vm4, %v4057_v58 }
 0x68c   :  { %v4229_v28 = vpop.f32.mrb[16].mxu0 }
 0x68d   :  { %v2538_v57 = vpop.f32.mrb[17].mxu0 }
 0x68e   :  { %2617 = vrot.lane.b32.xlu0 %v2538_v57, %s4659_s2  ;;  %v4230_v59 = vpop.f32.mrb[18].mxu0  ;;  %v4634_v57 = vld [vmem:[%s7832_s0 + $0x8] sm:$0xff] }
 0x68f   :  { %v2541_v0 = vpop.f32.mrb[19].mxu0 }
 0x690   :  { %2619 = vrot.lane.b32.xlu1 %v2541_v0, %s4659_s2  ;;  %v4636_v0 = vld [vmem:[%s7832_s0 + $0x10] sm:$0xff] }
 0x692   :  { %2621 = vrot.lane.b32.xlu0 %v4229_v28, %s4659_s2  ;;  %v4633_v28 = vld [vmem:[%s7832_s0] sm:$0xff] }
 0x694   :  { %2623 = vrot.lane.b32.xlu1 %v4230_v59, %s4659_s2  ;;  %v4233_v18 = vpop.f32.mrb[20].mxu0  ;;  %v4635_v59 = vld [vmem:[%s7832_s0 + $0x18] sm:$0xff] }
 0x695   :  { %v2554_v27 = vpop.f32.mrb[21].mxu0 }
 0x696   :  { %2625 = vrot.lane.b32.xlu0 %v2554_v27, %s4659_s2  ;;  %v4234_v19 = vpop.f32.mrb[22].mxu0  ;;  %v4638_v27 = vld [vmem:[%s7832_s0 + $0x20] sm:$0xff] }
 0x697   :  { %v2557_v62 = vpop.f32.mrb[23].mxu0 }
 0x698   :  { %2627 = vrot.lane.b32.xlu1 %v2557_v62, %s4659_s2  ;;  %v4640_v62 = vld [vmem:[%s7832_s0 + $0x30] sm:$0xff] }
 0x69a   :  { %2629 = vrot.lane.b32.xlu0 %v4233_v18, %s4659_s2  ;;  %v4637_v18 = vld [vmem:[%s7832_s0 + $0x28] sm:$0xff] }
 0x69c   :  { %2631 = vrot.lane.b32.xlu1 %v4234_v19, %s4659_s2  ;;  %v4237_v54 = vpop.f32.mrb[24].mxu0  ;;  %v4639_v19 = vld [vmem:[%s7832_s0 + $0x38] sm:$0xff] }
 0x69d   :  { %v2570_v5 = vpop.f32.mrb[25].mxu0 }
 0x69e   :  { %2633 = vrot.lane.b32.xlu0 %v2570_v5, %s4659_s2  ;;  %v4238_v16 = vpop.f32.mrb[26].mxu0  ;;  %v4642_v5 = vld [vmem:[%s7832_s0 + $0x40] sm:$0xff] }
 0x69f   :  { %v2573_v34 = vpop.f32.mrb[27].mxu0 }
 0x6a0   :  { %2635 = vrot.lane.b32.xlu1 %v2573_v34, %s4659_s2  ;;  %v4644_v34 = vld [vmem:[%s7832_s0 + $0x50] sm:$0xff] }
 0x6a2   :  { %2637 = vrot.lane.b32.xlu0 %v4237_v54, %s4659_s2  ;;  %v4641_v54 = vld [vmem:[%s7832_s0 + $0x48] sm:$0xff] }
 0x6a4   :  { %2639 = vrot.lane.b32.xlu1 %v4238_v16, %s4659_s2  ;;  %v4241_v30 = vpop.f32.mrb[28].mxu0  ;;  %v4643_v16 = vld [vmem:[%s7832_s0 + $0x58] sm:$0xff] }
 0x6a5   :  { %v2586_v63 = vpop.f32.mrb[29].mxu0 }
 0x6a6   :  { %2641 = vrot.lane.b32.xlu0 %v2586_v63, %s4659_s2  ;;  %v4242_v46 = vpop.f32.mrb[30].mxu0  ;;  %v4646_v63 = vld [vmem:[%s7832_s0 + $0x60] sm:$0xff] }
 0x6a7   :  { %v2589_v58 = vpop.f32.mrb[31].mxu0 }
 0x6a8   :  { %2643 = vrot.lane.b32.xlu1 %v2589_v58, %s4659_s2  ;;  %v6775_v58 = vpop.permute.xlu0 %1792 }
 0x6a9   :  { %8380 = vst [vmem:[#allocation43_spill] sm:$0xff] %v6775_v58 }
 0x6aa   :  { %2645 = vrot.lane.b32.xlu0 %v4241_v30, %s4659_s2  ;;  %v4645_v30 = vld [vmem:[%s7832_s0 + $0x68] sm:$0xff] }
 0x6ac   :  { %2647 = vrot.lane.b32.xlu1 %v4242_v46, %s4659_s2  ;;  %v4647_v46 = vld [vmem:[%s7832_s0 + $0x70] sm:$0xff] }
 0x6ae   :  { %2699 = vperm.xlu0 %4296, %v4633_v28   ;;  %v6777_v28 = vpop.permute.xlu0 %1788 }
 0x6af   :  { %8381 = vst [vmem:[#allocation76_spill] sm:$0xff] %v6777_v28 }
 0x6b0   :  { %2703 = vperm.xlu1 %4297, %v4634_v57  }
 0x6b2   :  { %2711 = vperm.xlu0 %4296, %v4635_v59   ;;  %v2362_v59 = vld [vmem:[#allocation4 + $0x10] sm:$0xff] }
 0x6b4   :  { %2707 = vperm.xlu1 %4297, %v4636_v0  }
 0x6b6   :  { %2719 = vperm.xlu0 %4296, %v4637_v18   ;;  %v2458_v18 = vmul.f32 %v6677_v29, %v2362_v59 }
 0x6b8   :  { %2715 = vperm.xlu1 %4297, %v4638_v27  }
 0x6ba   :  { %2727 = vperm.xlu0 %4296, %v4639_v19  }
 0x6bc   :  { %2723 = vperm.xlu1 %4297, %v4640_v62  }
 0x6be   :  { %2735 = vperm.xlu0 %4296, %v4641_v54  }
 0x6c0   :  { %2731 = vperm.xlu1 %4297, %v4642_v5  }
 0x6c2   :  { %2743 = vperm.xlu0 %4296, %v4643_v16  }
 0x6c4   :  { %2739 = vperm.xlu1 %4297, %v4644_v34  }
 0x6c6   :  { %2751 = vperm.xlu0 %4296, %v4645_v30  }
 0x6c8   :  { %2747 = vperm.xlu1 %4297, %v4646_v63  }
 0x6cc   :  { %2755 = vperm.xlu1 %4297, %v4647_v46  }
 0x700   :  { %v6779_v57 = vpop.permute.xlu0 %2617 }
 0x701   :  { %8382 = vst [vmem:[#allocation77_spill] sm:$0xff] %v6779_v57 }
 0x702   :  { %v6781_v0 = vpop.permute.xlu1 %2619 }
 0x703   :  { %8383 = vst [vmem:[#allocation78_spill] sm:$0xff] %v6781_v0 }
 0x704   :  { %v2622_v27 = vpop.permute.xlu0 %2621 }
 0x705   :  { %v2667_v19 = vadd.f32 %v2622_v27, %v2458_v18  ;;  %v8395_v27 = vld [vmem:[#allocation5_spill] sm:$0xff] }
 0x706   :  { %v6785_v62 = vpop.permute.xlu1 %2623 }
 0x707   :  { %2684 = vst.msk [vmem:[#allocation4 + $0x10] sm:$0xff] %vm7979_vm6, %v2667_v19  ;;  %8384 = vst [vmem:[#allocation79_spill] sm:$0xff] %v6785_v62  ;;  %v2764_v19 = vsub.s32 3, %v8395_v27  ;;  %vm8399_vm6 = vcmp.gt.f32.partialorder %v4800_v48, 0.0 }
 0x708   :  { %v6787_v54 = vpop.permute.xlu0 %2625 }
 0x709   :  { %8385 = vst [vmem:[#allocation80_spill] sm:$0xff] %v6787_v54 }
 0x70a   :  { %v6789_v5 = vpop.permute.xlu1 %2627 }
 0x70b   :  { %8386 = vst [vmem:[#allocation81_spill] sm:$0xff] %v6789_v5 }
 0x70c   :  { %v6791_v16 = vpop.permute.xlu0 %2629 }
 0x70d   :  { %8387 = vst [vmem:[#allocation82_spill] sm:$0xff] %v6791_v16  ;;  %v4648_v16 = vld [vmem:[%s7834_s1] sm:$0xf] }
 0x70e   :  { %v6793_v34 = vpop.permute.xlu1 %2631  ;;  %v6813_v54 = vrot.slane %v4648_v16, %v2764_v19 }
 0x70f   :  { %8388 = vst [vmem:[#allocation83_spill] sm:$0xff] %v6793_v34 }
 0x710   :  { %v6795_v30 = vpop.permute.xlu0 %2633 }
 0x711   :  { %8389 = vst [vmem:[#allocation84_spill] sm:$0xff] %v6795_v30 }
 0x712   :  { %v6797_v63 = vpop.permute.xlu1 %2635 }
 0x713   :  { %8390 = vst [vmem:[#allocation85_spill] sm:$0xff] %v6797_v63 }
 0x714   :  { %v6799_v29 = vpop.permute.xlu0 %2637 }
 0x715   :  { %8391 = vst [vmem:[#allocation86_spill] sm:$0xff] %v6799_v29 }
 0x716   :  { %v6801_v46 = vpop.permute.xlu1 %2639 }
 0x717   :  { %8392 = vst [vmem:[#allocation87_spill] sm:$0xff] %v6801_v46 }
 0x718   :  { %v6803_v59 = vpop.permute.xlu0 %2641 }
 0x719   :  { %8393 = vst [vmem:[#allocation88_spill] sm:$0xff] %v6803_v59 }
 0x71a   :  { %v6805_v18 = vpop.permute.xlu1 %2643 }
 0x71b   :  { %8394 = vst [vmem:[#allocation89_spill] sm:$0xff] %v6805_v18 }
 0x71c   :  { %v6808_v12 = vpop.permute.xlu0 %2645 }
 0x71d   :  { %8396 = vst [vmem:[#allocation5_spill] sm:$0xff] %v6808_v12 }
 0x71e   :  { %v6815_v30 = vpop.permute.xlu1 %2647 }
 0x71f   :  { %8397 = vst [vmem:[#allocation90_spill] sm:$0xff] %v6815_v30 }
 0x72d   :  { %v2700_v0 = vpop.permute.xlu0 %2699 }
 0x72e   :  { %v2766_v29 = vadd.f32 %v6813_v54, %v2700_v0 }
 0x72f   :  { %v2704_v42 = vpop.permute.xlu1 %2703 }
 0x730   :  { %v2798_v46 = vmul.f32 0.01, %v2766_v29  ;;  %v2767_v59 = vadd.f32 %v6813_v54, %v2704_v42  ;;  %vm2782_vm14 = vcmp.ge.f32.partialorder %v2766_v29, 0.0 }
 0x731   :  { %v2712_v18 = vpop.permute.xlu0 %2711 }
 0x732   :  { %v2799_v27 = vmul.f32 0.01, %v2767_v59  ;;  %v2769_v12 = vadd.f32 %v6813_v54, %v2712_v18  ;;  %v2814_v63 = vsel %vm2782_vm14, %v2766_v29, %v2798_v46  ;;  %vm2783_vm3 = vcmp.ge.f32.partialorder %v2767_v59, 0.0 }
 0x733   :  { %v2708_v58 = vpop.permute.xlu1 %2707  ;;  %v6822_v16 = vsel %vm8398_vm1, %v2814_v63, -1e+30  ;;  %vm8400_vm1 = vcmp.gt.f32.partialorder %v4825_v8, 0.0 }
 0x734   :  { %v2801_v19 = vmul.f32 0.01, %v2769_v12  ;;  %v2768_v30 = vadd.f32 %v6813_v54, %v2708_v58  ;;  %2862 = vmax.xlane.f32.xlu1 %v6822_v16  ;;  %v2815_v0 = vsel %vm2783_vm3, %v2767_v59, %v2799_v27  ;;  %vm2785_vm2 = vcmp.ge.f32.partialorder %v2769_v12, 0.0 }
 0x735   :  { %v2720_v42 = vpop.permute.xlu0 %2719  ;;  %v6828_v36 = vsel %vm8399_vm6, %v2815_v0, -1e+30  ;;  %vm8401_vm3 = vcmp.gt.f32.partialorder %v4792_v45, 0.0 }
 0x736   :  { %v2800_v18 = vmul.f32 0.01, %v2768_v30  ;;  %v2771_v29 = vadd.f32 %v6813_v54, %v2720_v42  ;;  %2864 = vmax.xlane.f32.xlu0 %v6828_v36  ;;  %v2817_v46 = vsel %vm2785_vm2, %v2769_v12, %v2801_v19  ;;  %vm2784_vm14 = vcmp.ge.f32.partialorder %v2768_v30, 0.0 }
 0x737   :  { %v2716_v63 = vpop.permute.xlu1 %2715  ;;  %v6834_v58 = vsel %vm8400_vm1, %v2817_v46, -1e+30  ;;  %vm8402_vm1 = vcmp.gt.f32.partialorder %v4827_v9, 0.0 }
 0x738   :  { %v2803_v34 = vmul.f32 0.01, %v2771_v29  ;;  %v2770_v59 = vadd.f32 %v6813_v54, %v2716_v63  ;;  %2868 = vmax.xlane.f32.xlu1 %v6834_v58  ;;  %v2816_v27 = vsel %vm2784_vm14, %v2768_v30, %v2800_v18  ;;  %vm2787_vm6 = vcmp.ge.f32.partialorder %v2771_v29, 0.0 }
 0x739   :  { %v2728_v0 = vpop.permute.xlu0 %2727  ;;  %v6840_v42 = vsel %vm8401_vm3, %v2816_v27, -1e+30  ;;  %vm8403_vm3 = vcmp.gt.f32.partialorder %v4812_v60, 0.0 }
 0x73a   :  { %v2802_v28 = vmul.f32 0.01, %v2770_v59  ;;  %v2773_v12 = vadd.f32 %v6813_v54, %v2728_v0  ;;  %2866 = vmax.xlane.f32.xlu0 %v6840_v42  ;;  %v2819_v19 = vsel %vm2787_vm6, %v2771_v29, %v2803_v34  ;;  %vm2786_vm2 = vcmp.ge.f32.partialorder %v2770_v59, 0.0 }
 0x73b   :  { %v2724_v46 = vpop.permute.xlu1 %2723  ;;  %v6846_v63 = vsel %vm8402_vm1, %v2819_v19, -1e+30  ;;  %vm8405_vm1 = vcmp.gt.f32.partialorder %v8404_v3, 0.0 }
 0x73c   :  { %v2805_v15 = vmul.f32 0.01, %v2773_v12  ;;  %v2772_v30 = vadd.f32 %v6813_v54, %v2724_v46  ;;  %2872 = vmax.xlane.f32.xlu1 %v6846_v63  ;;  %v2818_v18 = vsel %vm2786_vm2, %v2770_v59, %v2802_v28  ;;  %vm2789_vm14 = vcmp.ge.f32.partialorder %v2773_v12, 0.0 }
 0x73d   :  { %v2736_v27 = vpop.permute.xlu0 %2735  ;;  %v6852_v0 = vsel %vm8403_vm3, %v2818_v18, -1e+30  ;;  %vm8406_vm3 = vcmp.gt.f32.partialorder %v4845_v17, 0.0 }
 0x73e   :  { %v2804_v5 = vmul.f32 0.01, %v2772_v30  ;;  %v2775_v34 = vadd.f32 %v6813_v54, %v2736_v27  ;;  %2870 = vmax.xlane.f32.xlu0 %v6852_v0  ;;  %v2821_v29 = vsel %vm2789_vm14, %v2773_v12, %v2805_v15  ;;  %vm2788_vm6 = vcmp.ge.f32.partialorder %v2772_v30, 0.0 }
 0x73f   :  { %v2732_v19 = vpop.permute.xlu1 %2731  ;;  %v6858_v46 = vsel %vm8405_vm1, %v2821_v29, -1e+30  ;;  %vm8407_vm1 = vcmp.gt.f32.partialorder %v4901_v4, 0.0 }
 0x740   :  { %v2807_v62 = vmul.f32 0.01, %v2775_v34  ;;  %v2774_v28 = vadd.f32 %v6813_v54, %v2732_v19  ;;  %2876 = vmax.xlane.f32.xlu1 %v6858_v46  ;;  %v2820_v59 = vsel %vm2788_vm6, %v2772_v30, %v2804_v5  ;;  %vm2791_vm2 = vcmp.ge.f32.partialorder %v2775_v34, 0.0 }
 0x741   :  { %v2744_v18 = vpop.permute.xlu0 %2743  ;;  %v6864_v27 = vsel %vm8406_vm3, %v2820_v59, -1e+30  ;;  %vm8408_vm3 = vcmp.gt.f32.partialorder %v4858_v39, 0.0 }
 0x742   :  { %v2806_v32 = vmul.f32 0.01, %v2774_v28  ;;  %v2777_v15 = vadd.f32 %v6813_v54, %v2744_v18  ;;  %2874 = vmax.xlane.f32.xlu0 %v6864_v27  ;;  %v2823_v12 = vsel %vm2791_vm2, %v2775_v34, %v2807_v62  ;;  %vm2790_vm14 = vcmp.ge.f32.partialorder %v2774_v28, 0.0 }
 0x743   :  { %v2740_v29 = vpop.permute.xlu1 %2739  ;;  %v6870_v19 = vsel %vm8407_vm1, %v2823_v12, -1e+30  ;;  %vm8409_vm1 = vcmp.gt.f32.partialorder %v4876_v52, 0.0 }
 0x744   :  { %v2809_v57 = vmul.f32 0.01, %v2777_v15  ;;  %v2776_v5 = vadd.f32 %v6813_v54, %v2740_v29  ;;  %2880 = vmax.xlane.f32.xlu1 %v6870_v19  ;;  %v2822_v30 = vsel %vm2790_vm14, %v2774_v28, %v2806_v32  ;;  %vm2793_vm6 = vcmp.ge.f32.partialorder %v2777_v15, 0.0 }
 0x745   :  { %v2752_v59 = vpop.permute.xlu0 %2751  ;;  %v6876_v18 = vsel %vm8408_vm3, %v2822_v30, -1e+30  ;;  %vm8410_vm3 = vcmp.gt.f32.partialorder %v8272_v7, 0.0 }
 0x746   :  { %v2808_v14 = vmul.f32 0.01, %v2776_v5  ;;  %v2779_v62 = vadd.f32 %v6813_v54, %v2752_v59  ;;  %2878 = vmax.xlane.f32.xlu0 %v6876_v18  ;;  %v2825_v34 = vsel %vm2793_vm6, %v2777_v15, %v2809_v57  ;;  %vm2792_vm2 = vcmp.ge.f32.partialorder %v2776_v5, 0.0 }
 0x747   :  { %v2748_v12 = vpop.permute.xlu1 %2747  ;;  %v6882_v29 = vsel %vm152_vm11, %v2825_v34, -1e+30 }
 0x748   :  { %v2811_v55 = vmul.f32 0.01, %v2779_v62  ;;  %v2778_v32 = vadd.f32 %v6813_v54, %v2748_v12  ;;  %2884 = vmax.xlane.f32.xlu1 %v6882_v29  ;;  %v2824_v28 = vsel %vm2792_vm2, %v2776_v5, %v2808_v14  ;;  %vm2795_vm14 = vcmp.ge.f32.partialorder %v2779_v62, 0.0 }
 0x749   :  { %v6888_v30 = vsel %vm8409_vm1, %v2824_v28, -1e+30  ;;  %vm3102_vm1 = vcmask 31768  }
 0x74a   :  { %v2810_v59 = vmul.f32 0.01, %v2778_v32  ;;  %2882 = vmax.xlane.f32.xlu0 %v6888_v30  ;;  %v2827_v57 = vsel %vm2795_vm14, %v2779_v62, %v2811_v55  ;;  %vm2794_vm6 = vcmp.ge.f32.partialorder %v2778_v32, 0.0  ;;  %vm8411_vm14 = vcmp.gt.f32.partialorder %v8278_v26, 0.0  ;;  %v7027_v26 = vld [vmem:[#allocation2 + $0x60] sm:$0xff] }
 0x74b   :  { %v2756_v15 = vpop.permute.xlu1 %2755  ;;  %v6893_v34 = vsel %vm154_vm9, %v2827_v57, -1e+30  ;;  %v4649_v57 = vld [vmem:[%s7832_s0 + $0x78] sm:$0xff]  ;;  %8427 = vst [vmem:[#allocation105_spill] sm:$0xff] %v7027_v26  ;;  %s4660_s0 = smov 104  }
 0x74c   :  { %v2780_v12 = vadd.f32 %v6813_v54, %v2756_v15  ;;  %2888 = vmax.xlane.f32.xlu1 %v6893_v34  ;;  %v2826_v14 = vsel %vm2794_vm6, %v2778_v32, %v2810_v59  ;;  %v6910_v32 = vld [vmem:[#allocation2] sm:$0xff] }
 0x74d   :  { %v6899_v5 = vsel %vm8410_vm3, %v2826_v14, -1e+30  ;;  %v6915_v14 = vld [vmem:[#allocation2 + $0x8] sm:$0xff]  ;;  %vm8429_vm3 = vcmp.gt.f32.partialorder %v8355_v47, 0.0 }
 0x74e   :  { %v2812_v28 = vmul.f32 0.01, %v2780_v12  ;;  %2886 = vmax.xlane.f32.xlu0 %v6899_v5  ;;  %vm2796_vm2 = vcmp.ge.f32.partialorder %v2780_v12, 0.0  ;;  %8412 = vst [vmem:[#allocation6_spill] sm:$0xff] %v6915_v14 }
 0x750   :  { %v2828_v55 = vsel %vm2796_vm2, %v2780_v12, %v2812_v28  ;;  %v6934_v28 = vld [vmem:[#allocation2 + $0x10] sm:$0xff]  ;;  %vm8430_vm2 = vcmp.gt.f32.partialorder %v4790_v44, 0.0 }
 0x751   :  { %v6904_v62 = vsel %vm8411_vm14, %v2828_v55, -1e+30  ;;  %8414 = vst [vmem:[#allocation92_spill] sm:$0xff] %v6934_v28  ;;  %vm8431_vm14 = vcmp.gt.f32.partialorder %v4825_v8, 0.0 }
 0x752   :  { %2890 = vmax.xlane.f32.xlu0 %v6904_v62 }
 0x768   :  { %2759 = vperm.xlu0 %4296, %v4649_v57   ;;  %v6925_v57 = vld [vmem:[#allocation2 + $0x18] sm:$0xff] }
 0x7c1   :  { %v2863_v59 = vpop.xlane.xlu1 %2862 }
 0x7c2   :  { %v6913_v15 = vmax.f32 %v6910_v32, %v2863_v59  ;;  %v6944_v59 = vld [vmem:[#allocation2 + $0x28] sm:$0xff] }
 0x7c3   :  { %v2865_v12 = vpop.xlane.xlu0 %2864 }
 0x7c4   :  { %3103 = vst.msk [vmem:[#allocation2] sm:$0xff] %vm3102_vm1, %v6913_v15  ;;  %v6922_v55 = vmax.f32 %v6915_v14, %v2865_v12  ;;  %2960 = vperm.xlu0 %4296, %v6913_v15   ;;  %v6953_v12 = vld [vmem:[#allocation2 + $0x20] sm:$0xff] }
 0x7c5   :  { %v2869_v24 = vpop.xlane.xlu1 %2868  ;;  %8416 = vst [vmem:[#allocation94_spill] sm:$0xff] %v6953_v12 }
 0x7c6   :  { %8413 = vst [vmem:[#allocation91_spill] sm:$0xff] %v6922_v55  ;;  %3104 = vst.msk [vmem:[#allocation2 + $0x8] sm:$0xff] %vm3102_vm1, %v6922_v55  ;;  %v6932_v41 = vmax.f32 %v6925_v57, %v2869_v24  ;;  %v6963_v24 = vld [vmem:[#allocation2 + $0x38] sm:$0xff] }
 0x7c7   :  { %v2867_v50 = vpop.xlane.xlu0 %2866 }
 0x7c8   :  { %3106 = vst.msk [vmem:[#allocation2 + $0x18] sm:$0xff] %vm3102_vm1, %v6932_v41  ;;  %v6941_v53 = vmax.f32 %v6934_v28, %v2867_v50  ;;  %2975 = vperm.xlu0 %4296, %v6932_v41   ;;  %v6972_v50 = vld [vmem:[#allocation2 + $0x30] sm:$0xff] }
 0x7c9   :  { %v2873_v6 = vpop.xlane.xlu1 %2872  ;;  %8418 = vst [vmem:[#allocation96_spill] sm:$0xff] %v6972_v50 }
 0x7ca   :  { %8415 = vst [vmem:[#allocation93_spill] sm:$0xff] %v6941_v53  ;;  %3105 = vst.msk [vmem:[#allocation2 + $0x10] sm:$0xff] %vm3102_vm1, %v6941_v53  ;;  %v6951_v25 = vmax.f32 %v6944_v59, %v2873_v6  ;;  %v6982_v6 = vld [vmem:[#allocation2 + $0x48] sm:$0xff] }
 0x7cb   :  { %v2871_v13 = vpop.xlane.xlu0 %2870 }
 0x7cc   :  { %3108 = vst.msk [vmem:[#allocation2 + $0x28] sm:$0xff] %vm3102_vm1, %v6951_v25  ;;  %v6960_v61 = vmax.f32 %v6953_v12, %v2871_v13  ;;  %2985 = vperm.xlu0 %4296, %v6951_v25   ;;  %v6991_v13 = vld [vmem:[#allocation2 + $0x40] sm:$0xff] }
 0x7cd   :  { %v2877_v33 = vpop.xlane.xlu1 %2876  ;;  %8420 = vst [vmem:[#allocation98_spill] sm:$0xff] %v6991_v13 }
 0x7ce   :  { %8417 = vst [vmem:[#allocation95_spill] sm:$0xff] %v6960_v61  ;;  %3107 = vst.msk [vmem:[#allocation2 + $0x20] sm:$0xff] %vm3102_vm1, %v6960_v61  ;;  %v6970_v31 = vmax.f32 %v6963_v24, %v2877_v33  ;;  %v7001_v33 = vld [vmem:[#allocation2 + $0x58] sm:$0xff] }
 0x7cf   :  { %v2875_v40 = vpop.xlane.xlu0 %2874  ;;  %8422 = vst [vmem:[#allocation100_spill] sm:$0xff] %v7001_v33 }
 0x7d0   :  { %3110 = vst.msk [vmem:[#allocation2 + $0x38] sm:$0xff] %vm3102_vm1, %v6970_v31  ;;  %v6979_v22 = vmax.f32 %v6972_v50, %v2875_v40  ;;  %2995 = vperm.xlu0 %4296, %v6970_v31   ;;  %v7010_v40 = vld [vmem:[#allocation2 + $0x50] sm:$0xff] }
 0x7d1   :  { %v2881_v21 = vpop.xlane.xlu1 %2880  ;;  %8424 = vst [vmem:[#allocation102_spill] sm:$0xff] %v7010_v40 }
 0x7d2   :  { %8419 = vst [vmem:[#allocation97_spill] sm:$0xff] %v6979_v22  ;;  %3109 = vst.msk [vmem:[#allocation2 + $0x30] sm:$0xff] %vm3102_vm1, %v6979_v22  ;;  %v6989_v10 = vmax.f32 %v6982_v6, %v2881_v21  ;;  %v7020_v21 = vld [vmem:[#allocation2 + $0x68] sm:$0xff] }
 0x7d3   :  { %v2879_v2 = vpop.xlane.xlu0 %2878  ;;  %8425 = vst [vmem:[#allocation103_spill] sm:$0xff] %v7020_v21 }
 0x7d4   :  { %3112 = vst.msk [vmem:[#allocation2 + $0x48] sm:$0xff] %vm3102_vm1, %v6989_v10  ;;  %v6998_v12 = vmax.f32 %v6991_v13, %v2879_v2  ;;  %3005 = vperm.xlu0 %4296, %v6989_v10  }
 0x7d5   :  { %v2885_v50 = vpop.xlane.xlu1 %2884 }
 0x7d6   :  { %8421 = vst [vmem:[#allocation99_spill] sm:$0xff] %v6998_v12  ;;  %3111 = vst.msk [vmem:[#allocation2 + $0x40] sm:$0xff] %vm3102_vm1, %v6998_v12  ;;  %v7008_v28 = vmax.f32 %v7001_v33, %v2885_v50 }
 0x7d7   :  { %v2883_v14 = vpop.xlane.xlu0 %2882 }
 0x7d8   :  { %8423 = vst [vmem:[#allocation101_spill] sm:$0xff] %v7008_v28  ;;  %3114 = vst.msk [vmem:[#allocation2 + $0x58] sm:$0xff] %vm3102_vm1, %v7008_v28  ;;  %v7017_v1 = vmax.f32 %v7010_v40, %v2883_v14  ;;  %3015 = vperm.xlu0 %4296, %v7008_v28   ;;  %v7039_v28 = vld [vmem:[#allocation2 + $0x70] sm:$0xff] }
 0x7d9   :  { %v2889_v13 = vpop.xlane.xlu1 %2888  ;;  %8428 = vst [vmem:[#allocation106_spill] sm:$0xff] %v7039_v28 }
 0x7da   :  { %3113 = vst.msk [vmem:[#allocation2 + $0x50] sm:$0xff] %vm3102_vm1, %v7017_v1  ;;  %v7025_v50 = vmax.f32 %v7020_v21, %v2889_v13 }
 0x7db   :  { %v2887_v2 = vpop.xlane.xlu0 %2886 }
 0x7dc   :  { %8426 = vst [vmem:[#allocation104_spill] sm:$0xff] %v7025_v50  ;;  %3116 = vst.msk [vmem:[#allocation2 + $0x68] sm:$0xff] %vm3102_vm1, %v7025_v50  ;;  %v7034_v14 = vmax.f32 %v7027_v26, %v2887_v2  ;;  %3025 = vperm.xlu0 %4296, %v7025_v50  }
 0x7de   :  { %3115 = vst.msk [vmem:[#allocation2 + $0x60] sm:$0xff] %vm3102_vm1, %v7034_v14 }
 0x7df   :  { %v2891_v13 = vpop.xlane.xlu0 %2890 }
 0x7e0   :  { %v7042_v40 = vmax.f32 %v7039_v28, %v2891_v13 }
 0x7e2   :  { %3117 = vst.msk [vmem:[#allocation2 + $0x70] sm:$0xff] %vm3102_vm1, %v7042_v40 }
 0x7e7   :  { %v2760_v33 = vpop.permute.xlu0 %2759 }
 0x7e8   :  { %v2781_v21 = vadd.f32 %v6813_v54, %v2760_v33 }
 0x7ea   :  { %v2813_v7 = vmul.f32 0.01, %v2781_v21  ;;  %vm2797_vm6 = vcmp.ge.f32.partialorder %v2781_v21, 0.0 }
 0x7ec   :  { %v2829_v2 = vsel %vm2797_vm6, %v2781_v21, %v2813_v7  ;;  %vm8432_vm6 = vcmp.gt.f32.partialorder %v4827_v9, 0.0  ;;  %v7086_v9 = vld [vmem:[#allocation2 + $0x78] sm:$0xff] }
 0x7ed   :  { %v7049_v50 = vsel %vm8429_vm3, %v2829_v2, -1e+30  ;;  %vm8433_vm3 = vcmp.gt.f32.partialorder %v8404_v3, 0.0 }
 0x7ee   :  { %2892 = vmax.xlane.f32.xlu1 %v7049_v50 }
 0x7ff   :  { %2965 = vperm.xlu1 %4297, %v6922_v55  }
 0x803   :  { %2970 = vperm.xlu1 %4297, %v6941_v53  }
 0x807   :  { %2980 = vperm.xlu1 %4297, %v6960_v61  }
 0x80b   :  { %2990 = vperm.xlu1 %4297, %v6979_v22  }
 0x80f   :  { %3000 = vperm.xlu1 %4297, %v6998_v12  }
 0x843   :  { %v2961_v54 = vpop.permute.xlu0 %2960 }
 0x844   :  { %v3038_v33 = vsub.f32 %v6822_v16, %v2961_v54 }
 0x846   :  { %v3054_v7 = vmul.f32 1.442695, %v3038_v33 }
 0x847   :  { %v2976_v21 = vpop.permute.xlu0 %2975 }
 0x848   :  { %4506 = vpow2.f32 %v3054_v7  ;;  %v3041_v13 = vsub.f32 %v6834_v58, %v2976_v21 }
 0x84a   :  { %v3060_v2 = vmul.f32 1.442695, %v3041_v13 }
 0x84b   :  { %v2986_v28 = vpop.permute.xlu0 %2985 }
 0x84c   :  { %4508 = vpow2.f32 %v3060_v2  ;;  %v3043_v26 = vsub.f32 %v6846_v63, %v2986_v28 }
 0x84e   :  { %v3064_v53 = vmul.f32 1.442695, %v3043_v26 }
 0x84f   :  { %v2996_v55 = vpop.permute.xlu0 %2995 }
 0x850   :  { %4510 = vpow2.f32 %v3064_v53  ;;  %v3045_v22 = vsub.f32 %v6858_v46, %v2996_v55 }
 0x852   :  { %v4507_v61 = vpop.eup %4506  ;;  %v3068_v12 = vmul.f32 1.442695, %v3045_v22 }
 0x853   :  { %v3006_v47 = vpop.permute.xlu0 %3005  ;;  %v3086_v16 = vsel %vm8430_vm2, %v4507_v61, 0.0  ;;  %vm8434_vm2 = vcmp.gt.f32.partialorder %v4901_v4, 0.0 }
 0x854   :  { %4512 = vpow2.f32 %v3068_v12  ;;  %v3047_v54 = vsub.f32 %v6870_v19, %v3006_v47  ;;  %3151 = vadd.xlane.f32.xlu1 %v3086_v16  ;;  %v8435_v12 = vmov 0  }
 0x856   :  { %v7064_v58 = vpop.eup %4508  ;;  %v3072_v33 = vmul.f32 1.442695, %v3047_v54 }
 0x857   :  { %v3089_v26 = vsel %vm8431_vm14, %v7064_v58, 0.0  ;;  %vm8436_vm14 = vcmp.gt.f32.partialorder %v4800_v48, 0.0 }
 0x858   :  { %4514 = vpow2.f32 %v3072_v33  ;;  %3157 = vadd.xlane.f32.xlu1 %v3089_v26 }
 0x85a   :  { %v7069_v53 = vpop.eup %4510 }
 0x85b   :  { %v3091_v44 = vsel %vm8432_vm6, %v7069_v53, 0.0  ;;  %vm8438_vm6 = vcmp.gt.f32.partialorder %v4812_v60, 0.0 }
 0x85c   :  { %3161 = vadd.xlane.f32.xlu1 %v3091_v44 }
 0x85e   :  { %v7074_v22 = vpop.eup %4512 }
 0x85f   :  { %v3093_v47 = vsel %vm8433_vm3, %v7074_v22, 0.0  ;;  %vm8439_vm3 = vcmp.gt.f32.partialorder %v4845_v17, 0.0  ;;  %v8442_v17 = vsub.f32 %v6925_v57, %v6932_v41  ;;  %v8445_v41 = vsub.f32 %v6982_v6, %v6989_v10  ;;  %v3119_v57 = vld [vmem:[#allocation3] sm:$0xff]  ;;  %v3124_v6 = vld [vmem:[#allocation3 + $0x28] sm:$0xff] }
 0x860   :  { %3165 = vadd.xlane.f32.xlu1 %v3093_v47 }
 0x862   :  { %v7079_v63 = vpop.eup %4514 }
 0x863   :  { %v3095_v8 = vsel %vm8434_vm2, %v7079_v63, 0.0  ;;  %vm8440_vm2 = vcmp.gt.f32.partialorder %v4858_v39, 0.0  ;;  %v2932_v39 = vmul.f32 1.442695, %v8442_v17 }
 0x864   :  { %3169 = vadd.xlane.f32.xlu1 %v3095_v8 }
 0x875   :  { %3010 = vperm.xlu1 %4297, %v7017_v1  }
 0x879   :  { %3020 = vperm.xlu1 %4297, %v7034_v14  }
 0x87b   :  { %v2893_v46 = vpop.xlane.xlu1 %2892 }
 0x87c   :  { %v7089_v19 = vmax.f32 %v7086_v9, %v2893_v46 }
 0x87d   :  { %3030 = vperm.xlu1 %4297, %v7042_v40  }
 0x87e   :  { %v2925_v3 = vsub.f32 %v7086_v9, %v7089_v19  ;;  %3118 = vst.msk [vmem:[#allocation2 + $0x78] sm:$0xff] %vm3102_vm1, %v7089_v19  ;;  %3035 = vperm.xlu0 %4296, %v7089_v19  }
 0x87f   :  { %v2966_v4 = vpop.permute.xlu1 %2965 }
 0x880   :  { %v3039_v28 = vsub.f32 %v6828_v36, %v2966_v4 }
 0x881   :  { %3337 = vrot.lane.b32.xlu1 %v6563_v23, %s4660_s0 }
 0x882   :  { %v3056_v55 = vmul.f32 1.442695, %v3039_v28  ;;  %4298 = vset.pattern.permute.xlu0 %v8435_v12 }
 0x883   :  { %v2971_v7 = vpop.permute.xlu1 %2970 }
 0x884   :  { %4516 = vpow2.f32 %v3056_v55  ;;  %v3040_v21 = vsub.f32 %v6840_v42, %v2971_v7 }
 0x885   :  { %3339 = vrot.lane.b32.xlu1 %v6653_v20, %s4660_s0 }
 0x886   :  { %v3058_v13 = vmul.f32 1.442695, %v3040_v21 }
 0x887   :  { %v2981_v2 = vpop.permute.xlu1 %2980 }
 0x888   :  { %4518 = vpow2.f32 %v3058_v13  ;;  %v3042_v16 = vsub.f32 %v6852_v0, %v2981_v2 }
 0x889   :  { %3343 = vrot.lane.b32.xlu1 %v6660_v43, %s4660_s0 }
 0x88a   :  { %v3062_v36 = vmul.f32 1.442695, %v3042_v16 }
 0x88b   :  { %v2991_v23 = vpop.permute.xlu1 %2990 }
 0x88c   :  { %4520 = vpow2.f32 %v3062_v36  ;;  %v3044_v54 = vsub.f32 %v6864_v27, %v2991_v23 }
 0x88e   :  { %v4517_v33 = vpop.eup %4516  ;;  %v3066_v26 = vmul.f32 1.442695, %v3044_v54 }
 0x88f   :  { %v3001_v44 = vpop.permute.xlu1 %3000  ;;  %v4060_v42 = vpack.c.bf16 %v4517_v33, %v4507_v61  ;;  %v3087_v11 = vsel %vm8436_vm14, %v4517_v33, 0.0 }
 0x890   :  { %4522 = vpow2.f32 %v3066_v26  ;;  %v3046_v20 = vsub.f32 %v6876_v18, %v3001_v44  ;;  %v3126_v44 = vld [vmem:[#allocation3 + $0x38] sm:$0xff] }
 0x891   :  { %4259 = vmatprep.mubr.msk.bf16.mxu1 %vm5554_vm0, %v4060_v42  ;;  %vm8437_vm0 = vcmp.gt.f32.partialorder %v4792_v45, 0.0  ;;  %v8441_v45 = vsub.f32 %v6910_v32, %v6913_v15  ;;  %v8444_v32 = vsub.f32 %v6963_v24, %v6970_v31  ;;  %v3122_v31 = vld [vmem:[#allocation3 + $0x18] sm:$0xff] }
 0x892   :  { %v7111_v47 = vpop.eup %4518  ;;  %v3070_v0 = vmul.f32 1.442695, %v3046_v20 }
 0x893   :  { %v4063_v43 = vpack.c.bf16 %v7064_v58, %v7111_v47  ;;  %v3088_v28 = vsel %vm8437_vm0, %v7111_v47, 0.0  ;;  %v2926_v60 = vmul.f32 1.442695, %v8441_v45  ;;  %v2940_v15 = vmul.f32 1.442695, %v8444_v32  ;;  %v8483_v58 = vld [vmem:[#allocation100_spill] sm:$0xff] }
 0x894   :  { %4524 = vpow2.f32 %v3070_v0  ;;  %v8484_v47 = vld [vmem:[#allocation101_spill] sm:$0xff] }
 0x895   :  { %4526 = vpow2.f32 %v2926_v60 }
 0x896   :  { %v7115_v8 = vpop.eup %4520  ;;  %4528 = vpow2.f32 %v2932_v39 }
 0x897   :  { %v4066_v27 = vpack.c.bf16 %v7069_v53, %v7115_v8  ;;  %v3090_v55 = vsel %vm8438_vm6, %v7115_v8, 0.0 }
 0x89a   :  { %v7119_v46 = vpop.eup %4522 }
 0x89b   :  { %v4069_v61 = vpack.c.bf16 %v7074_v22, %v7119_v46  ;;  %v3092_v48 = vsel %vm8439_vm3, %v7119_v46, 0.0  ;;  %v8500_v22 = vld [vmem:[#allocation49_spill] sm:$0xff]  ;;  %vm8548_vm3 = vcmask 195712  }
 0x89d   :  { %3153 = vadd.xlane.f32.xlu0 %v3087_v11 }
 0x89e   :  { %v7125_v18 = vpop.eup %4524 }
 0x89f   :  { %v4072_v4 = vpack.c.bf16 %v7079_v63, %v7125_v18  ;;  %v3094_v7 = vsel %vm8440_vm2, %v7125_v18, 0.0  ;;  %v7164_v21 = vpop.eup %4526  ;;  %vm8552_vm2 = vmmov %vm8548_vm3 }
 0x8a1   :  { %3155 = vadd.xlane.f32.xlu0 %v3088_v28 }
 0x8a5   :  { %3159 = vadd.xlane.f32.xlu0 %v3090_v55  ;;  %v3128_v55 = vld [vmem:[#allocation3 + $0x48] sm:$0xff] }
 0x8a9   :  { %3163 = vadd.xlane.f32.xlu0 %v3092_v48 }
 0x8ad   :  { %3167 = vadd.xlane.f32.xlu0 %v3094_v7 }
 0x8c3   :  { %3335 = vrot.lane.b32.xlu0 %v6646_v49, %s4660_s0  ;;  %v3016_v49 = vpop.permute.xlu0 %3015 }
 0x8c7   :  { %3341 = vrot.lane.b32.xlu0 %v6570_v56, %s4660_s0  ;;  %v8443_v56 = vsub.f32 %v6944_v59, %v6951_v25  ;;  %v3135_v25 = vmul.f32 %v7164_v21, %v3119_v57  ;;  %v7170_v59 = vpop.eup %4528  ;;  %v3026_v39 = vpop.permute.xlu0 %3025 }
 0x8cb   :  { %3345 = vrot.lane.b32.xlu0 %v6577_v51, %s4660_s0  ;;  %v2936_v51 = vmul.f32 1.442695, %v8443_v56 }
 0x8cd   :  { %4530 = vpow2.f32 %v2936_v51 }
 0x8ce   :  { %4532 = vpow2.f32 %v2940_v15 }
 0x8cf   :  { %3347 = vrot.lane.b32.xlu0 %v6667_v37, %s4660_s0  ;;  %v3049_v37 = vsub.f32 %v6882_v29, %v3016_v49  ;;  %v3138_v29 = vmul.f32 %v7170_v59, %v3122_v31  ;;  %v3051_v49 = vsub.f32 %v6893_v34, %v3026_v39 }
 0x8d1   :  { %v3076_v13 = vmul.f32 1.442695, %v3049_v37 }
 0x8d3   :  { %3349 = vrot.lane.b32.xlu0 %v6584_v38, %s4660_s0  ;;  %v2944_v38 = vmul.f32 1.442695, %v8445_v41  ;;  %v3080_v41 = vmul.f32 1.442695, %v3051_v49  ;;  %v8464_v49 = vld [vmem:[#allocation97_spill] sm:$0xff] }
 0x8d5   :  { %4534 = vpow2.f32 %v2944_v38 }
 0x8d6   :  { %4536 = vpow2.f32 %v3076_v13 }
 0x8d7   :  { %v7174_v24 = vpop.eup %4530 }
 0x8d8   :  { %v3140_v23 = vmul.f32 %v7174_v24, %v3124_v6  ;;  %v7178_v54 = vpop.eup %4532 }
 0x8d9   :  { %v3142_v42 = vmul.f32 %v7178_v54, %v3126_v44  ;;  %v8454_v44 = vld [vmem:[#allocation6_spill] sm:$0xff] }
 0x8df   :  { %v7182_v20 = vpop.eup %4534 }
 0x8e0   :  { %v7184_v11 = vpop.eup %4536  ;;  %v3144_v48 = vmul.f32 %v7182_v20, %v3128_v55  ;;  %v8457_v55 = vld [vmem:[#allocation92_spill] sm:$0xff] }
 0x8e1   :  { %v3152_v2 = vpop.xlane.xlu1 %3151  ;;  %v3097_v45 = vsel %vm152_vm11, %v7184_v11, 0.0  ;;  %vm8446_vm11 = vcmp.gt.f32.partialorder %v4876_v52, 0.0 }
 0x8e2   :  { %v3183_v16 = vadd.f32 %v3152_v2, %v3135_v25 }
 0x8e4   :  { %3199 = vst.msk [vmem:[#allocation3] sm:$0xff] %vm3102_vm1, %v3183_v16  ;;  %v8447_v16 = vld [vmem:[#allocation7_spill] sm:$0xff] }
 0x8e5   :  { %v3158_v36 = vpop.xlane.xlu1 %3157  ;;  %vm8448_vm14 = vcmp.gt.f32.partialorder %v8447_v16, 0.0  ;;  %v8471_v16 = vld [vmem:[#allocation15_spill] sm:$0xff] }
 0x8e6   :  { %v3186_v10 = vadd.f32 %v3158_v36, %v3138_v29  ;;  %v8449_v36 = vld [vmem:[#allocation8_spill] sm:$0xff] }
 0x8e7   :  { %vm8450_vm0 = vcmp.gt.f32.partialorder %v8449_v36, 0.0 }
 0x8e8   :  { %3202 = vst.msk [vmem:[#allocation3 + $0x18] sm:$0xff] %vm3102_vm1, %v3186_v10 }
 0x8e9   :  { %v3162_v33 = vpop.xlane.xlu1 %3161 }
 0x8ea   :  { %v3188_v26 = vadd.f32 %v3162_v33, %v3140_v23  ;;  %v8452_v33 = vld [vmem:[#allocation10_spill] sm:$0xff] }
 0x8eb   :  { %vm8453_vm6 = vcmp.gt.f32.partialorder %v8452_v33, 0.0 }
 0x8ec   :  { %3204 = vst.msk [vmem:[#allocation3 + $0x28] sm:$0xff] %vm3102_vm1, %v3188_v26 }
 0x8ed   :  { %v3166_v0 = vpop.xlane.xlu1 %3165 }
 0x8ee   :  { %v3190_v28 = vadd.f32 %v3166_v0, %v3142_v42  ;;  %v8455_v42 = vld [vmem:[#allocation91_spill] sm:$0xff] }
 0x8ef   :  { %v8456_v0 = vsub.f32 %v8454_v44, %v8455_v42  ;;  %v8473_v42 = vld [vmem:[#allocation50_spill] sm:$0xff] }
 0x8f0   :  { %3206 = vst.msk [vmem:[#allocation3 + $0x38] sm:$0xff] %vm3102_vm1, %v3190_v28 }
 0x8f1   :  { %v3170_v7 = vpop.xlane.xlu1 %3169  ;;  %v2928_v28 = vmul.f32 1.442695, %v8456_v0  ;;  %v3121_v0 = vld [vmem:[#allocation3 + $0x10] sm:$0xff] }
 0x8f2   :  { %v3192_v60 = vadd.f32 %v3170_v7, %v3144_v48  ;;  %3173 = vadd.xlane.f32.xlu0 %v3097_v45  ;;  %v8458_v48 = vld [vmem:[#allocation93_spill] sm:$0xff] }
 0x8f3   :  { %v8459_v7 = vsub.f32 %v8457_v55, %v8458_v48 }
 0x8f4   :  { %3208 = vst.msk [vmem:[#allocation3 + $0x48] sm:$0xff] %vm3102_vm1, %v3192_v60  ;;  %v8460_v60 = vld [vmem:[#allocation94_spill] sm:$0xff] }
 0x8f5   :  { %v3011_v17 = vpop.permute.xlu1 %3010  ;;  %v2930_v45 = vmul.f32 1.442695, %v8459_v7 }
 0x8f6   :  { %v3048_v56 = vsub.f32 %v6888_v30, %v3011_v17  ;;  %v8461_v17 = vld [vmem:[#allocation95_spill] sm:$0xff] }
 0x8f7   :  { %v8462_v39 = vsub.f32 %v8460_v60, %v8461_v17  ;;  %v3123_v17 = vld [vmem:[#allocation3 + $0x20] sm:$0xff] }
 0x8f8   :  { %v3074_v51 = vmul.f32 1.442695, %v3048_v56 }
 0x8f9   :  { %v3021_v32 = vpop.permute.xlu1 %3020  ;;  %v2934_v56 = vmul.f32 1.442695, %v8462_v39 }
 0x8fa   :  { %v3050_v15 = vsub.f32 %v6899_v5, %v3021_v32  ;;  %4538 = vpow2.f32 %v3074_v51  ;;  %v8463_v51 = vld [vmem:[#allocation96_spill] sm:$0xff] }
 0x8fb   :  { %v8465_v32 = vsub.f32 %v8463_v51, %v8464_v49 }
 0x8fc   :  { %v3078_v37 = vmul.f32 1.442695, %v3050_v15 }
 0x8fd   :  { %v3031_v38 = vpop.permute.xlu1 %3030  ;;  %v3036_v35 = vpop.permute.xlu0 %3035  ;;  %v2938_v15 = vmul.f32 1.442695, %v8465_v32 }
 0x8fe   :  { %v3052_v57 = vsub.f32 %v6904_v62, %v3031_v38  ;;  %v3053_v13 = vsub.f32 %v7049_v50, %v3036_v35  ;;  %4540 = vpow2.f32 %v3078_v37  ;;  %v8467_v38 = vld [vmem:[#allocation98_spill] sm:$0xff]  ;;  %v8468_v35 = vld [vmem:[#allocation99_spill] sm:$0xff] }
 0x8ff   :  { %4542 = vpow2.f32 %v3080_v41  ;;  %v8466_v41 = vld [vmem:[#allocation14_spill] sm:$0xff] }
 0x900   :  { %v3082_v25 = vmul.f32 1.442695, %v3052_v57  ;;  %v3084_v2 = vmul.f32 1.442695, %v3053_v13  ;;  %v8469_v57 = vsub.f32 %v8467_v38, %v8468_v35 }
 0x902   :  { %4544 = vpow2.f32 %v3082_v25  ;;  %v2942_v13 = vmul.f32 1.442695, %v8469_v57  ;;  %v8470_v25 = vld [vmem:[#allocation102_spill] sm:$0xff]  ;;  %v8477_v57 = vld [vmem:[#allocation55_spill] sm:$0xff] }
 0x903   :  { %4546 = vpow2.f32 %v3084_v2  ;;  %v2920_v2 = vsub.f32 %v8470_v25, %v7017_v1 }
 0x904   :  { %v7197_v30 = vpop.eup %4538  ;;  %4548 = vpow2.f32 %v2928_v28  ;;  %v8474_v28 = vld [vmem:[#allocation106_spill] sm:$0xff] }
 0x905   :  { %v3096_v34 = vsel %vm8446_vm11, %v7197_v30, 0.0  ;;  %4550 = vpow2.f32 %v2930_v45  ;;  %v2946_v36 = vmul.f32 1.442695, %v2920_v2  ;;  %v2924_v55 = vsub.f32 %v8474_v28, %v7042_v40  ;;  %v8476_v40 = vld [vmem:[#allocation53_spill] sm:$0xff]  ;;  %vm8556_vm11 = vmmov %vm8552_vm2 }
 0x906   :  { %3171 = vadd.xlane.f32.xlu1 %v3096_v34  ;;  %4552 = vpow2.f32 %v2934_v56  ;;  %v4075_v53 = vpack.c.bf16 %v7184_v11, %v7197_v30  ;;  %v8489_v30 = vld [vmem:[#allocation103_spill] sm:$0xff] }
 0x907   :  { %4554 = vpow2.f32 %v2938_v15  ;;  %v2954_v39 = vmul.f32 1.442695, %v2924_v55  ;;  %v3125_v15 = vld [vmem:[#allocation3 + $0x30] sm:$0xff] }
 0x908   :  { %v7202_v5 = vpop.eup %4540  ;;  %4556 = vpow2.f32 %v2942_v13  ;;  %v3127_v13 = vld [vmem:[#allocation3 + $0x40] sm:$0xff] }
 0x909   :  { %v3098_v62 = vsel %vm8448_vm14, %v7202_v5, 0.0  ;;  %v7207_v50 = vpop.eup %4542  ;;  %4558 = vpow2.f32 %v2946_v36  ;;  %v3338_v36 = vpop.permute.xlu1 %3337 }
 0x90a   :  { %3175 = vadd.xlane.f32.xlu1 %v3098_v62  ;;  %v3099_v6 = vsel %vm154_vm9, %v7207_v50, 0.0  ;;  %v3120_v62 = vld [vmem:[#allocation3 + $0x8] sm:$0xff]  ;;  %v4078_v8 = vpack.c.bf16 %v7207_v50, %v7202_v5  ;;  %v8490_v5 = vld [vmem:[#allocation104_spill] sm:$0xff] }
 0x90b   :  { %v8491_v50 = vsub.f32 %v8489_v30, %v8490_v5  ;;  %v702_v30 = vld [vmem:[#allocation4 + $0x60] sm:$0xff] }
 0x90c   :  { %v7209_v31 = vpop.eup %4544  ;;  %v8503_v5 = vld [vmem:[#allocation29_spill] sm:$0xff] }
 0x90d   :  { %v7211_v29 = vpop.eup %4546  ;;  %v3100_v10 = vsel %vm8450_vm0, %v7209_v31, 0.0  ;;  %vm8561_vm0 = vmmov %vm8552_vm2 }
 0x90e   :  { %3179 = vadd.xlane.f32.xlu0 %v3100_v10  ;;  %v4081_v23 = vpack.c.bf16 %v7211_v29, %v7209_v31  ;;  %3177 = vadd.xlane.f32.xlu1 %v3099_v6  ;;  %v3101_v26 = vsel %vm8453_vm6, %v7211_v29, 0.0  ;;  %v4549_v37 = vpop.eup %4548  ;;  %v8472_v10 = vld [vmem:[#allocation105_spill] sm:$0xff]  ;;  %v2956_v31 = vmul.f32 1.442695, %v2925_v3  ;;  %v3129_v29 = vld [vmem:[#allocation3 + $0x50] sm:$0xff] }
 0x90f   :  { %v4551_v34 = vpop.eup %4550  ;;  %v2922_v52 = vsub.f32 %v8472_v10, %v7034_v14  ;;  %v3136_v6 = vmul.f32 %v4549_v37, %v3120_v62  ;;  %v8475_v14 = vld [vmem:[#allocation16_spill] sm:$0xff]  ;;  %v8478_v62 = vld [vmem:[#allocation17_spill] sm:$0xff] }
 0x910   :  { %v3137_v48 = vmul.f32 %v4551_v34, %v3121_v0 }
 0x911   :  { %v2950_v1 = vmul.f32 1.442695, %v2922_v52 }
 0x912   :  { %3181 = vadd.xlane.f32.xlu1 %v3101_v26  ;;  %v4553_v26 = vpop.eup %4552 }
 0x913   :  { %v4555_v45 = vpop.eup %4554  ;;  %4560 = vpow2.f32 %v2950_v1  ;;  %v3139_v56 = vmul.f32 %v4553_v26, %v3123_v17 }
 0x914   :  { %v4557_v49 = vpop.eup %4556  ;;  %4562 = vpow2.f32 %v2954_v39 }
 0x915   :  { %v4559_v38 = vpop.eup %4558  ;;  %v3143_v25 = vmul.f32 %v4557_v49, %v3127_v13 }
 0x923   :  { %3238 = vperm.xlu1 %4297, %v4549_v37   ;;  %v3141_v37 = vmul.f32 %v4555_v45, %v3125_v15 }
 0x924   :  { %713 = vperm.xlu0 %4298, %v8466_v41  }
 0x927   :  { %3243 = vperm.xlu1 %4297, %v4551_v34   ;;  %v4561_v34 = vpop.eup %4560 }
 0x928   :  { %728 = vperm.xlu0 %4298, %v8471_v16   ;;  %v4563_v52 = vpop.eup %4562 }
 0x92a   :  { %v3154_v33 = vpop.xlane.xlu0 %3153 }
 0x92b   :  { %v3184_v44 = vadd.f32 %v3154_v33, %v3136_v6  ;;  %3253 = vperm.xlu1 %4297, %v4553_v26   ;;  %v3340_v6 = vpop.permute.xlu1 %3339 }
 0x92c   :  { %738 = vperm.xlu0 %4298, %v8473_v42  }
 0x92d   :  { %3200 = vst.msk [vmem:[#allocation3 + $0x8] sm:$0xff] %vm3102_vm1, %v3184_v44 }
 0x92e   :  { %v3156_v7 = vpop.xlane.xlu0 %3155 }
 0x92f   :  { %v3185_v60 = vadd.f32 %v3156_v7, %v3137_v48  ;;  %3263 = vperm.xlu1 %4297, %v4555_v45   ;;  %v3344_v26 = vpop.permute.xlu1 %3343  ;;  %v2952_v7 = vmul.f32 1.442695, %v8491_v50 }
 0x930   :  { %748 = vperm.xlu0 %4298, %v8475_v14   ;;  %v3131_v14 = vld [vmem:[#allocation3 + $0x60] sm:$0xff] }
 0x931   :  { %3201 = vst.msk [vmem:[#allocation3 + $0x10] sm:$0xff] %vm3102_vm1, %v3185_v60  ;;  %v3147_v17 = vmul.f32 %v4561_v34, %v3131_v14 }
 0x932   :  { %v3160_v51 = vpop.xlane.xlu0 %3159 }
 0x933   :  { %v3187_v32 = vadd.f32 %v3160_v51, %v3139_v56  ;;  %3273 = vperm.xlu1 %4297, %v4557_v49   ;;  %v3133_v49 = vld [vmem:[#allocation3 + $0x70] sm:$0xff] }
 0x934   :  { %758 = vperm.xlu0 %4298, %v8476_v40   ;;  %v3149_v40 = vmul.f32 %v4563_v52, %v3133_v49  ;;  %v8508_v49 = vld [vmem:[#allocation45_spill] sm:$0xff] }
 0x935   :  { %3203 = vst.msk [vmem:[#allocation3 + $0x20] sm:$0xff] %vm3102_vm1, %v3187_v32  ;;  %v3132_v32 = vld [vmem:[#allocation3 + $0x68] sm:$0xff] }
 0x936   :  { %v3164_v41 = vpop.xlane.xlu0 %3163 }
 0x937   :  { %v3189_v35 = vadd.f32 %v3164_v41, %v3141_v37  ;;  %3283 = vperm.xlu1 %4297, %v4559_v38  }
 0x938   :  { %768 = vperm.xlu0 %4298, %v8477_v57  }
 0x939   :  { %3205 = vst.msk [vmem:[#allocation3 + $0x30] sm:$0xff] %vm3102_vm1, %v3189_v35 }
 0x93a   :  { %v3168_v2 = vpop.xlane.xlu0 %3167 }
 0x93b   :  { %v3191_v16 = vadd.f32 %v3168_v2, %v3143_v25  ;;  %3293 = vperm.xlu1 %4297, %v4561_v34   ;;  %v691_v25 = vld [vmem:[#allocation4 + $0x8] sm:$0xff] }
 0x93c   :  { %778 = vperm.xlu0 %4298, %v8478_v62   ;;  %v8492_v62 = vld [vmem:[#allocation24_spill] sm:$0xff] }
 0x93d   :  { %3207 = vst.msk [vmem:[#allocation3 + $0x40] sm:$0xff] %vm3102_vm1, %v3191_v16  ;;  %v694_v16 = vld [vmem:[#allocation4 + $0x20] sm:$0xff] }
 0x93e   :  { %v3336_v10 = vpop.permute.xlu0 %3335 }
 0x93f   :  { %4243 = vmatprep.subr.bf16.mxu1 %v3336_v10  ;;  %3303 = vperm.xlu1 %4297, %v4563_v52  }
 0x940   :  { %4244 = vmatpush3.bf16.msra.mxu1 %v3336_v10 }
 0x941   :  { %4245 = vmatprep.subr.bf16.mxu1 %v3338_v36 }
 0x942   :  { %v3342_v33 = vpop.permute.xlu0 %3341 }
 0x943   :  { %4299 = vset.pattern.permute.xlu1 %v8435_v12  ;;  %v8496_v12 = vld [vmem:[#allocation38_spill] sm:$0xff] }
 0x944   :  { %4246 = vmatpush3.bf16.msra.mxu1 %v3338_v36 }
 0x945   :  { %4247 = vmatprep.subr.bf16.mxu1 %v3340_v6 }
 0x946   :  { %v3346_v44 = vpop.permute.xlu0 %3345 }
 0x948   :  { %4248 = vmatpush3.bf16.msra.mxu1 %v3340_v6  ;;  %v696_v6 = vld [vmem:[#allocation4 + $0x30] sm:$0xff] }
 0x949   :  { %4249 = vmatprep.subr.bf16.mxu1 %v3342_v33 }
 0x94a   :  { %v3348_v42 = vpop.permute.xlu0 %3347 }
 0x94c   :  { %4250 = vmatpush3.bf16.msra.mxu1 %v3342_v33  ;;  %v8494_v33 = vld [vmem:[#allocation26_spill] sm:$0xff] }
 0x94d   :  { %4251 = vmatprep.subr.bf16.mxu1 %v3344_v26 }
 0x94e   :  { %v3350_v0 = vpop.permute.xlu0 %3349 }
 0x950   :  { %4252 = vmatpush3.bf16.msra.mxu1 %v3344_v26 }
 0x951   :  { %4253 = vmatprep.subr.bf16.mxu1 %v3346_v44 }
 0x954   :  { %4254 = vmatpush3.bf16.msra.mxu1 %v3346_v44 }
 0x955   :  { %4255 = vmatprep.subr.bf16.mxu1 %v3348_v42 }
 0x958   :  { %4256 = vmatpush3.bf16.msra.mxu1 %v3348_v42 }
 0x959   :  { %4257 = vmatprep.subr.bf16.mxu1 %v3350_v0 }
 0x95c   :  { %4258 = vmatpush3.bf16.msra.mxu1 %v3350_v0  ;;  %v698_v0 = vld [vmem:[#allocation4 + $0x40] sm:$0xff] }
 0x95f   :  { %4260 = vmatmul.mubr.msk.bf16.vlgmr.msra.gmra.mrb[16].mxu1 %vm5562_vm15, %v4063_v43  ;;  %v8485_v43 = vsub.f32 %v8483_v58, %v8484_v47  ;;  %v8498_v47 = vld [vmem:[#allocation21_spill] sm:$0xff] }
 0x960   :  { %4263 = vmatprep.mubr.msk.bf16.mxu1 %vm5580_vm7, %v4066_v27 }
 0x961   :  { %v2948_v48 = vmul.f32 1.442695, %v8485_v43 }
 0x963   :  { %4564 = vpow2.f32 %v2948_v48  ;;  %v700_v48 = vld [vmem:[#allocation4 + $0x50] sm:$0xff] }
 0x964   :  { %4566 = vpow2.f32 %v2952_v7  ;;  %v8504_v7 = vld [vmem:[#allocation48_spill] sm:$0xff] }
 0x965   :  { %4568 = vpow2.f32 %v2956_v31 }
 0x967   :  { %4264 = vmatmul.mubr.msk.bf16.gmra.mrb[20].mxu1 %vm5596_vm8, %v4069_v61  ;;  %v3130_v61 = vld [vmem:[#allocation3 + $0x58] sm:$0xff]  ;;  %vm8493_vm8 = vcmask 64512  }
 0x968   :  { %4267 = vmatprep.mubr.msk.bf16.mxu1 %vm5612_vm13, %v4072_v4  ;;  %vm8495_vm9 = vmmov %vm8493_vm8 }
 0x969   :  { %vm8497_vm7 = vmmov %vm8493_vm8 }
 0x96a   :  { %vm8501_vm15 = vmmov %vm8497_vm7 }
 0x96b   :  { %vm8505_vm13 = vmmov %vm8497_vm7 }
 0x96d   :  { %v7294_v46 = vpop.eup %4564 }
 0x96e   :  { %v3146_v18 = vmul.f32 %v7294_v46, %v3130_v61  ;;  %v7305_v39 = vpop.eup %4566 }
 0x96f   :  { %4268 = vmatmul.mubr.msk.bf16.gmra.mrb[24].mxu1 %vm5629_vm12, %v4075_v53  ;;  %v3148_v9 = vmul.f32 %v7305_v39, %v3132_v32  ;;  %v7309_v3 = vpop.eup %4568  ;;  %v8499_v53 = vld [vmem:[#allocation31_spill] sm:$0xff]  ;;  %vm8509_vm12 = vmmov %vm8497_vm7 }
 0x970   :  { %4271 = vmatprep.mubr.msk.bf16.mxu1 %vm5646_vm5, %v4078_v8  ;;  %vm8513_vm5 = vmmov %vm8497_vm7 }
 0x977   :  { %4272 = vmatmul.mubr.msk.bf16.gmra.mrb[28].mxu1 %vm5663_vm4, %v4081_v23  ;;  %v3145_v23 = vmul.f32 %v4559_v38, %v3129_v29  ;;  %v3134_v38 = vld [vmem:[#allocation3 + $0x78] sm:$0xff]  ;;  %vm3536_vm4 = vcmask 261312  }
 0x978   :  { %v3150_v35 = vmul.f32 %v7309_v3, %v3134_v38 }
 0x97f   :  { %v3174_v4 = vpop.xlane.xlu0 %3173 }
 0x980   :  { %v3194_v11 = vadd.f32 %v3174_v4, %v3146_v18  ;;  %v8502_v4 = vld [vmem:[#allocation30_spill] sm:$0xff] }
 0x982   :  { %3210 = vst.msk [vmem:[#allocation3 + $0x58] sm:$0xff] %vm3102_vm1, %v3194_v11 }
 0x993   :  { %v3172_v45 = vpop.xlane.xlu1 %3171 }
 0x994   :  { %v3193_v60 = vadd.f32 %v3172_v45, %v3145_v23 }
 0x996   :  { %3209 = vst.msk [vmem:[#allocation3 + $0x50] sm:$0xff] %vm3102_vm1, %v3193_v60  ;;  %v8506_v60 = vld [vmem:[#allocation22_spill] sm:$0xff] }
 0x997   :  { %v3176_v56 = vpop.xlane.xlu1 %3175 }
 0x998   :  { %v3195_v51 = vadd.f32 %v3176_v56, %v3147_v17  ;;  %v704_v17 = vld [vmem:[#allocation4 + $0x70] sm:$0xff]  ;;  %v8507_v56 = vld [vmem:[#allocation32_spill] sm:$0xff] }
 0x99a   :  { %3211 = vst.msk [vmem:[#allocation3 + $0x60] sm:$0xff] %vm3102_vm1, %v3195_v51 }
 0x99b   :  { %v3180_v19 = vpop.xlane.xlu0 %3179  ;;  %v3178_v15 = vpop.xlane.xlu1 %3177 }
 0x99c   :  { %v3197_v37 = vadd.f32 %v3180_v19, %v3149_v40  ;;  %v3196_v41 = vadd.f32 %v3178_v15, %v3148_v9  ;;  %v8510_v15 = vld [vmem:[#allocation23_spill] sm:$0xff] }
 0x99e   :  { %3213 = vst.msk [vmem:[#allocation3 + $0x70] sm:$0xff] %vm3102_vm1, %v3197_v37  ;;  %3212 = vst.msk [vmem:[#allocation3 + $0x68] sm:$0xff] %vm3102_vm1, %v3196_v41  ;;  %v8511_v41 = vld [vmem:[#allocation44_spill] sm:$0xff] }
 0x99f   :  { %v3182_v57 = vpop.xlane.xlu1 %3181 }
 0x9a0   :  { %v3198_v13 = vadd.f32 %v3182_v57, %v3150_v35  ;;  %v8512_v35 = vld [vmem:[#allocation59_spill] sm:$0xff] }
 0x9a2   :  { %3214 = vst.msk [vmem:[#allocation3 + $0x78] sm:$0xff] %vm3102_vm1, %v3198_v13  ;;  %vm8544_vm1 = vmmov %vm8513_vm5 }
 0x9a3   :  { %v714_v2 = vpop.permute.xlu0 %713  ;;  %vm8559_vm14 = vmmov %vm8544_vm1 }
 0x9a4   :  { %v787_v34 = vmul.f32 %v714_v2, %v691_v25  ;;  %v8514_v25 = vld [vmem:[#allocation25_spill] sm:$0xff]  ;;  %vm8564_vm6 = vmmov %vm8544_vm1 }
 0x9a6   :  { %v956_v36 = vadd.f32 %v8492_v62, %v787_v34  ;;  %v8515_v34 = vld [vmem:[#allocation54_spill] sm:$0xff] }
 0x9a7   :  { %v729_v10 = vpop.permute.xlu0 %728 }
 0x9a8   :  { %973 = vst.msk [vmem:[#allocation4 + $0x8] sm:$0xff] %vm8493_vm8, %v956_v36  ;;  %v790_v52 = vmul.f32 %v729_v10, %v694_v16  ;;  %v8516_v36 = vld [vmem:[#allocation28_spill] sm:$0xff]  ;;  %vm8566_vm8 = vmmov %vm8544_vm1 }
 0x9aa   :  { %v959_v26 = vadd.f32 %v8494_v33, %v790_v52  ;;  %v8517_v52 = vld [vmem:[#allocation75_spill] sm:$0xff] }
 0x9ab   :  { %v739_v44 = vpop.permute.xlu0 %738 }
 0x9ac   :  { %976 = vst.msk [vmem:[#allocation4 + $0x20] sm:$0xff] %vm8495_vm9, %v959_v26  ;;  %v792_v42 = vmul.f32 %v739_v44, %v696_v6  ;;  %v8518_v26 = vld [vmem:[#allocation41_spill] sm:$0xff]  ;;  %vm8567_vm9 = vmmov %vm8561_vm0 }
 0x9ae   :  { %v961_v1 = vadd.f32 %v8496_v12, %v792_v42  ;;  %v8519_v42 = vld [vmem:[#allocation74_spill] sm:$0xff] }
 0x9af   :  { %v749_v28 = vpop.permute.xlu0 %748  ;;  %v1506_v55 = vld [vmem:[#allocation4 + $0x8] sm:$0xff] }
 0x9b0   :  { %978 = vst.msk [vmem:[#allocation4 + $0x30] sm:$0xff] %vm8497_vm7, %v961_v1  ;;  %v794_v58 = vmul.f32 %v749_v28, %v698_v0  ;;  %v1602_v43 = vmul.f32 %v8498_v47, %v1506_v55  ;;  %vm8569_vm7 = vmmov %vm8544_vm1 }
 0x9b2   :  { %v963_v8 = vadd.f32 %v8499_v53, %v794_v58  ;;  %v1811_v27 = vadd.f32 %v8500_v22, %v1602_v43  ;;  %v3556_v53 = vld [vmem:[#allocation3] sm:$0xff] }
 0x9b3   :  { %v759_v63 = vpop.permute.xlu0 %758  ;;  %v1509_v61 = vld [vmem:[#allocation4 + $0x20] sm:$0xff] }
 0x9b4   :  { %980 = vst.msk [vmem:[#allocation4 + $0x40] sm:$0xff] %vm8501_vm15, %v963_v8  ;;  %v796_v18 = vmul.f32 %v759_v63, %v700_v48  ;;  %v1605_v11 = vmul.f32 %v8502_v4, %v1509_v61  ;;  %v3572_v61 = vmax.f32 %v3556_v53, 1e-30  ;;  %v3558_v4 = vld [vmem:[#allocation3 + $0x10] sm:$0xff]  ;;  %vm3892_vm15 = vcmask 130048  }
 0x9b5   :  { %1828 = vst.msk [vmem:[#allocation4 + $0x8] sm:$0xff] %vm1826_vm10, %v1811_v27  ;;  %v3557_v27 = vld [vmem:[#allocation3 + $0x8] sm:$0xff] }
 0x9b6   :  { %v965_v50 = vadd.f32 %v8503_v5, %v796_v18  ;;  %v1814_v31 = vadd.f32 %v8504_v7, %v1605_v11  ;;  %v3573_v11 = vmax.f32 %v3557_v27, 1e-30  ;;  %4570 = vrcp.f32 %v3572_v61  ;;  %v7417_v27 = vpop.permute.xlu1 %3238 }
 0x9b7   :  { %v769_v29 = vpop.permute.xlu0 %768  ;;  %v1511_v23 = vld [vmem:[#allocation4 + $0x30] sm:$0xff]  ;;  %v3574_v5 = vmax.f32 %v3558_v4, 1e-30 }
 0x9b8   :  { %982 = vst.msk [vmem:[#allocation4 + $0x50] sm:$0xff] %vm8505_vm13, %v965_v50  ;;  %v798_v45 = vmul.f32 %v769_v29, %v702_v30  ;;  %v1607_v14 = vmul.f32 %v8506_v60, %v1511_v23  ;;  %v3560_v30 = vld [vmem:[#allocation3 + $0x20] sm:$0xff]  ;;  %v3559_v50 = vld [vmem:[#allocation3 + $0x18] sm:$0xff]  ;;  %4572 = vrcp.f32 %v3573_v11  ;;  %v3562_v23 = vld [vmem:[#allocation3 + $0x30] sm:$0xff] }
 0x9b9   :  { %1831 = vst.msk [vmem:[#allocation4 + $0x20] sm:$0xff] %vm1826_vm10, %v1814_v31  ;;  %v3576_v31 = vmax.f32 %v3560_v30, 1e-30  ;;  %v3575_v60 = vmax.f32 %v3559_v50, 1e-30  ;;  %4574 = vrcp.f32 %v3574_v5  ;;  %v8525_v4 = vld [vmem:[#allocation27_spill] sm:$0xff]  ;;  %vm8572_vm13 = vmmov %vm8561_vm0 }
 0x9ba   :  { %v967_v51 = vadd.f32 %v8507_v56, %v798_v45  ;;  %v1816_v32 = vadd.f32 %v8508_v49, %v1607_v14  ;;  %v3578_v56 = vmax.f32 %v3562_v23, 1e-30  ;;  %v3244_v61 = vpop.permute.xlu1 %3243  ;;  %v8526_v30 = vld [vmem:[#allocation18_spill] sm:$0xff]  ;;  %v8527_v50 = vld [vmem:[#allocation19_spill] sm:$0xff]  ;;  %v8529_v23 = vmov 2  }
 0x9bb   :  { %v779_v40 = vpop.permute.xlu0 %778  ;;  %v1513_v9 = vld [vmem:[#allocation4 + $0x40] sm:$0xff]  ;;  %4576 = vrcp.f32 %v3576_v31 }
 0x9bc   :  { %984 = vst.msk [vmem:[#allocation4 + $0x60] sm:$0xff] %vm8509_vm12, %v967_v51  ;;  %v800_v19 = vmul.f32 %v779_v40, %v704_v17  ;;  %v1609_v37 = vmul.f32 %v8510_v15, %v1513_v9  ;;  %v3561_v17 = vld [vmem:[#allocation3 + $0x28] sm:$0xff]  ;;  %v3564_v51 = vld [vmem:[#allocation3 + $0x40] sm:$0xff]  ;;  %4578 = vrcp.f32 %v3575_v60  ;;  %vm8575_vm12 = vmmov %vm8544_vm1 }
 0x9bd   :  { %1833 = vst.msk [vmem:[#allocation4 + $0x30] sm:$0xff] %vm1826_vm10, %v1816_v32  ;;  %v3577_v49 = vmax.f32 %v3561_v17, 1e-30  ;;  %v3563_v32 = vld [vmem:[#allocation3 + $0x38] sm:$0xff]  ;;  %4580 = vrcp.f32 %v3578_v56  ;;  %v3580_v9 = vmax.f32 %v3564_v51, 1e-30 }
 0x9be   :  { %v969_v38 = vadd.f32 %v8511_v41, %v800_v19  ;;  %v1818_v57 = vadd.f32 %v8512_v35, %v1609_v37  ;;  %v3566_v19 = vld [vmem:[#allocation3 + $0x50] sm:$0xff]  ;;  %v3579_v37 = vmax.f32 %v3563_v32, 1e-30  ;;  %v3565_v41 = vld [vmem:[#allocation3 + $0x48] sm:$0xff]  ;;  %v7426_v11 = vpop.permute.xlu1 %3253 }
 0x9bf   :  { %v1515_v13 = vld [vmem:[#allocation4 + $0x50] sm:$0xff]  ;;  %4582 = vrcp.f32 %v3577_v49  ;;  %v3582_v35 = vmax.f32 %v3566_v19, 1e-30 }
 0x9c0   :  { %986 = vst.msk [vmem:[#allocation4 + $0x70] sm:$0xff] %vm8513_vm5, %v969_v38  ;;  %v1611_v2 = vmul.f32 %v8514_v25, %v1515_v13  ;;  %v7366_v40 = vpop.eup %4570  ;;  %4584 = vrcp.f32 %v3580_v9  ;;  %v3581_v25 = vmax.f32 %v3565_v41, 1e-30  ;;  %v3217_v17 = vld [vmem:[#allocation4 + $0x10] sm:$0xff]  ;;  %v8530_v41 = vld [vmem:[#allocation13_spill] sm:$0xff]  ;;  %vm8576_vm5 = vmmov %vm8561_vm0 }
 0x9c1   :  { %1835 = vst.msk [vmem:[#allocation4 + $0x40] sm:$0xff] %vm1826_vm10, %v1818_v57  ;;  %v3568_v57 = vld [vmem:[#allocation3 + $0x60] sm:$0xff]  ;;  %4586 = vrcp.f32 %v3579_v37  ;;  %v3313_v51 = vmul.f32 %v3244_v61, %v3217_v17 }
 0x9c2   :  { %v1820_v16 = vadd.f32 %v8515_v34, %v1611_v2  ;;  %v7369_v15 = vpop.eup %4572  ;;  %v3567_v2 = vld [vmem:[#allocation3 + $0x58] sm:$0xff]  ;;  %4588 = vrcp.f32 %v3582_v35  ;;  %v7431_v5 = vpop.permute.xlu1 %3263 }
 0x9c3   :  { %v1517_v62 = vld [vmem:[#allocation4 + $0x60] sm:$0xff]  ;;  %v7372_v38 = vpop.eup %4574  ;;  %4590 = vrcp.f32 %v3581_v25 }
 0x9c4   :  { %1837 = vst.msk [vmem:[#allocation4 + $0x50] sm:$0xff] %vm1826_vm10, %v1820_v16  ;;  %v1613_v10 = vmul.f32 %v8516_v36, %v1517_v62  ;;  %v3584_v16 = vmax.f32 %v3568_v57, 1e-30  ;;  %v3570_v62 = vld [vmem:[#allocation3 + $0x70] sm:$0xff]  ;;  %v8531_v57 = vld [vmem:[#allocation66_spill] sm:$0xff] }
 0x9c5   :  { %v7375_v13 = vpop.eup %4576 }
 0x9c6   :  { %v1822_v6 = vadd.f32 %v8517_v52, %v1613_v10  ;;  %v7378_v34 = vpop.eup %4578  ;;  %v3583_v10 = vmax.f32 %v3567_v2, 1e-30  ;;  %v3569_v52 = vld [vmem:[#allocation3 + $0x68] sm:$0xff]  ;;  %4592 = vrcp.f32 %v3584_v16  ;;  %v7436_v31 = vpop.permute.xlu1 %3273  ;;  %v8532_v2 = vld [vmem:[#allocation33_spill] sm:$0xff] }
 0x9c7   :  { %v1519_v33 = vld [vmem:[#allocation4 + $0x70] sm:$0xff]  ;;  %v7381_v36 = vpop.eup %4580 }
 0x9c8   :  { %1839 = vst.msk [vmem:[#allocation4 + $0x60] sm:$0xff] %vm1826_vm10, %v1822_v6  ;;  %v1615_v44 = vmul.f32 %v8518_v26, %v1519_v33  ;;  %v3586_v33 = vmax.f32 %v3570_v62, 1e-30  ;;  %4594 = vrcp.f32 %v3583_v10  ;;  %v8533_v62 = vmov 3  }
 0x9c9   :  { %v7384_v6 = vpop.eup %4582 }
 0x9ca   :  { %v1824_v0 = vadd.f32 %v8519_v42, %v1615_v44  ;;  %v7387_v26 = vpop.eup %4584  ;;  %v3585_v44 = vmax.f32 %v3569_v52, 1e-30  ;;  %v3571_v42 = vld [vmem:[#allocation3 + $0x78] sm:$0xff]  ;;  %4596 = vrcp.f32 %v3586_v33  ;;  %v8534_v52 = vld [vmem:[#allocation47_spill] sm:$0xff] }
 0x9cc   :  { %1841 = vst.msk [vmem:[#allocation4 + $0x70] sm:$0xff] %vm1826_vm10, %v1824_v0  ;;  %v7390_v0 = vpop.eup %4586  ;;  %4598 = vrcp.f32 %v3585_v44  ;;  %v8535_v44 = vld [vmem:[#allocation51_spill] sm:$0xff] }
 0xa32   :  { %v4261_v12 = vpop.f32.mrb[16].mxu1 }
 0xa33   :  { %v3393_v1 = vpop.f32.mrb[17].mxu1 }
 0xa34   :  { %3472 = vrot.lane.b32.xlu1 %v3393_v1, %s4661_s9  ;;  %v4262_v28 = vpop.f32.mrb[18].mxu1  ;;  %v3587_v1 = vmax.f32 %v3571_v42, 1e-30 }
 0xa35   :  { %v3396_v55 = vpop.f32.mrb[19].mxu1 }
 0xa36   :  { %3474 = vrot.lane.b32.xlu0 %v3396_v55, %s4661_s9  ;;  %4600 = vrcp.f32 %v3587_v1  ;;  %v8537_v1 = vld [vmem:[#allocation34_spill] sm:$0xff] }
 0xa38   :  { %3476 = vrot.lane.b32.xlu1 %v4261_v12, %s4661_s9  ;;  %v7393_v12 = vpop.eup %4588 }
 0xa3a   :  { %3478 = vrot.lane.b32.xlu0 %v4262_v28, %s4661_s9  ;;  %v4265_v58 = vpop.f32.mrb[20].mxu1  ;;  %v7396_v28 = vpop.eup %4590 }
 0xa3b   :  { %v3409_v47 = vpop.f32.mrb[21].mxu1  ;;  %v7399_v55 = vpop.eup %4592 }
 0xa3c   :  { %3480 = vrot.lane.b32.xlu1 %v3409_v47, %s4661_s9  ;;  %v4266_v43 = vpop.f32.mrb[22].mxu1 }
 0xa3d   :  { %v3412_v48 = vpop.f32.mrb[23].mxu1 }
 0xa3e   :  { %3482 = vrot.lane.b32.xlu0 %v3412_v48, %s4661_s9  ;;  %v8520_v48 = vmov 1  }
 0xa40   :  { %3484 = vrot.lane.b32.xlu1 %v4265_v58, %s4661_s9  ;;  %v7402_v58 = vpop.eup %4594 }
 0xa41   :  { %v7405_v47 = vpop.eup %4596 }
 0xa42   :  { %3486 = vrot.lane.b32.xlu0 %v4266_v43, %s4661_s9  ;;  %v4269_v8 = vpop.f32.mrb[24].mxu1  ;;  %v7408_v43 = vpop.eup %4598 }
 0xa43   :  { %v3425_v22 = vpop.f32.mrb[25].mxu1  ;;  %v7412_v53 = vpop.eup %4600 }
 0xa44   :  { %3488 = vrot.lane.b32.xlu1 %v3425_v22, %s4661_s9  ;;  %v4270_v63 = vpop.f32.mrb[26].mxu1  ;;  %v8522_v22 = vld [vmem:[#allocation60_spill] sm:$0xff] }
 0xa45   :  { %v3428_v18 = vpop.f32.mrb[27].mxu1 }
 0xa46   :  { %3490 = vrot.lane.b32.xlu0 %v3428_v18, %s4661_s9  ;;  %v8524_v18 = vld [vmem:[#allocation63_spill] sm:$0xff] }
 0xa48   :  { %3492 = vrot.lane.b32.xlu1 %v4269_v8, %s4661_s9  ;;  %v8521_v8 = vld [vmem:[#allocation58_spill] sm:$0xff] }
 0xa4a   :  { %3494 = vrot.lane.b32.xlu0 %v4270_v63, %s4661_s9  ;;  %v4273_v7 = vpop.f32.mrb[28].mxu1  ;;  %v8523_v63 = vld [vmem:[#allocation62_spill] sm:$0xff] }
 0xa4b   :  { %v3441_v29 = vpop.f32.mrb[29].mxu1 }
 0xa4c   :  { %3496 = vrot.lane.b32.xlu1 %v3441_v29, %s4661_s9  ;;  %v4274_v45 = vpop.f32.mrb[30].mxu1  ;;  %v7441_v29 = vpop.permute.xlu1 %3283 }
 0xa4d   :  { %v3444_v14 = vpop.f32.mrb[31].mxu1 }
 0xa4e   :  { %3498 = vrot.lane.b32.xlu0 %v3444_v14, %s4661_s9 }
 0xa50   :  { %3500 = vrot.lane.b32.xlu1 %v4273_v7, %s4661_s9  ;;  %v8528_v7 = vld [vmem:[#allocation20_spill] sm:$0xff] }
 0xa52   :  { %3502 = vrot.lane.b32.xlu0 %v4274_v45, %s4661_s9  ;;  %v7447_v45 = vpop.permute.xlu1 %3293 }
 0xa54   :  { %3606 = vperm.xlu1 %4299, %v7366_v40  }
 0xa56   :  { %3611 = vperm.xlu0 %4298, %v7369_v15   ;;  %v7451_v60 = vpop.permute.xlu1 %3303 }
 0xa58   :  { %3616 = vperm.xlu1 %4299, %v7372_v38  }
 0xa5a   :  { %3626 = vperm.xlu0 %4298, %v7375_v13  }
 0xa5c   :  { %3621 = vperm.xlu1 %4299, %v7378_v34  }
 0xa5e   :  { %3636 = vperm.xlu0 %4298, %v7381_v36  }
 0xa60   :  { %3631 = vperm.xlu1 %4299, %v7384_v6  }
 0xa62   :  { %3646 = vperm.xlu0 %4298, %v7387_v26  }
 0xa64   :  { %3641 = vperm.xlu1 %4299, %v7390_v0  }
 0xa66   :  { %3656 = vperm.xlu0 %4298, %v7393_v12  }
 0xa68   :  { %3651 = vperm.xlu1 %4299, %v7396_v28  }
 0xa6a   :  { %3666 = vperm.xlu0 %4298, %v7399_v55  }
 0xa6c   :  { %3661 = vperm.xlu1 %4299, %v7402_v58  }
 0xa6e   :  { %3676 = vperm.xlu0 %4298, %v7405_v47  }
 0xa70   :  { %3671 = vperm.xlu1 %4299, %v7408_v43  }
 0xa72   :  { %4300 = vset.pattern.permute.xlu0 %v8520_v48 }
 0xa73   :  { %1523 = vperm.xlu0 %4300, %v8521_v8  }
 0xa74   :  { %3681 = vperm.xlu1 %4299, %v7412_v53  }
 0xa77   :  { %1538 = vperm.xlu0 %4300, %v8522_v22   ;;  %v8539_v22 = vld [vmem:[#allocation35_spill] sm:$0xff] }
 0xa78   :  { %4301 = vset.pattern.permute.xlu1 %v8520_v48 }
 0xa79   :  { %3689 = vperm.xlu1 %4301, %v7369_v15  }
 0xa7b   :  { %1548 = vperm.xlu0 %4300, %v8523_v63  }
 0xa7d   :  { %3693 = vperm.xlu1 %4301, %v7372_v38  }
 0xa7f   :  { %1558 = vperm.xlu0 %4300, %v8524_v18  }
 0xa81   :  { %3701 = vperm.xlu1 %4301, %v7375_v13  }
 0xa83   :  { %1568 = vperm.xlu0 %4300, %v8525_v4  }
 0xa85   :  { %3709 = vperm.xlu1 %4301, %v7381_v36  }
 0xa87   :  { %1578 = vperm.xlu0 %4300, %v8526_v30  }
 0xa89   :  { %3717 = vperm.xlu1 %4301, %v7387_v26  }
 0xa8b   :  { %1588 = vperm.xlu0 %4300, %v8527_v50  }
 0xa8d   :  { %3725 = vperm.xlu1 %4301, %v7393_v12  }
 0xa8f   :  { %1598 = vperm.xlu0 %4300, %v8528_v7  }
 0xa91   :  { %3733 = vperm.xlu1 %4301, %v7399_v55  }
 0xa93   :  { %3685 = vperm.xlu0 %4300, %v7366_v40  }
 0xa95   :  { %3741 = vperm.xlu1 %4301, %v7405_v47  }
 0xa97   :  { %3697 = vperm.xlu0 %4300, %v7378_v34  }
 0xa99   :  { %4303 = vset.pattern.permute.xlu1 %v8529_v23 }
 0xa9a   :  { %3749 = vperm.xlu1 %4303, %v7366_v40  }
 0xa9b   :  { %3705 = vperm.xlu0 %4300, %v7384_v6  }
 0xa9e   :  { %3757 = vperm.xlu1 %4303, %v7372_v38  }
 0xa9f   :  { %3713 = vperm.xlu0 %4300, %v7390_v0  }
 0xaa2   :  { %3761 = vperm.xlu1 %4303, %v7378_v34  }
 0xaa3   :  { %3721 = vperm.xlu0 %4300, %v7396_v28  }
 0xaa6   :  { %v7455_v14 = vpop.permute.xlu1 %3472  ;;  %3769 = vperm.xlu1 %4303, %v7384_v6  }
 0xaa7   :  { %3729 = vperm.xlu0 %4300, %v7402_v58  }
 0xaa8   :  { %v7459_v56 = vpop.permute.xlu0 %3474 }
 0xaaa   :  { %v3477_v49 = vpop.permute.xlu1 %3476  ;;  %3777 = vperm.xlu1 %4303, %v7390_v0  }
 0xaab   :  { %v3522_v32 = vadd.f32 %v3477_v49, %v3313_v51  ;;  %3737 = vperm.xlu0 %4300, %v7408_v43  }
 0xaac   :  { %v7464_v9 = vpop.permute.xlu0 %3478 }
 0xaad   :  { %3539 = vst.msk [vmem:[#allocation4 + $0x10] sm:$0xff] %vm3536_vm4, %v3522_v32 }
 0xaae   :  { %3785 = vperm.xlu1 %4303, %v7396_v28   ;;  %v7468_v19 = vpop.permute.xlu1 %3480 }
 0xaaf   :  { %3745 = vperm.xlu0 %4300, %v7412_v53  }
 0xab0   :  { %v7471_v37 = vpop.permute.xlu0 %3482 }
 0xab2   :  { %3793 = vperm.xlu1 %4303, %v7402_v58   ;;  %v7476_v35 = vpop.permute.xlu1 %3484 }
 0xab3   :  { %4302 = vset.pattern.permute.xlu0 %v8529_v23 }
 0xab4   :  { %2383 = vperm.xlu0 %4302, %v8530_v41   ;;  %v7479_v25 = vpop.permute.xlu0 %3486 }
 0xab6   :  { %3801 = vperm.xlu1 %4303, %v7408_v43   ;;  %v7483_v16 = vpop.permute.xlu1 %3488 }
 0xab8   :  { %2398 = vperm.xlu0 %4302, %v8531_v57   ;;  %v7486_v10 = vpop.permute.xlu0 %3490 }
 0xaba   :  { %3809 = vperm.xlu1 %4303, %v7412_v53   ;;  %v7490_v33 = vpop.permute.xlu1 %3492 }
 0xabc   :  { %2408 = vperm.xlu0 %4302, %v8532_v2   ;;  %v7494_v42 = vpop.permute.xlu0 %3494 }
 0xabd   :  { %8536 = vst [vmem:[#allocation7_spill] sm:$0xff] %v7494_v42 }
 0xabe   :  { %4305 = vset.pattern.permute.xlu1 %v8533_v62  ;;  %v7498_v48 = vpop.permute.xlu1 %3496 }
 0xabf   :  { %3817 = vperm.xlu1 %4305, %v7369_v15  }
 0xac0   :  { %2418 = vperm.xlu0 %4302, %v8534_v52   ;;  %v7500_v8 = vpop.permute.xlu0 %3498  ;;  %v1508_v52 = vld [vmem:[#allocation4 + $0x18] sm:$0xff] }
 0xac1   :  { %8538 = vst [vmem:[#allocation8_spill] sm:$0xff] %v7500_v8 }
 0xac2   :  { %v7504_v63 = vpop.permute.xlu1 %3500 }
 0xac3   :  { %3821 = vperm.xlu1 %4305, %v7372_v38  }
 0xac4   :  { %2428 = vperm.xlu0 %4302, %v8535_v44   ;;  %v7508_v38 = vpop.permute.xlu0 %3502 }
 0xac5   :  { %8540 = vst [vmem:[#allocation9_spill] sm:$0xff] %v7508_v38 }
 0xac7   :  { %3829 = vperm.xlu1 %4305, %v7375_v13  }
 0xac8   :  { %2438 = vperm.xlu0 %4302, %v8537_v1   ;;  %v8542_v1 = vld [vmem:[#allocation46_spill] sm:$0xff] }
 0xacb   :  { %3837 = vperm.xlu1 %4305, %v7381_v36  }
 0xacc   :  { %2448 = vperm.xlu0 %4302, %v8539_v22  }
 0xacf   :  { %3845 = vperm.xlu1 %4305, %v7387_v26  }
 0xad0   :  { %3753 = vperm.xlu0 %4302, %v7369_v15  }
 0xad3   :  { %v7510_v61 = vpop.permute.xlu1 %3606  ;;  %3853 = vperm.xlu1 %4305, %v7393_v12  }
 0xad4   :  { %3765 = vperm.xlu0 %4302, %v7375_v13  }
 0xad5   :  { %v7514_v18 = vpop.permute.xlu0 %3611 }
 0xad7   :  { %v3617_v4 = vpop.permute.xlu1 %3616  ;;  %3861 = vperm.xlu1 %4305, %v7399_v55  }
 0xad8   :  { %3773 = vperm.xlu0 %4302, %v7381_v36  }
 0xad9   :  { %v7518_v30 = vpop.permute.xlu0 %3626 }
 0xadb   :  { %v7520_v50 = vpop.permute.xlu1 %3621  ;;  %3869 = vperm.xlu1 %4305, %v7405_v47  }
 0xadc   :  { %3781 = vperm.xlu0 %4302, %v7387_v26  }
 0xadd   :  { %v7524_v15 = vpop.permute.xlu0 %3636 }
 0xadf   :  { %v7526_v7 = vpop.permute.xlu1 %3631 }
 0xae0   :  { %3789 = vperm.xlu0 %4302, %v7393_v12  }
 0xae1   :  { %v7529_v13 = vpop.permute.xlu0 %3646 }
 0xae3   :  { %v7531_v23 = vpop.permute.xlu1 %3641 }
 0xae4   :  { %3797 = vperm.xlu0 %4302, %v7399_v55   ;;  %v1505_v55 = vld [vmem:[#allocation4] sm:$0xff] }
 0xae5   :  { %v7534_v36 = vpop.permute.xlu0 %3656 }
 0xae7   :  { %v7536_v17 = vpop.permute.xlu1 %3651 }
 0xae8   :  { %3805 = vperm.xlu0 %4302, %v7405_v47   ;;  %v8541_v47 = vld [vmem:[#allocation65_spill] sm:$0xff] }
 0xae9   :  { %v7539_v51 = vpop.permute.xlu0 %3666 }
 0xaeb   :  { %v7541_v26 = vpop.permute.xlu1 %3661 }
 0xaec   :  { %4304 = vset.pattern.permute.xlu0 %v8533_v62 }
 0xaed   :  { %3233 = vperm.xlu0 %4304, %v7164_v21   ;;  %v7545_v12 = vpop.permute.xlu0 %3676 }
 0xaef   :  { %v7547_v49 = vpop.permute.xlu1 %3671 }
 0xaf1   :  { %3248 = vperm.xlu0 %4304, %v7170_v59   ;;  %v1510_v59 = vld [vmem:[#allocation4 + $0x28] sm:$0xff] }
 0xaf2   :  { %v1524_v32 = vpop.permute.xlu0 %1523 }
 0xaf3   :  { %v1601_v41 = vmul.f32 %v1524_v32, %v1505_v55  ;;  %v7550_v57 = vpop.permute.xlu1 %3681 }
 0xaf5   :  { %v1810_v2 = vadd.f32 %v8541_v47, %v1601_v41  ;;  %3258 = vperm.xlu0 %4304, %v7174_v24   ;;  %v8543_v41 = vld [vmem:[#allocation57_spill] sm:$0xff] }
 0xaf6   :  { %v1539_v44 = vpop.permute.xlu0 %1538 }
 0xaf7   :  { %1827 = vst.msk [vmem:[#allocation4] sm:$0xff] %vm1826_vm10, %v1810_v2  ;;  %v1604_v21 = vmul.f32 %v1539_v44, %v1508_v52  ;;  %v1512_v2 = vld [vmem:[#allocation4 + $0x38] sm:$0xff] }
 0xaf8   :  { %v7555_v62 = vpop.permute.xlu1 %3689 }
 0xaf9   :  { %v1813_v22 = vadd.f32 %v8542_v1, %v1604_v21  ;;  %3268 = vperm.xlu0 %4304, %v7178_v54   ;;  %v8545_v54 = vld [vmem:[#allocation36_spill] sm:$0xff] }
 0xafa   :  { %v1549_v38 = vpop.permute.xlu0 %1548 }
 0xafb   :  { %1830 = vst.msk [vmem:[#allocation4 + $0x18] sm:$0xff] %vm1826_vm10, %v1813_v22  ;;  %v1606_v55 = vmul.f32 %v1549_v38, %v1510_v59  ;;  %v8546_v22 = vld [vmem:[#allocation52_spill] sm:$0xff]  ;;  %v8547_v59 = vld [vmem:[#allocation77_spill] sm:$0xff] }
 0xafc   :  { %v3694_v32 = vpop.permute.xlu1 %3693 }
 0xafd   :  { %v1815_v47 = vadd.f32 %v8543_v41, %v1606_v55  ;;  %v7562_v24 = vsel %vm8544_vm1, %v3617_v4, %v3694_v32  ;;  %3278 = vperm.xlu0 %4304, %v7182_v20   ;;  %v1514_v4 = vld [vmem:[#allocation4 + $0x48] sm:$0xff] }
 0xafe   :  { %v1559_v52 = vpop.permute.xlu0 %1558  ;;  %v2360_v44 = vld [vmem:[#allocation4] sm:$0xff] }
 0xaff   :  { %1832 = vst.msk [vmem:[#allocation4 + $0x28] sm:$0xff] %vm1826_vm10, %v1815_v47  ;;  %v1608_v21 = vmul.f32 %v1559_v52, %v1512_v2  ;;  %v2456_v1 = vmul.f32 %v8545_v54, %v2360_v44  ;;  %v8549_v47 = vld [vmem:[#allocation56_spill] sm:$0xff] }
 0xb00   :  { %v7567_v8 = vpop.permute.xlu1 %3701  ;;  %v8550_v44 = vld [vmem:[#allocation12_spill] sm:$0xff] }
 0xb01   :  { %v1817_v38 = vadd.f32 %v8546_v22, %v1608_v21  ;;  %3288 = vperm.xlu0 %4304, %v7294_v46   ;;  %v2665_v55 = vadd.f32 %v8547_v59, %v2456_v1  ;;  %v8551_v21 = vld [vmem:[#allocation79_spill] sm:$0xff]  ;;  %v1516_v22 = vld [vmem:[#allocation4 + $0x58] sm:$0xff] }
 0xb02   :  { %v1569_v32 = vpop.permute.xlu0 %1568  ;;  %v2363_v41 = vld [vmem:[#allocation4 + $0x18] sm:$0xff] }
 0xb03   :  { %1834 = vst.msk [vmem:[#allocation4 + $0x38] sm:$0xff] %vm1826_vm10, %v1817_v38  ;;  %v1610_v20 = vmul.f32 %v1569_v32, %v1514_v4  ;;  %v2459_v2 = vmul.f32 %v8549_v47, %v2363_v41  ;;  %v8553_v38 = vld [vmem:[#allocation61_spill] sm:$0xff]  ;;  %v8554_v32 = vld [vmem:[#allocation11_spill] sm:$0xff]  ;;  %v1518_v47 = vld [vmem:[#allocation4 + $0x68] sm:$0xff] }
 0xb04   :  { %2682 = vst.msk [vmem:[#allocation4] sm:$0xff] %vm8548_vm3, %v2665_v55  ;;  %v7575_v52 = vpop.permute.xlu1 %3709  ;;  %vm8579_vm3 = vmmov %vm8561_vm0 }
 0xb05   :  { %v1819_v54 = vadd.f32 %v8550_v44, %v1610_v20  ;;  %3298 = vperm.xlu0 %4304, %v7305_v39   ;;  %v2668_v46 = vadd.f32 %v8551_v21, %v2459_v2  ;;  %v8555_v20 = vld [vmem:[#allocation81_spill] sm:$0xff] }
 0xb06   :  { %v1579_v1 = vpop.permute.xlu0 %1578  ;;  %v2365_v59 = vld [vmem:[#allocation4 + $0x28] sm:$0xff] }
 0xb07   :  { %1836 = vst.msk [vmem:[#allocation4 + $0x48] sm:$0xff] %vm1826_vm10, %v1819_v54  ;;  %v1612_v42 = vmul.f32 %v1579_v1, %v1516_v22  ;;  %v2461_v55 = vmul.f32 %v8553_v38, %v2365_v59  ;;  %v8557_v54 = vld [vmem:[#allocation37_spill] sm:$0xff]  ;;  %v8558_v1 = vld [vmem:[#allocation76_spill] sm:$0xff] }
 0xb08   :  { %2685 = vst.msk [vmem:[#allocation4 + $0x18] sm:$0xff] %vm8552_vm2, %v2668_v46  ;;  %v7583_v4 = vpop.permute.xlu1 %3717  ;;  %vm8580_vm2 = vmmov %vm8544_vm1 }
 0xb09   :  { %v1821_v41 = vadd.f32 %v8554_v32, %v1612_v42  ;;  %3308 = vperm.xlu0 %4304, %v7309_v3   ;;  %v2670_v39 = vadd.f32 %v8555_v20, %v2461_v55  ;;  %v8560_v3 = vld [vmem:[#allocation83_spill] sm:$0xff]  ;;  %v1520_v55 = vld [vmem:[#allocation4 + $0x78] sm:$0xff] }
 0xb0a   :  { %v1589_v2 = vpop.permute.xlu0 %1588  ;;  %v2367_v44 = vld [vmem:[#allocation4 + $0x38] sm:$0xff] }
 0xb0b   :  { %1838 = vst.msk [vmem:[#allocation4 + $0x58] sm:$0xff] %vm1826_vm10, %v1821_v41  ;;  %v1614_v21 = vmul.f32 %v1589_v2, %v1518_v47  ;;  %v2463_v46 = vmul.f32 %v8557_v54, %v2367_v44  ;;  %v8563_v44 = vld [vmem:[#allocation43_spill] sm:$0xff] }
 0xb0c   :  { %2687 = vst.msk [vmem:[#allocation4 + $0x28] sm:$0xff] %vm8556_vm11, %v2670_v39  ;;  %v3726_v22 = vpop.permute.xlu1 %3725  ;;  %v8562_v39 = vld [vmem:[#allocation40_spill] sm:$0xff]  ;;  %vm8581_vm11 = vmmov %vm8544_vm1 }
 0xb0d   :  { %v1823_v59 = vadd.f32 %v8558_v1, %v1614_v21  ;;  %v7594_v42 = vsel %vm8559_vm14, %v7534_v36, %v3726_v22  ;;  %3813 = vperm.xlu0 %4304, %v7366_v40   ;;  %v2672_v38 = vadd.f32 %v8560_v3, %v2463_v46  ;;  %v8565_v40 = vld [vmem:[#allocation85_spill] sm:$0xff]  ;;  %vm8582_vm14 = vmmov %vm8544_vm1 }
 0xb0e   :  { %v1599_v32 = vpop.permute.xlu0 %1598  ;;  %v2369_v20 = vld [vmem:[#allocation4 + $0x48] sm:$0xff] }
 0xb0f   :  { %1840 = vst.msk [vmem:[#allocation4 + $0x68] sm:$0xff] %vm1826_vm10, %v1823_v59  ;;  %v1616_v41 = vmul.f32 %v1599_v32, %v1520_v55  ;;  %v2465_v47 = vmul.f32 %v8562_v39, %v2369_v20  ;;  %v8568_v59 = vld [vmem:[#allocation39_spill] sm:$0xff] }
 0xb10   :  { %2689 = vst.msk [vmem:[#allocation4 + $0x38] sm:$0xff] %vm8561_vm0, %v2672_v38  ;;  %v3734_v2 = vpop.permute.xlu1 %3733  ;;  %vm8583_vm0 = vmmov %vm8544_vm1 }
 0xb11   :  { %v1825_v21 = vadd.f32 %v8563_v44, %v1616_v41  ;;  %v7604_v36 = vsel %vm8564_vm6, %v7539_v51, %v3734_v2  ;;  %3825 = vperm.xlu0 %4304, %v7378_v34   ;;  %v2674_v54 = vadd.f32 %v8565_v40, %v2465_v47  ;;  %v8570_v34 = vld [vmem:[#allocation87_spill] sm:$0xff]  ;;  %v8574_v2 = vld [vmem:[#allocation89_spill] sm:$0xff]  ;;  %vm8585_vm6 = vmmov %vm8579_vm3 }
 0xb12   :  { %v3686_v46 = vpop.permute.xlu0 %3685  ;;  %v2371_v22 = vld [vmem:[#allocation4 + $0x58] sm:$0xff] }
 0xb13   :  { %1842 = vst.msk [vmem:[#allocation4 + $0x78] sm:$0xff] %vm1826_vm10, %v1825_v21  ;;  %v3876_v1 = vsel %vm8566_vm8, %v7510_v61, %v3686_v46  ;;  %v2467_v3 = vmul.f32 %v8568_v59, %v2371_v22  ;;  %vm8571_vm10 = vmmov %vm8544_vm1  ;;  %v8573_v61 = vld [vmem:[#allocation64_spill] sm:$0xff]  ;;  %v8578_v22 = vld [vmem:[#allocation90_spill] sm:$0xff] }
 0xb14   :  { %2691 = vst.msk [vmem:[#allocation4 + $0x48] sm:$0xff] %vm8567_vm9, %v2674_v54  ;;  %v3742_v38 = vpop.permute.xlu1 %3741  ;;  %vm8587_vm8 = vmmov %vm8579_vm3 }
 0xb15   :  { %v7615_v51 = vsel %vm8569_vm7, %v7545_v12, %v3742_v38  ;;  %3833 = vperm.xlu0 %4304, %v7384_v6   ;;  %v2676_v55 = vadd.f32 %v8570_v34, %v2467_v3  ;;  %vm8589_vm9 = vmmov %vm8579_vm3  ;;  %vm3909_vm7 = vcmask 195584  }
 0xb16   :  { %v3698_v32 = vpop.permute.xlu0 %3697  ;;  %v2373_v20 = vld [vmem:[#allocation4 + $0x68] sm:$0xff] }
 0xb17   :  { %v3879_v41 = vsel %vm8571_vm10, %v7520_v50, %v3698_v32  ;;  %2693 = vst.msk [vmem:[#allocation4 + $0x58] sm:$0xff] %vm8572_vm13, %v2676_v55  ;;  %v2469_v39 = vmul.f32 %v8573_v61, %v2373_v20  ;;  %v8577_v50 = vld [vmem:[#allocation42_spill] sm:$0xff]  ;;  %vm8591_vm10 = vmmov %vm8579_vm3  ;;  %vm8592_vm13 = vcmask 261120  }
 0xb19   :  { %v3750_v47 = vpop.permute.xlu1 %3749  ;;  %3841 = vperm.xlu0 %4304, %v7390_v0   ;;  %v2678_v12 = vadd.f32 %v8574_v2, %v2469_v39 }
 0xb1a   :  { %v7626_v44 = vsel %vm3892_vm15, %v3876_v1, %v3750_v47  ;;  %v3706_v6 = vpop.permute.xlu0 %3705  ;;  %v2375_v21 = vld [vmem:[#allocation4 + $0x78] sm:$0xff] }
 0xb1b   :  { %v3881_v40 = vsel %vm8575_vm12, %v7526_v7, %v3706_v6  ;;  %2695 = vst.msk [vmem:[#allocation4 + $0x68] sm:$0xff] %vm8576_vm5, %v2678_v12  ;;  %v2471_v54 = vmul.f32 %v8577_v50, %v2375_v21  ;;  %vm8594_vm12 = vmmov %vm8579_vm3 }
 0xb1c   :  { %vm8596_vm5 = vmmov %vm8579_vm3 }
 0xb1d   :  { %v3758_v46 = vpop.permute.xlu1 %3757  ;;  %3849 = vperm.xlu0 %4304, %v7396_v28   ;;  %v2680_v59 = vadd.f32 %v8578_v22, %v2471_v54  ;;  %v2364_v54 = vld [vmem:[#allocation4 + $0x20] sm:$0xff] }
 0xb1e   :  { %v3714_v0 = vpop.permute.xlu0 %3713 }
 0xb1f   :  { %v3883_v3 = vsel %vm8544_vm1, %v7531_v23, %v3714_v0  ;;  %2697 = vst.msk [vmem:[#allocation4 + $0x78] sm:$0xff] %vm8579_vm3, %v2680_v59  ;;  %vm8598_vm1 = vmmov %vm8583_vm0 }
 0xb21   :  { %v3762_v1 = vpop.permute.xlu1 %3761  ;;  %3857 = vperm.xlu0 %4304, %v7402_v58  }
 0xb22   :  { %v7639_v7 = vsel %vm3892_vm15, %v3879_v41, %v3762_v1  ;;  %v3722_v38 = vpop.permute.xlu0 %3721 }
 0xb23   :  { %v3885_v34 = vsel %vm8580_vm2, %v7536_v17, %v3722_v38  ;;  %v2366_v38 = vld [vmem:[#allocation4 + $0x30] sm:$0xff]  ;;  %vm8599_vm2 = vmmov %vm8583_vm0 }
 0xb25   :  { %v3770_v55 = vpop.permute.xlu1 %3769  ;;  %3865 = vperm.xlu0 %4304, %v7408_v43  }
 0xb26   :  { %v7645_v28 = vsel %vm3892_vm15, %v3881_v40, %v3770_v55  ;;  %v3730_v32 = vpop.permute.xlu0 %3729  ;;  %v8584_v40 = vld [vmem:[#allocation78_spill] sm:$0xff] }
 0xb27   :  { %v3887_v23 = vsel %vm8581_vm11, %v7541_v26, %v3730_v32  ;;  %v8588_v32 = vld [vmem:[#allocation82_spill] sm:$0xff]  ;;  %vm8600_vm11 = vmmov %vm8592_vm13 }
 0xb29   :  { %v3778_v20 = vpop.permute.xlu1 %3777  ;;  %3873 = vperm.xlu0 %4304, %v7412_v53   ;;  %v2361_v53 = vld [vmem:[#allocation4 + $0x8] sm:$0xff] }
 0xb2a   :  { %v7651_v58 = vsel %vm3892_vm15, %v3883_v3, %v3778_v20  ;;  %v3738_v41 = vpop.permute.xlu0 %3737 }
 0xb2b   :  { %v3889_v17 = vsel %vm8582_vm14, %v7547_v49, %v3738_v41  ;;  %vm8601_vm14 = vmmov %vm8583_vm0 }
 0xb2d   :  { %v3786_v61 = vpop.permute.xlu1 %3785 }
 0xb2e   :  { %v7656_v43 = vsel %vm3892_vm15, %v3885_v34, %v3786_v61  ;;  %v3746_v39 = vpop.permute.xlu0 %3745 }
 0xb2f   :  { %v3891_v47 = vsel %vm8583_vm0, %v7550_v57, %v3746_v39  ;;  %v8586_v57 = vld [vmem:[#allocation80_spill] sm:$0xff]  ;;  %vm8602_vm0 = vmmov %vm8600_vm11 }
 0xb31   :  { %v3794_v2 = vpop.permute.xlu1 %3793 }
 0xb32   :  { %v7661_v26 = vsel %vm3892_vm15, %v3887_v23, %v3794_v2 }
 0xb33   :  { %v2384_v12 = vpop.permute.xlu0 %2383 }
 0xb34   :  { %v2457_v6 = vmul.f32 %v2384_v12, %v2361_v53  ;;  %v8590_v12 = vld [vmem:[#allocation84_spill] sm:$0xff] }
 0xb35   :  { %v3802_v21 = vpop.permute.xlu1 %3801 }
 0xb36   :  { %v2666_v50 = vadd.f32 %v8584_v40, %v2457_v6  ;;  %v7665_v49 = vsel %vm3892_vm15, %v3889_v17, %v3802_v21  ;;  %v2368_v17 = vld [vmem:[#allocation4 + $0x40] sm:$0xff] }
 0xb37   :  { %v2399_v22 = vpop.permute.xlu0 %2398 }
 0xb38   :  { %2683 = vst.msk [vmem:[#allocation4 + $0x8] sm:$0xff] %vm8585_vm6, %v2666_v50  ;;  %v2460_v59 = vmul.f32 %v2399_v22, %v2364_v54  ;;  %v3928_v50 = vld [vmem:[#allocation4 + $0x10] sm:$0xff]  ;;  %vm8603_vm6 = vmmov %vm8598_vm1 }
 0xb39   :  { %v3810_v0 = vpop.permute.xlu1 %3809  ;;  %v2370_v22 = vld [vmem:[#allocation4 + $0x50] sm:$0xff] }
 0xb3a   :  { %v2669_v3 = vadd.f32 %v8586_v57, %v2460_v59  ;;  %v7670_v1 = vsel %vm3892_vm15, %v3891_v47, %v3810_v0  ;;  %v3895_v47 = vsel %vm3892_vm15, %v7562_v24, %v3758_v46 }
 0xb3b   :  { %v2409_v34 = vpop.permute.xlu0 %2408 }
 0xb3c   :  { %2686 = vst.msk [vmem:[#allocation4 + $0x20] sm:$0xff] %vm8587_vm8, %v2669_v3  ;;  %v2462_v55 = vmul.f32 %v2409_v34, %v2366_v38  ;;  %v2372_v38 = vld [vmem:[#allocation4 + $0x60] sm:$0xff]  ;;  %vm8604_vm8 = vmmov %vm8602_vm0 }
 0xb3e   :  { %v2671_v23 = vadd.f32 %v8588_v32, %v2462_v55  ;;  %v3818_v20 = vpop.permute.xlu1 %3817 }
 0xb3f   :  { %v3216_v41 = vld [vmem:[#allocation4 + $0x8] sm:$0xff]  ;;  %v2419_v61 = vpop.permute.xlu0 %2418 }
 0xb40   :  { %v3312_v39 = vmul.f32 %v7417_v27, %v3216_v41  ;;  %2688 = vst.msk [vmem:[#allocation4 + $0x30] sm:$0xff] %vm8589_vm9, %v2671_v23  ;;  %v2464_v2 = vmul.f32 %v2419_v61, %v2368_v17  ;;  %v8595_v23 = vld [vmem:[#allocation88_spill] sm:$0xff]  ;;  %v2374_v61 = vld [vmem:[#allocation4 + $0x70] sm:$0xff]  ;;  %vm8605_vm9 = vmmov %vm8602_vm0 }
 0xb42   :  { %v3521_v53 = vadd.f32 %v7459_v56, %v3312_v39  ;;  %v2673_v6 = vadd.f32 %v8590_v12, %v2464_v2  ;;  %v3822_v21 = vpop.permute.xlu1 %3821  ;;  %v8593_v56 = vld [vmem:[#allocation86_spill] sm:$0xff] }
 0xb43   :  { %v3219_v40 = vld [vmem:[#allocation4 + $0x20] sm:$0xff]  ;;  %v3912_v54 = vsel %vm3909_vm7, %v3895_v47, %v3822_v21  ;;  %v2429_v59 = vpop.permute.xlu0 %2428 }
 0xb44   :  { %3538 = vst.msk [vmem:[#allocation4 + $0x8] sm:$0xff] %vm3536_vm4, %v3521_v53  ;;  %v3315_v27 = vmul.f32 %v7426_v11, %v3219_v40  ;;  %v3944_v0 = vmul.f32 %v3928_v50, %v3912_v54  ;;  %v2466_v57 = vmul.f32 %v2429_v59, %v2370_v22  ;;  %v8597_v53 = vld [vmem:[#allocation5_spill] sm:$0xff] }
 0xb45   :  { %2690 = vst.msk [vmem:[#allocation4 + $0x40] sm:$0xff] %vm8591_vm10, %v2673_v6  ;;  %vm8606_vm10 = vmmov %vm8602_vm0 }
 0xb46   :  { %v3524_v24 = vadd.f32 %v7468_v19, %v3315_v27  ;;  %3961 = vst.msk [vmem:[%s7836_s4 + $0x10] sm:$0xff] %vm8592_vm13, %v3944_v0  ;;  %v2675_v46 = vadd.f32 %v8593_v56, %v2466_v57  ;;  %v3830_v19 = vpop.permute.xlu1 %3829  ;;  %vm8607_vm13 = vmmov %vm8602_vm0 }
 0xb47   :  { %v3221_v3 = vld [vmem:[#allocation4 + $0x30] sm:$0xff]  ;;  %v2439_v34 = vpop.permute.xlu0 %2438 }
 0xb48   :  { %3541 = vst.msk [vmem:[#allocation4 + $0x20] sm:$0xff] %vm3536_vm4, %v3524_v24  ;;  %v3317_v11 = vmul.f32 %v7431_v5, %v3221_v3  ;;  %v2468_v55 = vmul.f32 %v2439_v34, %v2372_v38 }
 0xb49   :  { %2692 = vst.msk [vmem:[#allocation4 + $0x50] sm:$0xff] %vm8594_vm12, %v2675_v46  ;;  %vm8608_vm12 = vmmov %vm8602_vm0 }
 0xb4a   :  { %v3526_v32 = vadd.f32 %v7476_v35, %v3317_v11  ;;  %v2677_v41 = vadd.f32 %v8595_v23, %v2468_v55  ;;  %v3877_v35 = vsel %vm8598_vm1, %v7514_v18, %v7555_v62  ;;  %v3838_v50 = vpop.permute.xlu1 %3837  ;;  %v3880_v18 = vsel %vm8599_vm2, %v7518_v30, %v7567_v8  ;;  %vm8615_vm1 = vmmov %vm8602_vm0 }
 0xb4b   :  { %v2449_v39 = vpop.permute.xlu0 %2448  ;;  %v3927_v54 = vld [vmem:[#allocation4 + $0x8] sm:$0xff]  ;;  %v3882_v30 = vsel %vm8601_vm14, %v7524_v15, %v7575_v52  ;;  %v3884_v15 = vsel %vm8603_vm6, %v7529_v13, %v7583_v4  ;;  %vm8617_vm2 = vmmov %vm8602_vm0 }
 0xb4c   :  { %v3223_v17 = vld [vmem:[#allocation4 + $0x40] sm:$0xff]  ;;  %3543 = vst.msk [vmem:[#allocation4 + $0x30] sm:$0xff] %vm3536_vm4, %v3526_v32  ;;  %v2470_v47 = vmul.f32 %v2449_v39, %v2374_v61  ;;  %vm8619_vm14 = vmmov %vm8602_vm0 }
 0xb4d   :  { %v3319_v2 = vmul.f32 %v7436_v31, %v3223_v17  ;;  %2694 = vst.msk [vmem:[#allocation4 + $0x60] sm:$0xff] %vm8596_vm5, %v2677_v41  ;;  %vm8613_vm5 = vmmov %vm8602_vm0 }
 0xb4e   :  { %v2679_v12 = vadd.f32 %v8597_v53, %v2470_v47  ;;  %v3846_v24 = vpop.permute.xlu1 %3845 }
 0xb4f   :  { %v3528_v5 = vadd.f32 %v7483_v16, %v3319_v2  ;;  %v3754_v21 = vpop.permute.xlu0 %3753  ;;  %v3930_v0 = vld [vmem:[#allocation4 + $0x20] sm:$0xff] }
 0xb50   :  { %v3225_v6 = vld [vmem:[#allocation4 + $0x50] sm:$0xff]  ;;  %2696 = vst.msk [vmem:[#allocation4 + $0x70] sm:$0xff] %vm8579_vm3, %v2679_v12  ;;  %v3894_v31 = vsel %vm3892_vm15, %v3877_v35, %v3754_v21  ;;  %vm8616_vm3 = vmmov %vm8602_vm0 }
 0xb51   :  { %3545 = vst.msk [vmem:[#allocation4 + $0x40] sm:$0xff] %vm3536_vm4, %v3528_v5  ;;  %v3321_v40 = vmul.f32 %v7441_v29, %v3225_v6  ;;  %v3911_v16 = vsel %vm3909_vm7, %v3894_v31, %v3818_v20 }
 0xb52   :  { %v3943_v59 = vmul.f32 %v3927_v54, %v3911_v16  ;;  %v3218_v16 = vld [vmem:[#allocation4 + $0x18] sm:$0xff] }
 0xb53   :  { %v3530_v22 = vadd.f32 %v7490_v33, %v3321_v40  ;;  %v3766_v27 = vpop.permute.xlu0 %3765 }
 0xb54   :  { %v3227_v62 = vld [vmem:[#allocation4 + $0x60] sm:$0xff]  ;;  %3960 = vst.msk [vmem:[%s7836_s4 + $0x8] sm:$0xff] %vm8600_vm11, %v3943_v59  ;;  %v3897_v20 = vsel %vm3892_vm15, %v3880_v18, %v3766_v27  ;;  %v3220_v18 = vld [vmem:[#allocation4 + $0x28] sm:$0xff]  ;;  %vm8618_vm11 = vmmov %vm8602_vm0 }
 0xb55   :  { %3547 = vst.msk [vmem:[#allocation4 + $0x50] sm:$0xff] %vm3536_vm4, %v3530_v22  ;;  %v3323_v29 = vmul.f32 %v7447_v45, %v3227_v62  ;;  %v3914_v33 = vsel %vm3909_vm7, %v3897_v20, %v3830_v19  ;;  %v3222_v20 = vld [vmem:[#allocation4 + $0x38] sm:$0xff] }
 0xb56   :  { %v3946_v8 = vmul.f32 %v3930_v0, %v3914_v33 }
 0xb57   :  { %v3532_v57 = vadd.f32 %v7498_v48, %v3323_v29  ;;  %v3229_v56 = vld [vmem:[#allocation4 + $0x70] sm:$0xff]  ;;  %v3774_v45 = vpop.permute.xlu0 %3773 }
 0xb58   :  { %v3325_v46 = vmul.f32 %v7451_v60, %v3229_v56  ;;  %3963 = vst.msk [vmem:[%s7836_s4 + $0x20] sm:$0xff] %vm8602_vm0, %v3946_v8  ;;  %v3899_v3 = vsel %vm3892_vm15, %v3882_v30, %v3774_v45  ;;  %v3932_v48 = vld [vmem:[#allocation4 + $0x30] sm:$0xff]  ;;  %v3854_v60 = vpop.permute.xlu1 %3853  ;;  %v3934_v32 = vld [vmem:[#allocation4 + $0x40] sm:$0xff]  ;;  %v3226_v30 = vld [vmem:[#allocation4 + $0x58] sm:$0xff] }
 0xb59   :  { %3549 = vst.msk [vmem:[#allocation4 + $0x60] sm:$0xff] %vm3536_vm4, %v3532_v57  ;;  %v3916_v38 = vsel %vm3909_vm7, %v3899_v3, %v3838_v50  ;;  %v3224_v57 = vld [vmem:[#allocation4 + $0x48] sm:$0xff] }
 0xb5a   :  { %v3534_v34 = vadd.f32 %v7504_v63, %v3325_v46  ;;  %v3948_v11 = vmul.f32 %v3932_v48, %v3916_v38  ;;  %v3228_v3 = vld [vmem:[#allocation4 + $0x68] sm:$0xff] }
 0xb5b   :  { %v3782_v52 = vpop.permute.xlu0 %3781 }
 0xb5c   :  { %3551 = vst.msk [vmem:[#allocation4 + $0x70] sm:$0xff] %vm3536_vm4, %v3534_v34  ;;  %v3901_v55 = vsel %vm3892_vm15, %v3884_v15, %v3782_v52  ;;  %v3936_v4 = vld [vmem:[#allocation4 + $0x50] sm:$0xff]  ;;  %v3862_v17 = vpop.permute.xlu1 %3861 }
 0xb5d   :  { %3965 = vst.msk [vmem:[%s7836_s4 + $0x30] sm:$0xff] %vm8604_vm8, %v3948_v11  ;;  %v3918_v19 = vsel %vm3909_vm7, %v3901_v55, %v3846_v24  ;;  %v3230_v11 = vld [vmem:[#allocation4 + $0x78] sm:$0xff] }
 0xb5e   :  { %v3950_v63 = vmul.f32 %v3934_v32, %v3918_v19 }
 0xb5f   :  { %v3790_v23 = vpop.permute.xlu0 %3789 }
 0xb60   :  { %3967 = vst.msk [vmem:[%s7836_s4 + $0x40] sm:$0xff] %vm8605_vm9, %v3950_v63  ;;  %v3903_v13 = vsel %vm3892_vm15, %v7594_v42, %v3790_v23  ;;  %v3938_v47 = vld [vmem:[#allocation4 + $0x60] sm:$0xff]  ;;  %v3870_v42 = vpop.permute.xlu1 %3869 }
 0xb61   :  { %v3920_v41 = vsel %vm3909_vm7, %v3903_v13, %v3854_v60 }
 0xb62   :  { %v3952_v61 = vmul.f32 %v3936_v4, %v3920_v41 }
 0xb63   :  { %v3798_v39 = vpop.permute.xlu0 %3797  ;;  %v3940_v6 = vld [vmem:[#allocation4 + $0x70] sm:$0xff] }
 0xb64   :  { %3969 = vst.msk [vmem:[%s7836_s4 + $0x50] sm:$0xff] %vm8606_vm10, %v3952_v61  ;;  %v3905_v2 = vsel %vm3892_vm15, %v7604_v36, %v3798_v39  ;;  %v3215_v36 = vld [vmem:[#allocation4] sm:$0xff] }
 0xb65   :  { %v3922_v5 = vsel %vm3909_vm7, %v3905_v2, %v3862_v17 }
 0xb66   :  { %v3954_v53 = vmul.f32 %v3938_v47, %v3922_v5 }
 0xb67   :  { %v3806_v12 = vpop.permute.xlu0 %3805 }
 0xb68   :  { %3971 = vst.msk [vmem:[%s7836_s4 + $0x60] sm:$0xff] %vm8607_vm13, %v3954_v53  ;;  %v3907_v35 = vsel %vm3892_vm15, %v7615_v51, %v3806_v12  ;;  %vm8612_vm15 = vmmov %vm8602_vm0 }
 0xb69   :  { %v3924_v21 = vsel %vm3909_vm7, %v3907_v35, %v3870_v42 }
 0xb6a   :  { %v3956_v40 = vmul.f32 %v3940_v6, %v3924_v21 }
 0xb6c   :  { %3973 = vst.msk [vmem:[%s7836_s4 + $0x70] sm:$0xff] %vm8608_vm12, %v3956_v40  ;;  %v3234_v50 = vpop.permute.xlu0 %3233 }
 0xb6d   :  { %v3311_v31 = vmul.f32 %v3234_v50, %v3215_v36 }
 0xb6f   :  { %v3520_v54 = vadd.f32 %v7455_v14, %v3311_v31 }
 0xb70   :  { %v3249_v22 = vpop.permute.xlu0 %3248 }
 0xb71   :  { %3537 = vst.msk [vmem:[#allocation4] sm:$0xff] %vm3536_vm4, %v3520_v54  ;;  %v3314_v59 = vmul.f32 %v3249_v22, %v3218_v16 }
 0xb73   :  { %v3523_v51 = vadd.f32 %v7464_v9, %v3314_v59 }
 0xb74   :  { %v3259_v62 = vpop.permute.xlu0 %3258 }
 0xb75   :  { %3540 = vst.msk [vmem:[#allocation4 + $0x18] sm:$0xff] %vm3536_vm4, %v3523_v51  ;;  %v3316_v27 = vmul.f32 %v3259_v62, %v3220_v18 }
 0xb77   :  { %v3525_v29 = vadd.f32 %v7471_v37, %v3316_v27  ;;  %v8609_v37 = vld [vmem:[#allocation7_spill] sm:$0xff] }
 0xb78   :  { %v3269_v0 = vpop.permute.xlu0 %3268  ;;  %v3926_v32 = vld [vmem:[#allocation4] sm:$0xff] }
 0xb79   :  { %3542 = vst.msk [vmem:[#allocation4 + $0x28] sm:$0xff] %vm3536_vm4, %v3525_v29  ;;  %v3318_v33 = vmul.f32 %v3269_v0, %v3222_v20 }
 0xb7b   :  { %v3527_v14 = vadd.f32 %v7479_v25, %v3318_v33  ;;  %v8610_v25 = vld [vmem:[#allocation8_spill] sm:$0xff] }
 0xb7c   :  { %v3279_v24 = vpop.permute.xlu0 %3278  ;;  %v3929_v13 = vld [vmem:[#allocation4 + $0x18] sm:$0xff] }
 0xb7d   :  { %3544 = vst.msk [vmem:[#allocation4 + $0x38] sm:$0xff] %vm3536_vm4, %v3527_v14  ;;  %v3320_v8 = vmul.f32 %v3279_v24, %v3224_v57 }
 0xb7f   :  { %v3529_v9 = vadd.f32 %v7486_v10, %v3320_v8  ;;  %v8611_v10 = vld [vmem:[#allocation9_spill] sm:$0xff] }
 0xb80   :  { %v3289_v56 = vpop.permute.xlu0 %3288  ;;  %v3931_v61 = vld [vmem:[#allocation4 + $0x28] sm:$0xff] }
 0xb81   :  { %3546 = vst.msk [vmem:[#allocation4 + $0x48] sm:$0xff] %vm3536_vm4, %v3529_v9  ;;  %v3322_v45 = vmul.f32 %v3289_v56, %v3226_v30 }
 0xb83   :  { %v3531_v46 = vadd.f32 %v8609_v37, %v3322_v45 }
 0xb84   :  { %v3299_v48 = vpop.permute.xlu0 %3298  ;;  %v3933_v47 = vld [vmem:[#allocation4 + $0x38] sm:$0xff] }
 0xb85   :  { %3548 = vst.msk [vmem:[#allocation4 + $0x58] sm:$0xff] %vm3536_vm4, %v3531_v46  ;;  %v3324_v38 = vmul.f32 %v3299_v48, %v3228_v3 }
 0xb87   :  { %v3533_v34 = vadd.f32 %v8610_v25, %v3324_v38 }
 0xb88   :  { %v3309_v15 = vpop.permute.xlu0 %3308  ;;  %v3935_v12 = vld [vmem:[#allocation4 + $0x48] sm:$0xff] }
 0xb89   :  { %3550 = vst.msk [vmem:[#allocation4 + $0x68] sm:$0xff] %vm3536_vm4, %v3533_v34  ;;  %v3326_v52 = vmul.f32 %v3309_v15, %v3230_v11 }
 0xb8b   :  { %v3535_v60 = vadd.f32 %v8611_v10, %v3326_v52 }
 0xb8c   :  { %v3814_v55 = vpop.permute.xlu0 %3813  ;;  %v3937_v6 = vld [vmem:[#allocation4 + $0x58] sm:$0xff] }
 0xb8d   :  { %3552 = vst.msk [vmem:[#allocation4 + $0x78] sm:$0xff] %vm3536_vm4, %v3535_v60  ;;  %v3910_v19 = vsel %vm3909_vm7, %v7626_v44, %v3814_v55  ;;  %vm8614_vm4 = vmmov %vm8602_vm0 }
 0xb8e   :  { %v3942_v63 = vmul.f32 %v3926_v32, %v3910_v19 }
 0xb90   :  { %3959 = vst.msk [vmem:[%s7836_s4] sm:$0xff] %vm8612_vm15, %v3942_v63  ;;  %v3826_v23 = vpop.permute.xlu0 %3825  ;;  %v3939_v36 = vld [vmem:[#allocation4 + $0x68] sm:$0xff] }
 0xb91   :  { %v3913_v4 = vsel %vm3909_vm7, %v7639_v7, %v3826_v23 }
 0xb92   :  { %v3945_v41 = vmul.f32 %v3929_v13, %v3913_v4 }
 0xb94   :  { %3962 = vst.msk [vmem:[%s7836_s4 + $0x18] sm:$0xff] %vm8613_vm5, %v3945_v41  ;;  %v3834_v17 = vpop.permute.xlu0 %3833  ;;  %v3941_v54 = vld [vmem:[#allocation4 + $0x78] sm:$0xff] }
 0xb95   :  { %v3915_v44 = vsel %vm3909_vm7, %v7645_v28, %v3834_v17 }
 0xb96   :  { %v3947_v39 = vmul.f32 %v3931_v61, %v3915_v44 }
 0xb98   :  { %3964 = vst.msk [vmem:[%s7836_s4 + $0x28] sm:$0xff] %vm8614_vm4, %v3947_v39  ;;  %v3842_v2 = vpop.permute.xlu0 %3841 }
 0xb99   :  { %v3917_v7 = vsel %vm3909_vm7, %v7651_v58, %v3842_v2 }
 0xb9a   :  { %v3949_v5 = vmul.f32 %v3933_v47, %v3917_v7 }
 0xb9c   :  { %3966 = vst.msk [vmem:[%s7836_s4 + $0x38] sm:$0xff] %vm8615_vm1, %v3949_v5  ;;  %v3850_v53 = vpop.permute.xlu0 %3849 }
 0xb9d   :  { %v3919_v28 = vsel %vm3909_vm7, %v7656_v43, %v3850_v53 }
 0xb9e   :  { %v3951_v42 = vmul.f32 %v3935_v12, %v3919_v28 }
 0xba0   :  { %3968 = vst.msk [vmem:[%s7836_s4 + $0x48] sm:$0xff] %vm8616_vm3, %v3951_v42  ;;  %v3858_v35 = vpop.permute.xlu0 %3857 }
 0xba1   :  { %v3921_v58 = vsel %vm3909_vm7, %v7661_v26, %v3858_v35 }
 0xba2   :  { %v3953_v21 = vmul.f32 %v3937_v6, %v3921_v58 }
 0xba4   :  { %3970 = vst.msk [vmem:[%s7836_s4 + $0x58] sm:$0xff] %vm8617_vm2, %v3953_v21  ;;  %v3866_v40 = vpop.permute.xlu0 %3865 }
 0xba5   :  { %v3923_v43 = vsel %vm3909_vm7, %v7665_v49, %v3866_v40 }
 0xba6   :  { %v3955_v50 = vmul.f32 %v3939_v36, %v3923_v43 }
 0xba8   :  { %3972 = vst.msk [vmem:[%s7836_s4 + $0x68] sm:$0xff] %vm8618_vm11, %v3955_v50  ;;  %v3874_v31 = vpop.permute.xlu0 %3873 }
 0xba9   :  { %v3925_v26 = vsel %vm3909_vm7, %v7670_v1, %v3874_v31 }
 0xbaa   :  { %v3957_v16 = vmul.f32 %v3941_v54, %v3925_v26 }
 0xbac   :  { %3974 = vst.msk [vmem:[%s7836_s4 + $0x78] sm:$0xff] %vm8619_vm14, %v3957_v16 }

</bundles_post_ra>
